<compile_context>
chip_gen: v7x
topology: tpu7x:2x2x1
jax: 0.10.0
libtpu: 0.0.40
codegen_flags: <defaults>
</compile_context>

<pallas_src>
import functools

import jax
import jax.numpy as jnp
from jax.experimental import pallas as pl
from jax.experimental.pallas import tpu as pltpu


_VMEM_LIMIT_BYTES = 64 * 1024 * 1024   # raise v5e's 16 MiB default scoped VMEM


def _cparams(dims):
    return pltpu.CompilerParams(dimension_semantics=dims,
                                vmem_limit_bytes=_VMEM_LIMIT_BYTES)


def _pick_tile(n, target=512):
    """Largest tile <= target that divides n, preferring lane-aligned (x128)
    then sublane-aligned (x16 / x8) sizes; falls back to the full axis."""
    if n <= target:
        return n
    for step in (128, 16, 8):
        best = 0
        for t in range(step, target + 1, step):
            if n % t == 0:
                best = t
        if best:
            return best
    # TODO(synk): use a cdiv grid + padded/masked last tile instead of a
    # full-axis block (a full-HW block can exceed v7x's 64 MiB VMEM).
    return n


# ----------------------------------------------------------------------------
# Kernel 1: per-(batch, channel) mean / rstd over HW (tiled reduction)
# ----------------------------------------------------------------------------

def _stats_kernel(x_ref, mean_ref, rstd_ref, sum_sc, sq_sc, *, hw, eps):
    t = pl.program_id(1)

    @pl.when(t == 0)
    def _():
        sum_sc[...] = jnp.zeros_like(sum_sc)
        sq_sc[...] = jnp.zeros_like(sq_sc)

    x = x_ref[0].astype(jnp.float32)                       # (C, T)
    sum_sc[...] += jnp.sum(x, axis=1, keepdims=True)       # (C, 1)
    sq_sc[...] += jnp.sum(x * x, axis=1, keepdims=True)

    @pl.when(t == pl.num_programs(1) - 1)
    def _():
        # TODO(synk): Welford/shifted update if E[x^2]-mean^2 cancellation
        # ever matters for the target data distribution.
        mean = sum_sc[...] * (1.0 / hw)
        var = (sq_sc[...] - hw * mean * mean) / max(hw - 1.0, 1.0)  # ddof=1
        var = jnp.maximum(var, 0.0)
        mean_ref[0] = mean
        rstd_ref[0] = jax.lax.rsqrt(var + eps)


def instance_stats(x, tile, eps=1e-5):
    """Per-(B, C) mean and 1/std over the HW axis of a (B, C, HW) tensor."""
    B, C, M = x.shape
    kern = functools.partial(_stats_kernel, hw=float(M), eps=eps)
    # TODO(synk): on v7x (2 TCs) also split the HW reduction across cores when
    # B is small (per-core partial sums + combine).
    return pl.pallas_call(
        kern,
        out_shape=(jax.ShapeDtypeStruct((B, C, 1), jnp.float32),
                   jax.ShapeDtypeStruct((B, C, 1), jnp.float32)),
        grid=(B, M // tile),
        in_specs=[pl.BlockSpec((1, C, tile), lambda b, t: (b, 0, t))],
        out_specs=(pl.BlockSpec((1, C, 1), lambda b, t: (b, 0, 0)),
                   pl.BlockSpec((1, C, 1), lambda b, t: (b, 0, 0))),
        scratch_shapes=[pltpu.VMEM((C, 1), jnp.float32),
                        pltpu.VMEM((C, 1), jnp.float32)],
        compiler_params=_cparams(("parallel", "arbitrary")),
    )(x)


# ----------------------------------------------------------------------------
# Kernel 2a: f = relu6(conv_f(mvn(Fc)))   (channel-major output (B, Ch, HW))
# ----------------------------------------------------------------------------

def _proj_f_kernel(x_ref, mean_ref, rstd_ref, w_ref, b_ref, o_ref):
    x = x_ref[0].astype(jnp.float32)                       # (C, T)
    xn = ((x - mean_ref[0]) * rstd_ref[0]).astype(jnp.bfloat16)
    y = jnp.dot(w_ref[...], xn, preferred_element_type=jnp.float32)   # (Ch, T)
    o_ref[0] = jnp.clip(y + b_ref[...], 0.0, 6.0).astype(o_ref.dtype)


def proj_f(x, mean, rstd, w, b, *, tile):
    B, C, M = x.shape
    Ch = w.shape[0]
    return pl.pallas_call(
        _proj_f_kernel,
        out_shape=jax.ShapeDtypeStruct((B, Ch, M), jnp.bfloat16),
        grid=(B, M // tile),
        in_specs=[
            pl.BlockSpec((1, C, tile), lambda b, i: (b, 0, i)),
            pl.BlockSpec((1, C, 1), lambda b, i: (b, 0, 0)),
            pl.BlockSpec((1, C, 1), lambda b, i: (b, 0, 0)),
            pl.BlockSpec((Ch, C), lambda b, i: (0, 0)),
            pl.BlockSpec((Ch, 1), lambda b, i: (0, 0)),
        ],
        out_specs=pl.BlockSpec((1, Ch, tile), lambda b, i: (b, 0, i)),
        compiler_params=_cparams(("parallel", "parallel")),
    )(x, mean, rstd, w, b)


# ----------------------------------------------------------------------------
# Kernel 2b: fused g = relu6(conv_g(mvn(Fs))), h = relu6(conv_h(Fs))
#            single read of Fs, row-major (B, HW, Ch) outputs (attention K/V)
# ----------------------------------------------------------------------------

_DN_CT = (((0,), (1,)), ((), ()))    # contract x's channel dim with W's Cin dim


def _proj_gh_kernel(x_ref, mean_ref, rstd_ref, wg_ref, bg_ref, wh_ref, bh_ref,
                    g_ref, h_ref):
    x_bf = x_ref[0]                                        # (C, T) bf16
    x = x_bf.astype(jnp.float32)
    xn = ((x - mean_ref[0]) * rstd_ref[0]).astype(jnp.bfloat16)
    g = jax.lax.dot_general(xn, wg_ref[...], _DN_CT,
                            preferred_element_type=jnp.float32)        # (T, Ch)
    h = jax.lax.dot_general(x_bf, wh_ref[...], _DN_CT,
                            preferred_element_type=jnp.float32)        # (T, Ch)
    g_ref[0] = jnp.clip(g + bg_ref[...], 0.0, 6.0).astype(g_ref.dtype)
    h_ref[0] = jnp.clip(h + bh_ref[...], 0.0, 6.0).astype(h_ref.dtype)


def proj_gh(x, mean, rstd, wg, bg, wh, bh, *, tile):
    B, C, M = x.shape
    Ch = wg.shape[0]
    return pl.pallas_call(
        _proj_gh_kernel,
        out_shape=(jax.ShapeDtypeStruct((B, M, Ch), jnp.bfloat16),
                   jax.ShapeDtypeStruct((B, M, Ch), jnp.bfloat16)),
        grid=(B, M // tile),
        in_specs=[
            pl.BlockSpec((1, C, tile), lambda b, i: (b, 0, i)),
            pl.BlockSpec((1, C, 1), lambda b, i: (b, 0, 0)),
            pl.BlockSpec((1, C, 1), lambda b, i: (b, 0, 0)),
            pl.BlockSpec((Ch, C), lambda b, i: (0, 0)),
            pl.BlockSpec((1, Ch), lambda b, i: (0, 0)),
            pl.BlockSpec((Ch, C), lambda b, i: (0, 0)),
            pl.BlockSpec((1, Ch), lambda b, i: (0, 0)),
        ],
        out_specs=(pl.BlockSpec((1, tile, Ch), lambda b, i: (b, i, 0)),
                   pl.BlockSpec((1, tile, Ch), lambda b, i: (b, i, 0))),
        compiler_params=_cparams(("parallel", "parallel")),
    )(x, mean, rstd, wg, bg, wh, bh)


# ----------------------------------------------------------------------------
# Kernel 3: flash-style attention (online softmax) + fused out_conv + ReLU6
#           g/h VMEM-resident across the kv sweep when they fit
# ----------------------------------------------------------------------------

def _attn_kernel(f_ref, g_ref, h_ref, wo_ref, bo_ref, o_ref,
                 m_sc, l_sc, acc_sc, *, tk, resident):
    kv = pl.program_id(2)

    @pl.when(kv == 0)
    def _():
        m_sc[...] = jnp.full_like(m_sc, -jnp.inf)
        l_sc[...] = jnp.zeros_like(l_sc)
        acc_sc[...] = jnp.zeros_like(acc_sc)

    f = f_ref[0]                                           # (Ch, TM) bf16
    if resident:
        start = pl.multiple_of(kv * tk, tk)                # sublane-axis slice
        g = g_ref[0, pl.ds(start, tk), :]                  # (TK, Ch) bf16
        h = h_ref[0, pl.ds(start, tk), :]
    else:
        g = g_ref[0]                                       # (TK, Ch) bf16
        h = h_ref[0]

    # s[k, q] = sum_c g[k, c] * f[c, q]   (bf16 in, f32 acc on the MXU)
    s = jax.lax.dot_general(g, f, (((1,), (0,)), ((), ())),
                            preferred_element_type=jnp.float32)        # (TK, TM)

    m_prev = m_sc[...]                                     # (1, TM)
    m_new = jnp.maximum(m_prev, jnp.max(s, axis=0, keepdims=True))
    alpha = jnp.exp(m_prev - m_new)
    # TODO(synk): compute p in bf16 on v6e/v7x (bf16 EUP) when Ch is small;
    # keep f32 on v5e (its EUP has no bf16).
    p = jnp.exp(s - m_new)                                 # (TK, TM)
    l_sc[...] = alpha * l_sc[...] + jnp.sum(p, axis=0, keepdims=True)
    # acc[c, q] += sum_k h[k, c] * p[k, q]
    acc_sc[...] = alpha * acc_sc[...] + jax.lax.dot_general(
        h, p.astype(jnp.bfloat16), (((0,), (0,)), ((), ())),
        preferred_element_type=jnp.float32)                # (Ch, TM)
    m_sc[...] = m_new

    @pl.when(kv == pl.num_programs(2) - 1)
    def _():
        attn = acc_sc[...] * pl.reciprocal(l_sc[...], approx=True)     # (Ch, TM)
        y = jnp.dot(wo_ref[...], attn.astype(jnp.bfloat16),
                    preferred_element_type=jnp.float32)                # (C, TM)
        o_ref[0] = jnp.clip(y + bo_ref[...], 0.0, 6.0).astype(o_ref.dtype)


def flash_attention_outproj(f, g, h, wo, bo, *, tm, tk,
                            kv_resident_budget=24 * 1024 * 1024):
    B, Ch, M = f.shape
    C = wo.shape[0]
    # Keep K/V (g, h) resident in VMEM across the whole kv sweep when they fit
    # the budget: cuts their HBM traffic by a factor of (M // tm).
    resident = (2 * 2 * M * Ch * 2) <= kv_resident_budget  # 2 tensors x 2 bufs, bf16
    if resident:
        g_spec = pl.BlockSpec((1, M, Ch), lambda b, i, k: (b, 0, 0))
        h_spec = pl.BlockSpec((1, M, Ch), lambda b, i, k: (b, 0, 0))
    else:
        # stream kv tiles; a 3-deep pipeline hides HBM latency (v5e especially)
        g_spec = pl.BlockSpec((1, tk, Ch), lambda b, i, k: (b, k, 0),
                              pipeline_mode=pl.Buffered(3))
        h_spec = pl.BlockSpec((1, tk, Ch), lambda b, i, k: (b, k, 0),
                              pipeline_mode=pl.Buffered(3))
    kern = functools.partial(_attn_kernel, tk=tk, resident=resident)
    return pl.pallas_call(
        kern,
        out_shape=jax.ShapeDtypeStruct((B, C, M), jnp.bfloat16),
        grid=(B, M // tm, M // tk),
        in_specs=[
            pl.BlockSpec((1, Ch, tm), lambda b, i, k: (b, 0, i)),
            g_spec,
            h_spec,
            pl.BlockSpec((C, Ch), lambda b, i, k: (0, 0)),
            pl.BlockSpec((C, 1), lambda b, i, k: (0, 0)),
        ],
        out_specs=pl.BlockSpec((1, C, tm), lambda b, i, k: (b, 0, i)),
        scratch_shapes=[pltpu.VMEM((1, tm), jnp.float32),
                        pltpu.VMEM((1, tm), jnp.float32),
                        pltpu.VMEM((Ch, tm), jnp.float32)],
        compiler_params=_cparams(("parallel", "parallel", "arbitrary")),
    )(f, g, h, wo, bo)


# ----------------------------------------------------------------------------
# Parameters
# ----------------------------------------------------------------------------

def init_params(channels, key):
    half = channels // 2
    shapes = {
        "f_w": (half, channels, 1, 1), "f_b": (half,),
        "g_w": (half, channels, 1, 1), "g_b": (half,),
        "h_w": (half, channels, 1, 1), "h_b": (half,),
        "out_w": (channels, half, 1, 1), "out_b": (channels,),
    }
    params = {}
    keys = jax.random.split(key, len(shapes))
    for (name, shp), k in zip(sorted(shapes.items()), keys):
        scale = 0.1 if name.endswith("_w") else 0.05
        params[name] = scale * jax.random.normal(k, shp, jnp.float32)
    return params


# ----------------------------------------------------------------------------
# AttentionUnit forward
# ----------------------------------------------------------------------------

def attention_unit_forward(Fc, Fs, params):
    B, C, H, W = Fc.shape
    M = H * W

    t_proj = _pick_tile(M, 1024)   # stats / projection HW tile (mem-bound)
    tm = _pick_tile(M, 512)        # attention q tile  (>=256 for v6e/v7x MXU)
    tk = _pick_tile(M, 512)        # attention kv tile

    # NCHW -> (B, C, HW) is a free reshape (channel-major end to end: no HBM
    # transposes on input or output); activations are stored in bf16.
    xc = Fc.reshape(B, C, M).astype(jnp.bfloat16)
    xs = Fs.reshape(B, C, M).astype(jnp.bfloat16)

    # per-(B, C) stats for mean_variance_norm (tiled reduction over HW)
    mean_c, rstd_c = instance_stats(xc, t_proj)
    mean_s, rstd_s = instance_stats(xs, t_proj)

    w2d = lambda w: w[:, :, 0, 0].astype(jnp.bfloat16)        # (O, Cin) bf16
    bcol = lambda b: b.reshape(-1, 1).astype(jnp.float32)     # (O, 1)
    brow = lambda b: b.reshape(1, -1).astype(jnp.float32)     # (1, O)

    # f = relu6(conv_f(mvn(Fc)))                    -> (B, Ch, HW)
    f_Fc = proj_f(xc, mean_c, rstd_c, w2d(params["f_w"]), bcol(params["f_b"]),
                  tile=t_proj)
    # g = relu6(conv_g(mvn(Fs))), h = relu6(conv_h(Fs)) — fused, one Fs read
    g_Fs, h_Fs = proj_gh(xs, mean_s, rstd_s,
                         w2d(params["g_w"]), brow(params["g_b"]),
                         w2d(params["h_w"]), brow(params["h_b"]),
                         tile=t_proj)

    # Fcs = relu6(out_conv(h @ softmax(f g^T)^T)) — flash-tiled, out_conv fused
    out = flash_attention_outproj(f_Fc, g_Fs, h_Fs, w2d(params["out_w"]),
                                  bcol(params["out_b"]), tm=tm, tk=tk)

    # (B, C, HW) is already channel-major: reshape to NCHW is free.
    return out.reshape(B, C, H, W).astype(Fc.dtype)


# ----------------------------------------------------------------------------
# Pure-JAX reference (matches the PyTorch module semantics)
# ----------------------------------------------------------------------------

def reference_forward(Fc, Fs, params):
    B, C, H, W = Fc.shape
    eps = 1e-5

    def mvn(x):
        xf = x.reshape(B, C, -1)
        mean = xf.mean(axis=2, keepdims=True)
        var = jnp.var(xf, axis=2, ddof=1, keepdims=True) + eps
        return ((xf - mean) / jnp.sqrt(var)).reshape(x.shape)

    def conv1x1(x, w, b):
        return jnp.einsum("bchw,oc->bohw", x, w[:, :, 0, 0]) + b[None, :, None, None]

    relu6 = lambda v: jnp.clip(v, 0.0, 6.0)
    f_Fc = relu6(conv1x1(mvn(Fc), params["f_w"], params["f_b"]))
    g_Fs = relu6(conv1x1(mvn(Fs), params["g_w"], params["g_b"]))
    h_Fs = relu6(conv1x1(Fs, params["h_w"], params["h_b"]))

    fr = f_Fc.reshape(B, C // 2, -1).transpose(0, 2, 1)     # (B, HW, Ch)
    gr = g_Fs.reshape(B, C // 2, -1)                        # (B, Ch, HW)
    att = jax.nn.softmax(jnp.einsum("bmc,bcn->bmn", fr, gr), axis=-1)
    hr = h_Fs.reshape(B, C // 2, -1)                        # (B, Ch, HW)
    Fcs = jnp.einsum("bcn,bmn->bcm", hr, att).reshape(B, C // 2, H, W)
    return relu6(conv1x1(Fcs, params["out_w"], params["out_b"]))


# ----------------------------------------------------------------------------
# Main
# ----------------------------------------------------------------------------

if __name__ == "__main__":
    B, C, H, W = 2, 16, 32, 32   # channels must be even (attention dim = C//2)

    key = jax.random.PRNGKey(0)
    k_fc, k_fs, k_p = jax.random.split(key, 3)
    Fc = jax.random.normal(k_fc, (B, C, H, W), jnp.float32)
    Fs = jax.random.normal(k_fs, (B, C, H, W), jnp.float32)
    params = init_params(C, k_p)

    out = jax.jit(attention_unit_forward)(Fc, Fs, params)
    out = jax.block_until_ready(out)

    assert out.shape == (B, C, H, W)
    assert bool(jnp.all(jnp.isfinite(out)))

    ref = reference_forward(Fc, Fs, params)
    err = float(jnp.max(jnp.abs(out - ref)))
    # bf16 activation storage + bf16 MXU operands dominate the error budget.
    assert err < 4e-2, f"max abs error vs reference: {err}"

    print("KERNEL_OK")
</pallas_src>

<mosaic_0001>
module attributes {stable_mosaic.version = 11 : i64} {
  func.func @_stats_kernel(%arg0: i32, %arg1: i32, %arg2: memref<1x16x1024xbf16, #tpu.memory_space<vmem>>, %arg3: memref<1x16x1xf32, #tpu.memory_space<vmem>>, %arg4: memref<1x16x1xf32, #tpu.memory_space<vmem>>, %arg5: memref<16x1xf32, #tpu.memory_space<vmem>>, %arg6: memref<16x1xf32, #tpu.memory_space<vmem>>) attributes {dimension_semantics = [#tpu.dimension_semantics<parallel>, #tpu.dimension_semantics<arbitrary>], iteration_bounds = array<i64: 2, 1>, scalar_prefetch = 0 : i64, scratch_operands = 2 : i64, tpu.core_type = #tpu.core_type<tc>, window_params = [{transform_indices = @transform_0, window_bounds = array<i64: 1, 16, 1024>}, {transform_indices = @transform_1, window_bounds = array<i64: 1, 16, 1>}, {transform_indices = @transform_2, window_bounds = array<i64: 1, 16, 1>}]} {
    %c0_i32 = arith.constant 0 : i32
    %0 = arith.cmpi eq, %arg1, %c0_i32 : i32
    %1 = arith.extui %0 : i1 to i32
    %c0_i32_0 = arith.constant 0 : i32
    %2 = arith.cmpi ne, %1, %c0_i32_0 : i32
    scf.if %2 {
      %cst_14 = arith.constant 0.000000e+00 : f32
      %20 = vector.broadcast %cst_14 : f32 to vector<16x1xf32>
      %c0_15 = arith.constant 0 : index
      %c0_16 = arith.constant 0 : index
      %21 = vector.load %arg5[%c0_15, %c0_16] : memref<16x1xf32, #tpu.memory_space<vmem>>, vector<16x1xf32>
      tpu.vector_store %arg5[%c0_15, %c0_16], %20 {strides = array<i32>} : memref<16x1xf32, #tpu.memory_space<vmem>>, vector<16x1xf32>,
      %cst_17 = arith.constant 0.000000e+00 : f32
      %22 = vector.broadcast %cst_17 : f32 to vector<16x1xf32>
      %c0_18 = arith.constant 0 : index
      %c0_19 = arith.constant 0 : index
      %23 = vector.load %arg6[%c0_18, %c0_19] : memref<16x1xf32, #tpu.memory_space<vmem>>, vector<16x1xf32>
      tpu.vector_store %arg6[%c0_18, %c0_19], %22 {strides = array<i32>} : memref<16x1xf32, #tpu.memory_space<vmem>>, vector<16x1xf32>,
    } else {
    }
    %c0 = arith.constant 0 : index
    %c0_1 = arith.constant 0 : index
    %c0_2 = arith.constant 0 : index
    %3 = vector.load %arg2[%c0, %c0_1, %c0_2] : memref<1x16x1024xbf16, #tpu.memory_space<vmem>>, vector<1x16x1024xbf16>
    %4 = vector.shape_cast %3 : vector<1x16x1024xbf16> to vector<16x1024xbf16>
    %5 = arith.extf %4 : vector<16x1024xbf16> to vector<16x1024xf32>
    %c0_3 = arith.constant 0 : index
    %c0_4 = arith.constant 0 : index
    %6 = vector.load %arg5[%c0_3, %c0_4] : memref<16x1xf32, #tpu.memory_space<vmem>>, vector<16x1xf32>
    %cst = arith.constant dense<0.000000e+00> : vector<16xf32>
    %7 = vector.multi_reduction <add>, %5, %cst [1] : vector<16x1024xf32> to vector<16xf32>
    %8 = vector.shape_cast %7 : vector<16xf32> to vector<16x1xf32>
    %9 = arith.addf %6, %8 : vector<16x1xf32>
    %c0_5 = arith.constant 0 : index
    %c0_6 = arith.constant 0 : index
    %10 = vector.load %arg5[%c0_5, %c0_6] : memref<16x1xf32, #tpu.memory_space<vmem>>, vector<16x1xf32>
    tpu.vector_store %arg5[%c0_5, %c0_6], %9 {strides = array<i32>} : memref<16x1xf32, #tpu.memory_space<vmem>>, vector<16x1xf32>,
    %c0_7 = arith.constant 0 : index
    %c0_8 = arith.constant 0 : index
    %11 = vector.load %arg6[%c0_7, %c0_8] : memref<16x1xf32, #tpu.memory_space<vmem>>, vector<16x1xf32>
    %12 = arith.mulf %5, %5 : vector<16x1024xf32>
    %cst_9 = arith.constant dense<0.000000e+00> : vector<16xf32>
    %13 = vector.multi_reduction <add>, %12, %cst_9 [1] : vector<16x1024xf32> to vector<16xf32>
    %14 = vector.shape_cast %13 : vector<16xf32> to vector<16x1xf32>
    %15 = arith.addf %11, %14 : vector<16x1xf32>
    %c0_10 = arith.constant 0 : index
    %c0_11 = arith.constant 0 : index
    %16 = vector.load %arg6[%c0_10, %c0_11] : memref<16x1xf32, #tpu.memory_space<vmem>>, vector<16x1xf32>
    tpu.vector_store %arg6[%c0_10, %c0_11], %15 {strides = array<i32>} : memref<16x1xf32, #tpu.memory_space<vmem>>, vector<16x1xf32>,
    %c0_i32_12 = arith.constant 0 : i32
    %17 = arith.cmpi eq, %arg1, %c0_i32_12 : i32
    %18 = arith.extui %17 : i1 to i32
    %c0_i32_13 = arith.constant 0 : i32
    %19 = arith.cmpi ne, %18, %c0_i32_13 : i32
    scf.if %19 {
      %c0_14 = arith.constant 0 : index
      %c0_15 = arith.constant 0 : index
      %20 = vector.load %arg5[%c0_14, %c0_15] : memref<16x1xf32, #tpu.memory_space<vmem>>, vector<16x1xf32>
      %cst_16 = arith.constant 9.765625E-4 : f32
      %21 = vector.broadcast %cst_16 : f32 to vector<16x1xf32>
      %22 = arith.mulf %20, %21 : vector<16x1xf32>
      %c0_17 = arith.constant 0 : index
      %c0_18 = arith.constant 0 : index
      %23 = vector.load %arg6[%c0_17, %c0_18] : memref<16x1xf32, #tpu.memory_space<vmem>>, vector<16x1xf32>
      %cst_19 = arith.constant 1.024000e+03 : f32
      %24 = vector.broadcast %cst_19 : f32 to vector<16x1xf32>
      %25 = arith.mulf %24, %22 : vector<16x1xf32>
      %26 = arith.mulf %25, %22 : vector<16x1xf32>
      %27 = arith.subf %23, %26 : vector<16x1xf32>
      %cst_20 = arith.constant 1.023000e+03 : f32
      %28 = vector.broadcast %cst_20 : f32 to vector<16x1xf32>
      %29 = arith.divf %27, %28 : vector<16x1xf32>
      %cst_21 = arith.constant 0.000000e+00 : f32
      %30 = vector.broadcast %cst_21 : f32 to vector<16x1xf32>
      %31 = arith.maximumf %29, %30 : vector<16x1xf32>
      %c0_22 = arith.constant 0 : index
      %c0_23 = arith.constant 0 : index
      %c0_24 = arith.constant 0 : index
      %32 = vector.load %arg3[%c0_22, %c0_23, %c0_24] : memref<1x16x1xf32, #tpu.memory_space<vmem>>, vector<1x16x1xf32>
      %33 = vector.shape_cast %32 : vector<1x16x1xf32> to vector<16x1xf32>
      %34 = vector.shape_cast %22 : vector<16x1xf32> to vector<1x16x1xf32>
      tpu.vector_store %arg3[%c0_22, %c0_23, %c0_24], %34 {strides = array<i32>} : memref<1x16x1xf32, #tpu.memory_space<vmem>>, vector<1x16x1xf32>,
      %cst_25 = arith.constant 9.99999974E-6 : f32
      %35 = vector.broadcast %cst_25 : f32 to vector<16x1xf32>
      %36 = arith.addf %31, %35 : vector<16x1xf32>
      %37 = math.rsqrt %36 : vector<16x1xf32>
      %c0_26 = arith.constant 0 : index
      %c0_27 = arith.constant 0 : index
      %c0_28 = arith.constant 0 : index
      %38 = vector.load %arg4[%c0_26, %c0_27, %c0_28] : memref<1x16x1xf32, #tpu.memory_space<vmem>>, vector<1x16x1xf32>
      %39 = vector.shape_cast %38 : vector<1x16x1xf32> to vector<16x1xf32>
      %40 = vector.shape_cast %37 : vector<16x1xf32> to vector<1x16x1xf32>
      tpu.vector_store %arg4[%c0_26, %c0_27, %c0_28], %40 {strides = array<i32>} : memref<1x16x1xf32, #tpu.memory_space<vmem>>, vector<1x16x1xf32>,
    } else {
    }
    return
  }
  func.func @transform_0(%arg0: i32, %arg1: i32) -> (i32, i32, i32) {
    %c0_i32 = arith.constant 0 : i32
    %c0_i32_0 = arith.constant 0 : i32
    return %arg0, %c0_i32, %arg1 : i32, i32, i32
  }
  func.func @transform_1(%arg0: i32, %arg1: i32) -> (i32, i32, i32) {
    %c0_i32 = arith.constant 0 : i32
    %c0_i32_0 = arith.constant 0 : i32
    %c0_i32_1 = arith.constant 0 : i32
    return %arg0, %c0_i32, %c0_i32_0 : i32, i32, i32
  }
  func.func @transform_2(%arg0: i32, %arg1: i32) -> (i32, i32, i32) {
    %c0_i32 = arith.constant 0 : i32
    %c0_i32_0 = arith.constant 0 : i32
    %c0_i32_1 = arith.constant 0 : i32
    return %arg0, %c0_i32, %c0_i32_0 : i32, i32, i32
  }
}

module attributes {stable_mosaic.version = 11 : i64} {
  func.func @_proj_f_kernel(%arg0: i32, %arg1: i32, %arg2: memref<1x16x1024xbf16, #tpu.memory_space<vmem>>, %arg3: memref<1x16x1xf32, #tpu.memory_space<vmem>>, %arg4: memref<1x16x1xf32, #tpu.memory_space<vmem>>, %arg5: memref<8x16xbf16, #tpu.memory_space<vmem>>, %arg6: memref<8x1xf32, #tpu.memory_space<vmem>>, %arg7: memref<1x8x1024xbf16, #tpu.memory_space<vmem>>) attributes {dimension_semantics = [#tpu.dimension_semantics<parallel>, #tpu.dimension_semantics<parallel>], iteration_bounds = array<i64: 2, 1>, scalar_prefetch = 0 : i64, scratch_operands = 0 : i64, tpu.core_type = #tpu.core_type<tc>, window_params = [{transform_indices = @transform_0, window_bounds = array<i64: 1, 16, 1024>}, {transform_indices = @transform_1, window_bounds = array<i64: 1, 16, 1>}, {transform_indices = @transform_2, window_bounds = array<i64: 1, 16, 1>}, {pipeline_mode = #tpu.pipeline_mode<synchronous>, transform_indices = @transform_3, window_bounds = array<i64: 8, 16>}, {pipeline_mode = #tpu.pipeline_mode<synchronous>, transform_indices = @transform_4, window_bounds = array<i64: 8, 1>}, {transform_indices = @transform_5, window_bounds = array<i64: 1, 8, 1024>}]} {
    %c0 = arith.constant 0 : index
    %c0_0 = arith.constant 0 : index
    %c0_1 = arith.constant 0 : index
    %0 = vector.load %arg2[%c0, %c0_0, %c0_1] : memref<1x16x1024xbf16, #tpu.memory_space<vmem>>, vector<1x16x1024xbf16>
    %1 = vector.shape_cast %0 : vector<1x16x1024xbf16> to vector<16x1024xbf16>
    %2 = arith.extf %1 : vector<16x1024xbf16> to vector<16x1024xf32>
    %c0_2 = arith.constant 0 : index
    %c0_3 = arith.constant 0 : index
    %c0_4 = arith.constant 0 : index
    %3 = vector.load %arg3[%c0_2, %c0_3, %c0_4] : memref<1x16x1xf32, #tpu.memory_space<vmem>>, vector<1x16x1xf32>
    %4 = vector.shape_cast %3 : vector<1x16x1xf32> to vector<16x1xf32>
    %5 = vector.broadcast %4 : vector<16x1xf32> to vector<16x1024xf32>
    %6 = arith.subf %2, %5 : vector<16x1024xf32>
    %c0_5 = arith.constant 0 : index
    %c0_6 = arith.constant 0 : index
    %c0_7 = arith.constant 0 : index
    %7 = vector.load %arg4[%c0_5, %c0_6, %c0_7] : memref<1x16x1xf32, #tpu.memory_space<vmem>>, vector<1x16x1xf32>
    %8 = vector.shape_cast %7 : vector<1x16x1xf32> to vector<16x1xf32>
    %9 = vector.broadcast %8 : vector<16x1xf32> to vector<16x1024xf32>
    %10 = arith.mulf %6, %9 : vector<16x1024xf32>
    %11 = arith.truncf %10 : vector<16x1024xf32> to vector<16x1024xbf16>
    %c0_8 = arith.constant 0 : index
    %c0_9 = arith.constant 0 : index
    %12 = vector.load %arg5[%c0_8, %c0_9] : memref<8x16xbf16, #tpu.memory_space<vmem>>, vector<8x16xbf16>
    %cst = arith.constant dense<0.000000e+00> : vector<8x1024xf32>
    %13 = tpu.matmul %12, %11, %cst {dimension_numbers = #tpu.dot_dimension_numbers<[1], [0], [0], [1], [0, 0, 1, 1], [], []>} : vector<8x16xbf16>, vector<16x1024xbf16>, vector<8x1024xf32> -> vector<8x1024xf32>
    %c0_10 = arith.constant 0 : index
    %c0_11 = arith.constant 0 : index
    %14 = vector.load %arg6[%c0_10, %c0_11] : memref<8x1xf32, #tpu.memory_space<vmem>>, vector<8x1xf32>
    %15 = vector.broadcast %14 : vector<8x1xf32> to vector<8x1024xf32>
    %16 = arith.addf %13, %15 : vector<8x1024xf32>
    %cst_12 = arith.constant 0.000000e+00 : f32
    %cst_13 = arith.constant 6.000000e+00 : f32
    %17 = vector.broadcast %cst_12 : f32 to vector<8x1024xf32>
    %18 = arith.maximumf %17, %16 : vector<8x1024xf32>
    %19 = vector.broadcast %cst_13 : f32 to vector<8x1024xf32>
    %20 = arith.minimumf %19, %18 : vector<8x1024xf32>
    %21 = arith.truncf %20 : vector<8x1024xf32> to vector<8x1024xbf16>
    %c0_14 = arith.constant 0 : index
    %c0_15 = arith.constant 0 : index
    %c0_16 = arith.constant 0 : index
    %22 = vector.load %arg7[%c0_14, %c0_15, %c0_16] : memref<1x8x1024xbf16, #tpu.memory_space<vmem>>, vector<1x8x1024xbf16>
    %23 = vector.shape_cast %22 : vector<1x8x1024xbf16> to vector<8x1024xbf16>
    %24 = vector.shape_cast %21 : vector<8x1024xbf16> to vector<1x8x1024xbf16>
    tpu.vector_store %arg7[%c0_14, %c0_15, %c0_16], %24 {strides = array<i32>} : memref<1x8x1024xbf16, #tpu.memory_space<vmem>>, vector<1x8x1024xbf16>,
    return
  }
  func.func @transform_0(%arg0: i32, %arg1: i32) -> (i32, i32, i32) {
    %c0_i32 = arith.constant 0 : i32
    %c0_i32_0 = arith.constant 0 : i32
    return %arg0, %c0_i32, %arg1 : i32, i32, i32
  }
  func.func @transform_1(%arg0: i32, %arg1: i32) -> (i32, i32, i32) {
    %c0_i32 = arith.constant 0 : i32
    %c0_i32_0 = arith.constant 0 : i32
    %c0_i32_1 = arith.constant 0 : i32
    return %arg0, %c0_i32, %c0_i32_0 : i32, i32, i32
  }
  func.func @transform_2(%arg0: i32, %arg1: i32) -> (i32, i32, i32) {
    %c0_i32 = arith.constant 0 : i32
    %c0_i32_0 = arith.constant 0 : i32
    %c0_i32_1 = arith.constant 0 : i32
    return %arg0, %c0_i32, %c0_i32_0 : i32, i32, i32
  }
  func.func @transform_3(%arg0: i32, %arg1: i32) -> (i32, i32) {
    %c0_i32 = arith.constant 0 : i32
    %c0_i32_0 = arith.constant 0 : i32
    %c0_i32_1 = arith.constant 0 : i32
    return %c0_i32, %c0_i32_0 : i32, i32
  }
  func.func @transform_4(%arg0: i32, %arg1: i32) -> (i32, i32) {
    %c0_i32 = arith.constant 0 : i32
    %c0_i32_0 = arith.constant 0 : i32
    %c0_i32_1 = arith.constant 0 : i32
    return %c0_i32, %c0_i32_0 : i32, i32
  }
  func.func @transform_5(%arg0: i32, %arg1: i32) -> (i32, i32, i32) {
    %c0_i32 = arith.constant 0 : i32
    %c0_i32_0 = arith.constant 0 : i32
    return %arg0, %c0_i32, %arg1 : i32, i32, i32
  }
}

module attributes {stable_mosaic.version = 11 : i64} {
  func.func @_proj_gh_kernel(%arg0: i32, %arg1: i32, %arg2: memref<1x16x1024xbf16, #tpu.memory_space<vmem>>, %arg3: memref<1x16x1xf32, #tpu.memory_space<vmem>>, %arg4: memref<1x16x1xf32, #tpu.memory_space<vmem>>, %arg5: memref<8x16xbf16, #tpu.memory_space<vmem>>, %arg6: memref<1x8xf32, #tpu.memory_space<vmem>>, %arg7: memref<8x16xbf16, #tpu.memory_space<vmem>>, %arg8: memref<1x8xf32, #tpu.memory_space<vmem>>, %arg9: memref<1x1024x8xbf16, #tpu.memory_space<vmem>>, %arg10: memref<1x1024x8xbf16, #tpu.memory_space<vmem>>) attributes {dimension_semantics = [#tpu.dimension_semantics<parallel>, #tpu.dimension_semantics<parallel>], iteration_bounds = array<i64: 2, 1>, scalar_prefetch = 0 : i64, scratch_operands = 0 : i64, tpu.core_type = #tpu.core_type<tc>, window_params = [{transform_indices = @transform_0, window_bounds = array<i64: 1, 16, 1024>}, {transform_indices = @transform_1, window_bounds = array<i64: 1, 16, 1>}, {transform_indices = @transform_2, window_bounds = array<i64: 1, 16, 1>}, {pipeline_mode = #tpu.pipeline_mode<synchronous>, transform_indices = @transform_3, window_bounds = array<i64: 8, 16>}, {pipeline_mode = #tpu.pipeline_mode<synchronous>, transform_indices = @transform_4, window_bounds = array<i64: 1, 8>}, {pipeline_mode = #tpu.pipeline_mode<synchronous>, transform_indices = @transform_5, window_bounds = array<i64: 8, 16>}, {pipeline_mode = #tpu.pipeline_mode<synchronous>, transform_indices = @transform_6, window_bounds = array<i64: 1, 8>}, {transform_indices = @transform_7, window_bounds = array<i64: 1, 1024, 8>}, {transform_indices = @transform_8, window_bounds = array<i64: 1, 1024, 8>}]} {
    %c0 = arith.constant 0 : index
    %c0_0 = arith.constant 0 : index
    %c0_1 = arith.constant 0 : index
    %0 = vector.load %arg2[%c0, %c0_0, %c0_1] : memref<1x16x1024xbf16, #tpu.memory_space<vmem>>, vector<1x16x1024xbf16>
    %1 = vector.shape_cast %0 : vector<1x16x1024xbf16> to vector<16x1024xbf16>
    %2 = arith.extf %1 : vector<16x1024xbf16> to vector<16x1024xf32>
    %c0_2 = arith.constant 0 : index
    %c0_3 = arith.constant 0 : index
    %c0_4 = arith.constant 0 : index
    %3 = vector.load %arg3[%c0_2, %c0_3, %c0_4] : memref<1x16x1xf32, #tpu.memory_space<vmem>>, vector<1x16x1xf32>
    %4 = vector.shape_cast %3 : vector<1x16x1xf32> to vector<16x1xf32>
    %5 = vector.broadcast %4 : vector<16x1xf32> to vector<16x1024xf32>
    %6 = arith.subf %2, %5 : vector<16x1024xf32>
    %c0_5 = arith.constant 0 : index
    %c0_6 = arith.constant 0 : index
    %c0_7 = arith.constant 0 : index
    %7 = vector.load %arg4[%c0_5, %c0_6, %c0_7] : memref<1x16x1xf32, #tpu.memory_space<vmem>>, vector<1x16x1xf32>
    %8 = vector.shape_cast %7 : vector<1x16x1xf32> to vector<16x1xf32>
    %9 = vector.broadcast %8 : vector<16x1xf32> to vector<16x1024xf32>
    %10 = arith.mulf %6, %9 : vector<16x1024xf32>
    %11 = arith.truncf %10 : vector<16x1024xf32> to vector<16x1024xbf16>
    %c0_8 = arith.constant 0 : index
    %c0_9 = arith.constant 0 : index
    %12 = vector.load %arg5[%c0_8, %c0_9] : memref<8x16xbf16, #tpu.memory_space<vmem>>, vector<8x16xbf16>
    %cst = arith.constant dense<0.000000e+00> : vector<1024x8xf32>
    %13 = tpu.matmul %11, %12, %cst {dimension_numbers = #tpu.dot_dimension_numbers<[0], [1], [1], [0], [0, 1, 1, 0], [], []>} : vector<16x1024xbf16>, vector<8x16xbf16>, vector<1024x8xf32> -> vector<1024x8xf32>
    %c0_10 = arith.constant 0 : index
    %c0_11 = arith.constant 0 : index
    %14 = vector.load %arg7[%c0_10, %c0_11] : memref<8x16xbf16, #tpu.memory_space<vmem>>, vector<8x16xbf16>
    %cst_12 = arith.constant dense<0.000000e+00> : vector<1024x8xf32>
    %15 = tpu.matmul %1, %14, %cst_12 {dimension_numbers = #tpu.dot_dimension_numbers<[0], [1], [1], [0], [0, 1, 1, 0], [], []>} : vector<16x1024xbf16>, vector<8x16xbf16>, vector<1024x8xf32> -> vector<1024x8xf32>
    %c0_13 = arith.constant 0 : index
    %c0_14 = arith.constant 0 : index
    %16 = vector.load %arg6[%c0_13, %c0_14] : memref<1x8xf32, #tpu.memory_space<vmem>>, vector<1x8xf32>
    %17 = vector.broadcast %16 : vector<1x8xf32> to vector<1024x8xf32>
    %18 = arith.addf %13, %17 : vector<1024x8xf32>
    %cst_15 = arith.constant 0.000000e+00 : f32
    %cst_16 = arith.constant 6.000000e+00 : f32
    %19 = vector.broadcast %cst_15 : f32 to vector<1024x8xf32>
    %20 = arith.maximumf %19, %18 : vector<1024x8xf32>
    %21 = vector.broadcast %cst_16 : f32 to vector<1024x8xf32>
    %22 = arith.minimumf %21, %20 : vector<1024x8xf32>
    %23 = arith.truncf %22 : vector<1024x8xf32> to vector<1024x8xbf16>
    %c0_17 = arith.constant 0 : index
    %c0_18 = arith.constant 0 : index
    %c0_19 = arith.constant 0 : index
    %24 = vector.load %arg9[%c0_17, %c0_18, %c0_19] : memref<1x1024x8xbf16, #tpu.memory_space<vmem>>, vector<1x1024x8xbf16>
    %25 = vector.shape_cast %24 : vector<1x1024x8xbf16> to vector<1024x8xbf16>
    %26 = vector.shape_cast %23 : vector<1024x8xbf16> to vector<1x1024x8xbf16>
    tpu.vector_store %arg9[%c0_17, %c0_18, %c0_19], %26 {strides = array<i32>} : memref<1x1024x8xbf16, #tpu.memory_space<vmem>>, vector<1x1024x8xbf16>,
    %c0_20 = arith.constant 0 : index
    %c0_21 = arith.constant 0 : index
    %27 = vector.load %arg8[%c0_20, %c0_21] : memref<1x8xf32, #tpu.memory_space<vmem>>, vector<1x8xf32>
    %28 = vector.broadcast %27 : vector<1x8xf32> to vector<1024x8xf32>
    %29 = arith.addf %15, %28 : vector<1024x8xf32>
    %cst_22 = arith.constant 0.000000e+00 : f32
    %cst_23 = arith.constant 6.000000e+00 : f32
    %30 = vector.broadcast %cst_22 : f32 to vector<1024x8xf32>
    %31 = arith.maximumf %30, %29 : vector<1024x8xf32>
    %32 = vector.broadcast %cst_23 : f32 to vector<1024x8xf32>
    %33 = arith.minimumf %32, %31 : vector<1024x8xf32>
    %34 = arith.truncf %33 : vector<1024x8xf32> to vector<1024x8xbf16>
    %c0_24 = arith.constant 0 : index
    %c0_25 = arith.constant 0 : index
    %c0_26 = arith.constant 0 : index
    %35 = vector.load %arg10[%c0_24, %c0_25, %c0_26] : memref<1x1024x8xbf16, #tpu.memory_space<vmem>>, vector<1x1024x8xbf16>
    %36 = vector.shape_cast %35 : vector<1x1024x8xbf16> to vector<1024x8xbf16>
    %37 = vector.shape_cast %34 : vector<1024x8xbf16> to vector<1x1024x8xbf16>
    tpu.vector_store %arg10[%c0_24, %c0_25, %c0_26], %37 {strides = array<i32>} : memref<1x1024x8xbf16, #tpu.memory_space<vmem>>, vector<1x1024x8xbf16>,
    return
  }
  func.func @transform_0(%arg0: i32, %arg1: i32) -> (i32, i32, i32) {
    %c0_i32 = arith.constant 0 : i32
    %c0_i32_0 = arith.constant 0 : i32
    return %arg0, %c0_i32, %arg1 : i32, i32, i32
  }
  func.func @transform_1(%arg0: i32, %arg1: i32) -> (i32, i32, i32) {
    %c0_i32 = arith.constant 0 : i32
    %c0_i32_0 = arith.constant 0 : i32
    %c0_i32_1 = arith.constant 0 : i32
    return %arg0, %c0_i32, %c0_i32_0 : i32, i32, i32
  }
  func.func @transform_2(%arg0: i32, %arg1: i32) -> (i32, i32, i32) {
    %c0_i32 = arith.constant 0 : i32
    %c0_i32_0 = arith.constant 0 : i32
    %c0_i32_1 = arith.constant 0 : i32
    return %arg0, %c0_i32, %c0_i32_0 : i32, i32, i32
  }
  func.func @transform_3(%arg0: i32, %arg1: i32) -> (i32, i32) {
    %c0_i32 = arith.constant 0 : i32
    %c0_i32_0 = arith.constant 0 : i32
    %c0_i32_1 = arith.constant 0 : i32
    return %c0_i32, %c0_i32_0 : i32, i32
  }
  func.func @transform_4(%arg0: i32, %arg1: i32) -> (i32, i32) {
    %c0_i32 = arith.constant 0 : i32
    %c0_i32_0 = arith.constant 0 : i32
    %c0_i32_1 = arith.constant 0 : i32
    return %c0_i32, %c0_i32_0 : i32, i32
  }
  func.func @transform_5(%arg0: i32, %arg1: i32) -> (i32, i32) {
    %c0_i32 = arith.constant 0 : i32
    %c0_i32_0 = arith.constant 0 : i32
    %c0_i32_1 = arith.constant 0 : i32
    return %c0_i32, %c0_i32_0 : i32, i32
  }
  func.func @transform_6(%arg0: i32, %arg1: i32) -> (i32, i32) {
    %c0_i32 = arith.constant 0 : i32
    %c0_i32_0 = arith.constant 0 : i32
    %c0_i32_1 = arith.constant 0 : i32
    return %c0_i32, %c0_i32_0 : i32, i32
  }
  func.func @transform_7(%arg0: i32, %arg1: i32) -> (i32, i32, i32) {
    %c0_i32 = arith.constant 0 : i32
    %c0_i32_0 = arith.constant 0 : i32
    return %arg0, %arg1, %c0_i32 : i32, i32, i32
  }
  func.func @transform_8(%arg0: i32, %arg1: i32) -> (i32, i32, i32) {
    %c0_i32 = arith.constant 0 : i32
    %c0_i32_0 = arith.constant 0 : i32
    return %arg0, %arg1, %c0_i32 : i32, i32, i32
  }
}

module attributes {stable_mosaic.version = 11 : i64} {
  func.func @_attn_kernel(%arg0: i32, %arg1: i32, %arg2: i32, %arg3: memref<1x8x512xbf16, #tpu.memory_space<vmem>>, %arg4: memref<1x1024x8xbf16, #tpu.memory_space<vmem>>, %arg5: memref<1x1024x8xbf16, #tpu.memory_space<vmem>>, %arg6: memref<16x8xbf16, #tpu.memory_space<vmem>>, %arg7: memref<16x1xf32, #tpu.memory_space<vmem>>, %arg8: memref<1x16x512xbf16, #tpu.memory_space<vmem>>, %arg9: memref<1x512xf32, #tpu.memory_space<vmem>>, %arg10: memref<1x512xf32, #tpu.memory_space<vmem>>, %arg11: memref<8x512xf32, #tpu.memory_space<vmem>>) attributes {dimension_semantics = [#tpu.dimension_semantics<parallel>, #tpu.dimension_semantics<parallel>, #tpu.dimension_semantics<arbitrary>], iteration_bounds = array<i64: 2, 2, 2>, scalar_prefetch = 0 : i64, scratch_operands = 3 : i64, tpu.core_type = #tpu.core_type<tc>, window_params = [{transform_indices = @transform_0, window_bounds = array<i64: 1, 8, 512>}, {transform_indices = @transform_1, window_bounds = array<i64: 1, 1024, 8>}, {transform_indices = @transform_2, window_bounds = array<i64: 1, 1024, 8>}, {pipeline_mode = #tpu.pipeline_mode<synchronous>, transform_indices = @transform_3, window_bounds = array<i64: 16, 8>}, {pipeline_mode = #tpu.pipeline_mode<synchronous>, transform_indices = @transform_4, window_bounds = array<i64: 16, 1>}, {transform_indices = @transform_5, window_bounds = array<i64: 1, 16, 512>}]} {
    %c0_i32 = arith.constant 0 : i32
    %0 = arith.cmpi eq, %arg2, %c0_i32 : i32
    %1 = arith.extui %0 : i1 to i32
    %c0_i32_0 = arith.constant 0 : i32
    %2 = arith.cmpi ne, %1, %c0_i32_0 : i32
    scf.if %2 {
      %cst_23 = arith.constant 0xFF800000 : f32
      %40 = vector.broadcast %cst_23 : f32 to vector<1x512xf32>
      %c0_24 = arith.constant 0 : index
      %c0_25 = arith.constant 0 : index
      %41 = vector.load %arg9[%c0_24, %c0_25] : memref<1x512xf32, #tpu.memory_space<vmem>>, vector<1x512xf32>
      tpu.vector_store %arg9[%c0_24, %c0_25], %40 {strides = array<i32>} : memref<1x512xf32, #tpu.memory_space<vmem>>, vector<1x512xf32>,
      %cst_26 = arith.constant 0.000000e+00 : f32
      %42 = vector.broadcast %cst_26 : f32 to vector<1x512xf32>
      %c0_27 = arith.constant 0 : index
      %c0_28 = arith.constant 0 : index
      %43 = vector.load %arg10[%c0_27, %c0_28] : memref<1x512xf32, #tpu.memory_space<vmem>>, vector<1x512xf32>
      tpu.vector_store %arg10[%c0_27, %c0_28], %42 {strides = array<i32>} : memref<1x512xf32, #tpu.memory_space<vmem>>, vector<1x512xf32>,
      %cst_29 = arith.constant 0.000000e+00 : f32
      %44 = vector.broadcast %cst_29 : f32 to vector<8x512xf32>
      %c0_30 = arith.constant 0 : index
      %c0_31 = arith.constant 0 : index
      %45 = vector.load %arg11[%c0_30, %c0_31] : memref<8x512xf32, #tpu.memory_space<vmem>>, vector<8x512xf32>
      tpu.vector_store %arg11[%c0_30, %c0_31], %44 {strides = array<i32>} : memref<8x512xf32, #tpu.memory_space<vmem>>, vector<8x512xf32>,
    } else {
    }
    %c0 = arith.constant 0 : index
    %c0_1 = arith.constant 0 : index
    %c0_2 = arith.constant 0 : index
    %3 = vector.load %arg3[%c0, %c0_1, %c0_2] : memref<1x8x512xbf16, #tpu.memory_space<vmem>>, vector<1x8x512xbf16>
    %4 = vector.shape_cast %3 : vector<1x8x512xbf16> to vector<8x512xbf16>
    %c512_i32 = arith.constant 512 : i32
    %5 = arith.muli %arg2, %c512_i32 : i32
    %6 = tpu.assume_multiple %5, 512 : i32
    %c0_3 = arith.constant 0 : index
    %7 = arith.index_cast %6 : i32 to index
    %c0_4 = arith.constant 0 : index
    %8 = vector.load %arg4[%c0_3, %7, %c0_4] : memref<1x1024x8xbf16, #tpu.memory_space<vmem>>, vector<1x512x8xbf16>
    %9 = vector.shape_cast %8 : vector<1x512x8xbf16> to vector<512x8xbf16>
    %c0_5 = arith.constant 0 : index
    %10 = arith.index_cast %6 : i32 to index
    %c0_6 = arith.constant 0 : index
    %11 = vector.load %arg5[%c0_5, %10, %c0_6] : memref<1x1024x8xbf16, #tpu.memory_space<vmem>>, vector<1x512x8xbf16>
    %12 = vector.shape_cast %11 : vector<1x512x8xbf16> to vector<512x8xbf16>
    %cst = arith.constant dense<0.000000e+00> : vector<512x512xf32>
    %13 = tpu.matmul %9, %4, %cst {dimension_numbers = #tpu.dot_dimension_numbers<[1], [0], [0], [1], [0, 0, 1, 1], [], []>} : vector<512x8xbf16>, vector<8x512xbf16>, vector<512x512xf32> -> vector<512x512xf32>
    %c0_7 = arith.constant 0 : index
    %c0_8 = arith.constant 0 : index
    %14 = vector.load %arg9[%c0_7, %c0_8] : memref<1x512xf32, #tpu.memory_space<vmem>>, vector<1x512xf32>
    %cst_9 = arith.constant dense<0xFF800000> : vector<512xf32>
    %15 = vector.multi_reduction <maximumf>, %13, %cst_9 [0] : vector<512x512xf32> to vector<512xf32>
    %16 = vector.shape_cast %15 : vector<512xf32> to vector<1x512xf32>
    %17 = arith.maximumf %14, %16 : vector<1x512xf32>
    %18 = arith.subf %14, %17 : vector<1x512xf32>
    %19 = math.exp %18 : vector<1x512xf32>
    %20 = vector.broadcast %17 : vector<1x512xf32> to vector<512x512xf32>
    %21 = arith.subf %13, %20 : vector<512x512xf32>
    %22 = math.exp %21 : vector<512x512xf32>
    %c0_10 = arith.constant 0 : index
    %c0_11 = arith.constant 0 : index
    %23 = vector.load %arg10[%c0_10, %c0_11] : memref<1x512xf32, #tpu.memory_space<vmem>>, vector<1x512xf32>
    %24 = arith.mulf %19, %23 : vector<1x512xf32>
    %cst_12 = arith.constant dense<0.000000e+00> : vector<512xf32>
    %25 = vector.multi_reduction <add>, %22, %cst_12 [0] : vector<512x512xf32> to vector<512xf32>
    %26 = vector.shape_cast %25 : vector<512xf32> to vector<1x512xf32>
    %27 = arith.addf %24, %26 : vector<1x512xf32>
    %c0_13 = arith.constant 0 : index
    %c0_14 = arith.constant 0 : index
    %28 = vector.load %arg10[%c0_13, %c0_14] : memref<1x512xf32, #tpu.memory_space<vmem>>, vector<1x512xf32>
    tpu.vector_store %arg10[%c0_13, %c0_14], %27 {strides = array<i32>} : memref<1x512xf32, #tpu.memory_space<vmem>>, vector<1x512xf32>,
    %c0_15 = arith.constant 0 : index
    %c0_16 = arith.constant 0 : index
    %29 = vector.load %arg11[%c0_15, %c0_16] : memref<8x512xf32, #tpu.memory_space<vmem>>, vector<8x512xf32>
    %30 = vector.broadcast %19 : vector<1x512xf32> to vector<8x512xf32>
    %31 = arith.mulf %30, %29 : vector<8x512xf32>
    %32 = arith.truncf %22 : vector<512x512xf32> to vector<512x512xbf16>
    %cst_17 = arith.constant dense<0.000000e+00> : vector<8x512xf32>
    %33 = tpu.matmul %12, %32, %cst_17 {dimension_numbers = #tpu.dot_dimension_numbers<[0], [0], [1], [1], [0, 1, 1, 1], [], []>} : vector<512x8xbf16>, vector<512x512xbf16>, vector<8x512xf32> -> vector<8x512xf32>
    %34 = arith.addf %31, %33 : vector<8x512xf32>
    %c0_18 = arith.constant 0 : index
    %c0_19 = arith.constant 0 : index
    %35 = vector.load %arg11[%c0_18, %c0_19] : memref<8x512xf32, #tpu.memory_space<vmem>>, vector<8x512xf32>
    tpu.vector_store %arg11[%c0_18, %c0_19], %34 {strides = array<i32>} : memref<8x512xf32, #tpu.memory_space<vmem>>, vector<8x512xf32>,
    %c0_20 = arith.constant 0 : index
    %c0_21 = arith.constant 0 : index
    %36 = vector.load %arg9[%c0_20, %c0_21] : memref<1x512xf32, #tpu.memory_space<vmem>>, vector<1x512xf32>
    tpu.vector_store %arg9[%c0_20, %c0_21], %17 {strides = array<i32>} : memref<1x512xf32, #tpu.memory_space<vmem>>, vector<1x512xf32>,
    %c1_i32 = arith.constant 1 : i32
    %37 = arith.cmpi eq, %arg2, %c1_i32 : i32
    %38 = arith.extui %37 : i1 to i32
    %c0_i32_22 = arith.constant 0 : i32
    %39 = arith.cmpi ne, %38, %c0_i32_22 : i32
    scf.if %39 {
      %c0_23 = arith.constant 0 : index
      %c0_24 = arith.constant 0 : index
      %40 = vector.load %arg11[%c0_23, %c0_24] : memref<8x512xf32, #tpu.memory_space<vmem>>, vector<8x512xf32>
      %c0_25 = arith.constant 0 : index
      %c0_26 = arith.constant 0 : index
      %41 = vector.load %arg10[%c0_25, %c0_26] : memref<1x512xf32, #tpu.memory_space<vmem>>, vector<1x512xf32>
      %42 = tpu.reciprocal %41 {approx = true} : vector<1x512xf32> -> vector<1x512xf32>
      %43 = vector.broadcast %42 : vector<1x512xf32> to vector<8x512xf32>
      %44 = arith.mulf %40, %43 : vector<8x512xf32>
      %c0_27 = arith.constant 0 : index
      %c0_28 = arith.constant 0 : index
      %45 = vector.load %arg6[%c0_27, %c0_28] : memref<16x8xbf16, #tpu.memory_space<vmem>>, vector<16x8xbf16>
      %46 = arith.truncf %44 : vector<8x512xf32> to vector<8x512xbf16>
      %cst_29 = arith.constant dense<0.000000e+00> : vector<16x512xf32>
      %47 = tpu.matmul %45, %46, %cst_29 {dimension_numbers = #tpu.dot_dimension_numbers<[1], [0], [0], [1], [0, 0, 1, 1], [], []>} : vector<16x8xbf16>, vector<8x512xbf16>, vector<16x512xf32> -> vector<16x512xf32>
      %c0_30 = arith.constant 0 : index
      %c0_31 = arith.constant 0 : index
      %48 = vector.load %arg7[%c0_30, %c0_31] : memref<16x1xf32, #tpu.memory_space<vmem>>, vector<16x1xf32>
      %49 = vector.broadcast %48 : vector<16x1xf32> to vector<16x512xf32>
      %50 = arith.addf %47, %49 : vector<16x512xf32>
      %cst_32 = arith.constant 0.000000e+00 : f32
      %cst_33 = arith.constant 6.000000e+00 : f32
      %51 = vector.broadcast %cst_32 : f32 to vector<16x512xf32>
      %52 = arith.maximumf %51, %50 : vector<16x512xf32>
      %53 = vector.broadcast %cst_33 : f32 to vector<16x512xf32>
      %54 = arith.minimumf %53, %52 : vector<16x512xf32>
      %55 = arith.truncf %54 : vector<16x512xf32> to vector<16x512xbf16>
      %c0_34 = arith.constant 0 : index
      %c0_35 = arith.constant 0 : index
      %c0_36 = arith.constant 0 : index
      %56 = vector.load %arg8[%c0_34, %c0_35, %c0_36] : memref<1x16x512xbf16, #tpu.memory_space<vmem>>, vector<1x16x512xbf16>
      %57 = vector.shape_cast %56 : vector<1x16x512xbf16> to vector<16x512xbf16>
      %58 = vector.shape_cast %55 : vector<16x512xbf16> to vector<1x16x512xbf16>
      tpu.vector_store %arg8[%c0_34, %c0_35, %c0_36], %58 {strides = array<i32>} : memref<1x16x512xbf16, #tpu.memory_space<vmem>>, vector<1x16x512xbf16>,
    } else {
    }
    return
  }
  func.func @transform_0(%arg0: i32, %arg1: i32, %arg2: i32) -> (i32, i32, i32) {
    %c0_i32 = arith.constant 0 : i32
    %c0_i32_0 = arith.constant 0 : i32
    return %arg0, %c0_i32, %arg1 : i32, i32, i32
  }
  func.func @transform_1(%arg0: i32, %arg1: i32, %arg2: i32) -> (i32, i32, i32) {
    %c0_i32 = arith.constant 0 : i32
    %c0_i32_0 = arith.constant 0 : i32
    %c0_i32_1 = arith.constant 0 : i32
    return %arg0, %c0_i32, %c0_i32_0 : i32, i32, i32
  }
  func.func @transform_2(%arg0: i32, %arg1: i32, %arg2: i32) -> (i32, i32, i32) {
    %c0_i32 = arith.constant 0 : i32
    %c0_i32_0 = arith.constant 0 : i32
    %c0_i32_1 = arith.constant 0 : i32
    return %arg0, %c0_i32, %c0_i32_0 : i32, i32, i32
  }
  func.func @transform_3(%arg0: i32, %arg1: i32, %arg2: i32) -> (i32, i32) {
    %c0_i32 = arith.constant 0 : i32
    %c0_i32_0 = arith.constant 0 : i32
    %c0_i32_1 = arith.constant 0 : i32
    return %c0_i32, %c0_i32_0 : i32, i32
  }
  func.func @transform_4(%arg0: i32, %arg1: i32, %arg2: i32) -> (i32, i32) {
    %c0_i32 = arith.constant 0 : i32
    %c0_i32_0 = arith.constant 0 : i32
    %c0_i32_1 = arith.constant 0 : i32
    return %c0_i32, %c0_i32_0 : i32, i32
  }
  func.func @transform_5(%arg0: i32, %arg1: i32, %arg2: i32) -> (i32, i32, i32) {
    %c0_i32 = arith.constant 0 : i32
    %c0_i32_0 = arith.constant 0 : i32
    return %arg0, %c0_i32, %arg1 : i32, i32, i32
  }
}

</mosaic_0001>

<bundles_post_ra>
// kernel: attention_unit_forward.5
= control target key start
LH: loop header
LB: loop body
LE: loop exit
PB: predicated region body
PF: predicated region fallthrough
CT: control target
= control target key end

     0   :  { %8 = vsyncpa [#allocation5], 0  ;;  %s977_s0 = inlined_call_operand.hbm [shape: bf16[2,16,1024], index: 0, kind: input, shape index: {}]   ;;  %s978_s1 = inlined_call_operand.hbm [shape: f32[2,16,1], index: 1, kind: output, shape index: {0}]   ;;  %s979_s2 = inlined_call_operand.hbm [shape: f32[2,16,1], index: 2, kind: output, shape index: {1}]  }
   0x1   :  { %10 = vsyncpa [#allocation5 + $0x1], 0 }
   0x2   :  { %11 = vsyncpa [#allocation6], 0 }
   0x3   :  { %13 = vsyncpa [#allocation6 + $0x1], 0 }
   0x4   :  { %14 = vsyncpa [#allocation9], 0 }
   0x5   :  { %16 = vsyncpa [#allocation9 + $0x1], 0  ;;  %s734_s9 = smov 0   ;;  %s736_s10 = smov 0  }
   0x6   :  { %s738_s11 = smov 0   ;;  %s740_s12 = smov 0  }
   0x7   :  { %s742_s13 = smov 0   ;;  %s744_s14 = smov 0  }
   0x8 LB: > { %s467_s15 = sadd.s32 4294967295, %s709_s14   ;;  %s468_s16 = sadd.s32 4294967294, %s709_s14   ;;  %s709_s14 = sphi %s744_s14, %s22_s14   ;;  %s705_s13 = sphi %s742_s13, %s994_s13   ;;  %s701_s12 = sphi %s740_s12, %s993_s12   ;;  %s697_s11 = sphi %s738_s11, %s992_s11   ;;  %s693_s10 = sphi %s736_s10, %s991_s10   ;;  %s689_s9 = sphi %s734_s9, %s990_s9  }
   0x9   : > { %s34_s17 = sadd.s32 1, %s705_s13  ;;  %s43_s18 = sadd.s32 1, %s697_s11 }
   0xa   : > { %p36_p0 = scmp.ge.s32.totalorder %s34_s17, 2  ;;  %p50_p1 = scmp.ne.s32.totalorder %s697_s11, %s693_s10 }
   0xb   : > { %p51_p2 = scmp.eq.s32.totalorder %s709_s14, 0  ;;  %p56_p3 = scmp.ne.s32.totalorder %s693_s10, %s689_s9 }
   0xc   : > { %s996_s17 = smov (%p36_p0, %s34_s17), 0  ;;  %p57_p5 = scmp.eq.s32.totalorder %s467_s15, 0 }
   0xd   : > { %p775_p4 = por %p51_p2, %p50_p1  ;;  %s38_s20 = ssub.s32 %s705_s13, %s996_s17 }
   0xe   : > { %p80_p6 = scmp.eq.s32.totalorder %s467_s15, 1  ;;  %p41_p7 = scmp.eq.s32.totalorder %s38_s20, 0 }
   0xf   : > { %p781_p8 = por %p57_p5, %p56_p3  ;;  %p86_p10 = scmp.eq.s32.totalorder %s468_s16, 1 }
  0x10   : > { %p785_p9 = por %p80_p6, %p50_p1  ;;  %p506_p13 = scmp.lt.s32.totalorder %s709_s14, 2 }
  0x11   : > { %s790_s23 = scalar_select %p41_p7, %s697_s11, %s43_s18  }
  0x12   : > { %s983_s22 = scalar_select %p785_p9, 1, 0 }
  0x13   : > { %p792_p11 = por %p86_p10, %p56_p3  ;;  %s132_s25 = sand.u32 1, %s697_s11  }
  0x14   : > { %s471_s26 = sshll.u32 %s132_s25, 6  ;;  %s486_s27 = sshll.u32 %s705_s13, 10 }
  0x15   : > { %s984_s24 = scalar_select %p792_p11, 1, 0 }
  0x16   : > { %s803_s30 = scalar_lea.hbm %s977_s0, %s486_s27  ;;  %s136_s3 = scalar_lea.vmem [#allocation4], %s471_s26 }
  0x17   : > { %s145_s4 = sshll.u32 %s136_s3, 4  ;;  %p809_p0 = pnand %p506_p13, %p775_p4  ;;  %s805_s4 = int_to_ptr.vmem [resolvable:$true] %s145_s4 }
  0x18   : > { %s814_s6 = scalar_lea.sflag [#allocation5], %s132_s25  ;;  %s565_s7 = scalar_lea.hbm %s803_s30, 1024 }
  0x19   : > { %p566_p2 = scmp.ne.s32.totalorder %s803_s30, %s565_s7  ;;  %p567_p3 = pneg %p809_p0 }
  0x1a   : > { %s570_s16 = scalar_lea.hbm %s977_s0, 2048  ;;  %p571_p4 = scmp.lt.u32.totalorder %s803_s30, %s977_s0 }
  0x1b   : > { %p568_p5 = pnand %p567_p3, %p566_p2  ;;  %p572_p7 = scmp.lt.u32.totalorder %s570_s16, %s565_s7 }
  0x1c   : > { %p574_p13 = scmp.lt.u32.totalorder %s565_s7, %s803_s30 }
  0x1d   : > { %p569_p6 = pneg %p568_p5  ;;  %p573_p10 = por %p572_p7, %p571_p4 }
  0x1f   : > { %p575_p12 = por %p574_p13, %p573_p10 }
  0x21   : > { %p576_p1 = pnand %p575_p12, %p569_p6 }
  0x23   : > { %579 = shalt.err (!%p576_p1)
}
  0x24   : > { %s580_s20 = scalar_lea.vmem %s805_s4, 1024  ;;  %s711_s25 = smov [#allocation4]  }
  0x25   : > { %p581_p2 = scmp.ne.s32.totalorder %s805_s4, %s580_s20  ;;  %s585_s26 = sshll.u32 %s711_s25, 4  ;;  %s586_s26 = int_to_ptr.vmem [resolvable:$false] %s585_s26 }
  0x26   : > { %s587_s27 = scalar_lea.vmem %s586_s26, 2048  ;;  %p588_p9 = scmp.lt.s32.totalorder %s805_s4, %s586_s26 }
  0x27   : > { %p583_p5 = pnand %p581_p2, %p567_p3  ;;  %p589_p4 = scmp.lt.s32.totalorder %s587_s27, %s580_s20 }
  0x29   : > { %p584_p11 = pneg %p583_p5  ;;  %p590_p7 = por %p589_p4, %p588_p9 }
  0x2b   : > { %p591_p10 = pnand %p590_p7, %p584_p11 }
  0x2d   : > { %594 = shalt.err (!%p591_p10)
}
  0x2e   : > { %s712_s28 = smov 512   ;;  %s713_s29 = smov 32  }
  0x2f   : > { %498 = dma.hbm_to_vmem [thread:$0]  (!%p809_p0), %s803_s30, 1024, %s805_s4, %s814_s6, %s712_s28, %s712_s28, %s713_s29  }
  0x30   : > { %p153_p12 = scmp.lt.s32.totalorder %s709_s14, 3  ;;  %p986_p1 = scmp.ge.s32.totalorder %s709_s14, 1 }
  0x32   : > { %p154_p3 = pnand %p986_p1, %p153_p12 }
  0x33   : > { %s846_s3 = sand.u32 (!%p154_p3), 1, %s693_s10  }
  0x34   : > { %157 = sbr.rel (%p154_p3) target bundleno = 283 (0x11b), region = 24  ;;  %s475_s7 = sshll.u32 (!%p154_p3), %s846_s3, 6 }
  0x35   : > { %s160_s8 = scalar_lea.sflag (!%p154_p3), [#allocation5], %s846_s3  ;;  %s850_s15 = scalar_lea.vmem (!%p154_p3), [#allocation4], %s475_s7 }
  0x3b   : > { %676 = dma.done.wait (%p781_p8), %s160_s8, 1024  }
  0x3c   : > { %678 = vsyncadd (%p781_p8), %s160_s8, 4294966272  ;;  %vm194_vm0 = vcmask 7168   ;;  %v714_v0 = vmov 0.0   ;;  %v199_v1 = vld [vmem:[%s850_s15] sm:$0xff]  ;;  %v200_v2 = vld [vmem:[%s850_s15 + $0x8] sm:$0xff]  ;;  %s476_s21 = sshll.u32 %s846_s3, 4 }
  0x3d   : > { %195 = vst.msk [vmem:[#allocation2] sm:$0xff] %vm194_vm0, %v714_v0  ;;  %196 = vst.msk [vmem:[#allocation2 + $0x8] sm:$0xff] %vm194_vm0, %v714_v0  ;;  %v201_v3 = vld [vmem:[%s850_s15 + $0x10] sm:$0xff]  ;;  %v207_v4 = vunpack.c.l.bf16 %v199_v1  ;;  %v208_v5 = vunpack.c.h.bf16 %v199_v1  ;;  %v209_v6 = vunpack.c.l.bf16 %v200_v2  ;;  %v203_v7 = vld [vmem:[%s850_s15 + $0x20] sm:$0xff]  ;;  %v210_v9 = vunpack.c.h.bf16 %v200_v2  ;;  %s487_s30 = sshll.u32 %s701_s12, 8  ;;  %s181_s4 = scalar_lea.vmem [#allocation7], %s476_s21 }
  0x3e   : > { %197 = vst.msk [vmem:[#allocation3] sm:$0xff] %vm194_vm0, %v714_v0  ;;  %198 = vst.msk [vmem:[#allocation3 + $0x8] sm:$0xff] %vm194_vm0, %v714_v0  ;;  %v204_v8 = vld [vmem:[%s850_s15 + $0x28] sm:$0xff]  ;;  %v215_v11 = vunpack.c.l.bf16 %v203_v7  ;;  %v216_v12 = vunpack.c.h.bf16 %v203_v7  ;;  %v202_v14 = vld [vmem:[%s850_s15 + $0x18] sm:$0xff]  ;;  %v211_v15 = vunpack.c.l.bf16 %v201_v3  ;;  %v212_v21 = vunpack.c.h.bf16 %v201_v3  ;;  %s335_s5 = sshll.u32 %s181_s4, 4  ;;  %s882_s18 = scalar_lea.hbm %s978_s1, %s487_s30  ;;  %s884_s5 = int_to_ptr.vmem [resolvable:$true] %s335_s5 }
  0x3f   : > { %v225_v10 = vadd.f32 %v208_v5, %v207_v4  ;;  %v217_v13 = vunpack.c.l.bf16 %v204_v8  ;;  %v205_v16 = vld [vmem:[%s850_s15 + $0x30] sm:$0xff]  ;;  %v218_v18 = vunpack.c.h.bf16 %v204_v8  ;;  %v250_v20 = vmul.f32 %v207_v4, %v207_v4  ;;  %v206_v26 = vld [vmem:[%s850_s15 + $0x38] sm:$0xff]  ;;  %s317_s19 = scalar_lea.sflag [#allocation6], %s846_s3  ;;  %s595_s20 = scalar_lea.vmem %s884_s5, 256 }
  0x40   : > { %v234_v19 = vadd.f32 %v216_v12, %v215_v11  ;;  %v251_v22 = vmul.f32 %v208_v5, %v208_v5  ;;  %v252_v23 = vmul.f32 %v209_v6, %v209_v6  ;;  %v213_v24 = vunpack.c.l.bf16 %v202_v14  ;;  %p596_p8 = scmp.ne.s32.totalorder %s884_s5, %s595_s20  ;;  %p987_p9 = scmp.ne.s32.totalorder %s983_s22, 0 }
  0x41   : > { %v226_v17 = vadd.f32 %v225_v10, %v209_v6  ;;  %v219_v27 = vunpack.c.l.bf16 %v205_v16  ;;  %v253_v29 = vmul.f32 %v210_v9, %v210_v9  ;;  %v258_v31 = vmul.f32 %v215_v11, %v215_v11  ;;  %s715_s25 = smov [#allocation7]  }
  0x42   : > { %v235_v28 = vadd.f32 %v234_v19, %v217_v13  ;;  %v266_v30 = vadd.f32 %v251_v22, %v250_v20  ;;  %v259_v32 = vmul.f32 %v216_v12, %v216_v12  ;;  %v220_v34 = vunpack.c.h.bf16 %v205_v16  ;;  %p597_p11 = pnand %p596_p8, %p987_p9  ;;  %s599_s26 = sshll.u32 %s715_s25, 4  ;;  %s600_s26 = int_to_ptr.vmem [resolvable:$false] %s599_s26 }
  0x43   : > { %v227_v25 = vadd.f32 %v226_v17, %v210_v9  ;;  %v260_v36 = vmul.f32 %v217_v13, %v217_v13  ;;  %v214_v37 = vunpack.c.h.bf16 %v202_v14  ;;  %v221_v38 = vunpack.c.l.bf16 %v206_v26  ;;  %s601_s27 = scalar_lea.vmem %s600_s26, 512  ;;  %p602_p6 = scmp.lt.s32.totalorder %s884_s5, %s600_s26 }
  0x44   : > { %v236_v35 = vadd.f32 %v235_v28, %v218_v18  ;;  %v254_v39 = vmul.f32 %v211_v15, %v211_v15  ;;  %v267_v40 = vadd.f32 %v266_v30, %v252_v23  ;;  %v261_v43 = vmul.f32 %v218_v18, %v218_v18  ;;  %v223_v5 = vld [vmem:[#allocation2] sm:$0xff]  ;;  %v224_v8 = vld [vmem:[#allocation2 + $0x8] sm:$0xff]  ;;  %p598_p0 = pneg %p597_p11  ;;  %p603_p13 = scmp.lt.s32.totalorder %s601_s27, %s595_s20 }
  0x45   : > { %v228_v33 = vadd.f32 %v227_v25, %v211_v15  ;;  %v275_v44 = vadd.f32 %v259_v32, %v258_v31  ;;  %v222_v45 = vunpack.c.h.bf16 %v206_v26  ;;  %v255_v46 = vmul.f32 %v212_v21, %v212_v21  ;;  %v248_v9 = vld [vmem:[#allocation3] sm:$0xff]  ;;  %v249_v14 = vld [vmem:[#allocation3 + $0x8] sm:$0xff] }
  0x46   : > { %v237_v42 = vadd.f32 %v236_v35, %v219_v27  ;;  %v268_v47 = vadd.f32 %v267_v40, %v253_v29  ;;  %v262_v50 = vmul.f32 %v219_v27, %v219_v27  ;;  %v256_v52 = vmul.f32 %v213_v24, %v213_v24  ;;  %p604_p2 = por %p603_p13, %p602_p6 }
  0x47   : > { %v229_v41 = vadd.f32 %v228_v33, %v212_v21  ;;  %v276_v51 = vadd.f32 %v275_v44, %v260_v36  ;;  %v263_v56 = vmul.f32 %v220_v34, %v220_v34  ;;  %v257_v58 = vmul.f32 %v214_v37, %v214_v37 }
  0x48   : > { %v238_v49 = vadd.f32 %v237_v42, %v220_v34  ;;  %v269_v53 = vadd.f32 %v268_v47, %v254_v39  ;;  %v264_v61 = vmul.f32 %v221_v38, %v221_v38  ;;  %v265_v0 = vmul.f32 %v222_v45, %v222_v45  ;;  %p605_p5 = pnand %p604_p2, %p598_p0 }
  0x49   : > { %v230_v48 = vadd.f32 %v229_v41, %v213_v24  ;;  %v277_v57 = vadd.f32 %v276_v51, %v261_v43 }
  0x4a   : > { %v239_v55 = vadd.f32 %v238_v49, %v221_v38  ;;  %v270_v59 = vadd.f32 %v269_v53, %v255_v46 }
  0x4b   : > { %v231_v54 = vadd.f32 %v230_v48, %v214_v37  ;;  %v278_v62 = vadd.f32 %v277_v57, %v262_v50 }
  0x4c   : > { %v240_v60 = vadd.f32 %v239_v55, %v222_v45  ;;  %v271_v63 = vadd.f32 %v270_v59, %v256_v52 }
  0x4d   : > { %232 = vadd.xlane.f32.xlu0 %v231_v54  ;;  %v279_v1 = vadd.f32 %v278_v62, %v263_v56 }
  0x4e   : > { %v272_v2 = vadd.f32 %v271_v63, %v257_v58 }
  0x4f   : > { %v280_v3 = vadd.f32 %v279_v1, %v264_v61 }
  0x50   : > { %273 = vadd.xlane.f32.xlu1 %v272_v2 }
  0x51   : > { %241 = vadd.xlane.f32.xlu0 %v240_v60  ;;  %v281_v4 = vadd.f32 %v280_v3, %v265_v0 }
  0x54   : > { %282 = vadd.xlane.f32.xlu1 %v281_v4 }
  0xda   : > { %v233_v6 = vpop.xlane.xlu0 %232 }
  0xdb   : > { %v243_v7 = vadd.f32 %v233_v6, %v223_v5 }
  0xdd   : > { %246 = vst.msk [vmem:[#allocation2] sm:$0xff] %vm194_vm0, %v243_v7  ;;  %v274_v12 = vpop.xlane.xlu1 %273 }
  0xde   : > { %v242_v10 = vpop.xlane.xlu0 %241  ;;  %v284_v13 = vadd.f32 %v274_v12, %v248_v9 }
  0xdf   : > { %v244_v11 = vadd.f32 %v242_v10, %v224_v8 }
  0xe0   : > { %286 = vst.msk [vmem:[#allocation3] sm:$0xff] %vm194_vm0, %v284_v13 }
  0xe1   : > { %247 = vst.msk [vmem:[#allocation2 + $0x8] sm:$0xff] %vm194_vm0, %v244_v11  ;;  %v283_v15 = vpop.xlane.xlu1 %282 }
  0xe2   : > { %v285_v16 = vadd.f32 %v283_v15, %v249_v14 }
  0xe4   : > { %v291_v17 = vld [vmem:[#allocation2] sm:$0xff]  ;;  %287 = vst.msk [vmem:[#allocation3 + $0x8] sm:$0xff] %vm194_vm0, %v285_v16 }
  0xe5   : > { %v293_v18 = vmul.f32 0.0009765625, %v291_v17 }
  0xe7   : > { %v297_v19 = vmul.f32 1024.0, %v293_v18  ;;  %308 = vst.msk [vmem:[%s181_s4] sm:$0xff] %vm194_vm0, %v293_v18  ;;  %v295_v22 = vld [vmem:[#allocation3] sm:$0xff] }
  0xe8   : > { %v292_v20 = vld [vmem:[#allocation2 + $0x8] sm:$0xff] }
  0xe9   : > { %v294_v21 = vmul.f32 0.0009765625, %v292_v20  ;;  %v299_v23 = vmul.f32 %v297_v19, %v293_v18 }
  0xeb   : > { %v298_v24 = vmul.f32 1024.0, %v294_v21  ;;  %v301_v25 = vsub.f32 %v295_v22, %v299_v23  ;;  %309 = vst.msk [vmem:[%s181_s4 + $0x8] sm:$0xff] %vm194_vm0, %v294_v21 }
  0xec   : > { %608 = shalt.err (!%p605_p5)
}
  0xed   : > { %s609_s28 = scalar_lea.hbm %s882_s18, 256  ;;  %s613_s8 = scalar_lea.hbm %s978_s1, 512 }
  0xee   : > { %p610_p4 = scmp.ne.s32.totalorder %s882_s18, %s609_s28  ;;  %p614_p12 = scmp.lt.u32.totalorder %s882_s18, %s978_s1 }
  0xef   : > { %p615_p1 = scmp.lt.u32.totalorder %s613_s8, %s609_s28  ;;  %p617_p8 = scmp.lt.u32.totalorder %s609_s28, %s882_s18 }
  0xf0   : > { %p611_p7 = pnand %p610_p4, %p987_p9 }
  0xf1   : > { %p616_p3 = por %p615_p1, %p614_p12 }
  0xf2   : > { %p612_p10 = pneg %p611_p7 }
  0xf3   : > { %p618_p11 = por %p617_p8, %p616_p3 }
  0xf5   : > { %p619_p0 = pnand %p618_p11, %p612_p10 }
  0xf7   : > { %622 = shalt.err (!%p619_p0)
}
  0xf8   : > { %s716_s6 = smov 128   ;;  %s717_s16 = smov 8   ;;  %v296_v26 = vld [vmem:[#allocation3 + $0x8] sm:$0xff]  ;;  %v300_v27 = vmul.f32 %v298_v24, %v294_v21  ;;  %v304_v28 = vmul.f32 0.0009775171, %v301_v25 }
  0xf9   : > { %491 = dma.vmem_to_hbm [thread:$0]  (%p987_p9), %s884_s5, 256, %s882_s18, %s317_s19, %s716_s6, %s716_s6, %s717_s16  }
  0xfa   : > { %v302_v29 = vsub.f32 %v296_v26, %v300_v27  ;;  %v306_v30 = vmax.f32 %v304_v28, 0.0  ;;  %s188_s20 = scalar_lea.vmem [#allocation8], %s476_s21  ;;  %s922_s19 = scalar_lea.hbm %s979_s2, %s487_s30 }
  0xfb   : > { %s351_s25 = sshll.u32 %s188_s20, 4  ;;  %s322_s26 = scalar_lea.sflag [#allocation9], %s846_s3  ;;  %s924_s25 = int_to_ptr.vmem [resolvable:$true] %s351_s25 }
  0xfc   : > { %v305_v31 = vmul.f32 0.0009775171, %v302_v29  ;;  %v310_v32 = vadd.f32 1e-05, %v306_v30  ;;  %s623_s27 = scalar_lea.vmem %s924_s25, 256  ;;  %s718_s12 = smov [#allocation8]  }
  0xfd   : > { %p624_p6 = scmp.ne.s32.totalorder %s924_s25, %s623_s27  ;;  %s627_s21 = sshll.u32 %s718_s12, 4  ;;  %s628_s21 = int_to_ptr.vmem [resolvable:$false] %s627_s21 }
  0xfe   : > { %v307_v33 = vmax.f32 %v305_v31, 0.0  ;;  %561 = vrsqrt.f32 %v310_v32  ;;  %s629_s28 = scalar_lea.vmem %s628_s21, 512  ;;  %p630_p5 = scmp.lt.s32.totalorder %s924_s25, %s628_s21 }
  0xff   : > { %p625_p13 = pnand %p624_p6, %p987_p9  ;;  %p631_p4 = scmp.lt.s32.totalorder %s629_s28, %s623_s27 }
 0x100   : > { %v311_v34 = vadd.f32 1e-05, %v307_v33 }
 0x101   : > { %p626_p2 = pneg %p625_p13  ;;  %p632_p7 = por %p631_p4, %p630_p5 }
 0x102   : > { %563 = vrsqrt.f32 %v311_v34 }
 0x103   : > { %p633_p10 = pnand %p632_p7, %p626_p2 }
 0x108   : > { %v562_v35 = vpop.eup %561 }
 0x109   : > { %314 = vst.msk [vmem:[%s188_s20] sm:$0xff] %vm194_vm0, %v562_v35 }
 0x10c   : > { %v564_v36 = vpop.eup %563 }
 0x10d   : > { %315 = vst.msk [vmem:[%s188_s20 + $0x8] sm:$0xff] %vm194_vm0, %v564_v36 }
 0x10e   : > { %636 = shalt.err (!%p633_p10)
}
 0x10f   : > { %s637_s30 = scalar_lea.hbm %s922_s19, 256  ;;  %s641_s8 = scalar_lea.hbm %s979_s2, 512 }
 0x110   : > { %p638_p12 = scmp.ne.s32.totalorder %s922_s19, %s637_s30  ;;  %p642_p8 = scmp.lt.u32.totalorder %s922_s19, %s979_s2 }
 0x111   : > { %p643_p11 = scmp.lt.u32.totalorder %s641_s8, %s637_s30  ;;  %p645_p6 = scmp.lt.u32.totalorder %s637_s30, %s922_s19 }
 0x112   : > { %p639_p1 = pnand %p638_p12, %p987_p9 }
 0x113   : > { %p644_p0 = por %p643_p11, %p642_p8 }
 0x114   : > { %p640_p3 = pneg %p639_p1 }
 0x115   : > { %p646_p13 = por %p645_p6, %p644_p0 }
 0x117   : > { %p647_p2 = pnand %p646_p13, %p640_p3 }
 0x119   : > { %650 = shalt.err (!%p647_p2)
}
 0x11a   : > { %492 = dma.vmem_to_hbm [thread:$0]  (%p987_p9), %s924_s25, 256, %s922_s19, %s322_s26, %s716_s6, %s716_s6, %s717_s16  }
 0x11b PF: > { %s366_s20 = sand.u32 1, %s689_s9   ;;  %p988_p5 = scmp.ne.s32.totalorder %s984_s24, 0 }
 0x11c   : > { %p989_p4 = scmp.ge.s32.totalorder %s709_s14, 2  ;;  %s367_s5 = scalar_lea.sflag [#allocation6], %s366_s20 }
 0x11e   : > { %p500_p7 = pnand %p989_p4, %p988_p5 }
 0x120   : > { %680 = dma.done.wait (!%p500_p7), %s367_s5, 256  }
 0x121   : > { %682 = vsyncadd (!%p500_p7), %s367_s5, 4294967040  ;;  %s376_s22 = scalar_lea.sflag [#allocation9], %s366_s20 }
 0x122   : > { %684 = dma.done.wait (!%p500_p7), %s376_s22, 256  }
 0x123   : > { %686 = vsyncadd (!%p500_p7), %s376_s22, 4294967040  ;;  %s22_s14 = sadd.s32 1, %s709_s14   ;;  %s990_s9 = smov %s693_s10 }
 0x124   : > { %p19_p10 = scmp.ge.s32.totalorder %s22_s14, 4   ;;  %s991_s10 = smov %s697_s11 }
 0x125   : > { %s992_s11 = smov %s790_s23  ;;  %s993_s12 = smov %s705_s13 }
 0x126   : > { %s994_s13 = smov %s996_s17  ;;  %21 = sbr.rel (!%p19_p10) target bundleno = 8 (0x8), region = 94 }
 0x12d   :  { %381 = vsyncpa [#allocation5], 1 }
 0x12e   :  { %383 = vsyncpa [#allocation5 + $0x1], 1 }
 0x12f   :  { %384 = vsyncpa [#allocation6], 1 }
 0x130   :  { %386 = vsyncpa [#allocation6 + $0x1], 1 }
 0x131   :  { %387 = vsyncpa [#allocation9], 1 }
 0x132   :  { %389 = vsyncpa [#allocation9 + $0x1], 1 }

// kernel: attention_unit_forward.7
= control target key start
LH: loop header
LB: loop body
LE: loop exit
PB: predicated region body
PF: predicated region fallthrough
CT: control target
= control target key end

     0   :  { %s1616_s0 = inlined_call_operand.hbm [shape: bf16[2,16,1024], index: 0, kind: input, shape index: {}]   ;;  %s1617_s1 = inlined_call_operand.hbm [shape: f32[2,16,1], index: 1, kind: input, shape index: {}]   ;;  %s1618_s2 = inlined_call_operand.hbm [shape: f32[2,16,1], index: 2, kind: input, shape index: {}]   ;;  %s1619_s3 = inlined_call_operand.hbm [shape: bf16[8,16], index: 3, kind: input, shape index: {}]   ;;  %s1620_s4 = inlined_call_operand.hbm [shape: f32[8,1], index: 4, kind: input, shape index: {}]   ;;  %s1621_s5 = inlined_call_operand.hbm [shape: bf16[2,8,1024], index: 5, kind: output, shape index: {}]  }
   0x1   :  { %1644 = sst [smem:[#allocation23_spill]] %s1617_s1 }
   0x2   :  { %1645 = sst [smem:[#allocation24_spill]] %s1619_s3 }
   0x3   :  { %1646 = sst [smem:[#allocation25_spill]] %s1621_s5 }
   0x4   :  { %10 = vsyncpa [#allocation3], 0 }
   0x5   :  { %12 = vsyncpa [#allocation3 + $0x1], 0 }
   0x6   :  { %13 = vsyncpa [#allocation6], 0 }
   0x7   :  { %15 = vsyncpa [#allocation6 + $0x1], 0 }
   0x8   :  { %16 = vsyncpa [#allocation9], 0 }
   0x9   :  { %17 = vsyncpa [#allocation4], 0 }
   0xa   :  { %19 = vsyncpa [#allocation4 + $0x1], 0  ;;  %s1266_s18 = smov 0   ;;  %s1268_s19 = smov 0  }
   0xb   :  { %s1270_s20 = smov 0   ;;  %s1272_s21 = smov 0  }
   0xc   :  { %s1274_s22 = smov 0   ;;  %s1276_s23 = smov 0  }
   0xd LB: > { %1647 = sst [smem:[#allocation16_spill]] %s1203_s18  ;;  %s1297_s24 = sadd.s32 4294967295, %s1223_s23   ;;  %s1223_s23 = sphi %s1276_s23, %s25_s23   ;;  %s1219_s22 = sphi %s1274_s22, %s1693_s22   ;;  %s1215_s21 = sphi %s1272_s21, %s1692_s21   ;;  %s1211_s20 = sphi %s1270_s20, %s1688_s20   ;;  %s1207_s19 = sphi %s1268_s19, %s1691_s19   ;;  %s1203_s18 = sphi %s1266_s18, %s1690_s18  }
   0xe   : > { %1648 = sst [smem:[#allocation17_spill]] %s1211_s20  ;;  %s845_s25 = sadd.s32 4294967294, %s1223_s23  }
   0xf   : > { %1649 = sst [smem:[#allocation18_spill]] %s1223_s23  ;;  %p53_p0 = scmp.ne.s32.totalorder %s1211_s20, %s1207_s19 }
  0x10   : > { %p54_p1 = scmp.eq.s32.totalorder %s1223_s23, 0  ;;  %p59_p2 = scmp.ne.s32.totalorder %s1207_s19, %s1203_s18 }
  0x11   : > { %p1622_p3 = scmp.eq.s32.totalorder %s1297_s24, 0  ;;  %p179_p4 = scmp.eq.s32.totalorder %s1297_s24, 1 }
  0x12   : > { %p1308_p5 = por %p54_p1, %p53_p0  ;;  %p185_p6 = scmp.eq.s32.totalorder %s845_s25, 1 }
  0x13   : > { %p1314_p7 = por %p1622_p3, %p59_p2  ;;  %p1318_p8 = por %p179_p4, %p53_p0 }
  0x14   : > { %p1322_p9 = por %p185_p6, %p59_p2  ;;  %p846_p10 = scmp.ge.s32.totalorder %s1223_s23, 1 }
  0x15   : > { %s1651_s28 = scalar_select %p1314_p7, 1, 0 }
  0x16   : > { %s1652_s29 = scalar_select %p1318_p8, 1, 0 }
  0x17   : > { %s1654_s30 = scalar_select %p1322_p9, 1, 0 }
  0x18   : > { %1653 = sst [smem:[#allocation19_spill]] %s1652_s29  ;;  %p192_p11 = scmp.lt.s32.totalorder %s1223_s23, 3 }
  0x19   : > { %1655 = sst [smem:[#allocation20_spill]] %s1654_s30  ;;  %s1225_s7 = smov [#allocation8]  }
  0x1a   : > { %p1329_p13 = pnand %p846_p10, %p192_p11  ;;  %s205_s8 = sshll.u32 %s1225_s7, 4  ;;  %s206_s8 = int_to_ptr.vmem [resolvable:$true] %s205_s8 }
  0x1b   : > { %p926_p1 = scmp.lt.s32.totalorder %s1223_s23, 2  ;;  %s37_s11 = sadd.s32 1, %s1219_s22 }
  0x1c   : > { %s1656_s6 = scalar_select %p1329_p13, 1, 0 }
  0x1d   : > { %p903_p0 = pneg %p1329_p13  ;;  %p1338_p4 = pnand %p926_p1, %p1308_p5 }
  0x1e   : > { %p1349_p6 = scmp.ge.s32.totalorder %s37_s11, 2  ;;  %s1354_s13 = sand.u32 1, %s1211_s20  }
  0x1f   : > { %s1657_s9 = scalar_select %p1338_p4, 1, 0 }
  0x20   : > { %p1344_p2 = pnand %p903_p0, %p1622_p3  ;;  %s1660_s3 = sld [smem:[#allocation24_spill]] }
  0x21   : > { %s1659_s12 = scalar_select %p1349_p6, 1, 0 }
  0x22   : > { %s1658_s10 = scalar_select %p1344_p2, 1, 0 }
  0x23   : > { %p1631_p10 = pneg %p1344_p2 }
  0x26   : > { %s987_s16 = scalar_lea.hbm %s1660_s3, 64 }
  0x27   : > { %p988_p5 = scmp.ne.s32.totalorder %s1660_s3, %s987_s16  ;;  %p994_p0 = scmp.lt.u32.totalorder %s987_s16, %s1660_s3 }
  0x29   : > { %p990_p11 = pnand %p1631_p10, %p988_p5 }
  0x2b   : > { %p991_p1 = pneg %p990_p11 }
  0x2d   : > { %p996_p12 = pnand %p994_p0, %p991_p1 }
  0x2f   : > { %999 = shalt.err (!%p996_p12)
}
  0x30   : > { %s1000_s26 = scalar_lea.vmem %s206_s8, 64  ;;  %p1008_p7 = scmp.lt.s32.totalorder %s206_s8, %s206_s8 }
  0x31   : > { %p1001_p3 = scmp.ne.s32.totalorder %s206_s8, %s1000_s26  ;;  %p1009_p13 = scmp.lt.s32.totalorder %s1000_s26, %s1000_s26 }
  0x33   : > { %p1003_p9 = pnand %p1001_p3, %p1631_p10  ;;  %p1010_p4 = por %p1009_p13, %p1008_p7 }
  0x35   : > { %p1004_p8 = pneg %p1003_p9 }
  0x37   : > { %p1011_p6 = pnand %p1010_p4, %p1004_p8 }
  0x39   : > { %1014 = shalt.err (!%p1011_p6)
}
  0x3a   : > { %906 = dma.hbm_to_vmem [thread:$0]  (!%p1344_p2), %s1660_s3, 64, %s206_s8, [#allocation9]  }
  0x3b   : > { %p1661_p3 = scmp.ne.s32.totalorder %s1659_s12, 0  ;;  %s250_s26 = sand.u32 1, %s1223_s23  }
  0x3c   : > { %s1629_s16 = sshll.u32 %s1354_s13, 4  ;;  %s1630_s25 = sshll.u32 %s1219_s22, 8 }
  0x3d   : > { %s1695_s11 = smov (%p1661_p3, %s37_s11), 0  ;;  %s254_s27 = scalar_lea.vmem [#allocation5], %s1629_s16 }
  0x3e   : > { %1662 = sst [smem:[#allocation21_spill]] %s1695_s11  ;;  %s41_s17 = ssub.s32 %s1219_s22, %s1695_s11 }
  0x3f   : > { %p44_p7 = scmp.eq.s32.totalorder %s41_s17, 0  ;;  %s261_s7 = sshll.u32 %s254_s27, 4  ;;  %s1401_s7 = int_to_ptr.vmem [resolvable:$true] %s261_s7 }
  0x40   : > { %s1663_s14 = sadd.s32 1, %s1211_s20  ;;  %s1665_s1 = sld [smem:[#allocation23_spill]] }
  0x41   : > { %s1392_s15 = scalar_select %p44_p7, %s1211_s20, %s1663_s14  }
  0x42   : > { %s1403_s12 = scalar_lea.sflag [#allocation6], %s250_s26  ;;  %p1666_p9 = scmp.ne.s32.totalorder %s1657_s9, 0 }
  0x43   : > { %1664 = sst [smem:[#allocation22_spill]] %s1392_s15 }
  0x44   : > { %p1409_p12 = pneg %p1666_p9 }
  0x46   : > { %s1399_s8 = scalar_lea.hbm %s1665_s1, %s1630_s25  ;;  %s1020_s14 = scalar_lea.hbm %s1665_s1, 512 }
  0x47   : > { %s1015_s17 = scalar_lea.hbm %s1399_s8, 256  ;;  %p1021_p6 = scmp.lt.u32.totalorder %s1399_s8, %s1665_s1 }
  0x48   : > { %p1016_p8 = scmp.ne.s32.totalorder %s1399_s8, %s1015_s17  ;;  %p1022_p5 = scmp.lt.u32.totalorder %s1020_s14, %s1015_s17 }
  0x49   : > { %s1667_s27 = scalar_select %p1409_p12, 1, 0 }
  0x4a   : > { %p1018_p13 = pnand %p1409_p12, %p1016_p8  ;;  %p1023_p11 = por %p1022_p5, %p1021_p6 }
  0x4b   : > { %p1024_p1 = scmp.lt.u32.totalorder %s1015_s17, %s1399_s8 }
  0x4c   : > { %p1019_p4 = pneg %p1018_p13 }
  0x4d   : > { %p1025_p0 = por %p1024_p1, %p1023_p11 }
  0x4f   : > { %p1026_p3 = pnand %p1025_p0, %p1019_p4 }
  0x51   : > { %1029 = shalt.err (!%p1026_p3)
}
  0x52   : > { %s1030_s26 = scalar_lea.vmem %s1401_s7, 256  ;;  %s1226_s18 = smov [#allocation5]  }
  0x53   : > { %p1031_p7 = scmp.ne.s32.totalorder %s1401_s7, %s1030_s26  ;;  %s1035_s30 = sshll.u32 %s1226_s18, 4  ;;  %s1036_s30 = int_to_ptr.vmem [resolvable:$false] %s1035_s30 }
  0x54   : > { %s1037_s16 = scalar_lea.vmem %s1036_s30, 512  ;;  %p1038_p10 = scmp.lt.s32.totalorder %s1401_s7, %s1036_s30 }
  0x55   : > { %p1033_p8 = pnand %p1031_p7, %p1409_p12  ;;  %p1039_p2 = scmp.lt.s32.totalorder %s1037_s16, %s1030_s26 }
  0x57   : > { %p1034_p13 = pneg %p1033_p8  ;;  %p1040_p6 = por %p1039_p2, %p1038_p10 }
  0x59   : > { %p1041_p5 = pnand %p1040_p6, %p1034_p13 }
  0x5b   : > { %1044 = shalt.err (!%p1041_p5)
}
  0x5c   : > { %s1227_s25 = smov 128   ;;  %s1228_s17 = smov 8  }
  0x5d   : > { %916 = dma.hbm_to_vmem [thread:$0]  (!%p1666_p9), %s1399_s8, 256, %s1401_s7, %s1403_s12, %s1227_s25, %s1227_s25, %s1228_s17  }
  0x5e   : > { %s1668_s14 = sshll.u32 %s1219_s22, 8  ;;  %s1669_s16 = sshll.u32 %s1354_s13, 4 }
  0x5f   : > { %s1441_s30 = scalar_lea.hbm %s1618_s2, %s1668_s14  ;;  %s275_s1 = scalar_lea.vmem [#allocation7], %s1669_s16 }
  0x60   : > { %s282_s3 = sshll.u32 %s275_s1, 4  ;;  %s1229_s11 = smov [#allocation10]   ;;  %s1445_s3 = int_to_ptr.vmem [resolvable:$true] %s282_s3 }
  0x61   : > { %s216_s15 = sshll.u32 %s1229_s11, 4  ;;  %s1045_s5 = scalar_lea.hbm %s1620_s4, 128  ;;  %s217_s15 = int_to_ptr.vmem [resolvable:$true] %s216_s15 }
  0x62   : > { %p1046_p2 = scmp.ne.s32.totalorder %s1620_s4, %s1045_s5  ;;  %p1670_p10 = scmp.ne.s32.totalorder %s1658_s10, 0 }
  0x63   : > { %p1052_p0 = scmp.lt.u32.totalorder %s1045_s5, %s1620_s4 }
  0x64   : > { %p1671_p4 = pneg %p1670_p10 }
  0x66   : > { %p1048_p11 = pnand %p1046_p2, %p1671_p4 }
  0x68   : > { %p1049_p1 = pneg %p1048_p11 }
  0x6a   : > { %p1054_p3 = pnand %p1052_p0, %p1049_p1 }
  0x6c   : > { %1057 = shalt.err (!%p1054_p3)
}
  0x6d   : > { %s1058_s1 = scalar_lea.vmem %s217_s15, 128  ;;  %p1672_p8 = pmov %p1671_p4 }
  0x6e   : > { %p1059_p7 = scmp.ne.s32.totalorder %s217_s15, %s1058_s1  ;;  %p1066_p5 = scmp.lt.s32.totalorder %s217_s15, %s217_s15 }
  0x6f   : > { %p1067_p9 = scmp.lt.s32.totalorder %s1058_s1, %s1058_s1 }
  0x70   : > { %p1061_p13 = pnand %p1059_p7, %p1672_p8 }
  0x71   : > { %p1068_p12 = por %p1067_p9, %p1066_p5 }
  0x72   : > { %p1062_p6 = pneg %p1061_p13 }
  0x74   : > { %p1069_p2 = pnand %p1068_p12, %p1062_p6 }
  0x76   : > { %1072 = shalt.err (!%p1069_p2)
}
  0x77   : > { %909 = dma.hbm_to_vmem [thread:$0]  (!%p1670_p10), %s1620_s4, 128, %s217_s15, [#allocation9]  }
  0x78   : > { %s850_s5 = sshll.u32 %s1354_s13, 6  ;;  %s879_s29 = sshll.u32 %s1219_s22, 10 }
  0x79   : > { %s1472_s26 = scalar_lea.hbm %s1616_s0, %s879_s29  ;;  %s231_s10 = scalar_lea.vmem [#allocation2], %s850_s5 }
  0x7a   : > { %s240_s16 = sshll.u32 %s231_s10, 4  ;;  %s228_s7 = scalar_lea.sflag [#allocation3], %s1354_s13  ;;  %s1474_s16 = int_to_ptr.vmem [resolvable:$true] %s240_s16 }
  0x7b   : > { %s1073_s8 = scalar_lea.hbm %s1472_s26, 1024  ;;  %p1673_p12 = scmp.ne.s32.totalorder %s1667_s27, 0 }
  0x7c   : > { %p1074_p9 = scmp.ne.s32.totalorder %s1472_s26, %s1073_s8  ;;  %s1078_s1 = scalar_lea.hbm %s1616_s0, 2048 }
  0x7d   : > { %p1079_p11 = scmp.lt.u32.totalorder %s1472_s26, %s1616_s0  ;;  %p1080_p1 = scmp.lt.u32.totalorder %s1078_s1, %s1073_s8 }
  0x7e   : > { %p1076_p10 = pnand %p1074_p9, %p1673_p12  ;;  %p1082_p3 = scmp.lt.u32.totalorder %s1073_s8, %s1472_s26 }
  0x7f   : > { %p1081_p0 = por %p1080_p1, %p1079_p11 }
  0x80   : > { %p1077_p4 = pneg %p1076_p10 }
  0x81   : > { %p1083_p7 = por %p1082_p3, %p1081_p0 }
  0x83   : > { %p1084_p8 = pnand %p1083_p7, %p1077_p4 }
  0x85   : > { %1087 = shalt.err (!%p1084_p8)
}
  0x86   : > { %s1088_s5 = scalar_lea.vmem %s1474_s16, 1024  ;;  %s1230_s29 = smov [#allocation2]  }
  0x87   : > { %p1089_p13 = scmp.ne.s32.totalorder %s1474_s16, %s1088_s5  ;;  %s1093_s11 = sshll.u32 %s1230_s29, 4  ;;  %s1094_s11 = int_to_ptr.vmem [resolvable:$false] %s1093_s11 }
  0x88   : > { %s1095_s18 = scalar_lea.vmem %s1094_s11, 2048  ;;  %p1096_p2 = scmp.lt.s32.totalorder %s1474_s16, %s1094_s11 }
  0x89   : > { %p1091_p6 = pnand %p1089_p13, %p1673_p12  ;;  %p1097_p9 = scmp.lt.s32.totalorder %s1095_s18, %s1088_s5 }
  0x8b   : > { %p1092_p5 = pneg %p1091_p6  ;;  %p1098_p10 = por %p1097_p9, %p1096_p2 }
  0x8d   : > { %p1099_p11 = pnand %p1098_p10, %p1092_p5 }
  0x8f   : > { %1102 = shalt.err (!%p1099_p11)
}
  0x90   : > { %s1231_s10 = smov 512   ;;  %s1232_s8 = smov 32  }
  0x91   : > { %p1674_p4 = scmp.ne.s32.totalorder %s1657_s9, 0  ;;  %s1103_s15 = scalar_lea.hbm %s1441_s30, 256 }
  0x92   : > { %p1104_p1 = scmp.ne.s32.totalorder %s1441_s30, %s1103_s15  ;;  %s1108_s20 = scalar_lea.hbm %s1618_s2, 512 }
  0x93   : > { %913 = dma.hbm_to_vmem [thread:$0]  (!%p1674_p4), %s1472_s26, 1024, %s1474_s16, %s228_s7, %s1231_s10, %s1231_s10, %s1232_s8  }
  0x94   : > { %p1106_p0 = pnand %p1104_p1, %p1673_p12  ;;  %p1109_p7 = scmp.lt.u32.totalorder %s1441_s30, %s1618_s2 }
  0x95   : > { %p1110_p8 = scmp.lt.u32.totalorder %s1108_s20, %s1103_s15  ;;  %p1112_p6 = scmp.lt.u32.totalorder %s1103_s15, %s1441_s30 }
  0x96   : > { %p1107_p3 = pneg %p1106_p0 }
  0x97   : > { %p1111_p13 = por %p1110_p8, %p1109_p7 }
  0x99   : > { %p1113_p5 = por %p1112_p6, %p1111_p13 }
  0x9b   : > { %p1114_p2 = pnand %p1113_p5, %p1107_p3 }
  0x9d   : > { %1117 = shalt.err (!%p1114_p2)
}
  0x9e   : > { %s1118_s13 = scalar_lea.vmem %s1445_s3, 256  ;;  %s1233_s26 = smov [#allocation7]  }
  0x9f   : > { %p1119_p9 = scmp.ne.s32.totalorder %s1445_s3, %s1118_s13  ;;  %s1123_s16 = sshll.u32 %s1233_s26, 4  ;;  %s1124_s16 = int_to_ptr.vmem [resolvable:$false] %s1123_s16 }
  0xa0   : > { %s1125_s7 = scalar_lea.vmem %s1124_s16, 512  ;;  %p1126_p1 = scmp.lt.s32.totalorder %s1445_s3, %s1124_s16 }
  0xa1   : > { %p1121_p10 = pnand %p1119_p9, %p1673_p12  ;;  %p1127_p0 = scmp.lt.s32.totalorder %s1125_s7, %s1118_s13 }
  0xa3   : > { %p1122_p11 = pneg %p1121_p10  ;;  %p1128_p7 = por %p1127_p0, %p1126_p1 }
  0xa5   : > { %p1129_p8 = pnand %p1128_p7, %p1122_p11 }
  0xa7   : > { %1132 = shalt.err (!%p1129_p8)
}
  0xa8   : > { %919 = dma.hbm_to_vmem [thread:$0]  (!%p1674_p4), %s1441_s30, 256, %s1445_s3, %s1403_s12, %s1227_s25, %s1227_s25, %s1228_s17  }
  0xa9   : > { %p1675_p12 = scmp.ne.s32.totalorder %s1656_s6, 0 }
  0xaa   : > { %s1528_s27 = sand.u32 (!%p1675_p12), 1, %s1207_s19   ;;  %p1676_p3 = scmp.ne.s32.totalorder (!%p1675_p12), %s1651_s28, 0 }
  0xab   : > { %294 = sbr.rel (%p1675_p12) target bundleno = 573 (0x23d), region = 40  ;;  %s860_s29 = sshll.u32 (!%p1675_p12), %s1528_s27, 6 }
  0xac   : > { %s297_s11 = scalar_lea.sflag (!%p1675_p12), [#allocation3], %s1528_s27  ;;  %s1532_s18 = scalar_lea.vmem (!%p1675_p12), [#allocation2], %s860_s29 }
  0xb2   : > { %1186 = dma.done.wait (%p1676_p3), %s297_s11, 1024  }
  0xb3   : > { %1188 = vsyncadd (%p1676_p3), %s297_s11, 4294966272  ;;  %s305_s3 = sand.u32 1, %s1297_s24   ;;  %s861_s6 = sshll.u32 %s1528_s27, 4 }
  0xb4   : > { %s306_s9 = scalar_lea.sflag [#allocation6], %s305_s3  ;;  %s309_s12 = scalar_lea.vmem [#allocation5], %s861_s6 }
  0xb5   : > { %1190 = dma.done.wait (%p1676_p3), %s306_s9, 512  }
  0xb6   : > { %1192 = vsyncadd (%p1676_p3), %s306_s9, 4294966784  ;;  %s318_s25 = scalar_lea.vmem [#allocation7], %s861_s6  ;;  %p1677_p4 = scmp.eq.s32.totalorder %s1297_s24, 0 }
  0xb8   : > { %1194 = dma.done.wait (%p1677_p4), [#allocation9], 192   ;;  %p1678_p13 = pmov %p1677_p4 }
  0xb9   : > { %v1234_v0 = vmov 0   ;;  %v418_v1 = vld [vmem:[%s318_s25] sm:$0xff]  ;;  %v419_v3 = vld [vmem:[%s318_s25 + $0x8] sm:$0xff]  ;;  %vm461_vm0 = vcmask 130048   ;;  %s865_s24 = sshll.u32 %s1528_s27, 5  ;;  %s1679_s17 = sld [smem:[#allocation19_spill]] }
  0xba   : > { %1196 = vsyncadd (%p1678_p13), [#allocation9], 4294967104  ;;  %986 = vset.pattern.permute.xlu1 %v1234_v0  ;;  %985 = vset.pattern.permute.xlu0 %v1234_v0  ;;  %v390_v2 = vld [vmem:[%s309_s12] sm:$0xff]  ;;  %v391_v4 = vld [vmem:[%s309_s12 + $0x8] sm:$0xff]  ;;  %s362_s28 = scalar_lea.vmem [#allocation11], %s865_s24  ;;  %s886_s30 = sshll.u32 %s1215_s21, 9 }
  0xbb   : > { %497 = vmatprep.mubr.bf16.mxu0 %v1234_v0  ;;  %538 = vmatprep.mubr.bf16.mxu1 %v1234_v0  ;;  %v455_v5 = vld [vmem:[#allocation10] sm:$0xff]  ;;  %v368_v8 = vld [vmem:[%s1532_s18 + $0x10] sm:$0xff]  ;;  %v369_v9 = vld [vmem:[%s1532_s18 + $0x18] sm:$0xff]  ;;  %s698_s10 = sshll.u32 %s362_s28, 4  ;;  %s1680_s14 = sld [smem:[#allocation25_spill]]  ;;  %s1569_s10 = int_to_ptr.vmem [resolvable:$true] %s698_s10 }
  0xbc   : > { %422 = vperm.xlu1 %986, %v418_v1   ;;  %394 = vperm.xlu0 %985, %v390_v2   ;;  %v366_v6 = vld [vmem:[%s1532_s18] sm:$0xff]  ;;  %v367_v7 = vld [vmem:[%s1532_s18 + $0x8] sm:$0xff]  ;;  %v372_v16 = vld [vmem:[%s1532_s18 + $0x30] sm:$0xff]  ;;  %v378_v17 = vunpack.c.l.bf16 %v368_v8  ;;  %v379_v18 = vunpack.c.h.bf16 %v368_v8  ;;  %v380_v20 = vunpack.c.l.bf16 %v369_v9  ;;  %v381_v21 = vunpack.c.h.bf16 %v369_v9  ;;  %s682_s20 = scalar_lea.sflag [#allocation4], %s1528_s27  ;;  %s1133_s23 = scalar_lea.vmem %s1569_s10, 512 }
  0xbd   : > { %v370_v10 = vld [vmem:[%s1532_s18 + $0x20] sm:$0xff]  ;;  %v375_v11 = vunpack.c.h.bf16 %v366_v6  ;;  %v371_v12 = vld [vmem:[%s1532_s18 + $0x28] sm:$0xff]  ;;  %v377_v13 = vunpack.c.h.bf16 %v367_v7  ;;  %v374_v14 = vunpack.c.l.bf16 %v366_v6  ;;  %v376_v15 = vunpack.c.l.bf16 %v367_v7  ;;  %v373_v19 = vld [vmem:[%s1532_s18 + $0x38] sm:$0xff]  ;;  %p1134_p6 = scmp.ne.s32.totalorder %s1569_s10, %s1133_s23  ;;  %s1235_s21 = smov [#allocation11]  }
  0xbe   : > { %v383_v24 = vunpack.c.h.bf16 %v370_v10  ;;  %v385_v25 = vunpack.c.h.bf16 %v371_v12  ;;  %v382_v26 = vunpack.c.l.bf16 %v370_v10  ;;  %v384_v27 = vunpack.c.l.bf16 %v371_v12  ;;  %v454_v7 = vld [vmem:[#allocation8] sm:$0xf]  ;;  %s1137_s5 = sshll.u32 %s1235_s21, 4  ;;  %s1138_s5 = int_to_ptr.vmem [resolvable:$false] %s1137_s5 }
  0xbf   : > { %v386_v32 = vunpack.c.l.bf16 %v372_v16  ;;  %v387_v33 = vunpack.c.h.bf16 %v372_v16  ;;  %v388_v34 = vunpack.c.l.bf16 %v373_v19  ;;  %v389_v35 = vunpack.c.h.bf16 %v373_v19  ;;  %p1681_p5 = scmp.ne.s32.totalorder %s1679_s17, 0  ;;  %s1139_s13 = scalar_lea.vmem %s1138_s5, 1024 }
  0xc0   : > { %427 = vperm.xlu1 %986, %v419_v3   ;;  %399 = vperm.xlu0 %985, %v391_v4   ;;  %p1140_p10 = scmp.lt.s32.totalorder %s1569_s10, %s1138_s5  ;;  %p1141_p11 = scmp.lt.s32.totalorder %s1139_s13, %s1133_s23 }
  0xc1   : > { %s1567_s1 = scalar_lea.hbm %s1680_s14, %s886_s30  ;;  %p1135_p2 = pnand %p1134_p6, %p1681_p5 }
  0xc2   : > { %p1142_p1 = por %p1141_p11, %p1140_p10 }
  0xc3   : > { %p1136_p9 = pneg %p1135_p2 }
  0xc4   : > { %458 = vperm.xlu0 %985, %v455_v5  }
  0xc5   : > { %p1143_p0 = pnand %p1142_p1, %p1136_p9 }
 0x13b   : > { %v423_v22 = vpop.permute.xlu1 %422  ;;  %v395_v23 = vpop.permute.xlu0 %394 }
 0x13c   : > { %v403_v28 = vsub.f32 %v375_v11, %v395_v23  ;;  %v405_v29 = vsub.f32 %v377_v13, %v395_v23  ;;  %v402_v30 = vsub.f32 %v374_v14, %v395_v23  ;;  %v404_v31 = vsub.f32 %v376_v15, %v395_v23 }
 0x13d   : > { %v407_v36 = vsub.f32 %v379_v18, %v395_v23  ;;  %v409_v37 = vsub.f32 %v381_v21, %v395_v23  ;;  %v406_v38 = vsub.f32 %v378_v17, %v395_v23  ;;  %v408_v39 = vsub.f32 %v380_v20, %v395_v23 }
 0x13e   : > { %v431_v41 = vmul.f32 %v423_v22, %v403_v28  ;;  %v433_v42 = vmul.f32 %v423_v22, %v405_v29  ;;  %v430_v43 = vmul.f32 %v423_v22, %v402_v30  ;;  %v432_v44 = vmul.f32 %v423_v22, %v404_v31 }
 0x13f   : > { %v400_v40 = vpop.permute.xlu0 %399  ;;  %v428_v49 = vpop.permute.xlu1 %427  ;;  %v435_v58 = vmul.f32 %v423_v22, %v407_v36  ;;  %v437_v60 = vmul.f32 %v423_v22, %v409_v37  ;;  %v434_v8 = vmul.f32 %v423_v22, %v406_v38  ;;  %v436_v9 = vmul.f32 %v423_v22, %v408_v39 }
 0x140   : > { %v411_v45 = vsub.f32 %v383_v24, %v400_v40  ;;  %v413_v46 = vsub.f32 %v385_v25, %v400_v40  ;;  %v410_v47 = vsub.f32 %v382_v26, %v400_v40  ;;  %v412_v48 = vsub.f32 %v384_v27, %v400_v40 }
 0x141   : > { %v415_v50 = vsub.f32 %v387_v33, %v400_v40  ;;  %v417_v51 = vsub.f32 %v389_v35, %v400_v40  ;;  %v414_v52 = vsub.f32 %v386_v32, %v400_v40  ;;  %v416_v53 = vsub.f32 %v388_v34, %v400_v40 }
 0x142   : > { %v439_v54 = vmul.f32 %v428_v49, %v411_v45  ;;  %v441_v55 = vmul.f32 %v428_v49, %v413_v46  ;;  %v438_v56 = vmul.f32 %v428_v49, %v410_v47  ;;  %v440_v57 = vmul.f32 %v428_v49, %v412_v48 }
 0x143   : > { %v443_v59 = vmul.f32 %v428_v49, %v415_v50  ;;  %v445_v61 = vmul.f32 %v428_v49, %v417_v51  ;;  %v442_v3 = vmul.f32 %v428_v49, %v414_v52  ;;  %v444_v4 = vmul.f32 %v428_v49, %v416_v53  ;;  %v459_v12 = vpop.permute.xlu0 %458 }
 0x144   : > { %v447_v62 = vpack.c.bf16 %v439_v54, %v431_v41  ;;  %v449_v63 = vpack.c.bf16 %v441_v55, %v433_v42  ;;  %v446_v1 = vpack.c.bf16 %v438_v56, %v430_v43  ;;  %v448_v2 = vpack.c.bf16 %v440_v57, %v432_v44 }
 0x145   : > { %v451_v5 = vpack.c.bf16 %v443_v59, %v435_v58  ;;  %v453_v6 = vpack.c.bf16 %v445_v61, %v437_v60  ;;  %v450_v10 = vpack.c.bf16 %v442_v3, %v434_v8  ;;  %v452_v11 = vpack.c.bf16 %v444_v4, %v436_v9 }
 0x146   : > { %465 = vmatprep.subr.bf16.mxu0 %v447_v62  ;;  %506 = vmatprep.subr.bf16.mxu1 %v449_v63 }
 0x147   : > { %466 = vmatpush1.bf16.msra.mxu0 %v446_v1  ;;  %507 = vmatpush1.bf16.msra.mxu1 %v448_v2 }
 0x148   : > { %547 = vmatprep.subr.bf16.mxu0 %v451_v5  ;;  %588 = vmatprep.subr.bf16.mxu1 %v453_v6 }
 0x14a   : > { %866 = vmatmul.mubr.msk.bf16.vlgmr.msra.gmra.mrb[0].mxu0 %vm461_vm0, %v454_v7  ;;  %867 = vmatmul.mubr.msk.bf16.vlgmr.msra.gmra.mrb[0].mxu1 %vm461_vm0, %v454_v7 }
 0x14b   : > { %548 = vmatpush1.bf16.msra.mxu0 %v450_v10  ;;  %589 = vmatpush1.bf16.msra.mxu1 %v452_v11 }
 0x14c   : > { %579 = vmatprep.mubr.bf16.mxu0 %v1234_v0  ;;  %620 = vmatprep.mubr.bf16.mxu1 %v1234_v0 }
 0x152   : > { %868 = vmatmul.mubr.msk.bf16.vlgmr.msra.gmra.mrb[4].mxu0 %vm461_vm0, %v454_v7  ;;  %869 = vmatmul.mubr.msk.bf16.vlgmr.msra.gmra.mrb[4].mxu1 %vm461_vm0, %v454_v7 }
 0x21d   : > { %v499_v13 = vpop.f32.mrb[0].mxu0  ;;  %v540_v14 = vpop.f32.mrb[0].mxu1 }
 0x21e   : > { %v500_v15 = vadd.f32 %v499_v13, %v459_v12  ;;  %v541_v16 = vadd.f32 %v540_v14, %v459_v12  ;;  %v501_v17 = vpop.f32.mrb[1].mxu0  ;;  %v542_v18 = vpop.f32.mrb[1].mxu1 }
 0x21f   : > { %v502_v19 = vadd.f32 %v501_v17, %v459_v12  ;;  %v543_v20 = vadd.f32 %v542_v18, %v459_v12  ;;  %v503_v21 = vpop.f32.mrb[2].mxu0  ;;  %v544_v22 = vpop.f32.mrb[2].mxu1 }
 0x220   : > { %v629_v23 = vmax.f32 %v500_v15, 0.0  ;;  %v631_v24 = vmax.f32 %v541_v16, 0.0  ;;  %v504_v25 = vpop.f32.mrb[3].mxu0  ;;  %v545_v26 = vpop.f32.mrb[3].mxu1 }
 0x221   : > { %v630_v0 = vmax.f32 %v502_v19, 0.0  ;;  %v632_v27 = vmax.f32 %v543_v20, 0.0 }
 0x222   : > { %v637_v28 = vmin.f32 %v629_v23, 6.0  ;;  %v639_v29 = vmin.f32 %v631_v24, 6.0 }
 0x223   : > { %v638_v30 = vmin.f32 %v630_v0, 6.0  ;;  %v640_v31 = vmin.f32 %v632_v27, 6.0 }
 0x225   : > { %v882_v32 = vpack.c.bf16 %v638_v30, %v637_v28  ;;  %v883_v33 = vpack.c.bf16 %v640_v31, %v639_v29  ;;  %v581_v34 = vpop.f32.mrb[4].mxu0  ;;  %v622_v35 = vpop.f32.mrb[4].mxu1 }
 0x226   : > { %v582_v36 = vadd.f32 %v581_v34, %v459_v12  ;;  %v623_v37 = vadd.f32 %v622_v35, %v459_v12  ;;  %v583_v38 = vpop.f32.mrb[5].mxu0  ;;  %v624_v39 = vpop.f32.mrb[5].mxu1 }
 0x227   : > { %677 = vst [vmem:[%s362_s28] sm:$0xff] %v882_v32  ;;  %678 = vst [vmem:[%s362_s28 + $0x8] sm:$0xff] %v883_v33  ;;  %v584_v40 = vadd.f32 %v583_v38, %v459_v12  ;;  %v625_v41 = vadd.f32 %v624_v39, %v459_v12  ;;  %v585_v42 = vpop.f32.mrb[6].mxu0  ;;  %v626_v43 = vpop.f32.mrb[6].mxu1 }
 0x228   : > { %v633_v44 = vmax.f32 %v582_v36, 0.0  ;;  %v635_v45 = vmax.f32 %v623_v37, 0.0  ;;  %v586_v46 = vpop.f32.mrb[7].mxu0  ;;  %v627_v47 = vpop.f32.mrb[7].mxu1 }
 0x229   : > { %v634_v48 = vmax.f32 %v584_v40, 0.0  ;;  %v636_v49 = vmax.f32 %v625_v41, 0.0 }
 0x22a   : > { %v641_v50 = vmin.f32 %v633_v44, 6.0  ;;  %v643_v51 = vmin.f32 %v635_v45, 6.0 }
 0x22b   : > { %v642_v52 = vmin.f32 %v634_v48, 6.0  ;;  %v644_v53 = vmin.f32 %v636_v49, 6.0 }
 0x22d   : > { %v884_v54 = vpack.c.bf16 %v642_v52, %v641_v50  ;;  %v885_v55 = vpack.c.bf16 %v644_v53, %v643_v51 }
 0x22f   : > { %679 = vst [vmem:[%s362_s28 + $0x10] sm:$0xff] %v884_v54  ;;  %680 = vst [vmem:[%s362_s28 + $0x18] sm:$0xff] %v885_v55 }
 0x230   : > { %1146 = shalt.err (!%p1143_p0)
}
 0x231   : > { %s1147_s26 = scalar_lea.hbm %s1567_s1, 512  ;;  %s1151_s27 = scalar_lea.hbm %s1680_s14, 1024 }
 0x232   : > { %p1148_p7 = scmp.ne.s32.totalorder %s1567_s1, %s1147_s26  ;;  %p1152_p3 = scmp.lt.u32.totalorder %s1567_s1, %s1680_s14 }
 0x233   : > { %p1153_p4 = scmp.lt.u32.totalorder %s1151_s27, %s1147_s26  ;;  %p1155_p6 = scmp.lt.u32.totalorder %s1147_s26, %s1567_s1 }
 0x234   : > { %p1149_p8 = pnand %p1148_p7, %p1681_p5 }
 0x235   : > { %p1154_p13 = por %p1153_p4, %p1152_p3 }
 0x236   : > { %p1150_p12 = pneg %p1149_p8 }
 0x237   : > { %p1156_p2 = por %p1155_p6, %p1154_p13 }
 0x239   : > { %p1157_p9 = pnand %p1156_p2, %p1150_p12 }
 0x23b   : > { %1160 = shalt.err (!%p1157_p9)
}
 0x23c   : > { %901 = dma.vmem_to_hbm [thread:$0]  (%p1681_p5), %s1569_s10, 512, %s1567_s1, %s682_s20  }
 0x23d PF: > { %s1682_s18 = sld [smem:[#allocation16_spill]]  ;;  %s1683_s3 = sld [smem:[#allocation20_spill]] }
 0x23e   : > { %s1684_s6 = sld [smem:[#allocation18_spill]] }
 0x243   : > { %s710_s9 = sand.u32 1, %s1682_s18   ;;  %p1685_p10 = scmp.ne.s32.totalorder %s1683_s3, 0 }
 0x244   : > { %p1686_p11 = scmp.ge.s32.totalorder %s1684_s6, 2  ;;  %s711_s12 = scalar_lea.sflag [#allocation4], %s710_s9 }
 0x246   : > { %p921_p1 = pnand %p1686_p11, %p1685_p10 }
 0x248   : > { %1198 = dma.done.wait (!%p921_p1), %s711_s12, 512  }
 0x249   : > { %1200 = vsyncadd (!%p921_p1), %s711_s12, 4294966784  ;;  %s25_s23 = sadd.s32 1, %s1684_s6   ;;  %s1687_s25 = sld [smem:[#allocation17_spill]] }
 0x24a   : > { %p22_p0 = scmp.ge.s32.totalorder %s25_s23, 4   ;;  %s1688_s20 = sld [smem:[#allocation22_spill]] }
 0x24b   : > { %s1689_s24 = sld [smem:[#allocation21_spill]]  ;;  %s1690_s18 = smov %s1207_s19 }
 0x24c   : > { %s1692_s21 = smov %s1219_s22  ;;  %24 = sbr.rel (!%p22_p0) target bundleno = 13 (0xd), region = 117 }
 0x24f   : > { %s1691_s19 = smov %s1687_s25 }
 0x251   : > { %s1693_s22 = smov %s1689_s24 }
 0x253   :  { %716 = vsyncpa [#allocation3], 1 }
 0x254   :  { %718 = vsyncpa [#allocation3 + $0x1], 1 }
 0x255   :  { %719 = vsyncpa [#allocation6], 1 }
 0x256   :  { %721 = vsyncpa [#allocation6 + $0x1], 1 }
 0x257   :  { %722 = vsyncpa [#allocation9], 1 }
 0x258   :  { %723 = vsyncpa [#allocation4], 1 }
 0x259   :  { %725 = vsyncpa [#allocation4 + $0x1], 1 }

// kernel: attention_unit_forward.9
= control target key start
LH: loop header
LB: loop body
LE: loop exit
PB: predicated region body
PF: predicated region fallthrough
CT: control target
= control target key end

     0   :  { %s9610_s0 = inlined_call_operand.hbm [shape: bf16[2,8,1024], index: 0, kind: input, shape index: {}]   ;;  %s9611_s1 = inlined_call_operand.hbm [shape: bf16[2,1024,8], index: 1, kind: input, shape index: {}]   ;;  %s9612_s2 = inlined_call_operand.hbm [shape: bf16[2,1024,8], index: 2, kind: input, shape index: {}]   ;;  %s9613_s3 = inlined_call_operand.hbm [shape: bf16[16,8], index: 3, kind: input, shape index: {}]   ;;  %s9614_s4 = inlined_call_operand.hbm [shape: f32[16,1], index: 4, kind: input, shape index: {}]   ;;  %s9615_s5 = inlined_call_operand.hbm [shape: bf16[2,16,1024], index: 5, kind: output, shape index: {}]  }
   0x1   :  { %10294 = sst [smem:[#allocation283_spill]] %s9610_s0 }
   0x2   :  { %10295 = sst [smem:[#allocation284_spill]] %s9611_s1 }
   0x3   :  { %10296 = sst [smem:[#allocation285_spill]] %s9613_s3 }
   0x4   :  { %10297 = sst [smem:[#allocation286_spill]] %s9614_s4 }
   0x5   :  { %10298 = sst [smem:[#allocation287_spill]] %s9615_s5 }
   0x6   :  { %10 = vsyncpa [#allocation6], 0 }
   0x7   :  { %12 = vsyncpa [#allocation6 + $0x1], 0 }
   0x8   :  { %13 = vsyncpa [#allocation9], 0 }
   0x9   :  { %15 = vsyncpa [#allocation9 + $0x1], 0 }
   0xa   :  { %16 = vsyncpa [#allocation12], 0 }
   0xb   :  { %17 = vsyncpa [#allocation7], 0 }
   0xc   :  { %19 = vsyncpa [#allocation7 + $0x1], 0  ;;  %s5163_s18 = smov 0   ;;  %s5165_s19 = smov 0  }
   0xd   :  { %s5167_s20 = smov 0   ;;  %s5169_s21 = smov 0  }
   0xe   :  { %s5171_s22 = smov 0   ;;  %s5173_s23 = smov 0  }
   0xf   :  { %s5175_s24 = smov 0   ;;  %s5177_s25 = smov 0  }
  0x10   :  { %s5179_s26 = smov 0   ;;  %s5181_s27 = smov 0  }
  0x11   :  { %s5183_s28 = smov 0   ;;  %s5185_s29 = smov 0  }
  0x12   :  { %s5187_s30 = smov 0  }
  0x13 LB: > { %10299 = sst [smem:[#allocation19_spill]] %s5069_s19  ;;  %s5227_s6 = sadd.s32 4294967295, %s5113_s30   ;;  %s5113_s30 = sphi %s5187_s30, %s25_s30   ;;  %s5109_s29 = sphi %s5185_s29, %s11938_s29   ;;  %s5105_s28 = sphi %s5183_s28, %s11928_s28   ;;  %s5101_s27 = sphi %s5181_s27, %s11927_s27   ;;  %s5097_s26 = sphi %s5179_s26, %s11937_s26   ;;  %s5093_s25 = sphi %s5177_s25, %s11926_s25   ;;  %s5089_s24 = sphi %s5175_s24, %s11936_s24   ;;  %s5085_s23 = sphi %s5173_s23, %s11935_s23   ;;  %s5081_s22 = sphi %s5171_s22, %s11934_s22   ;;  %s5077_s21 = sphi %s5169_s21, %s11933_s21   ;;  %s5073_s20 = sphi %s5167_s20, %s11932_s20   ;;  %s5069_s19 = sphi %s5165_s19, %s11931_s19   ;;  %s5065_s18 = sphi %s5163_s18, %s11924_s18  }
  0x14   : > { %10300 = sst [smem:[#allocation20_spill]] %s5077_s21  ;;  %p92_p0 = scmp.ne.s32.totalorder %s5069_s19, %s5065_s18 }
  0x15   : > { %10301 = sst [smem:[#allocation21_spill]] %s5089_s24  ;;  %p9616_p1 = scmp.eq.s32.totalorder %s5227_s6, 0 }
  0x16   : > { %10302 = sst [smem:[#allocation22_spill]] %s5093_s25  ;;  %p3893_p2 = scmp.ge.s32.totalorder %s5113_s30, 1 }
  0x17   : > { %10303 = sst [smem:[#allocation23_spill]] %s5097_s26  ;;  %p199_p3 = scmp.lt.s32.totalorder %s5113_s30, 9 }
  0x18   : > { %10304 = sst [smem:[#allocation24_spill]] %s5101_s27  ;;  %p5235_p4 = por %p92_p0, %p9616_p1 }
  0x19   : > { %10305 = sst [smem:[#allocation25_spill]] %s5105_s28  ;;  %p5239_p5 = pnand %p3893_p2, %p199_p3 }
  0x1a   : > { %10306 = sst [smem:[#allocation26_spill]] %s5227_s6  ;;  %s5115_s9 = smov [#allocation11]  }
  0x1b   : > { %s10307_s7 = scalar_select %p5235_p4, 1, 0 }
  0x1c   : > { %s10309_s8 = scalar_select %p5239_p5, 1, 0 }
  0x1d   : > { %10308 = sst [smem:[#allocation27_spill]] %s10307_s7  ;;  %s211_s10 = sshll.u32 %s5115_s9, 4  ;;  %s212_s10 = int_to_ptr.vmem [resolvable:$true] %s211_s10 }
  0x1e   : > { %10310 = sst [smem:[#allocation28_spill]] %s10309_s8  ;;  %p4090_p6 = pneg %p5239_p5 }
  0x1f   : > { %s10312_s3 = sld [smem:[#allocation285_spill]] }
  0x20   : > { %p5247_p7 = pnand %p4090_p6, %p9616_p1 }
  0x22   : > { %p9626_p10 = pneg %p5247_p7 }
  0x25   : > { %s4821_s14 = scalar_lea.hbm %s10312_s3, 128 }
  0x26   : > { %p4822_p9 = scmp.ne.s32.totalorder %s10312_s3, %s4821_s14  ;;  %p4828_p13 = scmp.lt.u32.totalorder %s4821_s14, %s10312_s3 }
  0x28   : > { %p4824_p11 = pnand %p9626_p10, %p4822_p9 }
  0x2a   : > { %p4825_p12 = pneg %p4824_p11 }
  0x2c   : > { %p4830_p0 = pnand %p4828_p13, %p4825_p12 }
  0x2e   : > { %4833 = shalt.err (!%p4830_p0)
}
  0x2f   : > { %s4834_s9 = scalar_lea.vmem %s212_s10, 128  ;;  %p4842_p1 = scmp.lt.s32.totalorder %s212_s10, %s212_s10 }
  0x30   : > { %p4835_p2 = scmp.ne.s32.totalorder %s212_s10, %s4834_s9  ;;  %p4843_p8 = scmp.lt.s32.totalorder %s4834_s9, %s4834_s9 }
  0x32   : > { %p4837_p3 = pnand %p4835_p2, %p9626_p10  ;;  %p4844_p4 = por %p4843_p8, %p4842_p1 }
  0x34   : > { %p4838_p6 = pneg %p4837_p3 }
  0x36   : > { %p4845_p5 = pnand %p4844_p4, %p4838_p6 }
  0x38   : > { %4848 = shalt.err (!%p4845_p5)
}
  0x39   : > { %s9621_s12 = smov 64   ;;  %s9623_s13 = smov 4  }
  0x3a   : > { %4093 = dma.hbm_to_vmem [thread:$0]  (!%p5247_p7), %s10312_s3, 128, %s212_s10, [#allocation12], %s9621_s12, %s9621_s12, %s9623_s13  }
  0x3b   : > { %p86_p1 = scmp.ne.s32.totalorder %s5073_s20, %s5069_s19  ;;  %p9625_p4 = scmp.lt.s32.totalorder %s5113_s30, 8 }
  0x3c   : > { %s259_s16 = sand.u32 1, %s5113_s30   ;;  %p10313_p5 = scmp.eq.s32.totalorder %s5113_s30, 0 }
  0x3d   : > { %s261_s17 = sand.u32 1, %s5073_s20   ;;  %s9620_s18 = sshll.u32 %s5109_s29, 13 }
  0x3e   : > { %p88_p8 = por %p86_p1, %p10313_p5  ;;  %s5285_s9 = sshll.u32 %s261_s17, 9 }
  0x3f   : > { %s10314_s1 = sld [smem:[#allocation284_spill]]  ;;  %s263_s14 = scalar_lea.vmem [#allocation8], %s5285_s9 }
  0x40   : > { %p5296_p9 = pnand %p9625_p4, %p88_p8  ;;  %s270_s15 = sshll.u32 %s263_s14, 4  ;;  %s5301_s15 = int_to_ptr.vmem [resolvable:$true] %s270_s15 }
  0x41   : > { %s5303_s17 = scalar_lea.sflag [#allocation9], %s259_s16 }
  0x42   : > { %s10315_s10 = scalar_select %p5296_p9, 1, 0 }
  0x43   : > { %p9638_p12 = pneg %p5296_p9 }
  0x44   : > { %10316 = sst [smem:[#allocation29_spill]] %s10315_s10 }
  0x45   : > { %s5292_s25 = scalar_lea.hbm %s10314_s1, %s9620_s18  ;;  %s4854_s12 = scalar_lea.hbm %s10314_s1, 16384 }
  0x46   : > { %s4849_s5 = scalar_lea.hbm %s5292_s25, 8192  ;;  %p4855_p2 = scmp.lt.u32.totalorder %s5292_s25, %s10314_s1 }
  0x47   : > { %p4850_p11 = scmp.ne.s32.totalorder %s5292_s25, %s4849_s5  ;;  %p4856_p3 = scmp.lt.u32.totalorder %s4854_s12, %s4849_s5 }
  0x48   : > { %p4858_p1 = scmp.lt.u32.totalorder %s4849_s5, %s5292_s25 }
  0x49   : > { %p4852_p13 = pnand %p9638_p12, %p4850_p11  ;;  %p4857_p6 = por %p4856_p3, %p4855_p2 }
  0x4b   : > { %p4853_p0 = pneg %p4852_p13  ;;  %p4859_p5 = por %p4858_p1, %p4857_p6 }
  0x4d   : > { %p4860_p8 = pnand %p4859_p5, %p4853_p0 }
  0x4f   : > { %4863 = shalt.err (!%p4860_p8)
}
  0x50   : > { %s4864_s16 = scalar_lea.vmem %s5301_s15, 8192  ;;  %s5118_s18 = smov [#allocation8]  }
  0x51   : > { %p4865_p11 = scmp.ne.s32.totalorder %s5301_s15, %s4864_s16  ;;  %s4869_s14 = sshll.u32 %s5118_s18, 4  ;;  %s4870_s14 = int_to_ptr.vmem [resolvable:$false] %s4869_s14 }
  0x52   : > { %s4871_s3 = scalar_lea.vmem %s4870_s14, 16384  ;;  %p4872_p10 = scmp.lt.s32.totalorder %s5301_s15, %s4870_s14 }
  0x53   : > { %p4867_p13 = pnand %p4865_p11, %p9638_p12  ;;  %p4873_p2 = scmp.lt.s32.totalorder %s4871_s3, %s4864_s16 }
  0x55   : > { %p4868_p4 = pneg %p4867_p13  ;;  %p4874_p3 = por %p4873_p2, %p4872_p10 }
  0x57   : > { %p4875_p6 = pnand %p4874_p3, %p4868_p4 }
  0x59   : > { %4878 = shalt.err (!%p4875_p6)
}
  0x5a   : > { %s10317_s12 = smov 4   ;;  %s10318_s13 = smov 64  }
  0x5b   : > { %4103 = dma.hbm_to_vmem [thread:$0]  (!%p5296_p9), %s5292_s25, 8192, %s5301_s15, %s5303_s17, %s10318_s13, %s10318_s13, %s10317_s12  }
  0x5c   : > { %s79_s5 = sadd.s32 1, %s5073_s20  ;;  %s10319_s26 = sshll.u32 %s5109_s29, 13 }
  0x5d   : > { %s5340_s14 = scalar_lea.hbm %s9612_s2, %s10319_s26  ;;  %s284_s3 = scalar_lea.vmem [#allocation10], %s5285_s9 }
  0x5e   : > { %s5343_s1 = sshll.u32 %s284_s3, 4  ;;  %s5119_s24 = smov [#allocation13]   ;;  %s5435_s1 = int_to_ptr.vmem [resolvable:$true] %s5343_s1 }
  0x5f   : > { %s224_s7 = sshll.u32 %s5119_s24, 4  ;;  %s10320_s4 = sld [smem:[#allocation286_spill]]  ;;  %s225_s7 = int_to_ptr.vmem [resolvable:$true] %s224_s7 }
  0x60   : > { %p10321_p4 = pneg %p5247_p7 }
  0x65   : > { %s4879_s10 = scalar_lea.hbm %s10320_s4, 256 }
  0x66   : > { %p4880_p10 = scmp.ne.s32.totalorder %s10320_s4, %s4879_s10  ;;  %p4886_p5 = scmp.lt.u32.totalorder %s4879_s10, %s10320_s4 }
  0x68   : > { %p4882_p0 = pnand %p4880_p10, %p10321_p4 }
  0x6a   : > { %p4883_p1 = pneg %p4882_p0 }
  0x6c   : > { %p4888_p8 = pnand %p4886_p5, %p4883_p1 }
  0x6e   : > { %4891 = shalt.err (!%p4888_p8)
}
  0x6f   : > { %s4892_s24 = scalar_lea.vmem %s225_s7, 256  ;;  %p10322_p13 = pmov %p10321_p4 }
  0x70   : > { %p4893_p11 = scmp.ne.s32.totalorder %s225_s7, %s4892_s24  ;;  %p4900_p6 = scmp.lt.s32.totalorder %s225_s7, %s225_s7 }
  0x71   : > { %p4901_p12 = scmp.lt.s32.totalorder %s4892_s24, %s4892_s24 }
  0x72   : > { %p4895_p2 = pnand %p4893_p11, %p10322_p13 }
  0x73   : > { %p4902_p9 = por %p4901_p12, %p4900_p6 }
  0x74   : > { %p4896_p3 = pneg %p4895_p2 }
  0x76   : > { %p4903_p4 = pnand %p4902_p9, %p4896_p3 }
  0x78   : > { %4906 = shalt.err (!%p4903_p4)
}
  0x79   : > { %s5120_s0 = smov 128   ;;  %s10323_s19 = sld [smem:[#allocation26_spill]] }
  0x7a   : > { %s5121_s6 = smov 8   ;;  %s3892_s10 = sadd.s32 4294967294, %s5113_s30  }
  0x7b   : > { %4096 = dma.hbm_to_vmem [thread:$0]  (!%p5247_p7), %s10320_s4, 256, %s225_s7, [#allocation12], %s5120_s0, %s5120_s0, %s5121_s6  }
  0x7c   : > { %s37_s26 = sadd.s32 1, %s5101_s27  ;;  %s40_s18 = sadd.s32 1, %s5105_s28 }
  0x7d   : > { %p38_p9 = scmp.ge.s32.totalorder %s37_s26, 2  ;;  %s44_s16 = sadd.s32 1, %s5109_s29 }
  0x7e   : > { %s53_s3 = sadd.s32 1, %s5085_s23  ;;  %p60_p12 = scmp.ne.s32.totalorder %s5085_s23, %s5081_s22 }
  0x7f   : > { %s11940_s26 = smov (%p38_p9, %s37_s26), 0  ;;  %s11942_s18 = smov (!%p38_p9, %s40_s18), %s5105_s28 }
  0x80   : > { %10324 = sst [smem:[#allocation30_spill]] %s11940_s26  ;;  %p66_p10 = scmp.ne.s32.totalorder %s5081_s22, %s5077_s21 }
  0x81   : > { %p42_p0 = scmp.ge.s32.totalorder %s11942_s18, 2  ;;  %p186_p7 = scmp.eq.s32.totalorder %s10323_s19, 7 }
  0x82   : > { %p10325_p1 = scmp.eq.s32.totalorder %s5113_s30, 0  ;;  %p10327_p8 = scmp.eq.s32.totalorder %s10323_s19, 0 }
  0x83   : > { %s11944_s18 = smov (%p42_p0, %s11942_s18), 0  ;;  %s11946_s16 = smov (!%p42_p0, %s44_s16), %s5109_s29 }
  0x84   : > { %p5380_p5 = por %p10325_p1, %p60_p12  ;;  %p5389_p11 = por %p10327_p8, %p66_p10 }
  0x85   : > { %10329 = sst [smem:[#allocation31_spill]] %s11944_s18  ;;  %s49_s25 = ssub.s32 %s5105_s28, %s11944_s18 }
  0x86   : > { %p5398_p13 = por %p186_p7, %p60_p12  ;;  %p46_p2 = scmp.ge.s32.totalorder %s11946_s16, 2 }
  0x87   : > { %p192_p3 = scmp.eq.s32.totalorder %s3892_s10, 7  ;;  %s238_s24 = sand.u32 1, %s5085_s23  }
  0x88   : > { %s10330_s15 = scalar_select %p5398_p13, 1, 0 }
  0x89   : > { %s3898_s0 = sshll.u32 %s5105_s28, 2  ;;  %s11948_s16 = smov (%p46_p2, %s11946_s16), 0 }
  0x8a   : > { %10331 = sst [smem:[#allocation32_spill]] %s11948_s16  ;;  %p5409_p6 = por %p192_p3, %p66_p10 }
  0x8b   : > { %s48_s6 = ssub.s32 %s5109_s29, %s11948_s16  ;;  %s3897_s8 = sshll.u32 %s238_s24, 4 }
  0x8c   : > { %s10332_s19 = scalar_select %p5409_p6, 1, 0 }
  0x8d   : > { %s50_s9 = sor.u32 %s49_s25, %s48_s6  ;;  %p77_p4 = scmp.eq.s32.totalorder %s48_s6, 0 }
  0x8e   : > { %p51_p9 = scmp.eq.s32.totalorder %s50_s9, 0  ;;  %s3899_s18 = sshll.u32 %s5109_s29, 3 }
  0x8f   : > { %s5418_s10 = scalar_select %p77_p4, %s5073_s20, %s79_s5  }
  0x90   : > { %s5421_s4 = scalar_select %p51_p9, %s5085_s23, %s53_s3  }
  0x91   : > { %s242_s26 = scalar_lea.vmem [#allocation5], %s3897_s8  ;;  %s248_s27 = sadd.s32 %s3899_s18, %s3898_s0 }
  0x92   : > { %s252_s28 = sshll.u32 %s242_s26, 4  ;;  %s3900_s21 = sshll.u32 %s248_s27, 6  ;;  %s5424_s28 = int_to_ptr.vmem [resolvable:$true] %s252_s28 }
  0x93   : > { %p10333_p12 = scmp.lt.s32.totalorder %s5113_s30, 8  ;;  %s10335_s25 = sld [smem:[#allocation283_spill]] }
  0x94   : > { %s239_s27 = scalar_lea.sflag [#allocation6], %s238_s24 }
  0x95   : > { %p5430_p10 = pnand %p10333_p12, %p5380_p5 }
  0x97   : > { %p4909_p7 = pneg %p5430_p10 }
  0x99   : > { %s10336_s6 = smov %s10335_s25  ;;  %s5440_s9 = scalar_lea.hbm %s10335_s25, %s3900_s21 }
  0x9a   : > { %s4907_s26 = scalar_lea.hbm %s5440_s9, 256  ;;  %s4912_s0 = scalar_lea.hbm %s10336_s6, 1024 }
  0x9b   : > { %p4908_p0 = scmp.ne.s32.totalorder %s5440_s9, %s4907_s26  ;;  %p4913_p8 = scmp.lt.u32.totalorder %s5440_s9, %s10336_s6 }
  0x9c   : > { %p4914_p2 = scmp.lt.u32.totalorder %s4912_s0, %s4907_s26  ;;  %p4916_p4 = scmp.lt.u32.totalorder %s4907_s26, %s5440_s9 }
  0x9d   : > { %p4910_p1 = pnand %p4909_p7, %p4908_p0 }
  0x9e   : > { %p4915_p3 = por %p4914_p2, %p4913_p8 }
  0x9f   : > { %p4911_p5 = pneg %p4910_p1 }
  0xa0   : > { %p4917_p9 = por %p4916_p4, %p4915_p3 }
  0xa2   : > { %p4918_p12 = pnand %p4917_p9, %p4911_p5 }
  0xa4   : > { %4921 = shalt.err (!%p4918_p12)
}
  0xa5   : > { %s4922_s24 = scalar_lea.vmem %s5424_s28, 256  ;;  %s5122_s5 = smov [#allocation5]  }
  0xa6   : > { %p4923_p0 = scmp.ne.s32.totalorder %s5424_s28, %s4922_s24  ;;  %s4927_s3 = sshll.u32 %s5122_s5, 4  ;;  %s4928_s3 = int_to_ptr.vmem [resolvable:$false] %s4927_s3 }
  0xa7   : > { %s4929_s25 = scalar_lea.vmem %s4928_s3, 512  ;;  %p4930_p13 = scmp.lt.s32.totalorder %s5424_s28, %s4928_s3 }
  0xa8   : > { %p4925_p1 = pnand %p4923_p0, %p4909_p7  ;;  %p4931_p8 = scmp.lt.s32.totalorder %s4929_s25, %s4922_s24 }
  0xaa   : > { %p4926_p6 = pneg %p4925_p1  ;;  %p4932_p2 = por %p4931_p8, %p4930_p13 }
  0xac   : > { %p4933_p3 = pnand %p4932_p2, %p4926_p6 }
  0xae   : > { %4936 = shalt.err (!%p4933_p3)
}
  0xaf   : > { %s10337_s26 = sld [smem:[#allocation29_spill]]  ;;  %s4937_s18 = scalar_lea.hbm %s5340_s14, 8192 }
  0xb0   : > { %4100 = dma.hbm_to_vmem [thread:$0]  (!%p5430_p10), %s5440_s9, 256, %s5424_s28, %s239_s27  }
  0xb1   : > { %p4938_p7 = scmp.ne.s32.totalorder %s5340_s14, %s4937_s18  ;;  %s4942_s8 = scalar_lea.hbm %s9612_s2, 16384 }
  0xb2   : > { %p4943_p13 = scmp.lt.u32.totalorder %s5340_s14, %s9612_s2  ;;  %p4944_p6 = scmp.lt.u32.totalorder %s4942_s8, %s4937_s18 }
  0xb3   : > { %p4946_p1 = scmp.lt.u32.totalorder %s4937_s18, %s5340_s14 }
  0xb4   : > { %p4945_p0 = por %p4944_p6, %p4943_p13 }
  0xb5   : > { %p10338_p5 = scmp.ne.s32.totalorder %s10337_s26, 0 }
  0xb6   : > { %p4947_p8 = por %p4946_p1, %p4945_p0 }
  0xb7   : > { %p10339_p4 = pneg %p10338_p5 }
  0xb9   : > { %p4940_p9 = pnand %p4938_p7, %p10339_p4 }
  0xbb   : > { %p4941_p12 = pneg %p4940_p9 }
  0xbd   : > { %p4948_p2 = pnand %p4947_p8, %p4941_p12 }
  0xbf   : > { %4951 = shalt.err (!%p4948_p2)
}
  0xc0   : > { %s4952_s28 = scalar_lea.vmem %s5435_s1, 8192  ;;  %p10340_p3 = pmov %p10339_p4 }
  0xc1   : > { %p4953_p10 = scmp.ne.s32.totalorder %s5435_s1, %s4952_s28  ;;  %s5123_s9 = smov [#allocation10]  }
  0xc2   : > { %s4957_s27 = sshll.u32 %s5123_s9, 4  ;;  %s4958_s27 = int_to_ptr.vmem [resolvable:$false] %s4957_s27 }
  0xc3   : > { %p4955_p7 = pnand %p4953_p10, %p10340_p3  ;;  %s4959_s24 = scalar_lea.vmem %s4958_s27, 16384 }
  0xc4   : > { %p4960_p9 = scmp.lt.s32.totalorder %s5435_s1, %s4958_s27  ;;  %p4961_p13 = scmp.lt.s32.totalorder %s4959_s24, %s4952_s28 }
  0xc5   : > { %p4956_p4 = pneg %p4955_p7 }
  0xc6   : > { %p4962_p6 = por %p4961_p13, %p4960_p9 }
  0xc8   : > { %p4963_p0 = pnand %p4962_p6, %p4956_p4 }
  0xca   : > { %4966 = shalt.err (!%p4963_p0)
}
  0xcb   : > { %4106 = dma.hbm_to_vmem [thread:$0]  (!%p10338_p5), %s5340_s14, 8192, %s5435_s1, %s5303_s17, %s10318_s13, %s10318_s13, %s10317_s12  }
  0xcc   : > { %s10341_s5 = sld [smem:[#allocation28_spill]] }
  0xd2   : > { %p10342_p12 = scmp.ne.s32.totalorder %s10341_s5, 0 }
  0xd4   : > { %303 = sbr.rel (%p10342_p12) target bundleno = 1667 (0x683), region = 40 }
  0xdb   : > { %s5497_s3 = sand.u32 1, %s5081_s22  }
  0xdc   : > { %s3908_s25 = sshll.u32 %s5497_s3, 4  ;;  %s306_s18 = scalar_lea.sflag [#allocation6], %s5497_s3 }
  0xdd   : > { %s309_s7 = scalar_lea.vmem [#allocation5], %s3908_s25 }
  0xde   : > { %5048 = dma.done.wait (%p5389_p11), %s306_s18, 256  }
  0xdf   : > { %5050 = vsyncadd (%p5389_p11), %s306_s18, 4294967040  ;;  %s10343_s26 = sld [smem:[#allocation26_spill]]  ;;  %s10344_s0 = sld [smem:[#allocation19_spill]] }
  0xe0   : > { %s10345_s1 = sld [smem:[#allocation27_spill]] }
  0xe5   : > { %s314_s17 = sand.u32 1, %s10343_s26   ;;  %s316_s12 = sand.u32 1, %s10344_s0  }
  0xe6   : > { %s5507_s13 = sshll.u32 %s316_s12, 9  ;;  %s315_s14 = scalar_lea.sflag [#allocation9], %s314_s17 }
  0xe7   : > { %s318_s8 = scalar_lea.vmem [#allocation8], %s5507_s13  ;;  %p10346_p5 = scmp.ne.s32.totalorder %s10345_s1, 0 }
  0xe9   : > { %5052 = dma.done.wait (%p10346_p5), %s315_s14, 16384  }
  0xea   : > { %5054 = vsyncadd (%p10346_p5), %s315_s14, 4294950912  ;;  %s327_s21 = scalar_lea.vmem [#allocation10], %s5507_s13  ;;  %p10347_p1 = scmp.eq.s32.totalorder %s10343_s26, 0 }
  0xec   : > { %5056 = dma.done.wait (%p10347_p1), [#allocation12], 384   ;;  %p10348_p11 = pmov %p10347_p1 }
  0xed   : > { %s3913_s11 = sshll.u32 %s5497_s3, 5  ;;  %s10349_s28 = sld [smem:[#allocation21_spill]] }
  0xee   : > { %5058 = vsyncadd (%p10348_p11), [#allocation12], 4294966912  ;;  %s5520_s16 = scalar_lea.vmem [#allocation14], %s3913_s11 }
  0xf3   : > { %p3914_p8 = scmp.ne.s32.totalorder %s10349_s28, 0 }
  0xf4   : > { %v379_v0 = vlaneseq (!%p3914_p8)  ;;  %v5124_v1 = vmov (!%p3914_p8), 0.0   ;;  %v5125_v2 = vmov (!%p3914_p8), -inf  }
  0xf5   : > { %378 = sbr.rel (%p3914_p8) target bundleno = 252 (0xfc), region = 64  ;;  %385 = vst [vmem:[#allocation4] sm:$0xff] (!%p3914_p8), %v5124_v1  ;;  %386 = vst [vmem:[#allocation4 + $0x8] sm:$0xff] (!%p3914_p8), %v5124_v1 }
  0xf6   : > { %387 = vst [vmem:[#allocation4 + $0x10] sm:$0xff] (!%p3914_p8), %v5124_v1  ;;  %388 = vst [vmem:[#allocation4 + $0x18] sm:$0xff] (!%p3914_p8), %v5124_v1  ;;  %vm381_vm0 = vcmp.lt.s32.totalorder (!%p3914_p8), %v379_v0, 512 }
  0xf7   : > { %383 = vst.msk [vmem:[#allocation2] sm:$0xf] (!%p3914_p8), %vm381_vm0, %v5125_v2  ;;  %384 = vst.msk [vmem:[#allocation3] sm:$0xf] (!%p3914_p8), %vm381_vm0, %v5124_v1 }
  0xfc PF: > { %v389_v3 = vld [vmem:[%s309_s7] sm:$0xff]  ;;  %s10350_s9 = sld [smem:[#allocation21_spill]]  ;;  %vm793_vm1 = vcmask 1043456   ;;  %v390_v4 = vld [vmem:[%s309_s7 + $0x8] sm:$0xff]  ;;  %v5126_v9 = vmov 0   ;;  %vm696_vm2 = vcmask 64512  }
  0xfd   : > { %v3951_v5 = vcombine.high %v389_v3, %v389_v3  ;;  %v3953_v6 = vcombine.high %v390_v4, %v390_v4  ;;  %v3950_v7 = vcombine.low %v389_v3, %v389_v3  ;;  %v3952_v8 = vcombine.low %v390_v4, %v390_v4  ;;  %838 = vmatprep.mubr.bf16.mxu0 %v5126_v9 }
  0xfe   : > { %1191 = vmatprep.mubr.bf16.mxu1 %v5126_v9 }
  0xff   : > { %3954 = vmatprep.subr.msk.bf16.mxu0 %vm793_vm1, %v3951_v5  ;;  %3987 = vmatprep.subr.msk.bf16.mxu1 %vm793_vm1, %v3953_v6  ;;  %v795_v10 = vsel %vm793_vm1, %v3950_v7, 0  ;;  %v801_v11 = vsel %vm793_vm1, %v3952_v8, 0 }
 0x100   : > { %807 = vmatpush1.bf16.msra.mxu0 %v795_v10  ;;  %1160 = vmatpush1.bf16.msra.mxu1 %v801_v11 }
 0x102   : > { %s3915_s27 = sshll.u32 %s10350_s9, 9  ;;  %p4052_p2 = scmp.ne.s32.totalorder %s10350_s9, 1 }
 0x103   : > { %s5525_s24 = sshra.s32 %s3915_s27, 3 }
 0x104   : > { %s3916_s5 = sshll.u32 %s5525_s24, 2 }
 0x105   : > { %s5537_s25 = scalar_lea.vmem %s318_s8, %s3916_s5 [#allocation8]  ;;  %s5989_s18 = scalar_lea.vmem %s327_s21, %s3916_s5 [#allocation10] }
 0x106   : > { %v4239_v12 = vld [vmem:[%s5537_s25] sm:$0xff]   ;;  %v4240_v13 = vld [vmem:[%s5537_s25 + $0x8] sm:$0xff]   ;;  %v4241_v14 = vld [vmem:[%s5537_s25 + $0x10] sm:$0xff]  }
 0x107   : > { %3955 = vmatmul.mubr.msk.bf16.vlgmr.msra.gmra.mrb[0].mxu0 %vm696_vm2, %v4239_v12  ;;  %3988 = vmatmul.mubr.msk.bf16.vlgmr.msra.gmra.mrb[0].mxu1 %vm696_vm2, %v4239_v12  ;;  %v4242_v15 = vld [vmem:[%s5537_s25 + $0x18] sm:$0xff]   ;;  %v4243_v16 = vld [vmem:[%s5537_s25 + $0x20] sm:$0xff]   ;;  %v4244_v17 = vld [vmem:[%s5537_s25 + $0x28] sm:$0xff]  }
 0x108   : > { %848 = vmatprep.mubr.bf16.mxu0 %v5126_v9  ;;  %1201 = vmatprep.mubr.bf16.mxu1 %v5126_v9  ;;  %v4245_v18 = vld [vmem:[%s5537_s25 + $0x30] sm:$0xff]   ;;  %v4246_v19 = vld [vmem:[%s5537_s25 + $0x38] sm:$0xff]   ;;  %v4247_v20 = vld [vmem:[%s5537_s25 + $0x40] sm:$0xff]  }
 0x109   : > { %v4248_v21 = vld [vmem:[%s5537_s25 + $0x48] sm:$0xff]   ;;  %v4249_v22 = vld [vmem:[%s5537_s25 + $0x50] sm:$0xff]   ;;  %v4250_v23 = vld [vmem:[%s5537_s25 + $0x58] sm:$0xff]  }
 0x10a   : > { %v4251_v24 = vld [vmem:[%s5537_s25 + $0x60] sm:$0xff]   ;;  %v4252_v25 = vld [vmem:[%s5537_s25 + $0x68] sm:$0xff]   ;;  %v4253_v26 = vld [vmem:[%s5537_s25 + $0x70] sm:$0xff]  }
 0x10b   : > { %v4254_v27 = vld [vmem:[%s5537_s25 + $0x78] sm:$0xff]   ;;  %v4255_v28 = vld [vmem:[%s5537_s25 + $0x80] sm:$0xff]   ;;  %v4256_v29 = vld [vmem:[%s5537_s25 + $0x88] sm:$0xff]  }
 0x10c   : > { %v4257_v30 = vld [vmem:[%s5537_s25 + $0x90] sm:$0xff]   ;;  %v4258_v31 = vld [vmem:[%s5537_s25 + $0x98] sm:$0xff]   ;;  %v4259_v32 = vld [vmem:[%s5537_s25 + $0xa0] sm:$0xff]  }
 0x10d   : > { %v4260_v33 = vld [vmem:[%s5537_s25 + $0xa8] sm:$0xff]   ;;  %v4261_v34 = vld [vmem:[%s5537_s25 + $0xb0] sm:$0xff]   ;;  %v4262_v35 = vld [vmem:[%s5537_s25 + $0xb8] sm:$0xff]  }
 0x10e   : > { %v4263_v36 = vld [vmem:[%s5537_s25 + $0xc0] sm:$0xff]   ;;  %v4264_v37 = vld [vmem:[%s5537_s25 + $0xc8] sm:$0xff]   ;;  %v4265_v38 = vld [vmem:[%s5537_s25 + $0xd0] sm:$0xff]  }
 0x10f   : > { %3956 = vmatmul.mubr.msk.bf16.gmra.mrb[4].mxu0 %vm696_vm2, %v4240_v13  ;;  %3989 = vmatmul.mubr.msk.bf16.gmra.mrb[4].mxu1 %vm696_vm2, %v4240_v13  ;;  %v4266_v43 = vld [vmem:[%s5537_s25 + $0xd8] sm:$0xff]   ;;  %v4267_v58 = vld [vmem:[%s5537_s25 + $0xe0] sm:$0xff]   ;;  %v4268_v12 = vld [vmem:[%s5537_s25 + $0xe8] sm:$0xff]  }
 0x110   : > { %858 = vmatprep.mubr.bf16.mxu0 %v5126_v9  ;;  %1211 = vmatprep.mubr.bf16.mxu1 %v5126_v9 }
 0x117   : > { %3957 = vmatmul.mubr.msk.bf16.gmra.mrb[8].mxu0 %vm696_vm2, %v4241_v14  ;;  %3990 = vmatmul.mubr.msk.bf16.gmra.mrb[8].mxu1 %vm696_vm2, %v4241_v14 }
 0x118   : > { %868 = vmatprep.mubr.bf16.mxu0 %v5126_v9  ;;  %1221 = vmatprep.mubr.bf16.mxu1 %v5126_v9 }
 0x11f   : > { %3958 = vmatmul.mubr.msk.bf16.gmra.mrb[12].mxu0 %vm696_vm2, %v4242_v15  ;;  %3991 = vmatmul.mubr.msk.bf16.gmra.mrb[12].mxu1 %vm696_vm2, %v4242_v15 }
 0x120   : > { %878 = vmatprep.mubr.bf16.mxu0 %v5126_v9  ;;  %1231 = vmatprep.mubr.bf16.mxu1 %v5126_v9 }
 0x127   : > { %3959 = vmatmul.mubr.msk.bf16.gmra.mrb[16].mxu0 %vm696_vm2, %v4243_v16  ;;  %3992 = vmatmul.mubr.msk.bf16.gmra.mrb[16].mxu1 %vm696_vm2, %v4243_v16 }
 0x128   : > { %888 = vmatprep.mubr.bf16.mxu0 %v5126_v9  ;;  %1241 = vmatprep.mubr.bf16.mxu1 %v5126_v9 }
 0x12f   : > { %3960 = vmatmul.mubr.msk.bf16.gmra.mrb[20].mxu0 %vm696_vm2, %v4244_v17  ;;  %3993 = vmatmul.mubr.msk.bf16.gmra.mrb[20].mxu1 %vm696_vm2, %v4244_v17 }
 0x130   : > { %898 = vmatprep.mubr.bf16.mxu0 %v5126_v9  ;;  %1251 = vmatprep.mubr.bf16.mxu1 %v5126_v9 }
 0x137   : > { %3961 = vmatmul.mubr.msk.bf16.gmra.mrb[24].mxu0 %vm696_vm2, %v4245_v18  ;;  %3994 = vmatmul.mubr.msk.bf16.gmra.mrb[24].mxu1 %vm696_vm2, %v4245_v18 }
 0x138   : > { %908 = vmatprep.mubr.bf16.mxu0 %v5126_v9  ;;  %1261 = vmatprep.mubr.bf16.mxu1 %v5126_v9 }
 0x13f   : > { %3962 = vmatmul.mubr.msk.bf16.gmra.mrb[28].mxu0 %vm696_vm2, %v4246_v19  ;;  %3995 = vmatmul.mubr.msk.bf16.gmra.mrb[28].mxu1 %vm696_vm2, %v4246_v19 }
 0x140   : > { %918 = vmatprep.mubr.bf16.mxu0 %v5126_v9  ;;  %1271 = vmatprep.mubr.bf16.mxu1 %v5126_v9 }
 0x147   : > { %3963 = vmatmul.mubr.msk.bf16.gmra.mrb[32].mxu0 %vm696_vm2, %v4247_v20  ;;  %3996 = vmatmul.mubr.msk.bf16.gmra.mrb[32].mxu1 %vm696_vm2, %v4247_v20 }
 0x148   : > { %928 = vmatprep.mubr.bf16.mxu0 %v5126_v9  ;;  %1281 = vmatprep.mubr.bf16.mxu1 %v5126_v9 }
 0x14f   : > { %3964 = vmatmul.mubr.msk.bf16.gmra.mrb[36].mxu0 %vm696_vm2, %v4248_v21  ;;  %3997 = vmatmul.mubr.msk.bf16.gmra.mrb[36].mxu1 %vm696_vm2, %v4248_v21 }
 0x150   : > { %938 = vmatprep.mubr.bf16.mxu0 %v5126_v9  ;;  %1291 = vmatprep.mubr.bf16.mxu1 %v5126_v9 }
 0x157   : > { %3965 = vmatmul.mubr.msk.bf16.gmra.mrb[40].mxu0 %vm696_vm2, %v4249_v22  ;;  %3998 = vmatmul.mubr.msk.bf16.gmra.mrb[40].mxu1 %vm696_vm2, %v4249_v22 }
 0x158   : > { %948 = vmatprep.mubr.bf16.mxu0 %v5126_v9  ;;  %1301 = vmatprep.mubr.bf16.mxu1 %v5126_v9 }
 0x15f   : > { %3966 = vmatmul.mubr.msk.bf16.gmra.mrb[44].mxu0 %vm696_vm2, %v4250_v23  ;;  %3999 = vmatmul.mubr.msk.bf16.gmra.mrb[44].mxu1 %vm696_vm2, %v4250_v23 }
 0x160   : > { %958 = vmatprep.mubr.bf16.mxu0 %v5126_v9  ;;  %1311 = vmatprep.mubr.bf16.mxu1 %v5126_v9 }
 0x167   : > { %3967 = vmatmul.mubr.msk.bf16.gmra.mrb[48].mxu0 %vm696_vm2, %v4251_v24  ;;  %4000 = vmatmul.mubr.msk.bf16.gmra.mrb[48].mxu1 %vm696_vm2, %v4251_v24 }
 0x168   : > { %968 = vmatprep.mubr.bf16.mxu0 %v5126_v9  ;;  %1321 = vmatprep.mubr.bf16.mxu1 %v5126_v9 }
 0x16f   : > { %3968 = vmatmul.mubr.msk.bf16.gmra.mrb[52].mxu0 %vm696_vm2, %v4252_v25  ;;  %4001 = vmatmul.mubr.msk.bf16.gmra.mrb[52].mxu1 %vm696_vm2, %v4252_v25 }
 0x170   : > { %978 = vmatprep.mubr.bf16.mxu0 %v5126_v9  ;;  %1331 = vmatprep.mubr.bf16.mxu1 %v5126_v9 }
 0x177   : > { %3969 = vmatmul.mubr.msk.bf16.gmra.mrb[56].mxu0 %vm696_vm2, %v4253_v26  ;;  %4002 = vmatmul.mubr.msk.bf16.gmra.mrb[56].mxu1 %vm696_vm2, %v4253_v26 }
 0x178   : > { %988 = vmatprep.mubr.bf16.mxu0 %v5126_v9  ;;  %1341 = vmatprep.mubr.bf16.mxu1 %v5126_v9 }
 0x17f   : > { %3970 = vmatmul.mubr.msk.bf16.gmra.mrb[60].mxu0 %vm696_vm2, %v4254_v27  ;;  %4003 = vmatmul.mubr.msk.bf16.gmra.mrb[60].mxu1 %vm696_vm2, %v4254_v27 }
 0x180   : > { %998 = vmatprep.mubr.bf16.mxu0 %v5126_v9  ;;  %1351 = vmatprep.mubr.bf16.mxu1 %v5126_v9 }
 0x187   : > { %3971 = vmatmul.mubr.msk.bf16.gmra.mrb[64].mxu0 %vm696_vm2, %v4255_v28  ;;  %4004 = vmatmul.mubr.msk.bf16.gmra.mrb[64].mxu1 %vm696_vm2, %v4255_v28 }
 0x188   : > { %1008 = vmatprep.mubr.bf16.mxu0 %v5126_v9  ;;  %1361 = vmatprep.mubr.bf16.mxu1 %v5126_v9 }
 0x18f   : > { %3972 = vmatmul.mubr.msk.bf16.gmra.mrb[68].mxu0 %vm696_vm2, %v4256_v29  ;;  %4005 = vmatmul.mubr.msk.bf16.gmra.mrb[68].mxu1 %vm696_vm2, %v4256_v29  ;;  %v4269_v29 = vld [vmem:[%s5537_s25 + $0xf0] sm:$0xff]  }
 0x190   : > { %1018 = vmatprep.mubr.bf16.mxu0 %v5126_v9  ;;  %1371 = vmatprep.mubr.bf16.mxu1 %v5126_v9 }
 0x197   : > { %3973 = vmatmul.mubr.msk.bf16.gmra.mrb[72].mxu0 %vm696_vm2, %v4257_v30  ;;  %4006 = vmatmul.mubr.msk.bf16.gmra.mrb[72].mxu1 %vm696_vm2, %v4257_v30 }
 0x198   : > { %1028 = vmatprep.mubr.bf16.mxu0 %v5126_v9  ;;  %1381 = vmatprep.mubr.bf16.mxu1 %v5126_v9 }
 0x19f   : > { %3974 = vmatmul.mubr.msk.bf16.gmra.mrb[76].mxu0 %vm696_vm2, %v4258_v31  ;;  %4007 = vmatmul.mubr.msk.bf16.gmra.mrb[76].mxu1 %vm696_vm2, %v4258_v31 }
 0x1a0   : > { %1038 = vmatprep.mubr.bf16.mxu0 %v5126_v9  ;;  %1391 = vmatprep.mubr.bf16.mxu1 %v5126_v9 }
 0x1a7   : > { %3975 = vmatmul.mubr.msk.bf16.gmra.mrb[80].mxu0 %vm696_vm2, %v4259_v32  ;;  %4008 = vmatmul.mubr.msk.bf16.gmra.mrb[80].mxu1 %vm696_vm2, %v4259_v32 }
 0x1a8   : > { %1048 = vmatprep.mubr.bf16.mxu0 %v5126_v9  ;;  %1401 = vmatprep.mubr.bf16.mxu1 %v5126_v9 }
 0x1af   : > { %3976 = vmatmul.mubr.msk.bf16.gmra.mrb[84].mxu0 %vm696_vm2, %v4260_v33  ;;  %4009 = vmatmul.mubr.msk.bf16.gmra.mrb[84].mxu1 %vm696_vm2, %v4260_v33 }
 0x1b0   : > { %1058 = vmatprep.mubr.bf16.mxu0 %v5126_v9  ;;  %1411 = vmatprep.mubr.bf16.mxu1 %v5126_v9 }
 0x1b7   : > { %3977 = vmatmul.mubr.msk.bf16.gmra.mrb[88].mxu0 %vm696_vm2, %v4261_v34  ;;  %4010 = vmatmul.mubr.msk.bf16.gmra.mrb[88].mxu1 %vm696_vm2, %v4261_v34 }
 0x1b8   : > { %1068 = vmatprep.mubr.bf16.mxu0 %v5126_v9  ;;  %1421 = vmatprep.mubr.bf16.mxu1 %v5126_v9 }
 0x1bf   : > { %3978 = vmatmul.mubr.msk.bf16.gmra.mrb[92].mxu0 %vm696_vm2, %v4262_v35  ;;  %4011 = vmatmul.mubr.msk.bf16.gmra.mrb[92].mxu1 %vm696_vm2, %v4262_v35 }
 0x1c0   : > { %1078 = vmatprep.mubr.bf16.mxu0 %v5126_v9  ;;  %1431 = vmatprep.mubr.bf16.mxu1 %v5126_v9 }
 0x1c7   : > { %3979 = vmatmul.mubr.msk.bf16.gmra.mrb[96].mxu0 %vm696_vm2, %v4263_v36  ;;  %4012 = vmatmul.mubr.msk.bf16.gmra.mrb[96].mxu1 %vm696_vm2, %v4263_v36 }
 0x1c8   : > { %1088 = vmatprep.mubr.bf16.mxu0 %v5126_v9  ;;  %1441 = vmatprep.mubr.bf16.mxu1 %v5126_v9 }
 0x1cf   : > { %3980 = vmatmul.mubr.msk.bf16.gmra.mrb[100].mxu0 %vm696_vm2, %v4264_v37  ;;  %4013 = vmatmul.mubr.msk.bf16.gmra.mrb[100].mxu1 %vm696_vm2, %v4264_v37 }
 0x1d0   : > { %1098 = vmatprep.mubr.bf16.mxu0 %v5126_v9  ;;  %1451 = vmatprep.mubr.bf16.mxu1 %v5126_v9 }
 0x1d7   : > { %3981 = vmatmul.mubr.msk.bf16.gmra.mrb[104].mxu0 %vm696_vm2, %v4265_v38  ;;  %4014 = vmatmul.mubr.msk.bf16.gmra.mrb[104].mxu1 %vm696_vm2, %v4265_v38 }
 0x1d8   : > { %1108 = vmatprep.mubr.bf16.mxu0 %v5126_v9  ;;  %1461 = vmatprep.mubr.bf16.mxu1 %v5126_v9 }
 0x1da   : > { %v5674_v39 = vpop.f32.mrb[0].mxu0  ;;  %v5676_v40 = vpop.f32.mrb[0].mxu1 }
 0x1db   : > { %v5678_v41 = vpop.f32.mrb[1].mxu0  ;;  %v5680_v42 = vpop.f32.mrb[1].mxu1 }
 0x1dc   : > { %v5683_v44 = vpop.f32.mrb[2].mxu0  ;;  %v5685_v45 = vpop.f32.mrb[2].mxu1 }
 0x1dd   : > { %v1513_v46 = vmax.f32 %v5674_v39, %v5683_v44  ;;  %v1651_v47 = vmax.f32 %v5676_v40, %v5685_v45  ;;  %v5691_v48 = vpop.f32.mrb[3].mxu0  ;;  %v5693_v49 = vpop.f32.mrb[3].mxu1 }
 0x1de   : > { %v1582_v50 = vmax.f32 %v5678_v41, %v5691_v48  ;;  %v1720_v51 = vmax.f32 %v5680_v42, %v5693_v49 }
 0x1df   : > { %3982 = vmatmul.mubr.msk.bf16.gmra.mrb[108].mxu0 %vm696_vm2, %v4266_v43  ;;  %4015 = vmatmul.mubr.msk.bf16.gmra.mrb[108].mxu1 %vm696_vm2, %v4266_v43 }
 0x1e0   : > { %1118 = vmatprep.mubr.bf16.mxu0 %v5126_v9  ;;  %1471 = vmatprep.mubr.bf16.mxu1 %v5126_v9 }
 0x1e2   : > { %v5703_v52 = vpop.f32.mrb[4].mxu0  ;;  %v5705_v53 = vpop.f32.mrb[4].mxu1 }
 0x1e3   : > { %v1514_v54 = vmax.f32 %v1513_v46, %v5703_v52  ;;  %v1652_v55 = vmax.f32 %v1651_v47, %v5705_v53  ;;  %v5709_v56 = vpop.f32.mrb[5].mxu0  ;;  %v5711_v57 = vpop.f32.mrb[5].mxu1 }
 0x1e4   : > { %v1583_v59 = vmax.f32 %v1582_v50, %v5709_v56  ;;  %v1721_v60 = vmax.f32 %v1720_v51, %v5711_v57  ;;  %v5716_v61 = vpop.f32.mrb[6].mxu0  ;;  %v5718_v62 = vpop.f32.mrb[6].mxu1 }
 0x1e5   : > { %10351 = vst [vmem:[#allocation33_spill] sm:$0xff] %v5718_v62  ;;  %v1515_v63 = vmax.f32 %v1514_v54, %v5716_v61  ;;  %v1653_v0 = vmax.f32 %v1652_v55, %v5718_v62  ;;  %v5722_v1 = vpop.f32.mrb[7].mxu0  ;;  %v5724_v2 = vpop.f32.mrb[7].mxu1 }
 0x1e6   : > { %10352 = vst [vmem:[#allocation34_spill] sm:$0xff] %v5722_v1  ;;  %10353 = vst [vmem:[#allocation35_spill] sm:$0xff] %v5724_v2  ;;  %v1584_v3 = vmax.f32 %v1583_v59, %v5722_v1  ;;  %v1722_v4 = vmax.f32 %v1721_v60, %v5724_v2 }
 0x1e7   : > { %3983 = vmatmul.mubr.msk.bf16.gmra.mrb[112].mxu0 %vm696_vm2, %v4267_v58  ;;  %4016 = vmatmul.mubr.msk.bf16.gmra.mrb[112].mxu1 %vm696_vm2, %v4267_v58  ;;  %v4270_v58 = vld [vmem:[%s5537_s25 + $0xf8] sm:$0xff]  }
 0x1e8   : > { %1128 = vmatprep.mubr.bf16.mxu0 %v5126_v9  ;;  %1481 = vmatprep.mubr.bf16.mxu1 %v5126_v9 }
 0x1ea   : > { %v5732_v5 = vpop.f32.mrb[8].mxu0  ;;  %v5734_v6 = vpop.f32.mrb[8].mxu1 }
 0x1eb   : > { %10354 = vst [vmem:[#allocation36_spill] sm:$0xff] %v5732_v5  ;;  %10355 = vst [vmem:[#allocation37_spill] sm:$0xff] %v5734_v6  ;;  %v1516_v7 = vmax.f32 %v1515_v63, %v5732_v5  ;;  %v1654_v8 = vmax.f32 %v1653_v0, %v5734_v6  ;;  %v5738_v10 = vpop.f32.mrb[9].mxu0  ;;  %v5740_v11 = vpop.f32.mrb[9].mxu1 }
 0x1ec   : > { %10356 = vst [vmem:[#allocation38_spill] sm:$0xff] %v5738_v10  ;;  %10357 = vst [vmem:[#allocation39_spill] sm:$0xff] %v5740_v11  ;;  %v1585_v13 = vmax.f32 %v1584_v3, %v5738_v10  ;;  %v1723_v14 = vmax.f32 %v1722_v4, %v5740_v11  ;;  %v5745_v15 = vpop.f32.mrb[10].mxu0  ;;  %v5747_v16 = vpop.f32.mrb[10].mxu1 }
 0x1ed   : > { %10358 = vst [vmem:[#allocation40_spill] sm:$0xff] %v5745_v15  ;;  %10359 = vst [vmem:[#allocation41_spill] sm:$0xff] %v5747_v16  ;;  %v1517_v17 = vmax.f32 %v1516_v7, %v5745_v15  ;;  %v1655_v18 = vmax.f32 %v1654_v8, %v5747_v16  ;;  %v5751_v19 = vpop.f32.mrb[11].mxu0  ;;  %v5753_v20 = vpop.f32.mrb[11].mxu1 }
 0x1ee   : > { %10360 = vst [vmem:[#allocation42_spill] sm:$0xff] %v5751_v19  ;;  %10361 = vst [vmem:[#allocation43_spill] sm:$0xff] %v5753_v20  ;;  %v1586_v21 = vmax.f32 %v1585_v13, %v5751_v19  ;;  %v1724_v22 = vmax.f32 %v1723_v14, %v5753_v20 }
 0x1ef   : > { %3984 = vmatmul.mubr.msk.bf16.gmra.mrb[116].mxu0 %vm696_vm2, %v4268_v12  ;;  %4017 = vmatmul.mubr.msk.bf16.gmra.mrb[116].mxu1 %vm696_vm2, %v4268_v12 }
 0x1f0   : > { %1138 = vmatprep.mubr.bf16.mxu0 %v5126_v9  ;;  %1491 = vmatprep.mubr.bf16.mxu1 %v5126_v9 }
 0x1f2   : > { %v5761_v23 = vpop.f32.mrb[12].mxu0  ;;  %v5763_v24 = vpop.f32.mrb[12].mxu1 }
 0x1f3   : > { %10362 = vst [vmem:[#allocation44_spill] sm:$0xff] %v5761_v23  ;;  %10363 = vst [vmem:[#allocation45_spill] sm:$0xff] %v5763_v24  ;;  %v1518_v25 = vmax.f32 %v1517_v17, %v5761_v23  ;;  %v1656_v26 = vmax.f32 %v1655_v18, %v5763_v24  ;;  %v5767_v27 = vpop.f32.mrb[13].mxu0  ;;  %v5769_v28 = vpop.f32.mrb[13].mxu1 }
 0x1f4   : > { %10364 = vst [vmem:[#allocation46_spill] sm:$0xff] %v5767_v27  ;;  %10365 = vst [vmem:[#allocation47_spill] sm:$0xff] %v5769_v28  ;;  %v1587_v30 = vmax.f32 %v1586_v21, %v5767_v27  ;;  %v1725_v31 = vmax.f32 %v1724_v22, %v5769_v28  ;;  %v5774_v32 = vpop.f32.mrb[14].mxu0  ;;  %v5776_v33 = vpop.f32.mrb[14].mxu1 }
 0x1f5   : > { %10366 = vst [vmem:[#allocation48_spill] sm:$0xff] %v5774_v32  ;;  %10367 = vst [vmem:[#allocation49_spill] sm:$0xff] %v5776_v33  ;;  %v1519_v34 = vmax.f32 %v1518_v25, %v5774_v32  ;;  %v1657_v35 = vmax.f32 %v1656_v26, %v5776_v33  ;;  %v5780_v36 = vpop.f32.mrb[15].mxu0  ;;  %v5782_v37 = vpop.f32.mrb[15].mxu1 }
 0x1f6   : > { %10368 = vst [vmem:[#allocation50_spill] sm:$0xff] %v5780_v36  ;;  %10369 = vst [vmem:[#allocation51_spill] sm:$0xff] %v5782_v37  ;;  %v1588_v38 = vmax.f32 %v1587_v30, %v5780_v36  ;;  %v1726_v43 = vmax.f32 %v1725_v31, %v5782_v37 }
 0x1f7   : > { %3985 = vmatmul.mubr.msk.bf16.gmra.mrb[120].mxu0 %vm696_vm2, %v4269_v29  ;;  %4018 = vmatmul.mubr.msk.bf16.gmra.mrb[120].mxu1 %vm696_vm2, %v4269_v29 }
 0x1f8   : > { %1148 = vmatprep.mubr.bf16.mxu0 %v5126_v9  ;;  %1501 = vmatprep.mubr.bf16.mxu1 %v5126_v9 }
 0x1fa   : > { %v5790_v46 = vpop.f32.mrb[16].mxu0  ;;  %v5792_v47 = vpop.f32.mrb[16].mxu1 }
 0x1fb   : > { %10370 = vst [vmem:[#allocation52_spill] sm:$0xff] %v5790_v46  ;;  %10371 = vst [vmem:[#allocation53_spill] sm:$0xff] %v5792_v47  ;;  %v1520_v50 = vmax.f32 %v1519_v34, %v5790_v46  ;;  %v1658_v51 = vmax.f32 %v1657_v35, %v5792_v47  ;;  %v5796_v54 = vpop.f32.mrb[17].mxu0  ;;  %v5798_v55 = vpop.f32.mrb[17].mxu1 }
 0x1fc   : > { %10372 = vst [vmem:[#allocation54_spill] sm:$0xff] %v5796_v54  ;;  %10373 = vst [vmem:[#allocation55_spill] sm:$0xff] %v5798_v55  ;;  %v1589_v59 = vmax.f32 %v1588_v38, %v5796_v54  ;;  %v1727_v60 = vmax.f32 %v1726_v43, %v5798_v55  ;;  %v5803_v63 = vpop.f32.mrb[18].mxu0  ;;  %v5805_v9 = vpop.f32.mrb[18].mxu1 }
 0x1fd   : > { %10374 = vst [vmem:[#allocation56_spill] sm:$0xff] %v5803_v63  ;;  %10375 = vst [vmem:[#allocation57_spill] sm:$0xff] %v5805_v9  ;;  %v1521_v0 = vmax.f32 %v1520_v50, %v5803_v63  ;;  %v1659_v3 = vmax.f32 %v1658_v51, %v5805_v9  ;;  %v5809_v4 = vpop.f32.mrb[19].mxu0  ;;  %v5811_v7 = vpop.f32.mrb[19].mxu1 }
 0x1fe   : > { %10376 = vst [vmem:[#allocation58_spill] sm:$0xff] %v5809_v4  ;;  %10377 = vst [vmem:[#allocation59_spill] sm:$0xff] %v5811_v7  ;;  %v1590_v8 = vmax.f32 %v1589_v59, %v5809_v4  ;;  %v1728_v12 = vmax.f32 %v1727_v60, %v5811_v7 }
 0x1ff   : > { %3986 = vmatmul.mubr.msk.bf16.gmra.mrb[124].mxu0 %vm696_vm2, %v4270_v58  ;;  %4019 = vmatmul.mubr.msk.bf16.gmra.mrb[124].mxu1 %vm696_vm2, %v4270_v58 }
 0x202   : > { %v5817_v13 = vpop.f32.mrb[20].mxu0  ;;  %v5819_v14 = vpop.f32.mrb[20].mxu1 }
 0x203   : > { %10378 = vst [vmem:[#allocation60_spill] sm:$0xff] %v5817_v13  ;;  %10379 = vst [vmem:[#allocation61_spill] sm:$0xff] %v5819_v14  ;;  %v1522_v17 = vmax.f32 %v1521_v0, %v5817_v13  ;;  %v1660_v18 = vmax.f32 %v1659_v3, %v5819_v14  ;;  %v5823_v21 = vpop.f32.mrb[21].mxu0  ;;  %v5825_v22 = vpop.f32.mrb[21].mxu1 }
 0x204   : > { %10380 = vst [vmem:[#allocation62_spill] sm:$0xff] %v5823_v21  ;;  %10381 = vst [vmem:[#allocation63_spill] sm:$0xff] %v5825_v22  ;;  %v1591_v25 = vmax.f32 %v1590_v8, %v5823_v21  ;;  %v1729_v26 = vmax.f32 %v1728_v12, %v5825_v22  ;;  %v5829_v29 = vpop.f32.mrb[22].mxu0  ;;  %v5831_v30 = vpop.f32.mrb[22].mxu1 }
 0x205   : > { %10382 = vst [vmem:[#allocation64_spill] sm:$0xff] %v5829_v29  ;;  %10383 = vst [vmem:[#allocation65_spill] sm:$0xff] %v5831_v30  ;;  %v1523_v31 = vmax.f32 %v1522_v17, %v5829_v29  ;;  %v1661_v34 = vmax.f32 %v1660_v18, %v5831_v30  ;;  %v5835_v35 = vpop.f32.mrb[23].mxu0  ;;  %v5837_v38 = vpop.f32.mrb[23].mxu1 }
 0x206   : > { %10384 = vst [vmem:[#allocation66_spill] sm:$0xff] %v5835_v35  ;;  %10385 = vst [vmem:[#allocation67_spill] sm:$0xff] %v5837_v38  ;;  %v1592_v43 = vmax.f32 %v1591_v25, %v5835_v35  ;;  %v1730_v50 = vmax.f32 %v1729_v26, %v5837_v38 }
 0x20a   : > { %v5841_v51 = vpop.f32.mrb[24].mxu0  ;;  %v5843_v58 = vpop.f32.mrb[24].mxu1 }
 0x20b   : > { %10386 = vst [vmem:[#allocation68_spill] sm:$0xff] %v5841_v51  ;;  %10387 = vst [vmem:[#allocation69_spill] sm:$0xff] %v5843_v58  ;;  %v1524_v59 = vmax.f32 %v1523_v31, %v5841_v51  ;;  %v1662_v60 = vmax.f32 %v1661_v34, %v5843_v58  ;;  %v5847_v0 = vpop.f32.mrb[25].mxu0  ;;  %v5849_v3 = vpop.f32.mrb[25].mxu1 }
 0x20c   : > { %10388 = vst [vmem:[#allocation70_spill] sm:$0xff] %v5847_v0  ;;  %10389 = vst [vmem:[#allocation71_spill] sm:$0xff] %v5849_v3  ;;  %v1593_v8 = vmax.f32 %v1592_v43, %v5847_v0  ;;  %v1731_v12 = vmax.f32 %v1730_v50, %v5849_v3  ;;  %v5853_v17 = vpop.f32.mrb[26].mxu0  ;;  %v5855_v18 = vpop.f32.mrb[26].mxu1 }
 0x20d   : > { %10390 = vst [vmem:[#allocation72_spill] sm:$0xff] %v5853_v17  ;;  %10391 = vst [vmem:[#allocation73_spill] sm:$0xff] %v5855_v18  ;;  %v1525_v25 = vmax.f32 %v1524_v59, %v5853_v17  ;;  %v1663_v26 = vmax.f32 %v1662_v60, %v5855_v18  ;;  %v5859_v38 = vpop.f32.mrb[27].mxu0  ;;  %v5861_v31 = vpop.f32.mrb[27].mxu1 }
 0x20e   : > { %10392 = vst [vmem:[#allocation74_spill] sm:$0xff] %v5859_v38  ;;  %10393 = vst [vmem:[#allocation75_spill] sm:$0xff] %v5861_v31  ;;  %v1594_v34 = vmax.f32 %v1593_v8, %v5859_v38  ;;  %v1732_v58 = vmax.f32 %v1731_v12, %v5861_v31 }
 0x212   : > { %v5865_v51 = vpop.f32.mrb[28].mxu0  ;;  %v5867_v43 = vpop.f32.mrb[28].mxu1 }
 0x213   : > { %10394 = vst [vmem:[#allocation76_spill] sm:$0xff] %v5865_v51  ;;  %10395 = vst [vmem:[#allocation77_spill] sm:$0xff] %v5867_v43  ;;  %v1526_v50 = vmax.f32 %v1525_v25, %v5865_v51  ;;  %v1664_v3 = vmax.f32 %v1663_v26, %v5867_v43  ;;  %v5871_v0 = vpop.f32.mrb[29].mxu0  ;;  %v5873_v59 = vpop.f32.mrb[29].mxu1 }
 0x214   : > { %10396 = vst [vmem:[#allocation78_spill] sm:$0xff] %v5871_v0  ;;  %10397 = vst [vmem:[#allocation79_spill] sm:$0xff] %v5873_v59  ;;  %v1595_v60 = vmax.f32 %v1594_v34, %v5871_v0  ;;  %v1733_v18 = vmax.f32 %v1732_v58, %v5873_v59  ;;  %v5877_v17 = vpop.f32.mrb[30].mxu0  ;;  %v5879_v8 = vpop.f32.mrb[30].mxu1 }
 0x215   : > { %10398 = vst [vmem:[#allocation80_spill] sm:$0xff] %v5877_v17  ;;  %10399 = vst [vmem:[#allocation81_spill] sm:$0xff] %v5879_v8  ;;  %v1527_v12 = vmax.f32 %v1526_v50, %v5877_v17  ;;  %v1665_v31 = vmax.f32 %v1664_v3, %v5879_v8  ;;  %v5883_v38 = vpop.f32.mrb[31].mxu0  ;;  %v5885_v25 = vpop.f32.mrb[31].mxu1 }
 0x216   : > { %10400 = vst [vmem:[#allocation82_spill] sm:$0xff] %v5883_v38  ;;  %10401 = vst [vmem:[#allocation83_spill] sm:$0xff] %v5885_v25  ;;  %v1596_v26 = vmax.f32 %v1595_v60, %v5883_v38  ;;  %v1734_v43 = vmax.f32 %v1733_v18, %v5885_v25 }
 0x21a   : > { %v5889_v51 = vpop.f32.mrb[32].mxu0  ;;  %v5891_v34 = vpop.f32.mrb[32].mxu1 }
 0x21b   : > { %10402 = vst [vmem:[#allocation84_spill] sm:$0xff] %v5889_v51  ;;  %10403 = vst [vmem:[#allocation85_spill] sm:$0xff] %v5891_v34  ;;  %v1528_v58 = vmax.f32 %v1527_v12, %v5889_v51  ;;  %v1666_v59 = vmax.f32 %v1665_v31, %v5891_v34  ;;  %v5895_v0 = vpop.f32.mrb[33].mxu0  ;;  %v5897_v50 = vpop.f32.mrb[33].mxu1 }
 0x21c   : > { %10404 = vst [vmem:[#allocation86_spill] sm:$0xff] %v5895_v0  ;;  %10405 = vst [vmem:[#allocation87_spill] sm:$0xff] %v5897_v50  ;;  %v1597_v3 = vmax.f32 %v1596_v26, %v5895_v0  ;;  %v1735_v8 = vmax.f32 %v1734_v43, %v5897_v50  ;;  %v5901_v17 = vpop.f32.mrb[34].mxu0  ;;  %v5903_v60 = vpop.f32.mrb[34].mxu1 }
 0x21d   : > { %10406 = vst [vmem:[#allocation88_spill] sm:$0xff] %v5901_v17  ;;  %10407 = vst [vmem:[#allocation89_spill] sm:$0xff] %v5903_v60  ;;  %v1529_v18 = vmax.f32 %v1528_v58, %v5901_v17  ;;  %v1667_v25 = vmax.f32 %v1666_v59, %v5903_v60  ;;  %v5907_v38 = vpop.f32.mrb[35].mxu0  ;;  %v5909_v12 = vpop.f32.mrb[35].mxu1 }
 0x21e   : > { %10408 = vst [vmem:[#allocation90_spill] sm:$0xff] %v5907_v38  ;;  %10409 = vst [vmem:[#allocation91_spill] sm:$0xff] %v5909_v12  ;;  %v1598_v31 = vmax.f32 %v1597_v3, %v5907_v38  ;;  %v1736_v34 = vmax.f32 %v1735_v8, %v5909_v12 }
 0x222   : > { %v5913_v51 = vpop.f32.mrb[36].mxu0  ;;  %v5915_v26 = vpop.f32.mrb[36].mxu1 }
 0x223   : > { %10410 = vst [vmem:[#allocation92_spill] sm:$0xff] %v5913_v51  ;;  %10411 = vst [vmem:[#allocation93_spill] sm:$0xff] %v5915_v26  ;;  %v1530_v43 = vmax.f32 %v1529_v18, %v5913_v51  ;;  %v1668_v50 = vmax.f32 %v1667_v25, %v5915_v26  ;;  %v5919_v0 = vpop.f32.mrb[37].mxu0  ;;  %v5921_v58 = vpop.f32.mrb[37].mxu1 }
 0x224   : > { %10412 = vst [vmem:[#allocation94_spill] sm:$0xff] %v5919_v0  ;;  %10413 = vst [vmem:[#allocation95_spill] sm:$0xff] %v5921_v58  ;;  %v1599_v59 = vmax.f32 %v1598_v31, %v5919_v0  ;;  %v1737_v60 = vmax.f32 %v1736_v34, %v5921_v58  ;;  %v5925_v17 = vpop.f32.mrb[38].mxu0  ;;  %v5927_v3 = vpop.f32.mrb[38].mxu1 }
 0x225   : > { %10414 = vst [vmem:[#allocation96_spill] sm:$0xff] %v5925_v17  ;;  %10415 = vst [vmem:[#allocation97_spill] sm:$0xff] %v5927_v3  ;;  %v1531_v8 = vmax.f32 %v1530_v43, %v5925_v17  ;;  %v1669_v12 = vmax.f32 %v1668_v50, %v5927_v3  ;;  %v5931_v38 = vpop.f32.mrb[39].mxu0  ;;  %v5933_v18 = vpop.f32.mrb[39].mxu1 }
 0x226   : > { %10416 = vst [vmem:[#allocation98_spill] sm:$0xff] %v5931_v38  ;;  %10417 = vst [vmem:[#allocation99_spill] sm:$0xff] %v5933_v18  ;;  %v1600_v25 = vmax.f32 %v1599_v59, %v5931_v38  ;;  %v1738_v26 = vmax.f32 %v1737_v60, %v5933_v18 }
 0x22a   : > { %v5937_v51 = vpop.f32.mrb[40].mxu0  ;;  %v5939_v31 = vpop.f32.mrb[40].mxu1 }
 0x22b   : > { %10418 = vst [vmem:[#allocation100_spill] sm:$0xff] %v5937_v51  ;;  %10419 = vst [vmem:[#allocation101_spill] sm:$0xff] %v5939_v31  ;;  %v1532_v34 = vmax.f32 %v1531_v8, %v5937_v51  ;;  %v1670_v58 = vmax.f32 %v1669_v12, %v5939_v31  ;;  %v5943_v0 = vpop.f32.mrb[41].mxu0  ;;  %v5945_v43 = vpop.f32.mrb[41].mxu1 }
 0x22c   : > { %10420 = vst [vmem:[#allocation102_spill] sm:$0xff] %v5943_v0  ;;  %10421 = vst [vmem:[#allocation103_spill] sm:$0xff] %v5945_v43  ;;  %v1601_v50 = vmax.f32 %v1600_v25, %v5943_v0  ;;  %v1739_v3 = vmax.f32 %v1738_v26, %v5945_v43  ;;  %v5949_v17 = vpop.f32.mrb[42].mxu0  ;;  %v5951_v59 = vpop.f32.mrb[42].mxu1 }
 0x22d   : > { %10422 = vst [vmem:[#allocation104_spill] sm:$0xff] %v5949_v17  ;;  %10423 = vst [vmem:[#allocation105_spill] sm:$0xff] %v5951_v59  ;;  %v1533_v60 = vmax.f32 %v1532_v34, %v5949_v17  ;;  %v1671_v18 = vmax.f32 %v1670_v58, %v5951_v59  ;;  %v5955_v38 = vpop.f32.mrb[43].mxu0  ;;  %v5957_v8 = vpop.f32.mrb[43].mxu1 }
 0x22e   : > { %10424 = vst [vmem:[#allocation106_spill] sm:$0xff] %v5955_v38  ;;  %10425 = vst [vmem:[#allocation107_spill] sm:$0xff] %v5957_v8  ;;  %v1602_v12 = vmax.f32 %v1601_v50, %v5955_v38  ;;  %v1740_v31 = vmax.f32 %v1739_v3, %v5957_v8 }
 0x232   : > { %v5961_v51 = vpop.f32.mrb[44].mxu0  ;;  %v5963_v26 = vpop.f32.mrb[44].mxu1 }
 0x233   : > { %10426 = vst [vmem:[#allocation108_spill] sm:$0xff] %v5961_v51  ;;  %10427 = vst [vmem:[#allocation109_spill] sm:$0xff] %v5963_v26  ;;  %v1534_v25 = vmax.f32 %v1533_v60, %v5961_v51  ;;  %v1672_v34 = vmax.f32 %v1671_v18, %v5963_v26  ;;  %v5967_v17 = vpop.f32.mrb[45].mxu0  ;;  %v5969_v58 = vpop.f32.mrb[45].mxu1 }
 0x234   : > { %10428 = vst [vmem:[#allocation110_spill] sm:$0xff] %v5967_v17  ;;  %10429 = vst [vmem:[#allocation111_spill] sm:$0xff] %v5969_v58  ;;  %v1603_v59 = vmax.f32 %v1602_v12, %v5967_v17  ;;  %v1741_v50 = vmax.f32 %v1740_v31, %v5969_v58  ;;  %v5973_v38 = vpop.f32.mrb[46].mxu0  ;;  %v5975_v3 = vpop.f32.mrb[46].mxu1  ;;  %v4271_v31 = vld [vmem:[%s5989_s18 + $0xc0] sm:$0xff]   ;;  %v4273_v17 = vld [vmem:[%s5989_s18 + $0xc8] sm:$0xff]  }
 0x235   : > { %10430 = vst [vmem:[#allocation112_spill] sm:$0xff] %v5973_v38  ;;  %10431 = vst [vmem:[#allocation113_spill] sm:$0xff] %v5975_v3  ;;  %v1535_v8 = vmax.f32 %v1534_v25, %v5973_v38  ;;  %v1673_v43 = vmax.f32 %v1672_v34, %v5975_v3  ;;  %v5979_v0 = vpop.f32.mrb[47].mxu0  ;;  %v5981_v60 = vpop.f32.mrb[47].mxu1  ;;  %v4272_v12 = vld [vmem:[%s5989_s18 + $0x40] sm:$0xff]   ;;  %3321 = vxpose.xlu1.c.b16.start [1/8] (narrow) %v4271_v31, 16 }
 0x236   : > { %10432 = vst [vmem:[#allocation114_spill] sm:$0xff] %v5979_v0  ;;  %10433 = vst [vmem:[#allocation115_spill] sm:$0xff] %v5981_v60  ;;  %v1604_v18 = vmax.f32 %v1603_v59, %v5979_v0  ;;  %v1742_v26 = vmax.f32 %v1741_v50, %v5981_v60  ;;  %3289 = vxpose.xlu0.c.b16.start [1/8] (narrow) %v4272_v12, 16  ;;  %v4274_v12 = vld [vmem:[%s5989_s18 + $0x48] sm:$0xff]  }
 0x239   : > { %3322 = vxpose.xlu1.c.b16.cont [2/8] (narrow) %v4273_v17, 16 }
 0x23a   : > { %v5993_v25 = vpop.f32.mrb[48].mxu0  ;;  %v5995_v34 = vpop.f32.mrb[48].mxu1  ;;  %3290 = vxpose.xlu0.c.b16.cont [2/8] (narrow) %v4274_v12, 16 }
 0x23b   : > { %10434 = vst [vmem:[#allocation116_spill] sm:$0xff] %v5993_v25  ;;  %10435 = vst [vmem:[#allocation117_spill] sm:$0xff] %v5995_v34  ;;  %v1536_v59 = vmax.f32 %v1535_v8, %v5993_v25  ;;  %v1674_v50 = vmax.f32 %v1673_v43, %v5995_v34  ;;  %v5999_v60 = vpop.f32.mrb[49].mxu0  ;;  %v6001_v3 = vpop.f32.mrb[49].mxu1 }
 0x23c   : > { %10436 = vst [vmem:[#allocation118_spill] sm:$0xff] %v5999_v60  ;;  %10437 = vst [vmem:[#allocation119_spill] sm:$0xff] %v6001_v3  ;;  %v1605_v0 = vmax.f32 %v1604_v18, %v5999_v60  ;;  %v1743_v38 = vmax.f32 %v1742_v26, %v6001_v3  ;;  %v6005_v31 = vpop.f32.mrb[50].mxu0  ;;  %v6007_v58 = vpop.f32.mrb[50].mxu1  ;;  %v4275_v26 = vld [vmem:[%s5989_s18 + $0xd0] sm:$0xff]  }
 0x23d   : > { %10438 = vst [vmem:[#allocation120_spill] sm:$0xff] %v6005_v31  ;;  %10439 = vst [vmem:[#allocation121_spill] sm:$0xff] %v6007_v58  ;;  %v1537_v8 = vmax.f32 %v1536_v59, %v6005_v31  ;;  %v1675_v43 = vmax.f32 %v1674_v50, %v6007_v58  ;;  %v6013_v34 = vpop.f32.mrb[51].mxu0  ;;  %v6015_v25 = vpop.f32.mrb[51].mxu1  ;;  %v4276_v3 = vld [vmem:[%s5989_s18 + $0x50] sm:$0xff]   ;;  %3323 = vxpose.xlu1.c.b16.cont [3/8] (narrow) %v4275_v26, 16 }
 0x23e   : > { %10440 = vst [vmem:[#allocation122_spill] sm:$0xff] %v6013_v34  ;;  %10441 = vst [vmem:[#allocation123_spill] sm:$0xff] %v6015_v25  ;;  %v1606_v51 = vmax.f32 %v1605_v0, %v6013_v34  ;;  %v1744_v18 = vmax.f32 %v1743_v38, %v6015_v25  ;;  %3291 = vxpose.xlu0.c.b16.cont [3/8] (narrow) %v4276_v3, 16  ;;  %v4277_v26 = vld [vmem:[%s5989_s18 + $0xd8] sm:$0xff]  }
 0x23f   : > { %v4278_v3 = vld [vmem:[%s5989_s18 + $0x58] sm:$0xff]  }
 0x241   : > { %3324 = vxpose.xlu1.c.b16.cont [4/8] (narrow) %v4277_v26, 16 }
 0x242   : > { %v6021_v60 = vpop.f32.mrb[52].mxu0  ;;  %v6023_v30 = vpop.f32.mrb[52].mxu1  ;;  %3292 = vxpose.xlu0.c.b16.cont [4/8] (narrow) %v4278_v3, 16 }
 0x243   : > { %10442 = vst [vmem:[#allocation124_spill] sm:$0xff] %v6021_v60  ;;  %10443 = vst [vmem:[#allocation125_spill] sm:$0xff] %v6023_v30  ;;  %v1538_v59 = vmax.f32 %v1537_v8, %v6021_v60  ;;  %v1676_v50 = vmax.f32 %v1675_v43, %v6023_v30  ;;  %v6027_v58 = vpop.f32.mrb[53].mxu0  ;;  %v6029_v38 = vpop.f32.mrb[53].mxu1 }
 0x244   : > { %10444 = vst [vmem:[#allocation126_spill] sm:$0xff] %v6027_v58  ;;  %10445 = vst [vmem:[#allocation127_spill] sm:$0xff] %v6029_v38  ;;  %v1607_v0 = vmax.f32 %v1606_v51, %v6027_v58  ;;  %v1745_v17 = vmax.f32 %v1744_v18, %v6029_v38  ;;  %v6033_v12 = vpop.f32.mrb[54].mxu0  ;;  %v6035_v25 = vpop.f32.mrb[54].mxu1  ;;  %v4279_v18 = vld [vmem:[%s5989_s18 + $0xe0] sm:$0xff]  }
 0x245   : > { %10446 = vst [vmem:[#allocation128_spill] sm:$0xff] %v6033_v12  ;;  %10447 = vst [vmem:[#allocation129_spill] sm:$0xff] %v6035_v25  ;;  %v1539_v8 = vmax.f32 %v1538_v59, %v6033_v12  ;;  %v1677_v43 = vmax.f32 %v1676_v50, %v6035_v25  ;;  %v6041_v30 = vpop.f32.mrb[55].mxu0  ;;  %v6043_v60 = vpop.f32.mrb[55].mxu1  ;;  %v4280_v38 = vld [vmem:[%s5989_s18 + $0x60] sm:$0xff]   ;;  %3325 = vxpose.xlu1.c.b16.cont [5/8] (narrow) %v4279_v18, 16 }
 0x246   : > { %10448 = vst [vmem:[#allocation130_spill] sm:$0xff] %v6041_v30  ;;  %10449 = vst [vmem:[#allocation131_spill] sm:$0xff] %v6043_v60  ;;  %v1608_v34 = vmax.f32 %v1607_v0, %v6041_v30  ;;  %v1746_v51 = vmax.f32 %v1745_v17, %v6043_v60  ;;  %3293 = vxpose.xlu0.c.b16.cont [5/8] (narrow) %v4280_v38, 16  ;;  %v4281_v18 = vld [vmem:[%s5989_s18 + $0xe8] sm:$0xff]  }
 0x247   : > { %v4282_v38 = vld [vmem:[%s5989_s18 + $0x68] sm:$0xff]  }
 0x249   : > { %3326 = vxpose.xlu1.c.b16.cont [6/8] (narrow) %v4281_v18, 16 }
 0x24a   : > { %v6049_v58 = vpop.f32.mrb[56].mxu0  ;;  %v6051_v31 = vpop.f32.mrb[56].mxu1  ;;  %3294 = vxpose.xlu0.c.b16.cont [6/8] (narrow) %v4282_v38, 16 }
 0x24b   : > { %10450 = vst [vmem:[#allocation132_spill] sm:$0xff] %v6049_v58  ;;  %10451 = vst [vmem:[#allocation133_spill] sm:$0xff] %v6051_v31  ;;  %v1540_v59 = vmax.f32 %v1539_v8, %v6049_v58  ;;  %v1678_v50 = vmax.f32 %v1677_v43, %v6051_v31  ;;  %v6055_v25 = vpop.f32.mrb[57].mxu0  ;;  %v6057_v0 = vpop.f32.mrb[57].mxu1 }
 0x24c   : > { %10452 = vst [vmem:[#allocation134_spill] sm:$0xff] %v6055_v25  ;;  %10453 = vst [vmem:[#allocation135_spill] sm:$0xff] %v6057_v0  ;;  %v1609_v17 = vmax.f32 %v1608_v34, %v6055_v25  ;;  %v1747_v26 = vmax.f32 %v1746_v51, %v6057_v0  ;;  %v6061_v3 = vpop.f32.mrb[58].mxu0  ;;  %v6063_v60 = vpop.f32.mrb[58].mxu1  ;;  %v4283_v51 = vld [vmem:[%s5989_s18 + $0xf0] sm:$0xff]  }
 0x24d   : > { %10454 = vst [vmem:[#allocation136_spill] sm:$0xff] %v6061_v3  ;;  %10455 = vst [vmem:[#allocation137_spill] sm:$0xff] %v6063_v60  ;;  %v1541_v8 = vmax.f32 %v1540_v59, %v6061_v3  ;;  %v1679_v43 = vmax.f32 %v1678_v50, %v6063_v60  ;;  %v6069_v31 = vpop.f32.mrb[59].mxu0  ;;  %v6071_v58 = vpop.f32.mrb[59].mxu1  ;;  %v4284_v0 = vld [vmem:[%s5989_s18 + $0x70] sm:$0xff]   ;;  %3327 = vxpose.xlu1.c.b16.cont [7/8] (narrow) %v4283_v51, 16 }
 0x24e   : > { %10456 = vst [vmem:[#allocation138_spill] sm:$0xff] %v6069_v31  ;;  %10457 = vst [vmem:[#allocation139_spill] sm:$0xff] %v6071_v58  ;;  %v1610_v30 = vmax.f32 %v1609_v17, %v6069_v31  ;;  %v1748_v34 = vmax.f32 %v1747_v26, %v6071_v58  ;;  %3295 = vxpose.xlu0.c.b16.cont [7/8] (narrow) %v4284_v0, 16 }
 0x252   : > { %v6077_v25 = vpop.f32.mrb[60].mxu0  ;;  %v6079_v12 = vpop.f32.mrb[60].mxu1 }
 0x253   : > { %10458 = vst [vmem:[#allocation140_spill] sm:$0xff] %v6077_v25  ;;  %10459 = vst [vmem:[#allocation141_spill] sm:$0xff] %v6079_v12  ;;  %v1542_v59 = vmax.f32 %v1541_v8, %v6077_v25  ;;  %v1680_v50 = vmax.f32 %v1679_v43, %v6079_v12  ;;  %v6083_v60 = vpop.f32.mrb[61].mxu0  ;;  %v6085_v3 = vpop.f32.mrb[61].mxu1 }
 0x254   : > { %10460 = vst [vmem:[#allocation142_spill] sm:$0xff] %v6083_v60  ;;  %10461 = vst [vmem:[#allocation143_spill] sm:$0xff] %v6085_v3  ;;  %v1611_v17 = vmax.f32 %v1610_v30, %v6083_v60  ;;  %v1749_v26 = vmax.f32 %v1748_v34, %v6085_v3  ;;  %v6089_v18 = vpop.f32.mrb[62].mxu0  ;;  %v6091_v38 = vpop.f32.mrb[62].mxu1 }
 0x255   : > { %10462 = vst [vmem:[#allocation144_spill] sm:$0xff] %v6089_v18  ;;  %10463 = vst [vmem:[#allocation145_spill] sm:$0xff] %v6091_v38  ;;  %v1543_v58 = vmax.f32 %v1542_v59, %v6089_v18  ;;  %v1681_v0 = vmax.f32 %v1680_v50, %v6091_v38  ;;  %v6095_v51 = vpop.f32.mrb[63].mxu0  ;;  %v6097_v8 = vpop.f32.mrb[63].mxu1 }
 0x256   : > { %10464 = vst [vmem:[#allocation146_spill] sm:$0xff] %v6095_v51  ;;  %10465 = vst [vmem:[#allocation147_spill] sm:$0xff] %v6097_v8  ;;  %v1612_v43 = vmax.f32 %v1611_v17, %v6095_v51  ;;  %v1750_v12 = vmax.f32 %v1749_v26, %v6097_v8 }
 0x25a   : > { %v6101_v25 = vpop.f32.mrb[64].mxu0  ;;  %v6103_v30 = vpop.f32.mrb[64].mxu1 }
 0x25b   : > { %10466 = vst [vmem:[#allocation148_spill] sm:$0xff] %v6101_v25  ;;  %10467 = vst [vmem:[#allocation149_spill] sm:$0xff] %v6103_v30  ;;  %v1544_v34 = vmax.f32 %v1543_v58, %v6101_v25  ;;  %v1682_v3 = vmax.f32 %v1681_v0, %v6103_v30  ;;  %v6107_v60 = vpop.f32.mrb[65].mxu0  ;;  %v6109_v59 = vpop.f32.mrb[65].mxu1 }
 0x25c   : > { %10468 = vst [vmem:[#allocation150_spill] sm:$0xff] %v6107_v60  ;;  %10469 = vst [vmem:[#allocation151_spill] sm:$0xff] %v6109_v59  ;;  %v1613_v50 = vmax.f32 %v1612_v43, %v6107_v60  ;;  %v1751_v38 = vmax.f32 %v1750_v12, %v6109_v59  ;;  %v6113_v18 = vpop.f32.mrb[66].mxu0  ;;  %v6115_v17 = vpop.f32.mrb[66].mxu1 }
 0x25d   : > { %10470 = vst [vmem:[#allocation152_spill] sm:$0xff] %v6113_v18  ;;  %10471 = vst [vmem:[#allocation153_spill] sm:$0xff] %v6115_v17  ;;  %v1545_v26 = vmax.f32 %v1544_v34, %v6113_v18  ;;  %v1683_v8 = vmax.f32 %v1682_v3, %v6115_v17  ;;  %v6119_v51 = vpop.f32.mrb[67].mxu0  ;;  %v6121_v58 = vpop.f32.mrb[67].mxu1 }
 0x25e   : > { %10472 = vst [vmem:[#allocation154_spill] sm:$0xff] %v6119_v51  ;;  %10473 = vst [vmem:[#allocation155_spill] sm:$0xff] %v6121_v58  ;;  %v1614_v0 = vmax.f32 %v1613_v50, %v6119_v51  ;;  %v1752_v30 = vmax.f32 %v1751_v38, %v6121_v58 }
 0x262   : > { %v6125_v25 = vpop.f32.mrb[68].mxu0  ;;  %v6127_v43 = vpop.f32.mrb[68].mxu1 }
 0x263   : > { %10474 = vst [vmem:[#allocation156_spill] sm:$0xff] %v6125_v25  ;;  %10475 = vst [vmem:[#allocation157_spill] sm:$0xff] %v6127_v43  ;;  %v1546_v12 = vmax.f32 %v1545_v26, %v6125_v25  ;;  %v1684_v59 = vmax.f32 %v1683_v8, %v6127_v43  ;;  %v6131_v60 = vpop.f32.mrb[69].mxu0  ;;  %v6133_v34 = vpop.f32.mrb[69].mxu1 }
 0x264   : > { %10476 = vst [vmem:[#allocation158_spill] sm:$0xff] %v6131_v60  ;;  %10477 = vst [vmem:[#allocation159_spill] sm:$0xff] %v6133_v34  ;;  %v1615_v3 = vmax.f32 %v1614_v0, %v6131_v60  ;;  %v1753_v18 = vmax.f32 %v1752_v30, %v6133_v34  ;;  %v6137_v31 = vpop.f32.mrb[70].mxu0  ;;  %v6139_v50 = vpop.f32.mrb[70].mxu1 }
 0x265   : > { %10478 = vst [vmem:[#allocation160_spill] sm:$0xff] %v6137_v31  ;;  %10479 = vst [vmem:[#allocation161_spill] sm:$0xff] %v6139_v50  ;;  %v1547_v38 = vmax.f32 %v1546_v12, %v6137_v31  ;;  %v1685_v51 = vmax.f32 %v1684_v59, %v6139_v50  ;;  %v6143_v35 = vpop.f32.mrb[71].mxu0  ;;  %v6145_v26 = vpop.f32.mrb[71].mxu1 }
 0x266   : > { %10480 = vst [vmem:[#allocation162_spill] sm:$0xff] %v6143_v35  ;;  %10481 = vst [vmem:[#allocation163_spill] sm:$0xff] %v6145_v26  ;;  %v1616_v8 = vmax.f32 %v1615_v3, %v6143_v35  ;;  %v1754_v25 = vmax.f32 %v1753_v18, %v6145_v26 }
 0x26a   : > { %v6149_v29 = vpop.f32.mrb[72].mxu0  ;;  %v6151_v0 = vpop.f32.mrb[72].mxu1 }
 0x26b   : > { %10482 = vst [vmem:[#allocation164_spill] sm:$0xff] %v6149_v29  ;;  %10483 = vst [vmem:[#allocation165_spill] sm:$0xff] %v6151_v0  ;;  %v1548_v30 = vmax.f32 %v1547_v38, %v6149_v29  ;;  %v1686_v60 = vmax.f32 %v1685_v51, %v6151_v0  ;;  %v6155_v22 = vpop.f32.mrb[73].mxu0  ;;  %v6157_v12 = vpop.f32.mrb[73].mxu1 }
 0x26c   : > { %10484 = vst [vmem:[#allocation166_spill] sm:$0xff] %v6155_v22  ;;  %10485 = vst [vmem:[#allocation167_spill] sm:$0xff] %v6157_v12  ;;  %v1617_v59 = vmax.f32 %v1616_v8, %v6155_v22  ;;  %v1755_v31 = vmax.f32 %v1754_v25, %v6157_v12  ;;  %v6161_v14 = vpop.f32.mrb[74].mxu0  ;;  %v6163_v3 = vpop.f32.mrb[74].mxu1 }
 0x26d   : > { %10486 = vst [vmem:[#allocation168_spill] sm:$0xff] %v6161_v14  ;;  %10487 = vst [vmem:[#allocation169_spill] sm:$0xff] %v6163_v3  ;;  %v1549_v18 = vmax.f32 %v1548_v30, %v6161_v14  ;;  %v1687_v35 = vmax.f32 %v1686_v60, %v6163_v3  ;;  %v6167_v21 = vpop.f32.mrb[75].mxu0  ;;  %v6169_v38 = vpop.f32.mrb[75].mxu1 }
 0x26e   : > { %10488 = vst [vmem:[#allocation170_spill] sm:$0xff] %v6167_v21  ;;  %10489 = vst [vmem:[#allocation171_spill] sm:$0xff] %v6169_v38  ;;  %v1618_v51 = vmax.f32 %v1617_v59, %v6167_v21  ;;  %v1756_v29 = vmax.f32 %v1755_v31, %v6169_v38 }
 0x272   : > { %v6173_v13 = vpop.f32.mrb[76].mxu0  ;;  %v6175_v8 = vpop.f32.mrb[76].mxu1 }
 0x273   : > { %10490 = vst [vmem:[#allocation172_spill] sm:$0xff] %v6173_v13  ;;  %10491 = vst [vmem:[#allocation173_spill] sm:$0xff] %v6175_v8  ;;  %v1550_v25 = vmax.f32 %v1549_v18, %v6173_v13  ;;  %v1688_v22 = vmax.f32 %v1687_v35, %v6175_v8  ;;  %v6179_v7 = vpop.f32.mrb[77].mxu0  ;;  %v6181_v30 = vpop.f32.mrb[77].mxu1 }
 0x274   : > { %10492 = vst [vmem:[#allocation174_spill] sm:$0xff] %v6179_v7  ;;  %10493 = vst [vmem:[#allocation175_spill] sm:$0xff] %v6181_v30  ;;  %v1619_v60 = vmax.f32 %v1618_v51, %v6179_v7  ;;  %v1757_v14 = vmax.f32 %v1756_v29, %v6181_v30  ;;  %v6185_v9 = vpop.f32.mrb[78].mxu0  ;;  %v6187_v59 = vpop.f32.mrb[78].mxu1 }
 0x275   : > { %10494 = vst [vmem:[#allocation176_spill] sm:$0xff] %v6185_v9  ;;  %10495 = vst [vmem:[#allocation177_spill] sm:$0xff] %v6187_v59  ;;  %v1551_v31 = vmax.f32 %v1550_v25, %v6185_v9  ;;  %v1689_v21 = vmax.f32 %v1688_v22, %v6187_v59  ;;  %v6191_v4 = vpop.f32.mrb[79].mxu0  ;;  %v6193_v18 = vpop.f32.mrb[79].mxu1 }
 0x276   : > { %10496 = vst [vmem:[#allocation178_spill] sm:$0xff] %v6191_v4  ;;  %10497 = vst [vmem:[#allocation179_spill] sm:$0xff] %v6193_v18  ;;  %v1620_v35 = vmax.f32 %v1619_v60, %v6191_v4  ;;  %v1758_v13 = vmax.f32 %v1757_v14, %v6193_v18 }
 0x27a   : > { %v6197_v63 = vpop.f32.mrb[80].mxu0  ;;  %v6199_v51 = vpop.f32.mrb[80].mxu1 }
 0x27b   : > { %10498 = vst [vmem:[#allocation180_spill] sm:$0xff] %v6197_v63  ;;  %10499 = vst [vmem:[#allocation181_spill] sm:$0xff] %v6199_v51  ;;  %v1552_v29 = vmax.f32 %v1551_v31, %v6197_v63  ;;  %v1690_v7 = vmax.f32 %v1689_v21, %v6199_v51  ;;  %v6203_v55 = vpop.f32.mrb[81].mxu0  ;;  %v6205_v25 = vpop.f32.mrb[81].mxu1 }
 0x27c   : > { %10500 = vst [vmem:[#allocation182_spill] sm:$0xff] %v6203_v55  ;;  %10501 = vst [vmem:[#allocation183_spill] sm:$0xff] %v6205_v25  ;;  %v1621_v22 = vmax.f32 %v1620_v35, %v6203_v55  ;;  %v1759_v9 = vmax.f32 %v1758_v13, %v6205_v25  ;;  %v6209_v47 = vpop.f32.mrb[82].mxu0  ;;  %v6211_v60 = vpop.f32.mrb[82].mxu1 }
 0x27d   : > { %10502 = vst [vmem:[#allocation184_spill] sm:$0xff] %v6209_v47  ;;  %10503 = vst [vmem:[#allocation185_spill] sm:$0xff] %v6211_v60  ;;  %v1553_v14 = vmax.f32 %v1552_v29, %v6209_v47  ;;  %v1691_v4 = vmax.f32 %v1690_v7, %v6211_v60  ;;  %v6215_v54 = vpop.f32.mrb[83].mxu0  ;;  %v6217_v31 = vpop.f32.mrb[83].mxu1  ;;  %v10727_v60 = vld [vmem:[#allocation68_spill] sm:$0xff] }
 0x27e   : > { %10504 = vst [vmem:[#allocation186_spill] sm:$0xff] %v6215_v54  ;;  %10505 = vst [vmem:[#allocation187_spill] sm:$0xff] %v6217_v31  ;;  %v1622_v21 = vmax.f32 %v1621_v22, %v6215_v54  ;;  %v1760_v63 = vmax.f32 %v1759_v9, %v6217_v31  ;;  %v10724_v31 = vld [vmem:[#allocation65_spill] sm:$0xff] }
 0x282   : > { %v6221_v46 = vpop.f32.mrb[84].mxu0  ;;  %v6223_v35 = vpop.f32.mrb[84].mxu1 }
 0x283   : > { %10506 = vst [vmem:[#allocation188_spill] sm:$0xff] %v6221_v46  ;;  %10507 = vst [vmem:[#allocation189_spill] sm:$0xff] %v6223_v35  ;;  %v1554_v13 = vmax.f32 %v1553_v14, %v6221_v46  ;;  %v1692_v55 = vmax.f32 %v1691_v4, %v6223_v35  ;;  %v6227_v37 = vpop.f32.mrb[85].mxu0  ;;  %v6229_v29 = vpop.f32.mrb[85].mxu1  ;;  %v10721_v35 = vld [vmem:[#allocation64_spill] sm:$0xff] }
 0x284   : > { %10508 = vst [vmem:[#allocation190_spill] sm:$0xff] %v6227_v37  ;;  %10509 = vst [vmem:[#allocation191_spill] sm:$0xff] %v6229_v29  ;;  %v1623_v7 = vmax.f32 %v1622_v21, %v6227_v37  ;;  %v1761_v47 = vmax.f32 %v1760_v63, %v6229_v29  ;;  %v6233_v33 = vpop.f32.mrb[86].mxu0  ;;  %v6235_v22 = vpop.f32.mrb[86].mxu1 }
 0x285   : > { %10510 = vst [vmem:[#allocation192_spill] sm:$0xff] %v6233_v33  ;;  %10511 = vst [vmem:[#allocation193_spill] sm:$0xff] %v6235_v22  ;;  %v1555_v9 = vmax.f32 %v1554_v13, %v6233_v33  ;;  %v1693_v54 = vmax.f32 %v1692_v55, %v6235_v22  ;;  %v6239_v36 = vpop.f32.mrb[87].mxu0  ;;  %v6241_v14 = vpop.f32.mrb[87].mxu1 }
 0x286   : > { %10512 = vst [vmem:[#allocation194_spill] sm:$0xff] %v6239_v36  ;;  %10513 = vst [vmem:[#allocation195_spill] sm:$0xff] %v6241_v14  ;;  %v1624_v4 = vmax.f32 %v1623_v7, %v6239_v36  ;;  %v1762_v46 = vmax.f32 %v1761_v47, %v6241_v14 }
 0x28a   : > { %v6245_v32 = vpop.f32.mrb[88].mxu0  ;;  %v6247_v21 = vpop.f32.mrb[88].mxu1 }
 0x28b   : > { %10514 = vst [vmem:[#allocation196_spill] sm:$0xff] %v6245_v32  ;;  %10515 = vst [vmem:[#allocation197_spill] sm:$0xff] %v6247_v21  ;;  %v1556_v63 = vmax.f32 %v1555_v9, %v6245_v32  ;;  %v1694_v37 = vmax.f32 %v1693_v54, %v6247_v21  ;;  %v6251_v28 = vpop.f32.mrb[89].mxu0  ;;  %v6253_v13 = vpop.f32.mrb[89].mxu1  ;;  %v10711_v21 = vld [vmem:[#allocation57_spill] sm:$0xff] }
 0x28c   : > { %10516 = vst [vmem:[#allocation198_spill] sm:$0xff] %v6251_v28  ;;  %10517 = vst [vmem:[#allocation199_spill] sm:$0xff] %v6253_v13  ;;  %v1625_v55 = vmax.f32 %v1624_v4, %v6251_v28  ;;  %v1763_v33 = vmax.f32 %v1762_v46, %v6253_v13  ;;  %v6257_v24 = vpop.f32.mrb[90].mxu0  ;;  %v6259_v7 = vpop.f32.mrb[90].mxu1 }
 0x28d   : > { %10518 = vst [vmem:[#allocation200_spill] sm:$0xff] %v6257_v24  ;;  %10519 = vst [vmem:[#allocation201_spill] sm:$0xff] %v6259_v7  ;;  %v1557_v47 = vmax.f32 %v1556_v63, %v6257_v24  ;;  %v1695_v36 = vmax.f32 %v1694_v37, %v6259_v7  ;;  %v6263_v27 = vpop.f32.mrb[91].mxu0  ;;  %v6265_v9 = vpop.f32.mrb[91].mxu1 }
 0x28e   : > { %10520 = vst [vmem:[#allocation202_spill] sm:$0xff] %v6263_v27  ;;  %10521 = vst [vmem:[#allocation203_spill] sm:$0xff] %v6265_v9  ;;  %v1626_v54 = vmax.f32 %v1625_v55, %v6263_v27  ;;  %v1764_v32 = vmax.f32 %v1763_v33, %v6265_v9 }
 0x292   : > { %v6269_v23 = vpop.f32.mrb[92].mxu0  ;;  %v6271_v4 = vpop.f32.mrb[92].mxu1 }
 0x293   : > { %10522 = vst [vmem:[#allocation204_spill] sm:$0xff] %v6269_v23  ;;  %10523 = vst [vmem:[#allocation205_spill] sm:$0xff] %v6271_v4  ;;  %v1558_v46 = vmax.f32 %v1557_v47, %v6269_v23  ;;  %v1696_v28 = vmax.f32 %v1695_v36, %v6271_v4  ;;  %v6275_v20 = vpop.f32.mrb[93].mxu0  ;;  %v6277_v63 = vpop.f32.mrb[93].mxu1 }
 0x294   : > { %10524 = vst [vmem:[#allocation206_spill] sm:$0xff] %v6275_v20  ;;  %10525 = vst [vmem:[#allocation207_spill] sm:$0xff] %v6277_v63  ;;  %v1627_v37 = vmax.f32 %v1626_v54, %v6275_v20  ;;  %v1765_v24 = vmax.f32 %v1764_v32, %v6277_v63  ;;  %v6281_v16 = vpop.f32.mrb[94].mxu0  ;;  %v6283_v55 = vpop.f32.mrb[94].mxu1 }
 0x295   : > { %10526 = vst [vmem:[#allocation208_spill] sm:$0xff] %v6281_v16  ;;  %10527 = vst [vmem:[#allocation209_spill] sm:$0xff] %v6283_v55  ;;  %v1559_v33 = vmax.f32 %v1558_v46, %v6281_v16  ;;  %v1697_v27 = vmax.f32 %v1696_v28, %v6283_v55  ;;  %v6287_v19 = vpop.f32.mrb[95].mxu0  ;;  %v6289_v47 = vpop.f32.mrb[95].mxu1 }
 0x296   : > { %10528 = vst [vmem:[#allocation210_spill] sm:$0xff] %v6287_v19  ;;  %10529 = vst [vmem:[#allocation211_spill] sm:$0xff] %v6289_v47  ;;  %v1628_v36 = vmax.f32 %v1627_v37, %v6287_v19  ;;  %v1766_v23 = vmax.f32 %v1765_v24, %v6289_v47  ;;  %v5127_v47 = vmov 1966171168  }
 0x297   : > { %v1796_v55 = vunpack.c.l.s4 %v5127_v47 }
 0x29a   : > { %v6293_v15 = vpop.f32.mrb[96].mxu0  ;;  %v6295_v54 = vpop.f32.mrb[96].mxu1 }
 0x29b   : > { %10530 = vst [vmem:[#allocation212_spill] sm:$0xff] %v6293_v15  ;;  %10531 = vst [vmem:[#allocation213_spill] sm:$0xff] %v6295_v54  ;;  %v1560_v32 = vmax.f32 %v1559_v33, %v6293_v15  ;;  %v1698_v20 = vmax.f32 %v1697_v27, %v6295_v54  ;;  %v6299_v11 = vpop.f32.mrb[97].mxu0  ;;  %v6301_v46 = vpop.f32.mrb[97].mxu1 }
 0x29c   : > { %10532 = vst [vmem:[#allocation214_spill] sm:$0xff] %v6299_v11  ;;  %10533 = vst [vmem:[#allocation215_spill] sm:$0xff] %v6301_v46  ;;  %v1629_v28 = vmax.f32 %v1628_v36, %v6299_v11  ;;  %v1767_v16 = vmax.f32 %v1766_v23, %v6301_v46  ;;  %v6305_v6 = vpop.f32.mrb[98].mxu0  ;;  %v6307_v37 = vpop.f32.mrb[98].mxu1 }
 0x29d   : > { %10534 = vst [vmem:[#allocation216_spill] sm:$0xff] %v6305_v6  ;;  %10535 = vst [vmem:[#allocation217_spill] sm:$0xff] %v6307_v37  ;;  %v1561_v24 = vmax.f32 %v1560_v32, %v6305_v6  ;;  %v1699_v19 = vmax.f32 %v1698_v20, %v6307_v37  ;;  %v6311_v10 = vpop.f32.mrb[99].mxu0  ;;  %v6313_v33 = vpop.f32.mrb[99].mxu1 }
 0x29e   : > { %10536 = vst [vmem:[#allocation218_spill] sm:$0xff] %v6311_v10  ;;  %10537 = vst [vmem:[#allocation219_spill] sm:$0xff] %v6313_v33  ;;  %v1630_v27 = vmax.f32 %v1629_v28, %v6311_v10  ;;  %v1768_v5 = vmax.f32 %v1767_v16, %v6313_v33 }
 0x2a2   : > { %v6317_v2 = vpop.f32.mrb[100].mxu0  ;;  %v6319_v36 = vpop.f32.mrb[100].mxu1 }
 0x2a3   : > { %10538 = vst [vmem:[#allocation220_spill] sm:$0xff] %v6317_v2  ;;  %10539 = vst [vmem:[#allocation221_spill] sm:$0xff] %v6319_v36  ;;  %v1562_v23 = vmax.f32 %v1561_v24, %v6317_v2  ;;  %v1700_v46 = vmax.f32 %v1699_v19, %v6319_v36  ;;  %v6323_v54 = vpop.f32.mrb[101].mxu0  ;;  %v6325_v32 = vpop.f32.mrb[101].mxu1 }
 0x2a4   : > { %10540 = vst [vmem:[#allocation222_spill] sm:$0xff] %v6323_v54  ;;  %10541 = vst [vmem:[#allocation223_spill] sm:$0xff] %v6325_v32  ;;  %v1631_v20 = vmax.f32 %v1630_v27, %v6323_v54  ;;  %v1769_v37 = vmax.f32 %v1768_v5, %v6325_v32  ;;  %v6329_v6 = vpop.f32.mrb[102].mxu0  ;;  %v6331_v28 = vpop.f32.mrb[102].mxu1 }
 0x2a5   : > { %10542 = vst [vmem:[#allocation224_spill] sm:$0xff] %v6329_v6  ;;  %10543 = vst [vmem:[#allocation225_spill] sm:$0xff] %v6331_v28  ;;  %v1563_v16 = vmax.f32 %v1562_v23, %v6329_v6  ;;  %v1701_v33 = vmax.f32 %v1700_v46, %v6331_v28  ;;  %v6335_v10 = vpop.f32.mrb[103].mxu0  ;;  %v6337_v24 = vpop.f32.mrb[103].mxu1 }
 0x2a6   : > { %10544 = vst [vmem:[#allocation226_spill] sm:$0xff] %v6335_v10  ;;  %10545 = vst [vmem:[#allocation227_spill] sm:$0xff] %v6337_v24  ;;  %v1632_v19 = vmax.f32 %v1631_v20, %v6335_v10  ;;  %v1770_v36 = vmax.f32 %v1769_v37, %v6337_v24 }
 0x2aa   : > { %v6341_v2 = vpop.f32.mrb[104].mxu0  ;;  %v6343_v27 = vpop.f32.mrb[104].mxu1 }
 0x2ab   : > { %10546 = vst [vmem:[#allocation228_spill] sm:$0xff] %v6341_v2  ;;  %10547 = vst [vmem:[#allocation229_spill] sm:$0xff] %v6343_v27  ;;  %v1564_v5 = vmax.f32 %v1563_v16, %v6341_v2  ;;  %v1702_v32 = vmax.f32 %v1701_v33, %v6343_v27  ;;  %v6347_v54 = vpop.f32.mrb[105].mxu0  ;;  %v6349_v23 = vpop.f32.mrb[105].mxu1 }
 0x2ac   : > { %10548 = vst [vmem:[#allocation230_spill] sm:$0xff] %v6347_v54  ;;  %10549 = vst [vmem:[#allocation231_spill] sm:$0xff] %v6349_v23  ;;  %v1633_v46 = vmax.f32 %v1632_v19, %v6347_v54  ;;  %v1771_v28 = vmax.f32 %v1770_v36, %v6349_v23  ;;  %v6353_v6 = vpop.f32.mrb[106].mxu0  ;;  %v6355_v20 = vpop.f32.mrb[106].mxu1 }
 0x2ad   : > { %10550 = vst [vmem:[#allocation232_spill] sm:$0xff] %v6353_v6  ;;  %10551 = vst [vmem:[#allocation233_spill] sm:$0xff] %v6355_v20  ;;  %v1565_v37 = vmax.f32 %v1564_v5, %v6353_v6  ;;  %v1703_v24 = vmax.f32 %v1702_v32, %v6355_v20  ;;  %v6359_v10 = vpop.f32.mrb[107].mxu0  ;;  %v6361_v16 = vpop.f32.mrb[107].mxu1 }
 0x2ae   : > { %10552 = vst [vmem:[#allocation234_spill] sm:$0xff] %v6359_v10  ;;  %10553 = vst [vmem:[#allocation235_spill] sm:$0xff] %v6361_v16  ;;  %v1634_v33 = vmax.f32 %v1633_v46, %v6359_v10  ;;  %v1772_v27 = vmax.f32 %v1771_v28, %v6361_v16 }
 0x2b2   : > { %v6365_v2 = vpop.f32.mrb[108].mxu0  ;;  %v6367_v19 = vpop.f32.mrb[108].mxu1 }
 0x2b3   : > { %10554 = vst [vmem:[#allocation236_spill] sm:$0xff] %v6365_v2  ;;  %10555 = vst [vmem:[#allocation237_spill] sm:$0xff] %v6367_v19  ;;  %v1566_v36 = vmax.f32 %v1565_v37, %v6365_v2  ;;  %v1704_v23 = vmax.f32 %v1703_v24, %v6367_v19  ;;  %v6371_v54 = vpop.f32.mrb[109].mxu0  ;;  %v6373_v5 = vpop.f32.mrb[109].mxu1 }
 0x2b4   : > { %10556 = vst [vmem:[#allocation238_spill] sm:$0xff] %v6371_v54  ;;  %10557 = vst [vmem:[#allocation239_spill] sm:$0xff] %v6373_v5  ;;  %v1635_v32 = vmax.f32 %v1634_v33, %v6371_v54  ;;  %v1773_v20 = vmax.f32 %v1772_v27, %v6373_v5  ;;  %v6377_v6 = vpop.f32.mrb[110].mxu0  ;;  %v6379_v46 = vpop.f32.mrb[110].mxu1 }
 0x2b5   : > { %10558 = vst [vmem:[#allocation240_spill] sm:$0xff] %v6377_v6  ;;  %10559 = vst [vmem:[#allocation241_spill] sm:$0xff] %v6379_v46  ;;  %v1567_v28 = vmax.f32 %v1566_v36, %v6377_v6  ;;  %v1705_v16 = vmax.f32 %v1704_v23, %v6379_v46  ;;  %v6383_v10 = vpop.f32.mrb[111].mxu0  ;;  %v6385_v37 = vpop.f32.mrb[111].mxu1 }
 0x2b6   : > { %10560 = vst [vmem:[#allocation242_spill] sm:$0xff] %v6383_v10  ;;  %10561 = vst [vmem:[#allocation243_spill] sm:$0xff] %v6385_v37  ;;  %v1636_v24 = vmax.f32 %v1635_v32, %v6383_v10  ;;  %v1774_v19 = vmax.f32 %v1773_v20, %v6385_v37 }
 0x2ba   : > { %v6389_v2 = vpop.f32.mrb[112].mxu0  ;;  %v6391_v33 = vpop.f32.mrb[112].mxu1 }
 0x2bb   : > { %10562 = vst [vmem:[#allocation244_spill] sm:$0xff] %v6389_v2  ;;  %10563 = vst [vmem:[#allocation245_spill] sm:$0xff] %v6391_v33  ;;  %v1568_v27 = vmax.f32 %v1567_v28, %v6389_v2  ;;  %v1706_v5 = vmax.f32 %v1705_v16, %v6391_v33  ;;  %v6395_v54 = vpop.f32.mrb[113].mxu0  ;;  %v6397_v36 = vpop.f32.mrb[113].mxu1 }
 0x2bc   : > { %10564 = vst [vmem:[#allocation246_spill] sm:$0xff] %v6395_v54  ;;  %10565 = vst [vmem:[#allocation247_spill] sm:$0xff] %v6397_v36  ;;  %v1637_v23 = vmax.f32 %v1636_v24, %v6395_v54  ;;  %v1775_v46 = vmax.f32 %v1774_v19, %v6397_v36  ;;  %v6401_v6 = vpop.f32.mrb[114].mxu0  ;;  %v6403_v32 = vpop.f32.mrb[114].mxu1 }
 0x2bd   : > { %10566 = vst [vmem:[#allocation248_spill] sm:$0xff] %v6401_v6  ;;  %10567 = vst [vmem:[#allocation249_spill] sm:$0xff] %v6403_v32  ;;  %v1569_v20 = vmax.f32 %v1568_v27, %v6401_v6  ;;  %v1707_v37 = vmax.f32 %v1706_v5, %v6403_v32  ;;  %v6407_v10 = vpop.f32.mrb[115].mxu0  ;;  %v6409_v28 = vpop.f32.mrb[115].mxu1 }
 0x2be   : > { %10568 = vst [vmem:[#allocation250_spill] sm:$0xff] %v6407_v10  ;;  %10569 = vst [vmem:[#allocation251_spill] sm:$0xff] %v6409_v28  ;;  %v1638_v16 = vmax.f32 %v1637_v23, %v6407_v10  ;;  %v1776_v33 = vmax.f32 %v1775_v46, %v6409_v28 }
 0x2c2   : > { %v6413_v2 = vpop.f32.mrb[116].mxu0  ;;  %v6415_v24 = vpop.f32.mrb[116].mxu1 }
 0x2c3   : > { %10570 = vst [vmem:[#allocation252_spill] sm:$0xff] %v6413_v2  ;;  %10571 = vst [vmem:[#allocation253_spill] sm:$0xff] %v6415_v24  ;;  %v1570_v19 = vmax.f32 %v1569_v20, %v6413_v2  ;;  %v1708_v36 = vmax.f32 %v1707_v37, %v6415_v24  ;;  %v6419_v54 = vpop.f32.mrb[117].mxu0  ;;  %v6421_v27 = vpop.f32.mrb[117].mxu1 }
 0x2c4   : > { %10572 = vst [vmem:[#allocation254_spill] sm:$0xff] %v6419_v54  ;;  %10573 = vst [vmem:[#allocation255_spill] sm:$0xff] %v6421_v27  ;;  %v1639_v5 = vmax.f32 %v1638_v16, %v6419_v54  ;;  %v1777_v32 = vmax.f32 %v1776_v33, %v6421_v27  ;;  %v6425_v6 = vpop.f32.mrb[118].mxu0  ;;  %v6427_v23 = vpop.f32.mrb[118].mxu1 }
 0x2c5   : > { %10574 = vst [vmem:[#allocation256_spill] sm:$0xff] %v6425_v6  ;;  %10575 = vst [vmem:[#allocation257_spill] sm:$0xff] %v6427_v23  ;;  %v1571_v46 = vmax.f32 %v1570_v19, %v6425_v6  ;;  %v1709_v28 = vmax.f32 %v1708_v36, %v6427_v23  ;;  %v6431_v10 = vpop.f32.mrb[119].mxu0  ;;  %v6433_v20 = vpop.f32.mrb[119].mxu1 }
 0x2c6   : > { %10576 = vst [vmem:[#allocation258_spill] sm:$0xff] %v6431_v10  ;;  %10577 = vst [vmem:[#allocation259_spill] sm:$0xff] %v6433_v20  ;;  %v1640_v37 = vmax.f32 %v1639_v5, %v6431_v10  ;;  %v1778_v24 = vmax.f32 %v1777_v32, %v6433_v20 }
 0x2ca   : > { %v6437_v2 = vpop.f32.mrb[120].mxu0  ;;  %v6439_v16 = vpop.f32.mrb[120].mxu1 }
 0x2cb   : > { %10578 = vst [vmem:[#allocation260_spill] sm:$0xff] %v6437_v2  ;;  %10579 = vst [vmem:[#allocation261_spill] sm:$0xff] %v6439_v16  ;;  %v1572_v33 = vmax.f32 %v1571_v46, %v6437_v2  ;;  %v1710_v27 = vmax.f32 %v1709_v28, %v6439_v16  ;;  %v6443_v54 = vpop.f32.mrb[121].mxu0  ;;  %v6445_v19 = vpop.f32.mrb[121].mxu1 }
 0x2cc   : > { %10580 = vst [vmem:[#allocation262_spill] sm:$0xff] %v6443_v54  ;;  %10581 = vst [vmem:[#allocation263_spill] sm:$0xff] %v6445_v19  ;;  %v1641_v36 = vmax.f32 %v1640_v37, %v6443_v54  ;;  %v1779_v23 = vmax.f32 %v1778_v24, %v6445_v19  ;;  %v6449_v6 = vpop.f32.mrb[122].mxu0  ;;  %v6451_v5 = vpop.f32.mrb[122].mxu1 }
 0x2cd   : > { %10582 = vst [vmem:[#allocation264_spill] sm:$0xff] %v6449_v6  ;;  %10583 = vst [vmem:[#allocation265_spill] sm:$0xff] %v6451_v5  ;;  %v1573_v32 = vmax.f32 %v1572_v33, %v6449_v6  ;;  %v1711_v20 = vmax.f32 %v1710_v27, %v6451_v5  ;;  %v6455_v10 = vpop.f32.mrb[123].mxu0  ;;  %v6457_v46 = vpop.f32.mrb[123].mxu1 }
 0x2ce   : > { %10584 = vst [vmem:[#allocation266_spill] sm:$0xff] %v6455_v10  ;;  %10585 = vst [vmem:[#allocation267_spill] sm:$0xff] %v6457_v46  ;;  %v1642_v28 = vmax.f32 %v1641_v36, %v6455_v10  ;;  %v1780_v16 = vmax.f32 %v1779_v23, %v6457_v46 }
 0x2d2   : > { %v6461_v2 = vpop.f32.mrb[124].mxu0  ;;  %v6463_v37 = vpop.f32.mrb[124].mxu1 }
 0x2d3   : > { %10586 = vst [vmem:[#allocation268_spill] sm:$0xff] %v6461_v2  ;;  %10587 = vst [vmem:[#allocation269_spill] sm:$0xff] %v6463_v37  ;;  %v1574_v24 = vmax.f32 %v1573_v32, %v6461_v2  ;;  %v1712_v19 = vmax.f32 %v1711_v20, %v6463_v37  ;;  %v6467_v54 = vpop.f32.mrb[125].mxu0  ;;  %v6469_v33 = vpop.f32.mrb[125].mxu1 }
 0x2d4   : > { %10588 = vst [vmem:[#allocation270_spill] sm:$0xff] %v6467_v54  ;;  %10589 = vst [vmem:[#allocation271_spill] sm:$0xff] %v6469_v33  ;;  %v1643_v27 = vmax.f32 %v1642_v28, %v6467_v54  ;;  %v1781_v5 = vmax.f32 %v1780_v16, %v6469_v33  ;;  %v6473_v6 = vpop.f32.mrb[126].mxu0  ;;  %v6475_v36 = vpop.f32.mrb[126].mxu1 }
 0x2d5   : > { %10590 = vst [vmem:[#allocation272_spill] sm:$0xff] %v6473_v6  ;;  %10591 = vst [vmem:[#allocation273_spill] sm:$0xff] %v6475_v36  ;;  %v1575_v23 = vmax.f32 %v1574_v24, %v6473_v6  ;;  %v1713_v46 = vmax.f32 %v1712_v19, %v6475_v36  ;;  %v6479_v10 = vpop.f32.mrb[127].mxu0  ;;  %v6481_v32 = vpop.f32.mrb[127].mxu1  ;;  %v10076_v24 = vlaneseq }
 0x2d6   : > { %10592 = vst [vmem:[#allocation274_spill] sm:$0xff] %v6479_v10  ;;  %10593 = vst [vmem:[#allocation275_spill] sm:$0xff] %v6481_v32  ;;  %v1644_v20 = vmax.f32 %v1643_v27, %v6479_v10  ;;  %v1782_v37 = vmax.f32 %v1781_v5, %v6481_v32  ;;  %v1797_v10 = vunpack.c.0.s8 %v1796_v55 }
 0x2d7   : > { %v1576_v2 = vrot.slane %v1575_v23, 4  ;;  %v1714_v28 = vrot.slane %v1713_v46, 4  ;;  %v1799_v5 = vshrl.u32 %v10076_v24, 7 }
 0x2d8   : > { %v1645_v54 = vrot.slane %v1644_v20, 4  ;;  %v1783_v16 = vrot.slane %v1782_v37, 4 }
 0x2d9   : > { %v1577_v33 = vmax.f32 %v1575_v23, %v1576_v2  ;;  %v1715_v11 = vmax.f32 %v1713_v46, %v1714_v28  ;;  %v6495_v55 = vsub.s32 3, %v1799_v5 }
 0x2da   : > { %v1646_v15 = vmax.f32 %v1644_v20, %v1645_v54  ;;  %v1784_v6 = vmax.f32 %v1782_v37, %v1783_v16  ;;  %v6486_v20 = vsub.s32 %v1797_v10, %v1799_v5 }
 0x2db   : > { %v1578_v19 = vrot.slane %v1577_v33, 2  ;;  %v1716_v36 = vrot.slane %v1715_v11, 2  ;;  %10597 = vst [vmem:[#allocation279_spill] sm:$0xff] %v6495_v55 }
 0x2dc   : > { %v1647_v63 = vrot.slane %v1646_v15, 2  ;;  %v1785_v4 = vrot.slane %v1784_v6, 2  ;;  %10594 = vst [vmem:[#allocation276_spill] sm:$0xff] %v6486_v20 }
 0x2dd   : > { %v1579_v62 = vmax.f32 %v1577_v33, %v1578_v19  ;;  %v1717_v1 = vmax.f32 %v1715_v11, %v1716_v36  ;;  %v10700_v36 = vld [vmem:[#allocation51_spill] sm:$0xff] }
 0x2de   : > { %v1648_v27 = vmax.f32 %v1646_v15, %v1647_v63  ;;  %v1786_v32 = vmax.f32 %v1784_v6, %v1785_v4  ;;  %v6491_v6 = vld [vmem:[#allocation2] sm:$0xf]  ;;  %v6493_v4 = vsub.s32 2, %v1799_v5  ;;  %v10706_v19 = vld [vmem:[#allocation55_spill] sm:$0xff] }
 0x2df   : > { %v1580_v9 = vrot.slane %v1579_v62, 1  ;;  %v1718_v7 = vrot.slane %v1717_v1, 1  ;;  %10595 = vst [vmem:[#allocation277_spill] sm:$0xff] %v6491_v6 }
 0x2e0   : > { %v1649_v2 = vrot.slane %v1648_v27, 1  ;;  %v1787_v46 = vrot.slane %v1786_v32, 1  ;;  %10596 = vst [vmem:[#allocation278_spill] sm:$0xff] %v6493_v4 }
 0x2e1   : > { %v1581_v54 = vmax.f32 %v1579_v62, %v1580_v9  ;;  %v1719_v23 = vmax.f32 %v1717_v1, %v1718_v7  ;;  %v6508_v7 = vsub.s32 0, %v1799_v5  ;;  %v6510_v9 = vsub.s32 1, %v1799_v5  ;;  %v10691_v5 = vld [vmem:[#allocation46_spill] sm:$0xff] }
 0x2e2   : > { %v1650_v47 = vmax.f32 %v1648_v27, %v1649_v2  ;;  %v1788_v37 = vmax.f32 %v1786_v32, %v1787_v46  ;;  %v10604_v46 = vld [vmem:[#allocation33_spill] sm:$0xff]  ;;  %v10703_v32 = vld [vmem:[#allocation54_spill] sm:$0xff] }
 0x2e3   : > { %10599 = vst [vmem:[#allocation281_spill] sm:$0xff] %v6508_v7  ;;  %10600 = vst [vmem:[#allocation282_spill] sm:$0xff] %v6510_v9 }
 0x2e4   : > { %v1793_v28 = vcombine.low %v1581_v54, %v1650_v47  ;;  %v1794_v16 = vcombine.low %v1719_v23, %v1788_v37  ;;  %v10676_v37 = vld [vmem:[#allocation36_spill] sm:$0xff]  ;;  %v10688_v23 = vld [vmem:[#allocation43_spill] sm:$0xff]  ;;  %v10697_v47 = vld [vmem:[#allocation50_spill] sm:$0xff] }
 0x2e6   : > { %v1801_v33 = vrot.slane %v1793_v28, %v6486_v20  ;;  %v1808_v11 = vrot.slane %v1794_v16, %v6486_v20 }
 0x2e8   : > { %v1809_v15 = vcombine.low %v1801_v33, %v1808_v11  ;;  %v10603_v33 = vld [vmem:[#allocation34_spill] sm:$0xff] }
 0x2ea   : > { %v1816_v63 = vrot.slane %v1809_v15, %v6486_v20  ;;  %v10675_v15 = vld [vmem:[#allocation35_spill] sm:$0xff] }
 0x2ec   : > { %v6498_v62 = vmax.f32 %v6491_v6, %v1816_v63  ;;  %v10694_v63 = vld [vmem:[#allocation47_spill] sm:$0xff] }
 0x2ee   : > { %10598 = vst [vmem:[#allocation280_spill] sm:$0xff] %v6498_v62  ;;  %v6502_v1 = vrot.slane %v6498_v62, %v6493_v4  ;;  %v6506_v10 = vrot.slane %v6498_v62, %v6495_v55  ;;  %v6522_v2 = vrot.slane %v6498_v62, %v6508_v7  ;;  %v6530_v54 = vrot.slane %v6498_v62, %v6510_v9 }
 0x2f0   : > { %v10673_v55 = vsub.f32 %v5674_v39, %v6522_v2  ;;  %v10674_v4 = vsub.f32 %v5678_v41, %v6530_v54  ;;  %v1858_v7 = vsub.f32 %v10675_v15, %v6506_v10  ;;  %v1859_v20 = vsub.f32 %v10676_v37, %v6522_v2  ;;  %v10679_v39 = vld [vmem:[#allocation38_spill] sm:$0xff]  ;;  %v10680_v41 = vld [vmem:[#allocation37_spill] sm:$0xff]  ;;  %v10682_v37 = vld [vmem:[#allocation39_spill] sm:$0xff] }
 0x2f1   : > { %v10677_v6 = vsub.f32 %v5676_v40, %v6502_v1  ;;  %v10678_v62 = vsub.f32 %v5680_v42, %v6506_v10  ;;  %v10681_v15 = vsub.f32 %v5683_v44, %v6522_v2  ;;  %v10683_v40 = vld [vmem:[#allocation40_spill] sm:$0xff]  ;;  %v10684_v42 = vsub.f32 %v5691_v48, %v6530_v54 }
 0x2f2   : > { %v2099_v16 = vmul.f32 1.442695, %v10673_v55  ;;  %v2101_v9 = vmul.f32 1.442695, %v10674_v4  ;;  %v1860_v55 = vsub.f32 %v10679_v39, %v6530_v54  ;;  %v1861_v4 = vsub.f32 %v10680_v41, %v6502_v1  ;;  %v10685_v39 = vld [vmem:[#allocation42_spill] sm:$0xff] }
 0x2f3   : > { %v2103_v24 = vmul.f32 1.442695, %v10677_v6  ;;  %v2105_v11 = vmul.f32 1.442695, %v10678_v62  ;;  %v2107_v28 = vmul.f32 1.442695, %v10681_v15  ;;  %v10687_v44 = vsub.f32 %v5685_v45, %v6502_v1 }
 0x2f4   : > { %4303 = vpow2.f32 %v2099_v16  ;;  %v2109_v62 = vmul.f32 1.442695, %v10684_v42  ;;  %v10686_v16 = vld [vmem:[#allocation41_spill] sm:$0xff]  ;;  %v10690_v48 = vsub.f32 %v5693_v49, %v6506_v10  ;;  %v10693_v45 = vsub.f32 %v5703_v52, %v6522_v2  ;;  %v10710_v41 = vld [vmem:[#allocation58_spill] sm:$0xff] }
 0x2f5   : > { %4305 = vpow2.f32 %v2101_v9  ;;  %v2111_v15 = vmul.f32 1.442695, %v10687_v44  ;;  %v10689_v9 = vld [vmem:[#allocation44_spill] sm:$0xff]  ;;  %v10696_v49 = vsub.f32 %v5709_v56, %v6530_v54  ;;  %v10699_v52 = vsub.f32 %v5705_v53, %v6502_v1 }
 0x2f6   : > { %4307 = vpow2.f32 %v2103_v24  ;;  %v2113_v42 = vmul.f32 1.442695, %v10690_v48  ;;  %v10692_v24 = vld [vmem:[#allocation45_spill] sm:$0xff]  ;;  %v2115_v44 = vmul.f32 1.442695, %v10693_v45  ;;  %v10702_v56 = vsub.f32 %v5711_v57, %v6506_v10 }
 0x2f7   : > { %4309 = vpow2.f32 %v2105_v11  ;;  %v10695_v11 = vld [vmem:[#allocation48_spill] sm:$0xff]  ;;  %v2117_v48 = vmul.f32 1.442695, %v10696_v49  ;;  %v2119_v45 = vmul.f32 1.442695, %v10699_v52  ;;  %v10705_v53 = vsub.f32 %v5716_v61, %v6522_v2  ;;  %v10730_v61 = vld [vmem:[#allocation70_spill] sm:$0xff] }
 0x2f8   : > { %4311 = vpow2.f32 %v2107_v28  ;;  %v10698_v28 = vld [vmem:[#allocation49_spill] sm:$0xff]  ;;  %v2121_v49 = vmul.f32 1.442695, %v10702_v56  ;;  %v10708_v57 = vsub.f32 %v10603_v33, %v6530_v54  ;;  %v10715_v33 = vld [vmem:[#allocation60_spill] sm:$0xff]  ;;  %v10732_v6 = vsub.f32 %v10683_v40, %v6522_v2 }
 0x2f9   : > { %4313 = vpow2.f32 %v2109_v62  ;;  %v10701_v62 = vld [vmem:[#allocation52_spill] sm:$0xff]  ;;  %v2123_v52 = vmul.f32 1.442695, %v10705_v53  ;;  %v10712_v53 = vsub.f32 %v10604_v46, %v6502_v1  ;;  %v2131_v46 = vmul.f32 1.442695, %v1859_v20  ;;  %v10739_v40 = vld [vmem:[#allocation73_spill] sm:$0xff] }
 0x2fa   : > { %4315 = vpow2.f32 %v2111_v15  ;;  %v10704_v15 = vld [vmem:[#allocation53_spill] sm:$0xff]  ;;  %v2125_v56 = vmul.f32 1.442695, %v10708_v57  ;;  %v2135_v20 = vmul.f32 1.442695, %v1861_v4  ;;  %v10736_v29 = vsub.f32 %v10685_v39, %v6530_v54 }
 0x2fb   : > { %4317 = vpow2.f32 %v2113_v42  ;;  %v10707_v42 = vld [vmem:[#allocation56_spill] sm:$0xff]  ;;  %v2127_v13 = vmul.f32 1.442695, %v10712_v53  ;;  %v10740_v57 = vsub.f32 %v10686_v16, %v6502_v1  ;;  %v10744_v4 = vsub.f32 %v10688_v23, %v6506_v10  ;;  %v10747_v16 = vld [vmem:[#allocation77_spill] sm:$0xff] }
 0x2fc   : > { %4319 = vpow2.f32 %v2115_v44  ;;  %v10717_v44 = vld [vmem:[#allocation62_spill] sm:$0xff]  ;;  %v10751_v23 = vld [vmem:[#allocation80_spill] sm:$0xff]  ;;  %v10756_v39 = vsub.f32 %v10692_v24, %v6502_v1  ;;  %v10763_v24 = vld [vmem:[#allocation85_spill] sm:$0xff] }
 0x2fd   : > { %4321 = vpow2.f32 %v2117_v48  ;;  %v10714_v48 = vld [vmem:[#allocation59_spill] sm:$0xff] }
 0x2fe   : > { %v6824_v27 = vpop.eup %4303  ;;  %4323 = vpow2.f32 %v2119_v45  ;;  %v10718_v45 = vld [vmem:[#allocation61_spill] sm:$0xff] }
 0x2ff   : > { %10709 = vst [vmem:[#allocation34_spill] sm:$0xff] %v6824_v27  ;;  %v6833_v14 = vpop.eup %4305  ;;  %4325 = vpow2.f32 %v2121_v49  ;;  %v2129_v27 = vmul.f32 1.442695, %v1858_v7  ;;  %v2133_v7 = vmul.f32 1.442695, %v1860_v55  ;;  %v10728_v55 = vsub.f32 %v10682_v37, %v6506_v10  ;;  %v10735_v37 = vld [vmem:[#allocation72_spill] sm:$0xff] }
 0x300   : > { %10713 = vst [vmem:[#allocation33_spill] sm:$0xff] %v6833_v14  ;;  %v6839_v22 = vpop.eup %4307  ;;  %4327 = vpow2.f32 %v2123_v52  ;;  %v10720_v14 = vld [vmem:[#allocation63_spill] sm:$0xff] }
 0x301   : > { %10716 = vst [vmem:[#allocation35_spill] sm:$0xff] %v6839_v22  ;;  %v6845_v53 = vpop.eup %4309  ;;  %4329 = vpow2.f32 %v2125_v56  ;;  %v10723_v22 = vld [vmem:[#allocation66_spill] sm:$0xff]  ;;  %v2137_v56 = vmul.f32 1.442695, %v10728_v55  ;;  %v10748_v55 = vsub.f32 %v10689_v9, %v6522_v2  ;;  %v10755_v9 = vld [vmem:[#allocation81_spill] sm:$0xff] }
 0x302   : > { %10719 = vst [vmem:[#allocation36_spill] sm:$0xff] %v6845_v53  ;;  %v6851_v49 = vpop.eup %4311  ;;  %4331 = vpow2.f32 %v2127_v13  ;;  %v10726_v53 = vld [vmem:[#allocation67_spill] sm:$0xff]  ;;  %v10731_v13 = vld [vmem:[#allocation69_spill] sm:$0xff] }
 0x303   : > { %10722 = vst [vmem:[#allocation38_spill] sm:$0xff] %v6851_v49  ;;  %v6857_v52 = vpop.eup %4313  ;;  %4333 = vpow2.f32 %v2129_v27  ;;  %v10734_v27 = vld [vmem:[#allocation71_spill] sm:$0xff] }
 0x304   : > { %10725 = vst [vmem:[#allocation37_spill] sm:$0xff] %v6857_v52  ;;  %v6866_v49 = vpop.eup %4315  ;;  %4335 = vpow2.f32 %v2131_v46  ;;  %v2139_v52 = vmul.f32 1.442695, %v10732_v6  ;;  %v10738_v46 = vld [vmem:[#allocation74_spill] sm:$0xff]  ;;  %v10752_v6 = vsub.f32 %v10691_v5, %v6530_v54  ;;  %v10759_v5 = vld [vmem:[#allocation84_spill] sm:$0xff] }
 0x305   : > { %10729 = vst [vmem:[#allocation39_spill] sm:$0xff] %v6866_v49  ;;  %v6875_v25 = vpop.eup %4317  ;;  %4337 = vpow2.f32 %v2133_v7  ;;  %v2141_v49 = vmul.f32 1.442695, %v10736_v29  ;;  %v10742_v7 = vld [vmem:[#allocation75_spill] sm:$0xff]  ;;  %v10743_v29 = vld [vmem:[#allocation76_spill] sm:$0xff] }
 0x306   : > { %10733 = vst [vmem:[#allocation40_spill] sm:$0xff] %v6875_v25  ;;  %v6884_v51 = vpop.eup %4319  ;;  %4339 = vpow2.f32 %v2135_v20  ;;  %v2143_v25 = vmul.f32 1.442695, %v10740_v57  ;;  %v10746_v20 = vld [vmem:[#allocation78_spill] sm:$0xff]  ;;  %v10760_v57 = vsub.f32 %v10694_v63, %v6506_v10  ;;  %v10767_v63 = vld [vmem:[#allocation88_spill] sm:$0xff] }
 0x307   : > { %10737 = vst [vmem:[#allocation42_spill] sm:$0xff] %v6884_v51  ;;  %v6893_v18 = vpop.eup %4321  ;;  %4341 = vpow2.f32 %v2137_v56  ;;  %v2145_v51 = vmul.f32 1.442695, %v10744_v4  ;;  %v10750_v56 = vld [vmem:[#allocation79_spill] sm:$0xff]  ;;  %v10764_v4 = vsub.f32 %v10695_v11, %v6522_v2  ;;  %v10771_v11 = vld [vmem:[#allocation89_spill] sm:$0xff] }
 0x308   : > { %10741 = vst [vmem:[#allocation41_spill] sm:$0xff] %v6893_v18  ;;  %v6902_v59 = vpop.eup %4323  ;;  %4343 = vpow2.f32 %v2139_v52  ;;  %v2147_v18 = vmul.f32 1.442695, %v10748_v55  ;;  %v10754_v52 = vld [vmem:[#allocation82_spill] sm:$0xff]  ;;  %v10768_v55 = vsub.f32 %v10697_v47, %v6530_v54  ;;  %v10775_v47 = vld [vmem:[#allocation92_spill] sm:$0xff] }
 0x309   : > { %10745 = vst [vmem:[#allocation43_spill] sm:$0xff] %v6902_v59  ;;  %v6911_v30 = vpop.eup %4325  ;;  %4345 = vpow2.f32 %v2141_v49  ;;  %v2149_v59 = vmul.f32 1.442695, %v10752_v6  ;;  %v10758_v49 = vld [vmem:[#allocation83_spill] sm:$0xff]  ;;  %v10772_v6 = vsub.f32 %v10698_v28, %v6502_v1  ;;  %v10779_v28 = vld [vmem:[#allocation93_spill] sm:$0xff] }
 0x30a   : > { %10749 = vst [vmem:[#allocation44_spill] sm:$0xff] %v6911_v30  ;;  %v6920_v8 = vpop.eup %4327  ;;  %4347 = vpow2.f32 %v2143_v25  ;;  %v2151_v30 = vmul.f32 1.442695, %v10756_v39  ;;  %v10762_v25 = vld [vmem:[#allocation86_spill] sm:$0xff]  ;;  %v10776_v39 = vsub.f32 %v10700_v36, %v6506_v10  ;;  %v10783_v36 = vld [vmem:[#allocation96_spill] sm:$0xff] }
 0x30b   : > { %10753 = vst [vmem:[#allocation46_spill] sm:$0xff] %v6920_v8  ;;  %v6929_v38 = vpop.eup %4329  ;;  %4349 = vpow2.f32 %v2145_v51  ;;  %v2153_v8 = vmul.f32 1.442695, %v10760_v57  ;;  %v10766_v51 = vld [vmem:[#allocation87_spill] sm:$0xff]  ;;  %v10780_v57 = vsub.f32 %v10701_v62, %v6522_v2  ;;  %v10787_v62 = vld [vmem:[#allocation97_spill] sm:$0xff] }
 0x30c   : > { %10757 = vst [vmem:[#allocation45_spill] sm:$0xff] %v6929_v38  ;;  %v6938_v3 = vpop.eup %4331  ;;  %4351 = vpow2.f32 %v2147_v18  ;;  %v2155_v38 = vmul.f32 1.442695, %v10764_v4  ;;  %v10770_v18 = vld [vmem:[#allocation90_spill] sm:$0xff]  ;;  %v10784_v4 = vsub.f32 %v10703_v32, %v6530_v54  ;;  %v10791_v32 = vld [vmem:[#allocation100_spill] sm:$0xff] }
 0x30d   : > { %10761 = vst [vmem:[#allocation47_spill] sm:$0xff] %v6938_v3  ;;  %v6947_v12 = vpop.eup %4333  ;;  %4353 = vpow2.f32 %v2149_v59  ;;  %v2157_v3 = vmul.f32 1.442695, %v10768_v55  ;;  %v10774_v59 = vld [vmem:[#allocation91_spill] sm:$0xff]  ;;  %v10788_v55 = vsub.f32 %v10704_v15, %v6502_v1  ;;  %v10795_v15 = vld [vmem:[#allocation101_spill] sm:$0xff] }
 0x30e   : > { %10765 = vst [vmem:[#allocation48_spill] sm:$0xff] %v6947_v12  ;;  %v6956_v0 = vpop.eup %4335  ;;  %4355 = vpow2.f32 %v2151_v30  ;;  %v2159_v12 = vmul.f32 1.442695, %v10772_v6  ;;  %v10778_v30 = vld [vmem:[#allocation94_spill] sm:$0xff]  ;;  %v10792_v6 = vsub.f32 %v10706_v19, %v6506_v10  ;;  %v10799_v19 = vld [vmem:[#allocation104_spill] sm:$0xff] }
 0x30f   : > { %10769 = vst [vmem:[#allocation50_spill] sm:$0xff] %v6956_v0  ;;  %v6965_v26 = vpop.eup %4337  ;;  %4357 = vpow2.f32 %v2153_v8  ;;  %v2161_v0 = vmul.f32 1.442695, %v10776_v39  ;;  %v10782_v8 = vld [vmem:[#allocation95_spill] sm:$0xff]  ;;  %v10796_v39 = vsub.f32 %v10707_v42, %v6522_v2  ;;  %v10803_v42 = vld [vmem:[#allocation105_spill] sm:$0xff] }
 0x310   : > { %10773 = vst [vmem:[#allocation49_spill] sm:$0xff] %v6965_v26  ;;  %v6974_v50 = vpop.eup %4339  ;;  %4359 = vpow2.f32 %v2155_v38  ;;  %v2163_v26 = vmul.f32 1.442695, %v10780_v57  ;;  %v10786_v38 = vld [vmem:[#allocation98_spill] sm:$0xff]  ;;  %v10800_v57 = vsub.f32 %v10710_v41, %v6530_v54  ;;  %v10807_v41 = vld [vmem:[#allocation108_spill] sm:$0xff] }
 0x311   : > { %10777 = vst [vmem:[#allocation51_spill] sm:$0xff] %v6974_v50  ;;  %v6983_v34 = vpop.eup %4341  ;;  %4361 = vpow2.f32 %v2157_v3  ;;  %v2165_v50 = vmul.f32 1.442695, %v10784_v4  ;;  %v10804_v4 = vsub.f32 %v10711_v21, %v6502_v1  ;;  %v10811_v21 = vld [vmem:[#allocation109_spill] sm:$0xff] }
 0x312   : > { %10781 = vst [vmem:[#allocation52_spill] sm:$0xff] %v6983_v34  ;;  %v6992_v43 = vpop.eup %4343  ;;  %4363 = vpow2.f32 %v2159_v12  ;;  %v2167_v34 = vmul.f32 1.442695, %v10788_v55  ;;  %v10808_v55 = vsub.f32 %v10714_v48, %v6506_v10  ;;  %v10815_v48 = vld [vmem:[#allocation112_spill] sm:$0xff] }
 0x313   : > { %10785 = vst [vmem:[#allocation54_spill] sm:$0xff] %v6992_v43  ;;  %v7001_v58 = vpop.eup %4345  ;;  %4365 = vpow2.f32 %v2161_v0  ;;  %v2169_v43 = vmul.f32 1.442695, %v10792_v6  ;;  %v10812_v6 = vsub.f32 %v10715_v33, %v6522_v2  ;;  %v10819_v33 = vld [vmem:[#allocation113_spill] sm:$0xff] }
 0x314   : > { %10789 = vst [vmem:[#allocation53_spill] sm:$0xff] %v7001_v58  ;;  %v7010_v17 = vpop.eup %4347  ;;  %4367 = vpow2.f32 %v2163_v26  ;;  %v2171_v58 = vmul.f32 1.442695, %v10796_v39  ;;  %v10816_v39 = vsub.f32 %v10717_v44, %v6530_v54  ;;  %v10823_v44 = vld [vmem:[#allocation116_spill] sm:$0xff] }
 0x315   : > { %10793 = vst [vmem:[#allocation55_spill] sm:$0xff] %v7010_v17  ;;  %v7019_v3 = vpop.eup %4349  ;;  %4369 = vpow2.f32 %v2165_v50  ;;  %v2173_v17 = vmul.f32 1.442695, %v10800_v57  ;;  %v10820_v57 = vsub.f32 %v10718_v45, %v6502_v1  ;;  %v10827_v45 = vld [vmem:[#allocation117_spill] sm:$0xff] }
 0x316   : > { %10797 = vst [vmem:[#allocation56_spill] sm:$0xff] %v7019_v3  ;;  %v7028_v12 = vpop.eup %4351  ;;  %4371 = vpow2.f32 %v2167_v34  ;;  %v2175_v3 = vmul.f32 1.442695, %v10804_v4  ;;  %v10824_v4 = vsub.f32 %v10720_v14, %v6506_v10  ;;  %v10831_v14 = vld [vmem:[#allocation120_spill] sm:$0xff] }
 0x317   : > { %10801 = vst [vmem:[#allocation58_spill] sm:$0xff] %v7028_v12  ;;  %v7037_v0 = vpop.eup %4353  ;;  %4373 = vpow2.f32 %v2169_v43  ;;  %v2177_v12 = vmul.f32 1.442695, %v10808_v55  ;;  %v10828_v55 = vsub.f32 %v10721_v35, %v6522_v2  ;;  %v10835_v35 = vld [vmem:[#allocation121_spill] sm:$0xff] }
 0x318   : > { %10805 = vst [vmem:[#allocation57_spill] sm:$0xff] %v7037_v0  ;;  %v7046_v26 = vpop.eup %4355  ;;  %4375 = vpow2.f32 %v2171_v58  ;;  %v2179_v0 = vmul.f32 1.442695, %v10812_v6  ;;  %v10832_v6 = vsub.f32 %v10723_v22, %v6530_v54  ;;  %v10839_v22 = vld [vmem:[#allocation124_spill] sm:$0xff] }
 0x319   : > { %10809 = vst [vmem:[#allocation59_spill] sm:$0xff] %v7046_v26  ;;  %v7055_v50 = vpop.eup %4357  ;;  %4377 = vpow2.f32 %v2173_v17  ;;  %v2181_v26 = vmul.f32 1.442695, %v10816_v39  ;;  %v10836_v39 = vsub.f32 %v10724_v31, %v6502_v1  ;;  %v10843_v31 = vld [vmem:[#allocation125_spill] sm:$0xff] }
 0x31a   : > { %10813 = vst [vmem:[#allocation60_spill] sm:$0xff] %v7055_v50  ;;  %v7064_v34 = vpop.eup %4359  ;;  %4379 = vpow2.f32 %v2175_v3  ;;  %v2183_v50 = vmul.f32 1.442695, %v10820_v57  ;;  %v10840_v57 = vsub.f32 %v10726_v53, %v6506_v10  ;;  %v10847_v53 = vld [vmem:[#allocation128_spill] sm:$0xff] }
 0x31b   : > { %10817 = vst [vmem:[#allocation62_spill] sm:$0xff] %v7064_v34  ;;  %v7073_v43 = vpop.eup %4361  ;;  %4381 = vpow2.f32 %v2177_v12  ;;  %v2185_v34 = vmul.f32 1.442695, %v10824_v4  ;;  %v10844_v4 = vsub.f32 %v10727_v60, %v6522_v2  ;;  %v10851_v60 = vld [vmem:[#allocation129_spill] sm:$0xff] }
 0x31c   : > { %10821 = vst [vmem:[#allocation61_spill] sm:$0xff] %v7073_v43  ;;  %v7082_v58 = vpop.eup %4363  ;;  %4383 = vpow2.f32 %v2179_v0  ;;  %v2187_v43 = vmul.f32 1.442695, %v10828_v55  ;;  %v10848_v55 = vsub.f32 %v10730_v61, %v6530_v54  ;;  %v10855_v61 = vld [vmem:[#allocation132_spill] sm:$0xff] }
 0x31d   : > { %10825 = vst [vmem:[#allocation63_spill] sm:$0xff] %v7082_v58  ;;  %v7091_v17 = vpop.eup %4365  ;;  %4385 = vpow2.f32 %v2181_v26  ;;  %v2189_v58 = vmul.f32 1.442695, %v10832_v6  ;;  %v10852_v6 = vsub.f32 %v10731_v13, %v6502_v1  ;;  %v10859_v13 = vld [vmem:[#allocation133_spill] sm:$0xff] }
 0x31e   : > { %10829 = vst [vmem:[#allocation64_spill] sm:$0xff] %v7091_v17  ;;  %v7100_v3 = vpop.eup %4367  ;;  %4387 = vpow2.f32 %v2183_v50  ;;  %v2191_v17 = vmul.f32 1.442695, %v10836_v39  ;;  %v10856_v39 = vsub.f32 %v10734_v27, %v6506_v10  ;;  %v10863_v27 = vld [vmem:[#allocation136_spill] sm:$0xff] }
 0x31f   : > { %10833 = vst [vmem:[#allocation66_spill] sm:$0xff] %v7100_v3  ;;  %v7109_v12 = vpop.eup %4369  ;;  %4389 = vpow2.f32 %v2185_v34  ;;  %v2193_v3 = vmul.f32 1.442695, %v10840_v57  ;;  %v10860_v57 = vsub.f32 %v10735_v37, %v6522_v2  ;;  %v10867_v37 = vld [vmem:[#allocation137_spill] sm:$0xff] }
 0x320   : > { %10837 = vst [vmem:[#allocation65_spill] sm:$0xff] %v7109_v12  ;;  %v7118_v0 = vpop.eup %4371  ;;  %4391 = vpow2.f32 %v2187_v43  ;;  %v2195_v12 = vmul.f32 1.442695, %v10844_v4  ;;  %v10864_v4 = vsub.f32 %v10738_v46, %v6530_v54  ;;  %v10871_v46 = vld [vmem:[#allocation140_spill] sm:$0xff] }
 0x321   : > { %10841 = vst [vmem:[#allocation67_spill] sm:$0xff] %v7118_v0  ;;  %v7127_v26 = vpop.eup %4373  ;;  %4393 = vpow2.f32 %v2189_v58  ;;  %v2197_v0 = vmul.f32 1.442695, %v10848_v55  ;;  %v10868_v55 = vsub.f32 %v10739_v40, %v6502_v1  ;;  %v10875_v40 = vld [vmem:[#allocation141_spill] sm:$0xff] }
 0x322   : > { %10845 = vst [vmem:[#allocation68_spill] sm:$0xff] %v7127_v26  ;;  %v7136_v50 = vpop.eup %4375  ;;  %4395 = vpow2.f32 %v2191_v17  ;;  %v2199_v26 = vmul.f32 1.442695, %v10852_v6  ;;  %v10872_v6 = vsub.f32 %v10742_v7, %v6506_v10  ;;  %v10879_v7 = vld [vmem:[#allocation144_spill] sm:$0xff] }
 0x323   : > { %10849 = vst [vmem:[#allocation70_spill] sm:$0xff] %v7136_v50  ;;  %v7145_v34 = vpop.eup %4377  ;;  %4397 = vpow2.f32 %v2193_v3  ;;  %v2201_v50 = vmul.f32 1.442695, %v10856_v39  ;;  %v10876_v39 = vsub.f32 %v10743_v29, %v6522_v2  ;;  %v10883_v29 = vld [vmem:[#allocation145_spill] sm:$0xff] }
 0x324   : > { %10853 = vst [vmem:[#allocation69_spill] sm:$0xff] %v7145_v34  ;;  %v7154_v43 = vpop.eup %4379  ;;  %4399 = vpow2.f32 %v2195_v12  ;;  %v2203_v34 = vmul.f32 1.442695, %v10860_v57  ;;  %v10880_v57 = vsub.f32 %v10746_v20, %v6530_v54  ;;  %v10887_v20 = vld [vmem:[#allocation148_spill] sm:$0xff] }
 0x325   : > { %10857 = vst [vmem:[#allocation71_spill] sm:$0xff] %v7154_v43  ;;  %v7163_v58 = vpop.eup %4381  ;;  %4401 = vpow2.f32 %v2197_v0  ;;  %v2205_v43 = vmul.f32 1.442695, %v10864_v4  ;;  %v10884_v4 = vsub.f32 %v10747_v16, %v6502_v1  ;;  %v10891_v16 = vld [vmem:[#allocation149_spill] sm:$0xff] }
 0x326   : > { %10861 = vst [vmem:[#allocation72_spill] sm:$0xff] %v7163_v58  ;;  %v7172_v17 = vpop.eup %4383  ;;  %4403 = vpow2.f32 %v2199_v26  ;;  %v2207_v58 = vmul.f32 1.442695, %v10868_v55  ;;  %v10888_v55 = vsub.f32 %v10750_v56, %v6506_v10  ;;  %v10895_v56 = vld [vmem:[#allocation152_spill] sm:$0xff] }
 0x327   : > { %10865 = vst [vmem:[#allocation74_spill] sm:$0xff] %v7172_v17  ;;  %v7181_v3 = vpop.eup %4385  ;;  %4405 = vpow2.f32 %v2201_v50  ;;  %v2209_v17 = vmul.f32 1.442695, %v10872_v6  ;;  %v10892_v6 = vsub.f32 %v10751_v23, %v6522_v2  ;;  %v10899_v23 = vld [vmem:[#allocation156_spill] sm:$0xff] }
 0x328   : > { %10869 = vst [vmem:[#allocation73_spill] sm:$0xff] %v7181_v3  ;;  %v7190_v12 = vpop.eup %4387  ;;  %4407 = vpow2.f32 %v2203_v34  ;;  %v2211_v3 = vmul.f32 1.442695, %v10876_v39  ;;  %v10896_v39 = vsub.f32 %v10754_v52, %v6530_v54  ;;  %v10903_v52 = vld [vmem:[#allocation160_spill] sm:$0xff] }
 0x329   : > { %10873 = vst [vmem:[#allocation75_spill] sm:$0xff] %v7190_v12  ;;  %v7199_v0 = vpop.eup %4389  ;;  %4409 = vpow2.f32 %v2205_v43  ;;  %v2213_v12 = vmul.f32 1.442695, %v10880_v57  ;;  %v10900_v57 = vsub.f32 %v10755_v9, %v6502_v1  ;;  %v10907_v9 = vld [vmem:[#allocation164_spill] sm:$0xff] }
 0x32a   : > { %10877 = vst [vmem:[#allocation76_spill] sm:$0xff] %v7199_v0  ;;  %v7208_v26 = vpop.eup %4391  ;;  %4411 = vpow2.f32 %v2207_v58  ;;  %v2215_v0 = vmul.f32 1.442695, %v10884_v4  ;;  %v10904_v4 = vsub.f32 %v10758_v49, %v6506_v10  ;;  %v10911_v49 = vld [vmem:[#allocation168_spill] sm:$0xff] }
 0x32b   : > { %10881 = vst [vmem:[#allocation78_spill] sm:$0xff] %v7208_v26  ;;  %v7217_v50 = vpop.eup %4393  ;;  %4413 = vpow2.f32 %v2209_v17  ;;  %v2217_v26 = vmul.f32 1.442695, %v10888_v55  ;;  %v10908_v55 = vsub.f32 %v10759_v5, %v6522_v2  ;;  %v10915_v5 = vld [vmem:[#allocation172_spill] sm:$0xff] }
 0x32c   : > { %10885 = vst [vmem:[#allocation77_spill] sm:$0xff] %v7217_v50  ;;  %v7226_v34 = vpop.eup %4395  ;;  %4415 = vpow2.f32 %v2211_v3  ;;  %v2219_v50 = vmul.f32 1.442695, %v10892_v6  ;;  %v10912_v6 = vsub.f32 %v10762_v25, %v6530_v54  ;;  %v10919_v25 = vld [vmem:[#allocation176_spill] sm:$0xff] }
 0x32d   : > { %10889 = vst [vmem:[#allocation79_spill] sm:$0xff] %v7226_v34  ;;  %v7235_v43 = vpop.eup %4397  ;;  %4417 = vpow2.f32 %v2213_v12  ;;  %v2221_v34 = vmul.f32 1.442695, %v10896_v39  ;;  %v10916_v39 = vsub.f32 %v10763_v24, %v6502_v1  ;;  %v10923_v24 = vld [vmem:[#allocation180_spill] sm:$0xff] }
 0x32e   : > { %10893 = vst [vmem:[#allocation80_spill] sm:$0xff] %v7235_v43  ;;  %v7244_v58 = vpop.eup %4399  ;;  %4419 = vpow2.f32 %v2215_v0  ;;  %v2223_v43 = vmul.f32 1.442695, %v10900_v57  ;;  %v10920_v57 = vsub.f32 %v10766_v51, %v6506_v10  ;;  %v10927_v51 = vld [vmem:[#allocation184_spill] sm:$0xff] }
 0x32f   : > { %10897 = vst [vmem:[#allocation82_spill] sm:$0xff] %v7244_v58  ;;  %v7253_v17 = vpop.eup %4401  ;;  %4421 = vpow2.f32 %v2217_v26  ;;  %v2225_v58 = vmul.f32 1.442695, %v10904_v4  ;;  %v10924_v4 = vsub.f32 %v10767_v63, %v6522_v2  ;;  %v10931_v63 = vld [vmem:[#allocation188_spill] sm:$0xff] }
 0x330   : > { %10901 = vst [vmem:[#allocation81_spill] sm:$0xff] %v7253_v17  ;;  %v7262_v3 = vpop.eup %4403  ;;  %4423 = vpow2.f32 %v2219_v50  ;;  %v2227_v17 = vmul.f32 1.442695, %v10908_v55  ;;  %v10928_v55 = vsub.f32 %v10770_v18, %v6530_v54  ;;  %v10935_v18 = vld [vmem:[#allocation192_spill] sm:$0xff] }
 0x331   : > { %10905 = vst [vmem:[#allocation83_spill] sm:$0xff] %v7262_v3  ;;  %v7271_v12 = vpop.eup %4405  ;;  %4425 = vpow2.f32 %v2221_v34  ;;  %v2229_v3 = vmul.f32 1.442695, %v10912_v6  ;;  %v10932_v6 = vsub.f32 %v10771_v11, %v6502_v1 }
 0x332   : > { %10909 = vst [vmem:[#allocation84_spill] sm:$0xff] %v7271_v12  ;;  %v7280_v0 = vpop.eup %4407  ;;  %4427 = vpow2.f32 %v2223_v43  ;;  %v2231_v12 = vmul.f32 1.442695, %v10916_v39  ;;  %v10936_v39 = vsub.f32 %v10774_v59, %v6506_v10  ;;  %v10943_v59 = vsub.f32 %v10778_v30, %v6530_v54 }
 0x333   : > { %10913 = vst [vmem:[#allocation86_spill] sm:$0xff] %v7280_v0  ;;  %v7289_v26 = vpop.eup %4409  ;;  %4429 = vpow2.f32 %v2225_v58  ;;  %v2233_v0 = vmul.f32 1.442695, %v10920_v57  ;;  %v10940_v57 = vsub.f32 %v10775_v47, %v6522_v2  ;;  %v10946_v47 = vsub.f32 %v10782_v8, %v6506_v10 }
 0x334   : > { %10917 = vst [vmem:[#allocation85_spill] sm:$0xff] %v7289_v26  ;;  %v7298_v50 = vpop.eup %4411  ;;  %4431 = vpow2.f32 %v2227_v17  ;;  %v2235_v26 = vmul.f32 1.442695, %v10924_v4  ;;  %v10944_v4 = vsub.f32 %v10779_v28, %v6502_v1  ;;  %v10950_v28 = vsub.f32 %v10787_v62, %v6502_v1 }
 0x335   : > { %10921 = vst [vmem:[#allocation87_spill] sm:$0xff] %v7298_v50  ;;  %v7307_v34 = vpop.eup %4413  ;;  %4433 = vpow2.f32 %v2229_v3  ;;  %v2237_v50 = vmul.f32 1.442695, %v10928_v55 }
 0x336   : > { %10925 = vst [vmem:[#allocation88_spill] sm:$0xff] %v7307_v34  ;;  %v7316_v43 = vpop.eup %4415  ;;  %4435 = vpow2.f32 %v2231_v12  ;;  %v2239_v34 = vmul.f32 1.442695, %v10932_v6 }
 0x337   : > { %10929 = vst [vmem:[#allocation90_spill] sm:$0xff] %v7316_v43  ;;  %v7325_v58 = vpop.eup %4417  ;;  %4437 = vpow2.f32 %v2233_v0  ;;  %v2241_v43 = vmul.f32 1.442695, %v10936_v39  ;;  %v2245_v39 = vmul.f32 1.442695, %v10943_v59 }
 0x338   : > { %10933 = vst [vmem:[#allocation89_spill] sm:$0xff] %v7325_v58  ;;  %v7334_v17 = vpop.eup %4419  ;;  %4439 = vpow2.f32 %v2235_v26  ;;  %v2243_v58 = vmul.f32 1.442695, %v10940_v57  ;;  %v2249_v26 = vmul.f32 1.442695, %v10946_v47  ;;  %v10947_v57 = vsub.f32 %v10783_v36, %v6522_v2 }
 0x339   : > { %10937 = vst [vmem:[#allocation91_spill] sm:$0xff] %v7334_v17  ;;  %v7343_v3 = vpop.eup %4421  ;;  %4441 = vpow2.f32 %v2237_v50  ;;  %v2247_v17 = vmul.f32 1.442695, %v10944_v4  ;;  %v10948_v50 = vsub.f32 %v10786_v38, %v6530_v54  ;;  %v2255_v4 = vmul.f32 1.442695, %v10950_v28  ;;  %v10955_v38 = vld [vmem:[#allocation102_spill] sm:$0xff] }
 0x33a   : > { %10941 = vst [vmem:[#allocation92_spill] sm:$0xff] %v7343_v3  ;;  %v7353_v6 = vpop.eup %4423  ;;  %4443 = vpow2.f32 %v2239_v34  ;;  %v2251_v55 = vmul.f32 1.442695, %v10947_v57  ;;  %v10951_v34 = vld [vmem:[#allocation99_spill] sm:$0xff]  ;;  %v10953_v47 = vsub.f32 %v10791_v32, %v6522_v2  ;;  %v10961_v32 = vsub.f32 %v10799_v19, %v6522_v2 }
 0x33b   : > { %10945 = vst [vmem:[#allocation94_spill] sm:$0xff] %v7353_v6  ;;  %v2253_v30 = vmul.f32 1.442695, %v10948_v50  ;;  %v7364_v59 = vpop.eup %4425  ;;  %4445 = vpow2.f32 %v2241_v43  ;;  %v10952_v3 = vsub.f32 %v10951_v34, %v6506_v10  ;;  %v10956_v50 = vsub.f32 %v10955_v38, %v6530_v54  ;;  %v10958_v28 = vld [vmem:[#allocation103_spill] sm:$0xff] }
 0x33c   : > { %10949 = vst [vmem:[#allocation93_spill] sm:$0xff] %v7364_v59  ;;  %v2259_v36 = vmul.f32 1.442695, %v10953_v47  ;;  %v7375_v57 = vpop.eup %4427  ;;  %4447 = vpow2.f32 %v2243_v58  ;;  %v10957_v43 = vsub.f32 %v10795_v15, %v6502_v1  ;;  %v10959_v6 = vsub.f32 %v10958_v28, %v6506_v10  ;;  %v10962_v58 = vld [vmem:[#allocation106_spill] sm:$0xff]  ;;  %v10966_v28 = vld [vmem:[#allocation107_spill] sm:$0xff] }
 0x33d   : > { %v2257_v8 = vmul.f32 1.442695, %v10952_v3  ;;  %10954 = vst [vmem:[#allocation95_spill] sm:$0xff] %v7375_v57  ;;  %v2261_v59 = vmul.f32 1.442695, %v10956_v50  ;;  %v7386_v3 = vpop.eup %4429  ;;  %4449 = vpow2.f32 %v2245_v39  ;;  %v10963_v57 = vsub.f32 %v10962_v58, %v6530_v54 }
 0x33e   : > { %v2263_v62 = vmul.f32 1.442695, %v10957_v43  ;;  %v2265_v34 = vmul.f32 1.442695, %v10959_v6  ;;  %10960 = vst [vmem:[#allocation96_spill] sm:$0xff] %v7386_v3  ;;  %v10964_v50 = vsub.f32 %v10803_v42, %v6502_v1  ;;  %v7397_v43 = vpop.eup %4431  ;;  %4451 = vpow2.f32 %v2247_v17 }
 0x33f   : > { %v2267_v47 = vmul.f32 1.442695, %v10961_v32  ;;  %v2269_v38 = vmul.f32 1.442695, %v10963_v57  ;;  %10965 = vst [vmem:[#allocation98_spill] sm:$0xff] %v7397_v43  ;;  %v10967_v6 = vsub.f32 %v10966_v28, %v6506_v10  ;;  %v10968_v19 = vsub.f32 %v10807_v41, %v6522_v2  ;;  %v10969_v32 = vld [vmem:[#allocation110_spill] sm:$0xff]  ;;  %v7414_v42 = vpop.eup %4433 }
 0x340   : > { %v2271_v15 = vmul.f32 1.442695, %v10964_v50  ;;  %v10970_v57 = vsub.f32 %v10969_v32, %v6530_v54  ;;  %10971 = vst [vmem:[#allocation97_spill] sm:$0xff] %v7414_v42  ;;  %4453 = vpow2.f32 %v2249_v26  ;;  %v10972_v17 = vsub.f32 %v10811_v21, %v6502_v1  ;;  %v10973_v28 = vld [vmem:[#allocation111_spill] sm:$0xff]  ;;  %v7431_v32 = vpop.eup %4435 }
 0x341   : > { %v7402_v3 = vmul.f32 1.442695, %v10967_v6  ;;  %v7407_v39 = vmul.f32 1.442695, %v10968_v19  ;;  %v10974_v6 = vsub.f32 %v10973_v28, %v6506_v10  ;;  %v10975_v41 = vsub.f32 %v10815_v48, %v6522_v2  ;;  %10976 = vst [vmem:[#allocation100_spill] sm:$0xff] %v7431_v32  ;;  %v10980_v28 = vld [vmem:[#allocation115_spill] sm:$0xff]  ;;  %v7448_v48 = vpop.eup %4437 }
 0x342   : > { %v7412_v58 = vmul.f32 1.442695, %v10970_v57  ;;  %v7419_v50 = vmul.f32 1.442695, %v10972_v17  ;;  %4455 = vpow2.f32 %v2251_v55  ;;  %v10977_v57 = vld [vmem:[#allocation114_spill] sm:$0xff]  ;;  %v10979_v21 = vsub.f32 %v10819_v33, %v6502_v1  ;;  %10982 = vst [vmem:[#allocation101_spill] sm:$0xff] %v7448_v48 }
 0x343   : > { %v7424_v43 = vmul.f32 1.442695, %v10974_v6  ;;  %v7429_v19 = vmul.f32 1.442695, %v10975_v41  ;;  %v10978_v26 = vsub.f32 %v10977_v57, %v6530_v54  ;;  %v10981_v6 = vsub.f32 %v10980_v28, %v6506_v10  ;;  %v10984_v57 = vld [vmem:[#allocation118_spill] sm:$0xff]  ;;  %v7465_v28 = vpop.eup %4439 }
 0x344   : > { %v7441_v17 = vmul.f32 1.442695, %v10979_v21  ;;  %4457 = vpow2.f32 %v2253_v30  ;;  %v10983_v55 = vsub.f32 %v10823_v44, %v6522_v2  ;;  %v10986_v33 = vsub.f32 %v10827_v45, %v6502_v1  ;;  %10987 = vst [vmem:[#allocation104_spill] sm:$0xff] %v7465_v28  ;;  %v7482_v45 = vpop.eup %4441 }
 0x345   : > { %v7436_v42 = vmul.f32 1.442695, %v10978_v26  ;;  %v7446_v0 = vmul.f32 1.442695, %v10981_v6  ;;  %v10985_v26 = vsub.f32 %v10984_v57, %v6530_v54  ;;  %4459 = vpow2.f32 %v2255_v4  ;;  %v10988_v6 = vld [vmem:[#allocation119_spill] sm:$0xff]  ;;  %v10991_v57 = vld [vmem:[#allocation122_spill] sm:$0xff] }
 0x346   : > { %v7453_v41 = vmul.f32 1.442695, %v10983_v55  ;;  %v7463_v21 = vmul.f32 1.442695, %v10986_v33  ;;  %v10989_v30 = vsub.f32 %v10988_v6, %v6506_v10  ;;  %v10990_v44 = vsub.f32 %v10831_v14, %v6522_v2  ;;  %10993 = vst [vmem:[#allocation105_spill] sm:$0xff] %v7482_v45  ;;  %v10995_v6 = vld [vmem:[#allocation123_spill] sm:$0xff] }
 0x347   : > { %v7458_v32 = vmul.f32 1.442695, %v10985_v26  ;;  %v10992_v26 = vsub.f32 %v10991_v57, %v6530_v54  ;;  %4461 = vpow2.f32 %v2257_v8  ;;  %v10994_v4 = vsub.f32 %v10835_v35, %v6502_v1  ;;  %v7499_v57 = vpop.eup %4443 }
 0x348   : > { %v7470_v48 = vmul.f32 1.442695, %v10989_v30  ;;  %v7475_v55 = vmul.f32 1.442695, %v10990_v44  ;;  %v10996_v30 = vsub.f32 %v10995_v6, %v6506_v10  ;;  %v10997_v14 = vsub.f32 %v10839_v22, %v6522_v2  ;;  %10998 = vst [vmem:[#allocation108_spill] sm:$0xff] %v7499_v57  ;;  %v11002_v6 = vld [vmem:[#allocation127_spill] sm:$0xff]  ;;  %v7516_v22 = vpop.eup %4445 }
 0x349   : > { %v7480_v11 = vmul.f32 1.442695, %v10992_v26  ;;  %v7487_v33 = vmul.f32 1.442695, %v10994_v4  ;;  %4463 = vpow2.f32 %v2259_v36  ;;  %v10999_v26 = vld [vmem:[#allocation126_spill] sm:$0xff]  ;;  %v11001_v35 = vsub.f32 %v10843_v31, %v6502_v1  ;;  %11004 = vst [vmem:[#allocation109_spill] sm:$0xff] %v7516_v22 }
 0x34a   : > { %v7492_v28 = vmul.f32 1.442695, %v10996_v30  ;;  %v7497_v44 = vmul.f32 1.442695, %v10997_v14  ;;  %v11000_v8 = vsub.f32 %v10999_v26, %v6530_v54  ;;  %v11003_v30 = vsub.f32 %v11002_v6, %v6506_v10  ;;  %v11006_v26 = vld [vmem:[#allocation130_spill] sm:$0xff]  ;;  %v7533_v6 = vpop.eup %4447 }
 0x34b   : > { %v7509_v4 = vmul.f32 1.442695, %v11001_v35  ;;  %4465 = vpow2.f32 %v2261_v59  ;;  %v11005_v36 = vsub.f32 %v10847_v53, %v6522_v2  ;;  %v11009_v31 = vsub.f32 %v10851_v60, %v6502_v1  ;;  %11010 = vst [vmem:[#allocation113_spill] sm:$0xff] %v7533_v6  ;;  %v7550_v60 = vpop.eup %4449 }
 0x34c   : > { %v7504_v45 = vmul.f32 1.442695, %v11000_v8  ;;  %v7514_v12 = vmul.f32 1.442695, %v11003_v30  ;;  %v11007_v8 = vsub.f32 %v11006_v26, %v6530_v54  ;;  %4467 = vpow2.f32 %v2263_v62  ;;  %v11011_v30 = vld [vmem:[#allocation131_spill] sm:$0xff]  ;;  %v11014_v26 = vld [vmem:[#allocation134_spill] sm:$0xff] }
 0x34d   : > { %v7521_v14 = vmul.f32 1.442695, %v11005_v36  ;;  %v7531_v35 = vmul.f32 1.442695, %v11009_v31  ;;  %v11012_v59 = vsub.f32 %v11011_v30, %v6506_v10  ;;  %v11013_v53 = vsub.f32 %v10855_v61, %v6522_v2  ;;  %11016 = vst [vmem:[#allocation116_spill] sm:$0xff] %v7550_v60  ;;  %v11018_v30 = vld [vmem:[#allocation135_spill] sm:$0xff] }
 0x34e   : > { %v7526_v57 = vmul.f32 1.442695, %v11007_v8  ;;  %v11015_v8 = vsub.f32 %v11014_v26, %v6530_v54  ;;  %4469 = vpow2.f32 %v2265_v34  ;;  %v11017_v62 = vsub.f32 %v10859_v13, %v6502_v1  ;;  %v7567_v26 = vpop.eup %4451 }
 0x34f   : > { %v7538_v22 = vmul.f32 1.442695, %v11012_v59  ;;  %v7543_v36 = vmul.f32 1.442695, %v11013_v53  ;;  %v11019_v59 = vsub.f32 %v11018_v30, %v6506_v10  ;;  %v11021_v61 = vsub.f32 %v10863_v27, %v6522_v2  ;;  %11022 = vst [vmem:[#allocation120_spill] sm:$0xff] %v7567_v26  ;;  %v11026_v30 = vld [vmem:[#allocation139_spill] sm:$0xff]  ;;  %v7584_v27 = vpop.eup %4453 }
 0x350   : > { %11008 = vst [vmem:[#allocation112_spill] sm:$0xff] %v7526_v57  ;;  %v7548_v57 = vmul.f32 1.442695, %v11015_v8  ;;  %v7555_v31 = vmul.f32 1.442695, %v11017_v62  ;;  %4471 = vpow2.f32 %v2267_v47  ;;  %v11023_v8 = vld [vmem:[#allocation138_spill] sm:$0xff]  ;;  %v11025_v13 = vsub.f32 %v10867_v37, %v6502_v1 }
 0x351   : > { %v7560_v6 = vmul.f32 1.442695, %v11019_v59  ;;  %v7565_v53 = vmul.f32 1.442695, %v11021_v61  ;;  %v11024_v34 = vsub.f32 %v11023_v8, %v6530_v54  ;;  %v11027_v59 = vsub.f32 %v11026_v30, %v6506_v10  ;;  %11028 = vst [vmem:[#allocation121_spill] sm:$0xff] %v7584_v27  ;;  %v11030_v8 = vld [vmem:[#allocation142_spill] sm:$0xff]  ;;  %v7601_v30 = vpop.eup %4455 }
 0x352   : > { %v7577_v62 = vmul.f32 1.442695, %v11025_v13  ;;  %4473 = vpow2.f32 %v2269_v38  ;;  %v11029_v47 = vsub.f32 %v10871_v46, %v6522_v2  ;;  %v11033_v37 = vsub.f32 %v10875_v40, %v6502_v1  ;;  %11034 = vst [vmem:[#allocation125_spill] sm:$0xff] %v7601_v30  ;;  %v7618_v40 = vpop.eup %4457 }
 0x353   : > { %11020 = vst [vmem:[#allocation117_spill] sm:$0xff] %v7560_v6  ;;  %v7572_v60 = vmul.f32 1.442695, %v11024_v34  ;;  %v7582_v6 = vmul.f32 1.442695, %v11027_v59  ;;  %v11031_v34 = vsub.f32 %v11030_v8, %v6530_v54  ;;  %4475 = vpow2.f32 %v2271_v15  ;;  %v11035_v59 = vld [vmem:[#allocation143_spill] sm:$0xff] }
 0x354   : > { %v7589_v61 = vmul.f32 1.442695, %v11029_v47  ;;  %v7599_v13 = vmul.f32 1.442695, %v11033_v37  ;;  %v11036_v38 = vsub.f32 %v11035_v59, %v6506_v10  ;;  %v11037_v46 = vsub.f32 %v10879_v7, %v6522_v2  ;;  %v11038_v8 = vld [vmem:[#allocation146_spill] sm:$0xff]  ;;  %11040 = vst [vmem:[#allocation128_spill] sm:$0xff] %v7618_v40 }
 0x355   : > { %v7594_v26 = vmul.f32 1.442695, %v11031_v34  ;;  %v11039_v34 = vsub.f32 %v11038_v8, %v6530_v54  ;;  %4477 = vpow2.f32 %v7402_v3  ;;  %v11041_v15 = vsub.f32 %v10883_v29, %v6502_v1  ;;  %v11042_v59 = vld [vmem:[#allocation147_spill] sm:$0xff]  ;;  %v11046_v3 = vld [vmem:[#allocation150_spill] sm:$0xff] }
 0x356   : > { %v7606_v27 = vmul.f32 1.442695, %v11036_v38  ;;  %v7611_v47 = vmul.f32 1.442695, %v11037_v46  ;;  %v11043_v38 = vsub.f32 %v11042_v59, %v6506_v10  ;;  %v11044_v46 = vsub.f32 %v10887_v20, %v6522_v2 }
 0x357   : > { %11032 = vst [vmem:[#allocation124_spill] sm:$0xff] %v7594_v26  ;;  %v7616_v26 = vmul.f32 1.442695, %v11039_v34  ;;  %v7624_v37 = vmul.f32 1.442695, %v11041_v15  ;;  %v7636_v34 = vpop.eup %4459  ;;  %4479 = vpow2.f32 %v7407_v39  ;;  %v11047_v40 = vsub.f32 %v11046_v3, %v6530_v54 }
 0x358   : > { %v7629_v7 = vmul.f32 1.442695, %v11043_v38  ;;  %v7634_v8 = vmul.f32 1.442695, %v11044_v46  ;;  %11045 = vst [vmem:[#allocation129_spill] sm:$0xff] %v7636_v34  ;;  %v11048_v15 = vsub.f32 %v10891_v16, %v6502_v1  ;;  %v11050_v38 = vld [vmem:[#allocation151_spill] sm:$0xff]  ;;  %v7654_v46 = vpop.eup %4461  ;;  %4481 = vpow2.f32 %v7412_v58 }
 0x359   : > { %v7642_v29 = vmul.f32 1.442695, %v11047_v40  ;;  %v11051_v30 = vsub.f32 %v11050_v38, %v6506_v10  ;;  %11052 = vst [vmem:[#allocation133_spill] sm:$0xff] %v7654_v46  ;;  %v11053_v39 = vsub.f32 %v10895_v56, %v6522_v2  ;;  %v11054_v40 = vld [vmem:[#allocation154_spill] sm:$0xff]  ;;  %4483 = vpow2.f32 %v7419_v50  ;;  %v11060_v58 = vld [vmem:[#allocation155_spill] sm:$0xff]  ;;  %v11067_v50 = vld [vmem:[#allocation157_spill] sm:$0xff] }
 0x35a   : > { %v7647_v59 = vmul.f32 1.442695, %v11048_v15  ;;  %v11055_v34 = vsub.f32 %v11054_v40, %v6530_v54  ;;  %v11057_v15 = vld [vmem:[#allocation153_spill] sm:$0xff]  ;;  %v11061_v46 = vsub.f32 %v11060_v58, %v6506_v10  ;;  %4485 = vpow2.f32 %v7424_v43  ;;  %v11075_v43 = vld [vmem:[#allocation162_spill] sm:$0xff] }
 0x35b   : > { %v7652_v20 = vmul.f32 1.442695, %v11051_v30  ;;  %v7660_v3 = vmul.f32 1.442695, %v11053_v39  ;;  %v7672_v30 = vpop.eup %4463  ;;  %v11063_v39 = vsub.f32 %v10899_v23, %v6522_v2  ;;  %4487 = vpow2.f32 %v7429_v19 }
 0x35c   : > { %11049 = vst [vmem:[#allocation132_spill] sm:$0xff] %v7647_v59  ;;  %v7665_v16 = vmul.f32 1.442695, %v11055_v34  ;;  %v11058_v59 = vsub.f32 %v11057_v15, %v6502_v1  ;;  %11059 = vst [vmem:[#allocation137_spill] sm:$0xff] %v7672_v30  ;;  %v7678_v56 = vmul.f32 1.442695, %v11061_v46  ;;  %v11068_v30 = vsub.f32 %v11067_v50, %v6502_v1 }
 0x35d   : > { %v7683_v40 = vmul.f32 1.442695, %v11063_v39  ;;  %v11064_v34 = vld [vmem:[#allocation158_spill] sm:$0xff]  ;;  %v11070_v46 = vld [vmem:[#allocation159_spill] sm:$0xff]  ;;  %v11073_v39 = vsub.f32 %v10903_v52, %v6522_v2  ;;  %4489 = vpow2.f32 %v7436_v42  ;;  %v11083_v19 = vsub.f32 %v10907_v9, %v6522_v2 }
 0x35e   : > { %11056 = vst [vmem:[#allocation136_spill] sm:$0xff] %v7665_v16  ;;  %v7670_v38 = vmul.f32 1.442695, %v11058_v59  ;;  %11062 = vst [vmem:[#allocation140_spill] sm:$0xff] %v7678_v56  ;;  %v11065_v16 = vsub.f32 %v11064_v34, %v6530_v54  ;;  %v7690_v59 = vpop.eup %4465  ;;  %v7696_v58 = vmul.f32 1.442695, %v11068_v30  ;;  %v11071_v56 = vsub.f32 %v11070_v46, %v6506_v10 }
 0x35f   : > { %11066 = vst [vmem:[#allocation141_spill] sm:$0xff] %v7690_v59  ;;  %v7706_v34 = vmul.f32 1.442695, %v11073_v39  ;;  %v11076_v59 = vsub.f32 %v11075_v43, %v6530_v54  ;;  %v11077_v30 = vld [vmem:[#allocation161_spill] sm:$0xff]  ;;  %v11084_v43 = vld [vmem:[#allocation166_spill] sm:$0xff]  ;;  %4491 = vpow2.f32 %v7441_v17  ;;  %v11090_v42 = vld [vmem:[#allocation167_spill] sm:$0xff]  ;;  %v11107_v17 = vsub.f32 %v10915_v5, %v6522_v2 }
 0x360   : > { %v7688_v15 = vmul.f32 1.442695, %v11065_v16  ;;  %11069 = vst [vmem:[#allocation144_spill] sm:$0xff] %v7696_v58  ;;  %v7701_v23 = vmul.f32 1.442695, %v11071_v56  ;;  %v7708_v16 = vpop.eup %4467  ;;  %v11078_v58 = vsub.f32 %v11077_v30, %v6502_v1  ;;  %v11079_v56 = vld [vmem:[#allocation163_spill] sm:$0xff]  ;;  %4493 = vpow2.f32 %v7446_v0 }
 0x361   : > { %11074 = vst [vmem:[#allocation148_spill] sm:$0xff] %v7708_v16  ;;  %v7714_v50 = vmul.f32 1.442695, %v11076_v59  ;;  %v7726_v39 = vpop.eup %4469  ;;  %v7732_v59 = vmul.f32 1.442695, %v11083_v19  ;;  %v11087_v16 = vld [vmem:[#allocation165_spill] sm:$0xff]  ;;  %v11093_v19 = vsub.f32 %v10911_v49, %v6522_v2  ;;  %4495 = vpow2.f32 %v7453_v41 }
 0x362   : > { %11072 = vst [vmem:[#allocation145_spill] sm:$0xff] %v7701_v23  ;;  %v7719_v46 = vmul.f32 1.442695, %v11078_v58  ;;  %v11080_v23 = vsub.f32 %v11079_v56, %v6506_v10  ;;  %11082 = vst [vmem:[#allocation152_spill] sm:$0xff] %v7726_v39  ;;  %v11085_v58 = vsub.f32 %v11084_v43, %v6530_v54  ;;  %v11091_v39 = vsub.f32 %v11090_v42, %v6506_v10  ;;  %v11100_v42 = vld [vmem:[#allocation169_spill] sm:$0xff]  ;;  %v11103_v49 = vld [vmem:[#allocation171_spill] sm:$0xff] }
 0x363   : > { %v7755_v43 = vmul.f32 1.442695, %v11093_v19  ;;  %v11104_v19 = vsub.f32 %v11103_v49, %v6506_v10  ;;  %v7785_v0 = vmul.f32 1.442695, %v11107_v17  ;;  %4497 = vpow2.f32 %v7458_v32  ;;  %v11115_v5 = vld [vmem:[#allocation175_spill] sm:$0xff] }
 0x364   : > { %v7724_v52 = vmul.f32 1.442695, %v11080_v23  ;;  %v7737_v30 = vmul.f32 1.442695, %v11085_v58  ;;  %v11088_v23 = vsub.f32 %v11087_v16, %v6502_v1  ;;  %v7750_v9 = vmul.f32 1.442695, %v11091_v39 }
 0x365   : > { %11094 = vst [vmem:[#allocation168_spill] sm:$0xff] %v7755_v43  ;;  %v11095_v58 = vld [vmem:[#allocation170_spill] sm:$0xff]  ;;  %v11101_v39 = vsub.f32 %v11100_v42, %v6502_v1  ;;  %v7775_v43 = vmul.f32 1.442695, %v11104_v19  ;;  %v11116_v17 = vsub.f32 %v11115_v5, %v6506_v10  ;;  %4499 = vpow2.f32 %v7463_v21  ;;  %v11122_v5 = vld [vmem:[#allocation177_spill] sm:$0xff] }
 0x366   : > { %11081 = vst [vmem:[#allocation149_spill] sm:$0xff] %v7724_v52  ;;  %11086 = vst [vmem:[#allocation156_spill] sm:$0xff] %v7737_v30  ;;  %v7742_v56 = vmul.f32 1.442695, %v11088_v23  ;;  %v7744_v52 = vpop.eup %4471  ;;  %v11096_v30 = vsub.f32 %v11095_v58, %v6530_v54  ;;  %v4285_v58 = vld [vmem:[%s5989_s18 + $0xf8] sm:$0xff]   ;;  %4501 = vpow2.f32 %v7470_v48 }
 0x367   : > { %11089 = vst [vmem:[#allocation160_spill] sm:$0xff] %v7744_v52  ;;  %11092 = vst [vmem:[#allocation164_spill] sm:$0xff] %v7750_v9  ;;  %v7762_v23 = vpop.eup %4473  ;;  %v11099_v52 = vld [vmem:[#allocation200_spill] sm:$0xff]  ;;  %v7770_v9 = vmul.f32 1.442695, %v11101_v39  ;;  %3328 = vxpose.xlu1.c.b16.end [8/8] (narrow) %v4285_v58, 16  ;;  %4503 = vpow2.f32 %v7475_v55 }
 0x368   : > { %v7760_v16 = vmul.f32 1.442695, %v11096_v30  ;;  %11098 = vst [vmem:[#allocation176_spill] sm:$0xff] %v7762_v23  ;;  %11105 = vst [vmem:[#allocation184_spill] sm:$0xff] %v7775_v43  ;;  %v4286_v30 = vld [vmem:[%s5989_s18 + $0x78] sm:$0xff]   ;;  %v11108_v23 = vld [vmem:[#allocation174_spill] sm:$0xff]  ;;  %4505 = vpow2.f32 %v7480_v11 }
 0x369   : > { %11102 = vst [vmem:[#allocation180_spill] sm:$0xff] %v7770_v9  ;;  %v11109_v42 = vsub.f32 %v11108_v23, %v6530_v54  ;;  %v11110_v9 = vld [vmem:[#allocation173_spill] sm:$0xff]  ;;  %v7805_v23 = vmul.f32 1.442695, %v11116_v17  ;;  %3296 = vxpose.xlu0.c.b16.end [8/8] (narrow) %v4286_v30, 16  ;;  %v11123_v17 = vsub.f32 %v11122_v5, %v6502_v1  ;;  %v11129_v30 = vld [vmem:[#allocation204_spill] sm:$0xff] }
 0x36a   : > { %11097 = vst [vmem:[#allocation172_spill] sm:$0xff] %v7760_v16  ;;  %v7779_v16 = vpop.eup %4475  ;;  %v11111_v49 = vsub.f32 %v11110_v9, %v6502_v1  ;;  %v2027_v21 = vsub.f32 %v11129_v30, %v6522_v2  ;;  %v11131_v5 = vld [vmem:[#allocation182_spill] sm:$0xff]  ;;  %4507 = vpow2.f32 %v7487_v33 }
 0x36b   : > { %11106 = vst [vmem:[#allocation188_spill] sm:$0xff] %v7779_v16  ;;  %v7790_v39 = vmul.f32 1.442695, %v11109_v42  ;;  %v7797_v43 = vpop.eup %4477  ;;  %v11114_v16 = vld [vmem:[#allocation202_spill] sm:$0xff]  ;;  %11117 = vst [vmem:[#allocation102_spill] sm:$0xff] %v7805_v23  ;;  %v11118_v42 = vsub.f32 %v10919_v25, %v6522_v2  ;;  %4509 = vpow2.f32 %v7492_v28 }
 0x36c   : > { %v7795_v19 = vmul.f32 1.442695, %v11111_v49  ;;  %11113 = vst [vmem:[#allocation99_spill] sm:$0xff] %v7797_v43  ;;  %v2024_v41 = vsub.f32 %v11114_v16, %v6530_v54  ;;  %v7812_v49 = vpop.eup %4479  ;;  %v11120_v16 = vld [vmem:[#allocation178_spill] sm:$0xff]  ;;  %v7823_v23 = vmul.f32 1.442695, %v11123_v17  ;;  %v11132_v17 = vsub.f32 %v11131_v5, %v6530_v54 }
 0x36d   : > { %v7810_v9 = vmul.f32 1.442695, %v11118_v42  ;;  %11119 = vst [vmem:[#allocation103_spill] sm:$0xff] %v7812_v49  ;;  %v11121_v32 = vsub.f32 %v11120_v16, %v6530_v54  ;;  %v7830_v58 = vpop.eup %4481  ;;  %v11130_v16 = vsub.f32 %v10923_v24, %v6522_v2  ;;  %v11140_v5 = vsub.f32 %v10927_v51, %v6522_v2 }
 0x36e   : > { %11112 = vst [vmem:[#allocation192_spill] sm:$0xff] %v7795_v19  ;;  %11124 = vst [vmem:[#allocation106_spill] sm:$0xff] %v7823_v23  ;;  %v11125_v19 = vld [vmem:[#allocation179_spill] sm:$0xff]  ;;  %v7843_v49 = vmul.f32 1.442695, %v11132_v17  ;;  %4511 = vpow2.f32 %v7497_v44 }
 0x36f   : > { %v7818_v43 = vmul.f32 1.442695, %v11121_v32  ;;  %v11126_v25 = vsub.f32 %v11125_v19, %v6506_v10  ;;  %11128 = vst [vmem:[#allocation110_spill] sm:$0xff] %v7830_v58  ;;  %v7838_v32 = vmul.f32 1.442695, %v11130_v16  ;;  %v4287_v19 = vld [vmem:[%s5989_s18 + $0x80] sm:$0xff]   ;;  %4513 = vpow2.f32 %v7504_v45 }
 0x370   : > { %11133 = vst [vmem:[#allocation111_spill] sm:$0xff] %v7843_v49  ;;  %v11135_v58 = vld [vmem:[#allocation181_spill] sm:$0xff]  ;;  %v11137_v23 = vld [vmem:[#allocation183_spill] sm:$0xff]  ;;  %v7863_v17 = vmul.f32 1.442695, %v11140_v5  ;;  %3305 = vxpose.xlu1.c.b16.start [1/8] (narrow) %v4287_v19, 16 }
 0x371   : > { %v7828_v42 = vmul.f32 1.442695, %v11126_v25  ;;  %v4288_v25 = vld [vmem:[%s5989_s18] sm:$0xff]   ;;  %v11136_v30 = vsub.f32 %v11135_v58, %v6502_v1  ;;  %v11138_v24 = vsub.f32 %v11137_v23, %v6506_v10  ;;  %v11143_v58 = vld [vmem:[#allocation186_spill] sm:$0xff] }
 0x372   : > { %3273 = vxpose.xlu0.c.b16.start [1/8] (narrow) %v4288_v25, 16  ;;  %v11157_v25 = vld [vmem:[#allocation208_spill] sm:$0xff] }
 0x373   : > { %11127 = vst [vmem:[#allocation107_spill] sm:$0xff] %v7828_v42  ;;  %v7847_v42 = vpop.eup %4483  ;;  %v7853_v48 = vmul.f32 1.442695, %v11136_v30  ;;  %v7858_v16 = vmul.f32 1.442695, %v11138_v24  ;;  %v11144_v30 = vsub.f32 %v11143_v58, %v6530_v54  ;;  %v11146_v24 = vld [vmem:[#allocation185_spill] sm:$0xff]  ;;  %v11151_v58 = vsub.f32 %v10931_v63, %v6522_v2 }
 0x374   : > { %11134 = vst [vmem:[#allocation114_spill] sm:$0xff] %v7847_v42  ;;  %v7865_v49 = vpop.eup %4485  ;;  %v11142_v42 = vld [vmem:[#allocation206_spill] sm:$0xff]  ;;  %v2031_v33 = vsub.f32 %v11157_v25, %v6522_v2  ;;  %v11161_v63 = vld [vmem:[#allocation191_spill] sm:$0xff]  ;;  %v11165_v25 = vsub.f32 %v10935_v18, %v6522_v2  ;;  %4515 = vpow2.f32 %v7509_v4  ;;  %v11188_v4 = vsub.f32 %v11099_v52, %v6522_v2 }
 0x375   : > { %11139 = vst [vmem:[#allocation115_spill] sm:$0xff] %v7858_v16  ;;  %11141 = vst [vmem:[#allocation118_spill] sm:$0xff] %v7865_v49  ;;  %v2028_v55 = vsub.f32 %v11142_v42, %v6530_v54  ;;  %v7873_v23 = vmul.f32 1.442695, %v11144_v30  ;;  %v11147_v16 = vsub.f32 %v11146_v24, %v6502_v1  ;;  %v7880_v5 = vpop.eup %4487  ;;  %v11149_v42 = vld [vmem:[#allocation187_spill] sm:$0xff]  ;;  %4517 = vpow2.f32 %v7514_v12 }
 0x376   : > { %11148 = vst [vmem:[#allocation122_spill] sm:$0xff] %v7880_v5  ;;  %v11150_v11 = vsub.f32 %v11149_v42, %v6506_v10  ;;  %v7891_v30 = vmul.f32 1.442695, %v11151_v58  ;;  %v7898_v19 = vpop.eup %4489  ;;  %v11158_v42 = vld [vmem:[#allocation189_spill] sm:$0xff]  ;;  %v11162_v58 = vsub.f32 %v11161_v63, %v6506_v10  ;;  %v7921_v28 = vmul.f32 1.442695, %v11165_v25 }
 0x377   : > { %11145 = vst [vmem:[#allocation119_spill] sm:$0xff] %v7873_v23  ;;  %v7878_v51 = vmul.f32 1.442695, %v11147_v16  ;;  %v11153_v23 = vld [vmem:[#allocation190_spill] sm:$0xff]  ;;  %11156 = vst [vmem:[#allocation127_spill] sm:$0xff] %v7898_v19  ;;  %v11174_v18 = vld [vmem:[#allocation195_spill] sm:$0xff]  ;;  %4519 = vpow2.f32 %v7521_v14 }
 0x378   : > { %v7886_v49 = vmul.f32 1.442695, %v11150_v11  ;;  %11152 = vst [vmem:[#allocation123_spill] sm:$0xff] %v7891_v30  ;;  %v11154_v16 = vsub.f32 %v11153_v23, %v6530_v54  ;;  %v11159_v11 = vsub.f32 %v11158_v42, %v6502_v1  ;;  %v7911_v30 = vmul.f32 1.442695, %v11162_v58  ;;  %v4289_v23 = vld [vmem:[%s5989_s18 + $0x88] sm:$0xff]  }
 0x379   : > { %v11166_v19 = vld [vmem:[#allocation194_spill] sm:$0xff]  ;;  %v11175_v25 = vsub.f32 %v11174_v18, %v6506_v10  ;;  %3306 = vxpose.xlu1.c.b16.cont [2/8] (narrow) %v4289_v23, 16  ;;  %v7991_v52 = vmul.f32 1.442695, %v2027_v21  ;;  %v11200_v14 = vld [vmem:[#allocation205_spill] sm:$0xff]  ;;  %v11203_v21 = vld [vmem:[#allocation207_spill] sm:$0xff] }
 0x37a   : > { %v7896_v24 = vmul.f32 1.442695, %v11154_v16  ;;  %v7906_v5 = vmul.f32 1.442695, %v11159_v11  ;;  %11163 = vst [vmem:[#allocation131_spill] sm:$0xff] %v7911_v30  ;;  %v4290_v16 = vld [vmem:[%s5989_s18 + $0x8] sm:$0xff]   ;;  %v11167_v42 = vsub.f32 %v11166_v19, %v6530_v54 }
 0x37b   : > { %v7941_v19 = vmul.f32 1.442695, %v11175_v25  ;;  %3274 = vxpose.xlu0.c.b16.cont [2/8] (narrow) %v4290_v16, 16  ;;  %v7972_v16 = vmul.f32 1.442695, %v11188_v4  ;;  %11196 = vst [vmem:[#allocation153_spill] sm:$0xff] %v7991_v52 }
 0x37c   : > { %11155 = vst [vmem:[#allocation126_spill] sm:$0xff] %v7896_v24  ;;  %11160 = vst [vmem:[#allocation130_spill] sm:$0xff] %v7906_v5  ;;  %v7915_v24 = vpop.eup %4491  ;;  %v7926_v11 = vmul.f32 1.442695, %v11167_v42  ;;  %v11169_v5 = vld [vmem:[#allocation193_spill] sm:$0xff]  ;;  %v11177_v42 = vld [vmem:[#allocation196_spill] sm:$0xff] }
 0x37d   : > { %11164 = vst [vmem:[#allocation134_spill] sm:$0xff] %v7915_v24  ;;  %v11170_v63 = vsub.f32 %v11169_v5, %v6502_v1  ;;  %v7933_v30 = vpop.eup %4493  ;;  %v11173_v24 = vld [vmem:[#allocation210_spill] sm:$0xff]  ;;  %11176 = vst [vmem:[#allocation142_spill] sm:$0xff] %v7941_v19  ;;  %v11185_v19 = vld [vmem:[#allocation199_spill] sm:$0xff]  ;;  %v8011_v52 = vmul.f32 1.442695, %v2031_v33 }
 0x37e   : > { %11168 = vst [vmem:[#allocation135_spill] sm:$0xff] %v7926_v11  ;;  %11172 = vst [vmem:[#allocation139_spill] sm:$0xff] %v7933_v30  ;;  %v2032_v44 = vsub.f32 %v11173_v24, %v6530_v54  ;;  %v11178_v11 = vsub.f32 %v11177_v42, %v6522_v2  ;;  %v11179_v24 = vld [vmem:[#allocation198_spill] sm:$0xff]  ;;  %v11198_v4 = vld [vmem:[#allocation112_spill] sm:$0xff] }
 0x37f   : > { %v7931_v58 = vmul.f32 1.442695, %v11170_v63  ;;  %v7948_v63 = vpop.eup %4495  ;;  %v11180_v30 = vsub.f32 %v11179_v24, %v6530_v54  ;;  %v4291_v24 = vld [vmem:[%s5989_s18 + $0x90] sm:$0xff]   ;;  %4521 = vpow2.f32 %v11198_v4  ;;  %11206 = vst [vmem:[#allocation162_spill] sm:$0xff] %v8011_v52  ;;  %v11218_v52 = vld [vmem:[#allocation214_spill] sm:$0xff] }
 0x380   : > { %v7946_v5 = vmul.f32 1.442695, %v11178_v11  ;;  %v11186_v11 = vsub.f32 %v11185_v19, %v6506_v10  ;;  %v7966_v23 = vpop.eup %4497  ;;  %v11190_v19 = vld [vmem:[#allocation201_spill] sm:$0xff]  ;;  %3307 = vxpose.xlu1.c.b16.cont [3/8] (narrow) %v4291_v24, 16  ;;  %4523 = vpow2.f32 %v7531_v35 }
 0x381   : > { %11171 = vst [vmem:[#allocation138_spill] sm:$0xff] %v7931_v58  ;;  %v7954_v45 = vmul.f32 1.442695, %v11180_v30  ;;  %v11182_v58 = vld [vmem:[#allocation197_spill] sm:$0xff]  ;;  %v7974_v30 = vmul.f32 1.442695, %v2024_v41  ;;  %4525 = vpow2.f32 %v7538_v22 }
 0x382   : > { %v11183_v18 = vsub.f32 %v11182_v58, %v6502_v1  ;;  %v7964_v42 = vmul.f32 1.442695, %v11186_v11  ;;  %v4292_v58 = vld [vmem:[%s5989_s18 + $0x10] sm:$0xff]   ;;  %v11191_v11 = vsub.f32 %v11190_v19, %v6502_v1  ;;  %v11201_v19 = vsub.f32 %v11200_v14, %v6502_v1  ;;  %v11208_v14 = vld [vmem:[#allocation209_spill] sm:$0xff] }
 0x383   : > { %11181 = vst [vmem:[#allocation143_spill] sm:$0xff] %v7954_v45  ;;  %3275 = vxpose.xlu0.c.b16.cont [3/8] (narrow) %v4292_v58, 16  ;;  %v11209_v24 = vsub.f32 %v11208_v14, %v6502_v1  ;;  %4527 = vpow2.f32 %v7543_v36  ;;  %v11219_v14 = vsub.f32 %v11218_v52, %v6530_v54  ;;  %v11225_v36 = vld [vmem:[#allocation215_spill] sm:$0xff] }
 0x384   : > { %v7959_v25 = vmul.f32 1.442695, %v11183_v18  ;;  %11187 = vst [vmem:[#allocation147_spill] sm:$0xff] %v7964_v42  ;;  %v7978_v18 = vpop.eup %4499  ;;  %v7984_v42 = vmul.f32 1.442695, %v11191_v11  ;;  %4529 = vpow2.f32 %v7548_v57 }
 0x385   : > { %11189 = vst [vmem:[#allocation150_spill] sm:$0xff] %v7978_v18  ;;  %v7993_v41 = vpop.eup %4501  ;;  %v7996_v18 = vmul.f32 1.442695, %v2028_v55  ;;  %v8001_v11 = vmul.f32 1.442695, %v11201_v19  ;;  %v11211_v19 = vld [vmem:[#allocation211_spill] sm:$0xff]  ;;  %4531 = vpow2.f32 %v7555_v31 }
 0x386   : > { %11184 = vst [vmem:[#allocation146_spill] sm:$0xff] %v7959_v25  ;;  %11192 = vst [vmem:[#allocation151_spill] sm:$0xff] %v7984_v42  ;;  %v11193_v25 = vld [vmem:[#allocation203_spill] sm:$0xff]  ;;  %v8013_v55 = vmul.f32 1.442695, %v2032_v44  ;;  %v11212_v35 = vsub.f32 %v11211_v19, %v6506_v10  ;;  %v11215_v44 = vld [vmem:[#allocation212_spill] sm:$0xff] }
 0x387   : > { %v11194_v12 = vsub.f32 %v11193_v25, %v6506_v10  ;;  %11197 = vst [vmem:[#allocation155_spill] sm:$0xff] %v7993_v41  ;;  %11199 = vst [vmem:[#allocation158_spill] sm:$0xff] %v7996_v18  ;;  %v8003_v25 = vpop.eup %4503  ;;  %v8021_v58 = vmul.f32 1.442695, %v11209_v24  ;;  %v8041_v24 = vmul.f32 1.442695, %v11219_v14 }
 0x388   : > { %11202 = vst [vmem:[#allocation157_spill] sm:$0xff] %v8001_v11  ;;  %11207 = vst [vmem:[#allocation161_spill] sm:$0xff] %v8013_v55  ;;  %v8015_v4 = vpop.eup %4505  ;;  %v8026_v11 = vmul.f32 1.442695, %v11212_v35  ;;  %v11216_v55 = vsub.f32 %v11215_v44, %v6522_v2  ;;  %v11241_v31 = vld [vmem:[#allocation220_spill] sm:$0xff]  ;;  %v11450_v18 = vld [vmem:[#allocation43_spill] sm:$0xff] }
 0x389   : > { %v7989_v45 = vmul.f32 1.442695, %v11194_v12  ;;  %v11204_v12 = vsub.f32 %v11203_v21, %v6506_v10  ;;  %11210 = vst [vmem:[#allocation163_spill] sm:$0xff] %v8021_v58  ;;  %v4293_v21 = vld [vmem:[%s5989_s18 + $0x98] sm:$0xff]   ;;  %v8030_v33 = vpop.eup %4507  ;;  %11220 = vst [vmem:[#allocation170_spill] sm:$0xff] %v8041_v24  ;;  %v11221_v58 = vld [vmem:[#allocation213_spill] sm:$0xff] }
 0x38a   : > { %11213 = vst [vmem:[#allocation166_spill] sm:$0xff] %v8026_v11  ;;  %11214 = vst [vmem:[#allocation165_spill] sm:$0xff] %v8030_v33  ;;  %v8036_v22 = vmul.f32 1.442695, %v11216_v55  ;;  %v11222_v19 = vsub.f32 %v11221_v58, %v6502_v1  ;;  %v8048_v11 = vpop.eup %4509  ;;  %v11226_v55 = vsub.f32 %v11225_v36, %v6506_v10  ;;  %3308 = vxpose.xlu1.c.b16.cont [4/8] (narrow) %v4293_v21, 16  ;;  %v11234_v24 = vld [vmem:[#allocation217_spill] sm:$0xff] }
 0x38b   : > { %11195 = vst [vmem:[#allocation154_spill] sm:$0xff] %v7989_v45  ;;  %v8009_v41 = vmul.f32 1.442695, %v11204_v12  ;;  %v4294_v12 = vld [vmem:[%s5989_s18 + $0x18] sm:$0xff]   ;;  %11224 = vst [vmem:[#allocation169_spill] sm:$0xff] %v8048_v11  ;;  %v8061_v58 = vpop.eup %4511  ;;  %v11235_v36 = vsub.f32 %v11234_v24, %v6502_v1  ;;  %v11449_v11 = vld [vmem:[#allocation41_spill] sm:$0xff] }
 0x38c   : > { %11217 = vst [vmem:[#allocation167_spill] sm:$0xff] %v8036_v22  ;;  %v8046_v35 = vmul.f32 1.442695, %v11222_v19  ;;  %v8054_v44 = vmul.f32 1.442695, %v11226_v55  ;;  %v11228_v22 = vld [vmem:[#allocation216_spill] sm:$0xff]  ;;  %v8079_v21 = vpop.eup %4513 }
 0x38d   : > { %11205 = vst [vmem:[#allocation159_spill] sm:$0xff] %v8009_v41  ;;  %v11229_v52 = vsub.f32 %v11228_v22, %v6522_v2  ;;  %3276 = vxpose.xlu0.c.b16.cont [4/8] (narrow) %v4294_v12, 16  ;;  %v11231_v19 = vld [vmem:[#allocation218_spill] sm:$0xff]  ;;  %v8072_v55 = vmul.f32 1.442695, %v11235_v36  ;;  %v11240_v12 = vld [vmem:[#allocation117_spill] sm:$0xff]  ;;  %v8094_v41 = vpop.eup %4515 }
 0x38e   : > { %11223 = vst [vmem:[#allocation200_spill] sm:$0xff] %v8046_v35  ;;  %11227 = vst [vmem:[#allocation171_spill] sm:$0xff] %v8054_v44  ;;  %v11232_v35 = vsub.f32 %v11231_v19, %v6530_v54  ;;  %v11237_v44 = vld [vmem:[#allocation219_spill] sm:$0xff]  ;;  %4533 = vpow2.f32 %v11240_v12  ;;  %v4295_v36 = vld [vmem:[%s5989_s18 + $0xa0] sm:$0xff]  }
 0x38f   : > { %v8059_v14 = vmul.f32 1.442695, %v11229_v52  ;;  %11236 = vst [vmem:[#allocation202_spill] sm:$0xff] %v8072_v55  ;;  %v11238_v22 = vsub.f32 %v11237_v44, %v6506_v10  ;;  %v4296_v55 = vld [vmem:[%s5989_s18 + $0x20] sm:$0xff]   ;;  %11247 = vst [vmem:[#allocation179_spill] sm:$0xff] %v8094_v41  ;;  %4535 = vpow2.f32 %v7565_v53  ;;  %v11258_v53 = vld [vmem:[#allocation226_spill] sm:$0xff] }
 0x390   : > { %v8067_v57 = vmul.f32 1.442695, %v11232_v35  ;;  %v11244_v35 = vld [vmem:[#allocation222_spill] sm:$0xff]  ;;  %v11248_v44 = vld [vmem:[#allocation221_spill] sm:$0xff]  ;;  %4537 = vpow2.f32 %v7572_v60  ;;  %3309 = vxpose.xlu1.c.b16.cont [5/8] (narrow) %v4295_v36, 16 }
 0x391   : > { %11230 = vst [vmem:[#allocation174_spill] sm:$0xff] %v8059_v14  ;;  %v8077_v52 = vmul.f32 1.442695, %v11238_v22  ;;  %v11242_v14 = vsub.f32 %v11241_v31, %v6522_v2  ;;  %v11249_v22 = vsub.f32 %v11248_v44, %v6502_v1  ;;  %v11259_v44 = vsub.f32 %v11258_v53, %v6530_v54  ;;  %3277 = vxpose.xlu0.c.b16.cont [5/8] (narrow) %v4296_v55, 16 }
 0x392   : > { %11233 = vst [vmem:[#allocation173_spill] sm:$0xff] %v8067_v57  ;;  %v11245_v57 = vsub.f32 %v11244_v35, %v6530_v54  ;;  %4539 = vpow2.f32 %v7577_v62  ;;  %v11273_v62 = vld [vmem:[#allocation229_spill] sm:$0xff] }
 0x393   : > { %11239 = vst [vmem:[#allocation175_spill] sm:$0xff] %v8077_v52  ;;  %v8085_v19 = vmul.f32 1.442695, %v11242_v14  ;;  %v8100_v12 = vmul.f32 1.442695, %v11249_v22  ;;  %v11251_v52 = vld [vmem:[#allocation223_spill] sm:$0xff]  ;;  %4541 = vpow2.f32 %v7582_v6  ;;  %v11274_v36 = vsub.f32 %v11273_v62, %v6502_v1 }
 0x394   : > { %v8090_v24 = vmul.f32 1.442695, %v11245_v57  ;;  %v11252_v14 = vsub.f32 %v11251_v52, %v6506_v10  ;;  %v8118_v22 = vmul.f32 1.442695, %v11259_v44  ;;  %4543 = vpow2.f32 %v7589_v61  ;;  %v11292_v61 = vld [vmem:[#allocation233_spill] sm:$0xff] }
 0x395   : > { %11243 = vst [vmem:[#allocation178_spill] sm:$0xff] %v8085_v19  ;;  %11250 = vst [vmem:[#allocation204_spill] sm:$0xff] %v8100_v12  ;;  %v11254_v19 = vld [vmem:[#allocation224_spill] sm:$0xff]  ;;  %v11261_v12 = vld [vmem:[#allocation225_spill] sm:$0xff] }
 0x396   : > { %11246 = vst [vmem:[#allocation177_spill] sm:$0xff] %v8090_v24  ;;  %v8105_v31 = vmul.f32 1.442695, %v11252_v14  ;;  %v11255_v57 = vsub.f32 %v11254_v19, %v6522_v2  ;;  %v8112_v24 = vpop.eup %4517  ;;  %11260 = vst [vmem:[#allocation206_spill] sm:$0xff] %v8118_v22  ;;  %v11262_v52 = vsub.f32 %v11261_v12, %v6502_v1  ;;  %v11270_v22 = vld [vmem:[#allocation230_spill] sm:$0xff] }
 0x397   : > { %11257 = vst [vmem:[#allocation183_spill] sm:$0xff] %v8112_v24  ;;  %v8125_v19 = vpop.eup %4519  ;;  %v11271_v12 = vsub.f32 %v11270_v22, %v6530_v54  ;;  %v11280_v22 = vld [vmem:[#allocation232_spill] sm:$0xff] }
 0x398   : > { %11253 = vst [vmem:[#allocation182_spill] sm:$0xff] %v8105_v31  ;;  %v8110_v35 = vmul.f32 1.442695, %v11255_v57  ;;  %v8123_v14 = vmul.f32 1.442695, %v11262_v52  ;;  %v11264_v57 = vld [vmem:[#allocation227_spill] sm:$0xff]  ;;  %v8143_v55 = vpop.eup %4521 }
 0x399   : > { %v11267_v31 = vld [vmem:[#allocation228_spill] sm:$0xff]  ;;  %v8141_v52 = vmul.f32 1.442695, %v11271_v12  ;;  %v11281_v12 = vsub.f32 %v11280_v22, %v6522_v2  ;;  %v11293_v22 = vsub.f32 %v11292_v61, %v6502_v1 }
 0x39a   : > { %11256 = vst [vmem:[#allocation181_spill] sm:$0xff] %v8110_v35  ;;  %11263 = vst [vmem:[#allocation186_spill] sm:$0xff] %v8123_v14  ;;  %v11265_v35 = vsub.f32 %v11264_v57, %v6506_v10  ;;  %v11268_v53 = vsub.f32 %v11267_v31, %v6522_v2  ;;  %v8149_v57 = vmul.f32 1.442695, %v11274_v36  ;;  %v8158_v14 = vpop.eup %4523 }
 0x39b   : > { %11272 = vst [vmem:[#allocation190_spill] sm:$0xff] %v8141_v52  ;;  %11279 = vst [vmem:[#allocation191_spill] sm:$0xff] %v8158_v14  ;;  %v8164_v6 = vmul.f32 1.442695, %v11281_v12  ;;  %v11283_v52 = vld [vmem:[#allocation234_spill] sm:$0xff] }
 0x39c   : > { %v8131_v60 = vmul.f32 1.442695, %v11265_v35  ;;  %v8136_v44 = vmul.f32 1.442695, %v11268_v53  ;;  %11275 = vst [vmem:[#allocation208_spill] sm:$0xff] %v8149_v57  ;;  %v11276_v35 = vld [vmem:[#allocation231_spill] sm:$0xff]  ;;  %v11284_v62 = vsub.f32 %v11283_v52, %v6530_v54  ;;  %v11286_v57 = vlaneseq }
 0x39d   : > { %v4297_v53 = vld [vmem:[%s5989_s18 + $0xa8] sm:$0xff]   ;;  %11282 = vst [vmem:[#allocation194_spill] sm:$0xff] %v8164_v6  ;;  %v8182_v12 = vmul.f32 1.442695, %v11293_v22  ;;  %v11295_v6 = vld [vmem:[#allocation235_spill] sm:$0xff] }
 0x39e   : > { %11266 = vst [vmem:[#allocation185_spill] sm:$0xff] %v8131_v60  ;;  %11269 = vst [vmem:[#allocation187_spill] sm:$0xff] %v8136_v44  ;;  %v11277_v60 = vsub.f32 %v11276_v35, %v6506_v10  ;;  %v4298_v44 = vld [vmem:[%s5989_s18 + $0x28] sm:$0xff]   ;;  %v8169_v36 = vmul.f32 1.442695, %v11284_v62  ;;  %vm8172_vm3 = vcmp.lt.s32.totalorder %v11286_v57, 512  ;;  %v8176_v35 = vpop.eup %4525  ;;  %v11296_v52 = vsub.f32 %v11295_v6, %v6506_v10 }
 0x39f   : > { %11290 = vst [vmem:[#allocation195_spill] sm:$0xff] %v8176_v35  ;;  %11294 = vst [vmem:[#allocation196_spill] sm:$0xff] %v8182_v12  ;;  %v11298_v57 = vld [vmem:[#allocation280_spill] sm:$0xff]  ;;  %3310 = vxpose.xlu1.c.b16.cont [6/8] (narrow) %v4297_v53, 16  ;;  %3278 = vxpose.xlu0.c.b16.cont [6/8] (narrow) %v4298_v44, 16  ;;  %v11302_v12 = vld [vmem:[#allocation238_spill] sm:$0xff] }
 0x3a0   : > { %v8154_v31 = vmul.f32 1.442695, %v11277_v60  ;;  %11285 = vst [vmem:[#allocation193_spill] sm:$0xff] %v8169_v36  ;;  %v11287_v60 = vmov 0  ;;  %v8187_v62 = vmul.f32 1.442695, %v11296_v52  ;;  %v8192_v36 = vpop.eup %4527  ;;  %v11303_v6 = vsub.f32 %v11302_v12, %v6530_v54 }
 0x3a1   : > { %v11288_v60 = vsel %vm8172_vm3, 4294967295, %v11287_v60  ;;  %3509 = vst.msk [vmem:[#allocation2] sm:$0xf] %vm8172_vm3, %v11298_v57  ;;  %v8210_v44 = vpop.eup %4529 }
 0x3a2   : > { %11278 = vst [vmem:[#allocation189_spill] sm:$0xff] %v8154_v31  ;;  %11289 = vst [vmem:[#allocation210_spill] sm:$0xff] %v11288_v60  ;;  %v11291_v31 = vld [vmem:[#allocation124_spill] sm:$0xff]  ;;  %v8203_v52 = vmul.f32 1.442695, %v11303_v6  ;;  %v4299_v6 = vld [vmem:[%s5989_s18 + $0xb0] sm:$0xff]   ;;  %v8225_v35 = vpop.eup %4531 }
 0x3a3   : > { %4545 = vpow2.f32 %v11291_v31  ;;  %11297 = vst [vmem:[#allocation198_spill] sm:$0xff] %v8187_v62  ;;  %v11299_v31 = vld [vmem:[#allocation236_spill] sm:$0xff]  ;;  %v11305_v62 = vld [vmem:[#allocation237_spill] sm:$0xff]  ;;  %11314 = vst [vmem:[#allocation205_spill] sm:$0xff] %v8225_v35  ;;  %3311 = vxpose.xlu1.c.b16.cont [7/8] (narrow) %v4299_v6, 16 }
 0x3a4   : > { %4547 = vpow2.f32 %v7599_v13  ;;  %v11300_v61 = vsub.f32 %v11299_v31, %v6522_v2  ;;  %11304 = vst [vmem:[#allocation199_spill] sm:$0xff] %v8203_v52  ;;  %v11306_v60 = vsub.f32 %v11305_v62, %v6502_v1  ;;  %v11308_v13 = vld [vmem:[#allocation239_spill] sm:$0xff] }
 0x3a5   : > { %4549 = vpow2.f32 %v7606_v27  ;;  %v11309_v53 = vsub.f32 %v11308_v13, %v6506_v10  ;;  %v4300_v52 = vld [vmem:[%s5989_s18 + $0x30] sm:$0xff]  }
 0x3a6   : > { %v8198_v22 = vmul.f32 1.442695, %v11300_v61  ;;  %v8208_v57 = vmul.f32 1.442695, %v11306_v60  ;;  %v11311_v61 = vld [vmem:[#allocation240_spill] sm:$0xff]  ;;  %4551 = vpow2.f32 %v7611_v47  ;;  %v11315_v60 = vld [vmem:[#allocation242_spill] sm:$0xff] }
 0x3a7   : > { %v8216_v31 = vmul.f32 1.442695, %v11309_v53  ;;  %v11316_v62 = vsub.f32 %v11315_v60, %v6530_v54  ;;  %4553 = vpow2.f32 %v7616_v26  ;;  %v11325_v47 = vld [vmem:[#allocation244_spill] sm:$0xff]  ;;  %3279 = vxpose.xlu0.c.b16.cont [7/8] (narrow) %v4300_v52, 16 }
 0x3a8   : > { %11301 = vst [vmem:[#allocation197_spill] sm:$0xff] %v8198_v22  ;;  %11307 = vst [vmem:[#allocation201_spill] sm:$0xff] %v8208_v57  ;;  %v11312_v22 = vsub.f32 %v11311_v61, %v6522_v2  ;;  %v11318_v57 = vld [vmem:[#allocation241_spill] sm:$0xff]  ;;  %v11326_v60 = vsub.f32 %v11325_v47, %v6522_v2  ;;  %4555 = vpow2.f32 %v7624_v37  ;;  %v11334_v47 = vld [vmem:[#allocation247_spill] sm:$0xff] }
 0x3a9   : > { %11310 = vst [vmem:[#allocation203_spill] sm:$0xff] %v8216_v31  ;;  %v8231_v27 = vmul.f32 1.442695, %v11316_v62  ;;  %v11319_v13 = vsub.f32 %v11318_v57, %v6502_v1  ;;  %v11321_v31 = vld [vmem:[#allocation243_spill] sm:$0xff]  ;;  %4557 = vpow2.f32 %v7629_v7  ;;  %v11340_v37 = vld [vmem:[#allocation250_spill] sm:$0xff] }
 0x3aa   : > { %v8221_v12 = vmul.f32 1.442695, %v11312_v22  ;;  %v11322_v22 = vsub.f32 %v11321_v31, %v6506_v10  ;;  %v8249_v62 = vmul.f32 1.442695, %v11326_v60  ;;  %v11335_v60 = vsub.f32 %v11334_v47, %v6506_v10  ;;  %v11349_v7 = vld [vmem:[#allocation251_spill] sm:$0xff] }
 0x3ab   : > { %11317 = vst [vmem:[#allocation207_spill] sm:$0xff] %v8231_v27  ;;  %v8236_v53 = vmul.f32 1.442695, %v11319_v13  ;;  %v11328_v27 = vld [vmem:[#allocation246_spill] sm:$0xff]  ;;  %v11341_v6 = vsub.f32 %v11340_v37, %v6530_v54  ;;  %4559 = vpow2.f32 %v7634_v8  ;;  %v11359_v8 = vld [vmem:[#allocation253_spill] sm:$0xff] }
 0x3ac   : > { %11313 = vst [vmem:[#allocation112_spill] sm:$0xff] %v8221_v12  ;;  %v8241_v61 = vmul.f32 1.442695, %v11322_v22  ;;  %v8243_v12 = vpop.eup %4533  ;;  %11327 = vst [vmem:[#allocation214_spill] sm:$0xff] %v8249_v62  ;;  %v11329_v57 = vsub.f32 %v11328_v27, %v6530_v54  ;;  %v11331_v22 = vld [vmem:[#allocation245_spill] sm:$0xff]  ;;  %4561 = vpow2.f32 %v7642_v29 }
 0x3ad   : > { %11320 = vst [vmem:[#allocation209_spill] sm:$0xff] %v8236_v53  ;;  %11324 = vst [vmem:[#allocation212_spill] sm:$0xff] %v8243_v12  ;;  %v8256_v31 = vpop.eup %4535  ;;  %v11332_v26 = vsub.f32 %v11331_v22, %v6502_v1  ;;  %v8267_v62 = vmul.f32 1.442695, %v11335_v60  ;;  %v11337_v53 = vld [vmem:[#allocation248_spill] sm:$0xff]  ;;  %v11346_v60 = vld [vmem:[#allocation34_spill] sm:$0xff]  ;;  %v11350_v12 = vsub.f32 %v11349_v7, %v6506_v10 }
 0x3ae   : > { %11323 = vst [vmem:[#allocation211_spill] sm:$0xff] %v8241_v61  ;;  %v8254_v13 = vmul.f32 1.442695, %v11329_v57  ;;  %v11338_v27 = vsub.f32 %v11337_v53, %v6522_v2  ;;  %v8274_v52 = vpop.eup %4537  ;;  %v8280_v22 = vmul.f32 1.442695, %v11341_v6  ;;  %v4301_v53 = vld [vmem:[%s5989_s18 + $0xb8] sm:$0xff]  }
 0x3af   : > { %v8262_v61 = vmul.f32 1.442695, %v11332_v26  ;;  %11336 = vst [vmem:[#allocation216_spill] sm:$0xff] %v8267_v62  ;;  %v11343_v26 = vld [vmem:[#allocation249_spill] sm:$0xff]  ;;  %v11347_v62 = vld [vmem:[#allocation38_spill] sm:$0xff]  ;;  %v11352_v6 = vld [vmem:[#allocation252_spill] sm:$0xff] }
 0x3b0   : > { %11330 = vst [vmem:[#allocation213_spill] sm:$0xff] %v8254_v13  ;;  %v8272_v57 = vmul.f32 1.442695, %v11338_v27  ;;  %11342 = vst [vmem:[#allocation217_spill] sm:$0xff] %v8280_v22  ;;  %v2613_v13 = vadd.f32 %v11347_v62, %v11346_v60  ;;  %v4302_v27 = vld [vmem:[%s5989_s18 + $0x38] sm:$0xff]   ;;  %v11353_v22 = vsub.f32 %v11352_v6, %v6522_v2  ;;  %3312 = vxpose.xlu1.c.b16.end [8/8] (narrow) %v4301_v53, 16 }
 0x3b1   : > { %11333 = vst [vmem:[#allocation215_spill] sm:$0xff] %v8262_v61  ;;  %v11344_v61 = vsub.f32 %v11343_v26, %v6502_v1  ;;  %v8297_v37 = vmul.f32 1.442695, %v11350_v12  ;;  %v11362_v12 = vld [vmem:[#allocation255_spill] sm:$0xff]  ;;  %3280 = vxpose.xlu0.c.b16.end [8/8] (narrow) %v4302_v27, 16 }
 0x3b2   : > { %11339 = vst [vmem:[#allocation218_spill] sm:$0xff] %v8272_v57  ;;  %v8291_v57 = vpop.eup %4539  ;;  %v8302_v26 = vmul.f32 1.442695, %v11353_v22  ;;  %v11365_v22 = vld [vmem:[#allocation42_spill] sm:$0xff]  ;;  %v11376_v27 = vld [vmem:[#allocation259_spill] sm:$0xff] }
 0x3b3   : > { %v8285_v47 = vmul.f32 1.442695, %v11344_v61  ;;  %11348 = vst [vmem:[#allocation117_spill] sm:$0xff] %v8291_v57  ;;  %11351 = vst [vmem:[#allocation220_spill] sm:$0xff] %v8297_v37  ;;  %v11355_v61 = vld [vmem:[#allocation254_spill] sm:$0xff]  ;;  %v8309_v14 = vpop.eup %4541  ;;  %v11360_v57 = vsub.f32 %v11359_v8, %v6502_v1  ;;  %v11363_v37 = vsub.f32 %v11362_v12, %v6506_v10 }
 0x3b4   : > { %11354 = vst [vmem:[#allocation222_spill] sm:$0xff] %v8302_v26  ;;  %11358 = vst [vmem:[#allocation223_spill] sm:$0xff] %v8309_v14  ;;  %v2614_v26 = vadd.f32 %v11365_v22, %v2613_v13 }
 0x3b5   : > { %11345 = vst [vmem:[#allocation219_spill] sm:$0xff] %v8285_v47  ;;  %v11356_v47 = vsub.f32 %v11355_v61, %v6530_v54  ;;  %v8315_v7 = vmul.f32 1.442695, %v11360_v57  ;;  %v8320_v6 = vmul.f32 1.442695, %v11363_v37  ;;  %v11366_v61 = vld [vmem:[#allocation132_spill] sm:$0xff] }
 0x3b6   : > { %4563 = vpow2.f32 %v11366_v61  ;;  %v11370_v57 = vld [vmem:[#allocation258_spill] sm:$0xff]  ;;  %v11373_v37 = vld [vmem:[#allocation257_spill] sm:$0xff]  ;;  %v11377_v61 = vsub.f32 %v11376_v27, %v6506_v10 }
 0x3b7   : > { %v8307_v35 = vmul.f32 1.442695, %v11356_v47  ;;  %11361 = vst [vmem:[#allocation224_spill] sm:$0xff] %v8315_v7  ;;  %11364 = vst [vmem:[#allocation226_spill] sm:$0xff] %v8320_v6  ;;  %v8323_v47 = vpop.eup %4543  ;;  %v11371_v8 = vsub.f32 %v11370_v57, %v6530_v54  ;;  %v11374_v12 = vsub.f32 %v11373_v37, %v6502_v1  ;;  %4565 = vpow2.f32 %v7652_v20  ;;  %v11384_v37 = vld [vmem:[#allocation262_spill] sm:$0xff] }
 0x3b8   : > { %v8341_v53 = vpop.eup %4545  ;;  %4567 = vpow2.f32 %v7660_v3  ;;  %v11395_v3 = vld [vmem:[#allocation264_spill] sm:$0xff] }
 0x3b9   : > { %11357 = vst [vmem:[#allocation221_spill] sm:$0xff] %v8307_v35  ;;  %v11367_v35 = vld [vmem:[#allocation256_spill] sm:$0xff]  ;;  %v8334_v7 = vmul.f32 1.442695, %v11371_v8  ;;  %v8339_v13 = vmul.f32 1.442695, %v11374_v12  ;;  %v8355_v6 = vpop.eup %4547  ;;  %v11385_v12 = vsub.f32 %v11384_v37, %v6530_v54 }
 0x3ba   : > { %v11368_v29 = vsub.f32 %v11367_v35, %v6522_v2  ;;  %v8347_v35 = vmul.f32 1.442695, %v11377_v61  ;;  %v11382_v8 = vld [vmem:[#allocation46_spill] sm:$0xff]  ;;  %11383 = vst [vmem:[#allocation231_spill] sm:$0xff] %v8355_v6  ;;  %v11396_v6 = vsub.f32 %v11395_v3, %v6522_v2 }
 0x3bb   : > { %11372 = vst [vmem:[#allocation227_spill] sm:$0xff] %v8334_v7  ;;  %11375 = vst [vmem:[#allocation228_spill] sm:$0xff] %v8339_v13  ;;  %v2615_v7 = vadd.f32 %v11382_v8, %v2614_v26  ;;  %v8361_v20 = vmul.f32 1.442695, %v11385_v12  ;;  %v11387_v13 = vld [vmem:[#allocation261_spill] sm:$0xff]  ;;  %v8373_v26 = vpop.eup %4549  ;;  %v11398_v12 = vld [vmem:[#allocation266_spill] sm:$0xff] }
 0x3bc   : > { %v8329_v14 = vmul.f32 1.442695, %v11368_v29  ;;  %11378 = vst [vmem:[#allocation230_spill] sm:$0xff] %v8347_v35  ;;  %v11379_v29 = vld [vmem:[#allocation260_spill] sm:$0xff]  ;;  %v11388_v27 = vsub.f32 %v11387_v13, %v6502_v1  ;;  %v11390_v35 = vld [vmem:[#allocation263_spill] sm:$0xff]  ;;  %11393 = vst [vmem:[#allocation233_spill] sm:$0xff] %v8373_v26  ;;  %v8387_v24 = vpop.eup %4551 }
 0x3bd   : > { %11386 = vst [vmem:[#allocation232_spill] sm:$0xff] %v8361_v20  ;;  %v8379_v37 = vmul.f32 1.442695, %v11396_v6  ;;  %v11399_v20 = vsub.f32 %v11398_v12, %v6530_v54 }
 0x3be   : > { %11369 = vst [vmem:[#allocation225_spill] sm:$0xff] %v8329_v14  ;;  %v11380_v14 = vsub.f32 %v11379_v29, %v6522_v2  ;;  %v8366_v61 = vmul.f32 1.442695, %v11388_v27  ;;  %v11401_v27 = vld [vmem:[#allocation50_spill] sm:$0xff] }
 0x3bf   : > { %11397 = vst [vmem:[#allocation235_spill] sm:$0xff] %v8379_v37  ;;  %v8384_v13 = vmul.f32 1.442695, %v11399_v20  ;;  %v11408_v37 = vld [vmem:[#allocation268_spill] sm:$0xff] }
 0x3c0   : > { %v8352_v57 = vmul.f32 1.442695, %v11380_v14  ;;  %11389 = vst [vmem:[#allocation234_spill] sm:$0xff] %v8366_v61  ;;  %v11391_v14 = vsub.f32 %v11390_v35, %v6506_v10  ;;  %v2616_v61 = vadd.f32 %v11401_v27, %v2615_v7  ;;  %v11402_v35 = vld [vmem:[#allocation265_spill] sm:$0xff]  ;;  %v11409_v20 = vsub.f32 %v11408_v37, %v6522_v2  ;;  %v8405_v7 = vpop.eup %4553  ;;  %v11420_v37 = vld [vmem:[#allocation271_spill] sm:$0xff] }
 0x3c1   : > { %11400 = vst [vmem:[#allocation236_spill] sm:$0xff] %v8384_v13  ;;  %v11411_v13 = vld [vmem:[#allocation140_spill] sm:$0xff]  ;;  %v8419_v41 = vpop.eup %4555 }
 0x3c2   : > { %11381 = vst [vmem:[#allocation229_spill] sm:$0xff] %v8352_v57  ;;  %v8371_v29 = vmul.f32 1.442695, %v11391_v14  ;;  %v11394_v57 = vld [vmem:[#allocation136_spill] sm:$0xff]  ;;  %v11403_v14 = vsub.f32 %v11402_v35, %v6502_v1  ;;  %v8403_v12 = vmul.f32 1.442695, %v11409_v20  ;;  %v11421_v20 = vsub.f32 %v11420_v37, %v6506_v10 }
 0x3c3   : > { %4569 = vpow2.f32 %v11394_v57  ;;  %11419 = vst [vmem:[#allocation241_spill] sm:$0xff] %v8419_v41 }
 0x3c4   : > { %11392 = vst [vmem:[#allocation124_spill] sm:$0xff] %v8371_v29  ;;  %4571 = vpow2.f32 %v7670_v38  ;;  %v8393_v57 = vmul.f32 1.442695, %v11403_v14  ;;  %v11405_v29 = vld [vmem:[#allocation267_spill] sm:$0xff]  ;;  %11410 = vst [vmem:[#allocation239_spill] sm:$0xff] %v8403_v12  ;;  %v11412_v38 = vld [vmem:[#allocation270_spill] sm:$0xff] }
 0x3c5   : > { %v11406_v6 = vsub.f32 %v11405_v29, %v6506_v10  ;;  %4573 = vpow2.f32 %v11411_v13  ;;  %v11413_v26 = vsub.f32 %v11412_v38, %v6530_v54  ;;  %v11415_v14 = vld [vmem:[#allocation269_spill] sm:$0xff]  ;;  %v8425_v13 = vmul.f32 1.442695, %v11421_v20  ;;  %v11423_v12 = vld [vmem:[#allocation272_spill] sm:$0xff]  ;;  %v11433_v20 = vld [vmem:[#allocation275_spill] sm:$0xff] }
 0x3c6   : > { %11404 = vst [vmem:[#allocation238_spill] sm:$0xff] %v8393_v57  ;;  %v11416_v57 = vsub.f32 %v11415_v14, %v6502_v1  ;;  %4575 = vpow2.f32 %v7683_v40  ;;  %v11430_v40 = vld [vmem:[#allocation273_spill] sm:$0xff] }
 0x3c7   : > { %v8398_v3 = vmul.f32 1.442695, %v11406_v6  ;;  %v8411_v35 = vmul.f32 1.442695, %v11413_v26  ;;  %v11418_v6 = vld [vmem:[#allocation54_spill] sm:$0xff]  ;;  %11422 = vst [vmem:[#allocation243_spill] sm:$0xff] %v8425_v13  ;;  %v11424_v26 = vsub.f32 %v11423_v12, %v6522_v2  ;;  %4577 = vpow2.f32 %v7688_v15 }
 0x3c8   : > { %v8416_v29 = vmul.f32 1.442695, %v11416_v57  ;;  %v11434_v13 = vsub.f32 %v11433_v20, %v6506_v10  ;;  %v11436_v12 = vld [vmem:[#allocation58_spill] sm:$0xff]  ;;  %v11441_v15 = vld [vmem:[#allocation35_spill] sm:$0xff]  ;;  %v11446_v10 = vld [vmem:[#allocation145_spill] sm:$0xff] }
 0x3c9   : > { %11407 = vst [vmem:[#allocation237_spill] sm:$0xff] %v8398_v3  ;;  %11414 = vst [vmem:[#allocation240_spill] sm:$0xff] %v8411_v35  ;;  %v2617_v3 = vadd.f32 %v11418_v6, %v2616_v61  ;;  %v8430_v38 = vmul.f32 1.442695, %v11424_v26  ;;  %v11426_v35 = vld [vmem:[#allocation274_spill] sm:$0xff]  ;;  %v8437_v61 = vpop.eup %4557 }
 0x3ca   : > { %11417 = vst [vmem:[#allocation242_spill] sm:$0xff] %v8416_v29  ;;  %v11427_v57 = vsub.f32 %v11426_v35, %v6530_v54  ;;  %11429 = vst [vmem:[#allocation245_spill] sm:$0xff] %v8437_v61  ;;  %v11431_v29 = vsub.f32 %v11430_v40, %v6502_v1  ;;  %v8448_v2 = vmul.f32 1.442695, %v11434_v13  ;;  %v11438_v54 = vld [vmem:[#allocation144_spill] sm:$0xff]  ;;  %v11439_v35 = vld [vmem:[#allocation33_spill] sm:$0xff] }
 0x3cb   : > { %11425 = vst [vmem:[#allocation244_spill] sm:$0xff] %v8430_v38  ;;  %v2618_v26 = vadd.f32 %v11436_v12, %v2617_v3  ;;  %v8451_v38 = vpop.eup %4559  ;;  %4579 = vpow2.f32 %v11438_v54  ;;  %v11442_v61 = vld [vmem:[#allocation39_spill] sm:$0xff]  ;;  %v11443_v1 = vld [vmem:[#allocation36_spill] sm:$0xff]  ;;  %v11447_v13 = vld [vmem:[#allocation62_spill] sm:$0xff]  ;;  %v2953_v54 = vpack.c.bf16 %v11347_v62, %v11346_v60  ;;  %v2957_v60 = vpack.c.bf16 %v11382_v8, %v11365_v22 }
 0x3cc   : > { %v8435_v14 = vmul.f32 1.442695, %v11427_v57  ;;  %v8443_v37 = vmul.f32 1.442695, %v11431_v29  ;;  %11435 = vst [vmem:[#allocation248_spill] sm:$0xff] %v8448_v2  ;;  %11437 = vst [vmem:[#allocation250_spill] sm:$0xff] %v8451_v38  ;;  %v2751_v41 = vadd.f32 %v11442_v61, %v11441_v15  ;;  %4581 = vpow2.f32 %v11446_v10 }
 0x3cd   : > { %v11440_v57 = vld [vmem:[#allocation37_spill] sm:$0xff]  ;;  %v11444_v29 = vld [vmem:[#allocation40_spill] sm:$0xff]  ;;  %v2619_v20 = vadd.f32 %v11447_v13, %v2618_v26  ;;  %4583 = vpow2.f32 %v7706_v34  ;;  %v11453_v26 = vld [vmem:[#allocation66_spill] sm:$0xff] }
 0x3ce   : > { %11428 = vst [vmem:[#allocation246_spill] sm:$0xff] %v8435_v14  ;;  %11432 = vst [vmem:[#allocation247_spill] sm:$0xff] %v8443_v37  ;;  %v2682_v14 = vadd.f32 %v11440_v57, %v11439_v35  ;;  %v2820_v40 = vadd.f32 %v11444_v29, %v11443_v1  ;;  %v8460_v37 = vpop.eup %4561  ;;  %v2954_v3 = vpack.c.bf16 %v11440_v57, %v11439_v35  ;;  %v11451_v15 = vld [vmem:[#allocation44_spill] sm:$0xff]  ;;  %4585 = vpow2.f32 %v7714_v50  ;;  %v11454_v35 = vld [vmem:[#allocation45_spill] sm:$0xff] }
 0x3cf   : > { %11445 = vst [vmem:[#allocation249_spill] sm:$0xff] %v8460_v37  ;;  %v8468_v2 = vpop.eup %4563  ;;  %v2752_v61 = vadd.f32 %v11450_v18, %v2751_v41  ;;  %v2620_v10 = vadd.f32 %v11453_v26, %v2619_v20  ;;  %v2958_v62 = vpack.c.bf16 %v11454_v35, %v11449_v11  ;;  %4587 = vpow2.f32 %v7719_v46  ;;  %v11459_v20 = vld [vmem:[#allocation149_spill] sm:$0xff] }
 0x3d0   : > { %11448 = vst [vmem:[#allocation34_spill] sm:$0xff] %v8468_v2  ;;  %v2683_v33 = vadd.f32 %v11449_v11, %v2682_v14  ;;  %v2821_v45 = vadd.f32 %v11451_v15, %v2820_v40  ;;  %v8474_v42 = vpop.eup %4565  ;;  %3337 = vmatprep.subr.bf16.mxu0 %v2954_v3  ;;  %v11456_v14 = vld [vmem:[#allocation47_spill] sm:$0xff]  ;;  %v11457_v40 = vld [vmem:[#allocation48_spill] sm:$0xff]  ;;  %4589 = vpow2.f32 %v11459_v20  ;;  %v11460_v3 = vld [vmem:[#allocation70_spill] sm:$0xff] }
 0x3d1   : > { %11452 = vst [vmem:[#allocation38_spill] sm:$0xff] %v8474_v42  ;;  %v8482_v34 = vpop.eup %4567  ;;  %v2753_v57 = vadd.f32 %v11456_v14, %v2752_v61  ;;  %3338 = vmatpush1.bf16.msra.mxu0 %v2953_v54  ;;  %v2621_v11 = vadd.f32 %v11460_v3, %v2620_v10  ;;  %v11461_v8 = vld [vmem:[#allocation49_spill] sm:$0xff]  ;;  %4591 = vpow2.f32 %v7732_v59  ;;  %v11465_v54 = vld [vmem:[#allocation52_spill] sm:$0xff]  ;;  %v11468_v14 = vld [vmem:[#allocation74_spill] sm:$0xff] }
 0x3d2   : > { %11455 = vst [vmem:[#allocation251_spill] sm:$0xff] %v8482_v34  ;;  %v2684_v41 = vadd.f32 %v11454_v35, %v2683_v33  ;;  %v2822_v18 = vadd.f32 %v11457_v40, %v2821_v45  ;;  %v8488_v50 = vpop.eup %4569  ;;  %v3017_v22 = vpack.c.bf16 %v8482_v34, %v8451_v38  ;;  %3339 = vmatprep.subr.bf16.mxu0 %v2958_v62  ;;  %v11462_v15 = vld [vmem:[#allocation53_spill] sm:$0xff]  ;;  %v11464_v33 = vld [vmem:[#allocation51_spill] sm:$0xff]  ;;  %v11467_v10 = vld [vmem:[#allocation156_spill] sm:$0xff] }
 0x3d3   : > { %11458 = vst [vmem:[#allocation252_spill] sm:$0xff] %v8488_v50  ;;  %v2962_v46 = vpack.c.bf16 %v11462_v15, %v11461_v8  ;;  %v8496_v2 = vpop.eup %4571  ;;  %v2754_v61 = vadd.f32 %v11464_v33, %v2753_v57  ;;  %4593 = vpow2.f32 %v11467_v10  ;;  %v2622_v34 = vadd.f32 %v11468_v14, %v2621_v11  ;;  %v11471_v57 = vld [vmem:[#allocation56_spill] sm:$0xff]  ;;  %v11474_v33 = vld [vmem:[#allocation78_spill] sm:$0xff] }
 0x3d4   : > { %11463 = vst [vmem:[#allocation254_spill] sm:$0xff] %v8496_v2  ;;  %v2685_v45 = vadd.f32 %v11461_v8, %v2684_v41  ;;  %v2823_v35 = vadd.f32 %v11465_v54, %v2822_v18  ;;  %v8502_v20 = vpop.eup %4573  ;;  %v3018_v62 = vpack.c.bf16 %v8488_v50, %v8460_v37  ;;  %v2961_v38 = vpack.c.bf16 %v11418_v6, %v11401_v27  ;;  %v11470_v41 = vld [vmem:[#allocation55_spill] sm:$0xff]  ;;  %v11473_v11 = vld [vmem:[#allocation164_spill] sm:$0xff]  ;;  %v11475_v27 = vld [vmem:[#allocation57_spill] sm:$0xff] }
 0x3d5   : > { %11466 = vst [vmem:[#allocation253_spill] sm:$0xff] %v8502_v20  ;;  %v8510_v40 = vpop.eup %4575  ;;  %4595 = vpow2.f32 %v7742_v56  ;;  %v2755_v18 = vadd.f32 %v11470_v41, %v2754_v61  ;;  %3340 = vmatpush1.bf16.msra.mxu0 %v2957_v60  ;;  %v2623_v50 = vadd.f32 %v11474_v33, %v2622_v34  ;;  %v11476_v6 = vld [vmem:[#allocation61_spill] sm:$0xff]  ;;  %v2965_v56 = vpack.c.bf16 %v11447_v13, %v11436_v12  ;;  %v11479_v61 = vld [vmem:[#allocation59_spill] sm:$0xff]  ;;  %v11480_v41 = vld [vmem:[#allocation60_spill] sm:$0xff] }
 0x3d6   : > { %11469 = vst [vmem:[#allocation255_spill] sm:$0xff] %v8510_v40  ;;  %v2686_v59 = vadd.f32 %v11462_v15, %v2685_v45  ;;  %v2824_v8 = vadd.f32 %v11471_v57, %v2823_v35  ;;  %v8516_v10 = vpop.eup %4577  ;;  %4597 = vpow2.f32 %v11473_v11  ;;  %3378 = vmatprep.subr.bf16.mxu1 %v3018_v62  ;;  %3341 = vmatprep.subr.bf16.mxu0 %v2962_v46  ;;  %v11478_v45 = vld [vmem:[#allocation168_spill] sm:$0xff]  ;;  %v11483_v62 = vld [vmem:[#allocation82_spill] sm:$0xff]  ;;  %v11484_v54 = vld [vmem:[#allocation65_spill] sm:$0xff] }
 0x3d7   : > { %11472 = vst [vmem:[#allocation42_spill] sm:$0xff] %v8516_v10  ;;  %v2966_v37 = vpack.c.bf16 %v11476_v6, %v11475_v27  ;;  %v8524_v15 = vpop.eup %4579  ;;  %4599 = vpow2.f32 %v11478_v45  ;;  %v2756_v35 = vadd.f32 %v11479_v61, %v2755_v18  ;;  %3379 = vmatpush1.bf16.msra.mxu1 %v3017_v22  ;;  %v11482_v46 = vld [vmem:[#allocation172_spill] sm:$0xff]  ;;  %v2624_v57 = vadd.f32 %v11483_v62, %v2623_v50  ;;  %v11485_v2 = vld [vmem:[#allocation69_spill] sm:$0xff] }
 0x3d8   : > { %11477 = vst [vmem:[#allocation132_spill] sm:$0xff] %v8524_v15  ;;  %v2687_v60 = vadd.f32 %v11475_v27, %v2686_v59  ;;  %v2825_v11 = vadd.f32 %v11480_v41, %v2824_v8  ;;  %v8530_v34 = vpop.eup %4581  ;;  %4601 = vpow2.f32 %v11482_v46  ;;  %v2970_v12 = vpack.c.bf16 %v11485_v2, %v11484_v54  ;;  %v11487_v59 = vld [vmem:[#allocation180_spill] sm:$0xff]  ;;  %v11488_v8 = vld [vmem:[#allocation63_spill] sm:$0xff]  ;;  %v11492_v41 = vld [vmem:[#allocation86_spill] sm:$0xff] }
 0x3d9   : > { %11481 = vst [vmem:[#allocation256_spill] sm:$0xff] %v8530_v34  ;;  %v2969_v13 = vpack.c.bf16 %v11460_v3, %v11453_v26  ;;  %v8538_v45 = vpop.eup %4583  ;;  %4603 = vpow2.f32 %v11487_v59  ;;  %v2757_v22 = vadd.f32 %v11488_v8, %v2756_v35  ;;  %v11489_v27 = vld [vmem:[#allocation64_spill] sm:$0xff]  ;;  %3342 = vmatpush1.bf16.msra.mxu0 %v2961_v38  ;;  %v2625_v15 = vadd.f32 %v11492_v41, %v2624_v57  ;;  %v11493_v3 = vld [vmem:[#allocation73_spill] sm:$0xff]  ;;  %v11496_v38 = vld [vmem:[#allocation67_spill] sm:$0xff] }
 0x3da   : > { %11486 = vst [vmem:[#allocation258_spill] sm:$0xff] %v8538_v45  ;;  %v2688_v18 = vadd.f32 %v11476_v6, %v2687_v60  ;;  %v2826_v61 = vadd.f32 %v11489_v27, %v2825_v11  ;;  %v8544_v46 = vpop.eup %4585  ;;  %v11491_v50 = vld [vmem:[#allocation184_spill] sm:$0xff]  ;;  %v3021_v26 = vpack.c.bf16 %v8538_v45, %v8510_v40  ;;  %3343 = vmatprep.subr.bf16.mxu0 %v2966_v37  ;;  %v11494_v34 = vld [vmem:[#allocation77_spill] sm:$0xff]  ;;  %v11499_v57 = vld [vmem:[#allocation90_spill] sm:$0xff] }
 0x3db   : > { %11490 = vst [vmem:[#allocation257_spill] sm:$0xff] %v8544_v46  ;;  %4605 = vpow2.f32 %v11491_v50  ;;  %v2974_v59 = vpack.c.bf16 %v11494_v34, %v11493_v3  ;;  %v8552_v20 = vpop.eup %4587  ;;  %v2758_v60 = vadd.f32 %v11496_v38, %v2757_v22  ;;  %v11497_v35 = vld [vmem:[#allocation68_spill] sm:$0xff]  ;;  %v2626_v8 = vadd.f32 %v11499_v57, %v2625_v15  ;;  %v11505_v15 = vld [vmem:[#allocation102_spill] sm:$0xff]  ;;  %v11523_v40 = vld [vmem:[#allocation97_spill] sm:$0xff] }
 0x3dc   : > { %11495 = vst [vmem:[#allocation259_spill] sm:$0xff] %v8552_v20  ;;  %4607 = vpow2.f32 %v7785_v0  ;;  %v2689_v6 = vadd.f32 %v11484_v54, %v2688_v18  ;;  %v2827_v11 = vadd.f32 %v11497_v35, %v2826_v61  ;;  %v8558_v50 = vpop.eup %4589  ;;  %v3022_v37 = vpack.c.bf16 %v8544_v46, %v8516_v10  ;;  %v11501_v0 = vld [vmem:[#allocation192_spill] sm:$0xff]  ;;  %v11502_v18 = vld [vmem:[#allocation71_spill] sm:$0xff]  ;;  %v11506_v35 = vld [vmem:[#allocation94_spill] sm:$0xff] }
 0x3dd   : > { %11498 = vst [vmem:[#allocation260_spill] sm:$0xff] %v8558_v50  ;;  %4609 = vpow2.f32 %v7790_v39  ;;  %v2973_v27 = vpack.c.bf16 %v11474_v33, %v11468_v14  ;;  %v8566_v45 = vpop.eup %4591  ;;  %v2759_v61 = vadd.f32 %v11502_v18, %v2758_v60  ;;  %v11503_v22 = vld [vmem:[#allocation72_spill] sm:$0xff]  ;;  %3344 = vmatpush1.bf16.msra.mxu0 %v2965_v56  ;;  %v2627_v46 = vadd.f32 %v11506_v35, %v2626_v8  ;;  %v11507_v14 = vld [vmem:[#allocation81_spill] sm:$0xff] }
 0x3de   : > { %11500 = vst [vmem:[#allocation46_spill] sm:$0xff] %v8566_v45  ;;  %4611 = vpow2.f32 %v11501_v0  ;;  %v2690_v54 = vadd.f32 %v11485_v2, %v2689_v6  ;;  %v2828_v38 = vadd.f32 %v11503_v22, %v2827_v11  ;;  %v8572_v39 = vpop.eup %4593  ;;  %3380 = vmatprep.subr.bf16.mxu1 %v3022_v37  ;;  %3345 = vmatprep.subr.bf16.mxu0 %v2970_v12  ;;  %v11508_v33 = vld [vmem:[#allocation85_spill] sm:$0xff]  ;;  %v11510_v6 = vld [vmem:[#allocation75_spill] sm:$0xff]  ;;  %v11511_v11 = vld [vmem:[#allocation76_spill] sm:$0xff] }
 0x3df   : > { %11504 = vst [vmem:[#allocation262_spill] sm:$0xff] %v8572_v39  ;;  %4613 = vpow2.f32 %v11505_v15  ;;  %v2978_v10 = vpack.c.bf16 %v11508_v33, %v11507_v14  ;;  %v8580_v2 = vpop.eup %4595  ;;  %v2760_v60 = vadd.f32 %v11510_v6, %v2759_v61  ;;  %3381 = vmatpush1.bf16.msra.mxu1 %v3021_v26  ;;  %v11513_v12 = vld [vmem:[#allocation98_spill] sm:$0xff]  ;;  %v11514_v18 = vld [vmem:[#allocation89_spill] sm:$0xff]  ;;  %v11519_v61 = vld [vmem:[#allocation80_spill] sm:$0xff] }
 0x3e0   : > { %11509 = vst [vmem:[#allocation261_spill] sm:$0xff] %v8580_v2  ;;  %4615 = vpow2.f32 %v7810_v9  ;;  %v2691_v56 = vadd.f32 %v11493_v3, %v2690_v54  ;;  %v2829_v15 = vadd.f32 %v11511_v11, %v2828_v38  ;;  %v8586_v8 = vpop.eup %4597  ;;  %v2628_v37 = vadd.f32 %v11513_v12, %v2627_v46  ;;  %v11515_v22 = vld [vmem:[#allocation93_spill] sm:$0xff]  ;;  %v11517_v3 = vld [vmem:[#allocation106_spill] sm:$0xff]  ;;  %v11518_v38 = vld [vmem:[#allocation79_spill] sm:$0xff] }
 0x3e1   : > { %11512 = vst [vmem:[#allocation263_spill] sm:$0xff] %v8586_v8  ;;  %4617 = vpow2.f32 %v7818_v43  ;;  %v2982_v0 = vpack.c.bf16 %v11515_v22, %v11514_v18  ;;  %v8594_v9 = vpop.eup %4599  ;;  %v2761_v26 = vadd.f32 %v11518_v38, %v2760_v60  ;;  %3346 = vmatpush1.bf16.msra.mxu0 %v2969_v13  ;;  %v11521_v46 = vld [vmem:[#allocation107_spill] sm:$0xff]  ;;  %v11522_v11 = vld [vmem:[#allocation104_spill] sm:$0xff]  ;;  %v11524_v20 = vld [vmem:[#allocation105_spill] sm:$0xff] }
 0x3e2   : > { %11516 = vst [vmem:[#allocation136_spill] sm:$0xff] %v8594_v9  ;;  %4619 = vpow2.f32 %v11517_v3  ;;  %v2692_v54 = vadd.f32 %v11494_v34, %v2691_v56  ;;  %v2830_v6 = vadd.f32 %v11519_v61, %v2829_v15  ;;  %v8600_v43 = vpop.eup %4601  ;;  %v2629_v8 = vadd.f32 %v11522_v11, %v2628_v37  ;;  %3347 = vmatprep.subr.bf16.mxu0 %v2974_v59  ;;  %v11526_v13 = vld [vmem:[#allocation83_spill] sm:$0xff]  ;;  %v11527_v60 = vld [vmem:[#allocation84_spill] sm:$0xff]  ;;  %v11530_v38 = vld [vmem:[#allocation113_spill] sm:$0xff] }
 0x3e3   : > { %11520 = vst [vmem:[#allocation264_spill] sm:$0xff] %v8600_v43  ;;  %4621 = vpow2.f32 %v11521_v46  ;;  %v3025_v2 = vpack.c.bf16 %v8594_v9, %v8566_v45  ;;  %v8608_v50 = vpop.eup %4603  ;;  %v2762_v56 = vadd.f32 %v11526_v13, %v2761_v26  ;;  %v11529_v37 = vld [vmem:[#allocation111_spill] sm:$0xff]  ;;  %v3026_v59 = vpack.c.bf16 %v8600_v43, %v8572_v39  ;;  %v11535_v13 = vld [vmem:[#allocation125_spill] sm:$0xff]  ;;  %v11536_v3 = vld [vmem:[#allocation116_spill] sm:$0xff] }
 0x3e4   : > { %11525 = vst [vmem:[#allocation266_spill] sm:$0xff] %v8608_v50  ;;  %4623 = vpow2.f32 %v7838_v32  ;;  %v2693_v34 = vadd.f32 %v11507_v14, %v2692_v54  ;;  %v2831_v15 = vadd.f32 %v11527_v60, %v2830_v6  ;;  %v2630_v61 = vadd.f32 %v11530_v38, %v2629_v8  ;;  %v11531_v14 = vld [vmem:[#allocation87_spill] sm:$0xff]  ;;  %v11532_v54 = vld [vmem:[#allocation88_spill] sm:$0xff] }
 0x3e5   : > { %v8614_v46 = vpop.eup %4605  ;;  %4625 = vpow2.f32 %v11529_v37  ;;  %v2763_v6 = vadd.f32 %v11531_v14, %v2762_v56  ;;  %3348 = vmatpush1.bf16.msra.mxu0 %v2973_v27  ;;  %v11534_v8 = vld [vmem:[#allocation115_spill] sm:$0xff]  ;;  %3382 = vmatprep.subr.bf16.mxu1 %v3026_v59  ;;  %v11537_v43 = vld [vmem:[#allocation128_spill] sm:$0xff]  ;;  %v11543_v59 = vld [vmem:[#allocation137_spill] sm:$0xff] }
 0x3e6   : > { %11528 = vst [vmem:[#allocation50_spill] sm:$0xff] %v8614_v46  ;;  %v8622_v9 = vpop.eup %4607  ;;  %4627 = vpow2.f32 %v7853_v48  ;;  %v2694_v32 = vadd.f32 %v11508_v33, %v2693_v34  ;;  %v2832_v26 = vadd.f32 %v11532_v54, %v2831_v15  ;;  %v2631_v60 = vadd.f32 %v11535_v13, %v2630_v61  ;;  %3349 = vmatprep.subr.bf16.mxu0 %v2978_v10  ;;  %v11539_v34 = vld [vmem:[#allocation91_spill] sm:$0xff]  ;;  %v11540_v15 = vld [vmem:[#allocation92_spill] sm:$0xff]  ;;  %v11544_v14 = vld [vmem:[#allocation141_spill] sm:$0xff] }
 0x3e7   : > { %v8628_v37 = vpop.eup %4609  ;;  %4629 = vpow2.f32 %v11534_v8  ;;  %v2764_v56 = vadd.f32 %v11539_v34, %v2763_v6  ;;  %3383 = vmatpush1.bf16.msra.mxu1 %v3025_v2  ;;  %v11542_v10 = vld [vmem:[#allocation119_spill] sm:$0xff]  ;;  %v11545_v54 = vld [vmem:[#allocation176_spill] sm:$0xff] }
 0x3e8   : > { %11533 = vst [vmem:[#allocation265_spill] sm:$0xff] %v8628_v37  ;;  %v8636_v33 = vpop.eup %4611  ;;  %4631 = vpow2.f32 %v7863_v17  ;;  %v2695_v27 = vadd.f32 %v11514_v18, %v2694_v32  ;;  %v2833_v8 = vadd.f32 %v11540_v15, %v2832_v26  ;;  %v2632_v39 = vadd.f32 %v11543_v59, %v2631_v60  ;;  %v11548_v32 = vld [vmem:[#allocation95_spill] sm:$0xff]  ;;  %v11549_v6 = vld [vmem:[#allocation96_spill] sm:$0xff] }
 0x3e9   : > { %11538 = vst [vmem:[#allocation267_spill] sm:$0xff] %v8636_v33  ;;  %v8642_v61 = vpop.eup %4613  ;;  %4633 = vpow2.f32 %v11542_v10  ;;  %v11546_v33 = vld [vmem:[#allocation160_spill] sm:$0xff]  ;;  %v2765_v2 = vadd.f32 %v11548_v32, %v2764_v56  ;;  %v11550_v10 = vpack.c.bf16 %v11492_v41, %v11483_v62  ;;  %v11557_v32 = vld [vmem:[#allocation101_spill] sm:$0xff] }
 0x3ea   : > { %11541 = vst [vmem:[#allocation268_spill] sm:$0xff] %v8642_v61  ;;  %v8650_v17 = vpop.eup %4615  ;;  %4635 = vpow2.f32 %v7878_v51  ;;  %v2696_v18 = vadd.f32 %v11515_v22, %v2695_v27  ;;  %v2834_v26 = vadd.f32 %v11549_v6, %v2833_v8  ;;  %v2633_v45 = vadd.f32 %v11546_v33, %v2632_v39  ;;  %v11552_v51 = vld [vmem:[#allocation110_spill] sm:$0xff]  ;;  %v11553_v22 = vld [vmem:[#allocation127_spill] sm:$0xff]  ;;  %v11556_v62 = vld [vmem:[#allocation100_spill] sm:$0xff] }
 0x3eb   : > { %11547 = vst [vmem:[#allocation140_spill] sm:$0xff] %v8650_v17  ;;  %3350 = vmatpush1.bf16.msra.mxu0 %v11550_v10  ;;  %v8659_v60 = vpop.eup %4617  ;;  %4637 = vpow2.f32 %v7886_v49  ;;  %v3029_v48 = vpack.c.bf16 %v8650_v17, %v8622_v9  ;;  %v11555_v8 = vld [vmem:[#allocation123_spill] sm:$0xff]  ;;  %v2766_v10 = vadd.f32 %v11556_v62, %v2765_v2  ;;  %v11559_v39 = vld [vmem:[#allocation126_spill] sm:$0xff]  ;;  %v11563_v2 = vld [vmem:[#allocation108_spill] sm:$0xff] }
 0x3ec   : > { %11551 = vst [vmem:[#allocation270_spill] sm:$0xff] %v8659_v60  ;;  %3351 = vmatprep.subr.bf16.mxu0 %v2982_v0  ;;  %v8667_v56 = vpop.eup %4619  ;;  %4639 = vpow2.f32 %v11555_v8  ;;  %v2697_v41 = vadd.f32 %v11523_v40, %v2696_v18  ;;  %v2835_v34 = vadd.f32 %v11557_v32, %v2834_v26  ;;  %v11560_v6 = vld [vmem:[#allocation103_spill] sm:$0xff]  ;;  %v3030_v0 = vpack.c.bf16 %v8659_v60, %v8628_v37  ;;  %v11561_v27 = vld [vmem:[#allocation122_spill] sm:$0xff]  ;;  %v11564_v62 = vld [vmem:[#allocation109_spill] sm:$0xff] }
 0x3ed   : > { %11554 = vst [vmem:[#allocation269_spill] sm:$0xff] %v8667_v56  ;;  %v8673_v49 = vpop.eup %4621  ;;  %4641 = vpow2.f32 %v11559_v39  ;;  %v2634_v15 = vadd.f32 %v11560_v6, %v2633_v45  ;;  %v11562_v8 = vld [vmem:[#allocation130_spill] sm:$0xff]  ;;  %v2767_v26 = vadd.f32 %v11563_v2, %v2766_v10  ;;  %v11565_v39 = vpack.c.bf16 %v11506_v35, %v11499_v57  ;;  %v11567_v60 = vld [vmem:[#allocation131_spill] sm:$0xff]  ;;  %v8701_v10 = vpop.trf.xlu1 }
 0x3ee   : > { %11558 = vst [vmem:[#allocation54_spill] sm:$0xff] %v8673_v49  ;;  %v8681_v56 = vpop.eup %4623  ;;  %4643 = vpow2.f32 %v11562_v8  ;;  %v2698_v18 = vadd.f32 %v11524_v20, %v2697_v41  ;;  %v2836_v32 = vadd.f32 %v11564_v62, %v2835_v34  ;;  %3384 = vmatprep.subr.bf16.mxu1 %v3030_v0  ;;  %v11568_v8 = vpack.c.bf16 %v11524_v20, %v11523_v40  ;;  %v8703_v35 = vpop.trf.xlu0  ;;  %v11572_v40 = vld [vmem:[#allocation121_spill] sm:$0xff]  ;;  %v11580_v2 = vld [vmem:[#allocation142_spill] sm:$0xff] }
 0x3ef   : > { %3352 = vmatpush1.bf16.msra.mxu0 %v11565_v39  ;;  %v8690_v45 = vpop.eup %4625  ;;  %4645 = vpow2.f32 %v11567_v60  ;;  %v2635_v17 = vadd.f32 %v11561_v27, %v2634_v15  ;;  %11569 = vst [vmem:[#allocation272_spill] sm:$0xff] %v8701_v10  ;;  %v11571_v60 = vld [vmem:[#allocation120_spill] sm:$0xff]  ;;  %3385 = vmatpush1.bf16.msra.mxu1 %v3029_v48 }
 0x3f0   : > { %11566 = vst [vmem:[#allocation271_spill] sm:$0xff] %v8690_v45  ;;  %3353 = vmatprep.subr.bf16.mxu0 %v11568_v8  ;;  %v8705_v57 = vpop.eup %4627  ;;  %4647 = vpow2.f32 %v7921_v28  ;;  %v2699_v15 = vadd.f32 %v11536_v3, %v2698_v18  ;;  %v2768_v0 = vadd.f32 %v11571_v60, %v2767_v26  ;;  %v2837_v20 = vadd.f32 %v11572_v40, %v2836_v32  ;;  %v11574_v8 = vld [vmem:[#allocation135_spill] sm:$0xff]  ;;  %v11575_v32 = vld [vmem:[#allocation138_spill] sm:$0xff]  ;;  %v11576_v26 = vld [vmem:[#allocation129_spill] sm:$0xff] }
 0x3f1   : > { %11570 = vst [vmem:[#allocation274_spill] sm:$0xff] %v8705_v57  ;;  %3369 = vmatprep.mubr.bf16.mxu0 %v8703_v35  ;;  %v8712_v39 = vpop.eup %4629  ;;  %4649 = vpow2.f32 %v11574_v8  ;;  %v2636_v34 = vadd.f32 %v7948_v63, %v2635_v17  ;;  %3410 = vmatprep.mubr.bf16.mxu1 %v8701_v10  ;;  %v11577_v40 = vld [vmem:[#allocation133_spill] sm:$0xff]  ;;  %v11578_v17 = vpack.c.bf16 %v11522_v11, %v11513_v12  ;;  %v11583_v12 = vld [vmem:[#allocation148_spill] sm:$0xff] }
 0x3f2   : > { %11573 = vst [vmem:[#allocation273_spill] sm:$0xff] %v8712_v39  ;;  %v8721_v18 = vpop.eup %4631  ;;  %4651 = vpow2.f32 %v11575_v32  ;;  %v2700_v48 = vadd.f32 %v11537_v43, %v2699_v15  ;;  %v2769_v60 = vadd.f32 %v11576_v26, %v2768_v0  ;;  %v2838_v8 = vadd.f32 %v11577_v40, %v2837_v20  ;;  %v11584_v32 = vld [vmem:[#allocation152_spill] sm:$0xff]  ;;  %v11586_v26 = vld [vmem:[#allocation143_spill] sm:$0xff] }
 0x3f3   : > { %3354 = vmatpush1.bf16.msra.mxu0 %v11578_v17  ;;  %v8730_v41 = vpop.eup %4633  ;;  %4653 = vpow2.f32 %v11580_v2  ;;  %v2637_v28 = vadd.f32 %v8003_v25, %v2636_v34  ;;  %v3033_v10 = vpack.c.bf16 %v8721_v18, %v8681_v56  ;;  %v11581_v15 = vpack.c.bf16 %v11537_v43, %v11536_v3  ;;  %v11592_v40 = vld [vmem:[#allocation147_spill] sm:$0xff] }
 0x3f4   : > { %11579 = vst [vmem:[#allocation275_spill] sm:$0xff] %v8730_v41  ;;  %v8741_v20 = vpop.eup %4635  ;;  %4655 = vpow2.f32 %v7946_v5  ;;  %v2701_v11 = vadd.f32 %v11544_v14, %v2700_v48  ;;  %v2770_v2 = vadd.f32 %v11583_v12, %v2769_v60  ;;  %v2839_v34 = vadd.f32 %v11584_v32, %v2838_v8  ;;  %v11587_v5 = vld [vmem:[#allocation146_spill] sm:$0xff]  ;;  %v11588_v48 = vld [vmem:[#allocation188_spill] sm:$0xff]  ;;  %v11589_v12 = vld [vmem:[#allocation99_spill] sm:$0xff] }
 0x3f5   : > { %3355 = vmatprep.subr.bf16.mxu0 %v11581_v15  ;;  %11582 = vst [vmem:[#allocation58_spill] sm:$0xff] %v8741_v20  ;;  %v8747_v17 = vpop.eup %4637  ;;  %4657 = vpow2.f32 %v11586_v26  ;;  %v2638_v43 = vadd.f32 %v8061_v58, %v2637_v28  ;;  %v3034_v3 = vpack.c.bf16 %v8730_v41, %v8690_v45  ;;  %v11590_v26 = vpack.c.bf16 %v11535_v13, %v11530_v38  ;;  %v11595_v13 = vld [vmem:[#allocation114_spill] sm:$0xff] }
 0x3f6   : > { %11585 = vst [vmem:[#allocation144_spill] sm:$0xff] %v8747_v17  ;;  %v8755_v0 = vpop.eup %4639  ;;  %4659 = vpow2.f32 %v11587_v5  ;;  %v2702_v60 = vadd.f32 %v11545_v54, %v2701_v11  ;;  %v2771_v8 = vadd.f32 %v11588_v48, %v2770_v2  ;;  %v2840_v32 = vadd.f32 %v11589_v12, %v2839_v34  ;;  %v11601_v11 = vld [vmem:[#allocation139_spill] sm:$0xff]  ;;  %v11612_v12 = vld [vmem:[#allocation158_spill] sm:$0xff] }
 0x3f7   : > { %3356 = vmatpush1.bf16.msra.mxu0 %v11590_v26  ;;  %v8764_v28 = vpop.eup %4641  ;;  %4661 = vpow2.f32 %v11592_v40  ;;  %v2639_v15 = vadd.f32 %v8125_v19, %v2638_v43  ;;  %3386 = vmatprep.subr.bf16.mxu1 %v3034_v3  ;;  %v11593_v5 = vpack.c.bf16 %v11545_v54, %v11544_v14  ;;  %v11596_v43 = vld [vmem:[#allocation118_spill] sm:$0xff] }
 0x3f8   : > { %11591 = vst [vmem:[#allocation33_spill] sm:$0xff] %v8764_v28  ;;  %v8775_v34 = vpop.eup %4643  ;;  %4663 = vpow2.f32 %v7972_v16  ;;  %v2703_v38 = vadd.f32 %v11552_v51, %v2702_v60  ;;  %v2772_v40 = vadd.f32 %v11595_v13, %v2771_v8  ;;  %v2841_v3 = vadd.f32 %v11596_v43, %v2840_v32  ;;  %3387 = vmatpush1.bf16.msra.mxu1 %v3033_v10  ;;  %v11599_v60 = vld [vmem:[#allocation151_spill] sm:$0xff]  ;;  %v11600_v32 = vld [vmem:[#allocation134_spill] sm:$0xff] }
 0x3f9   : > { %3357 = vmatprep.subr.bf16.mxu0 %v11593_v5  ;;  %11594 = vst [vmem:[#allocation37_spill] sm:$0xff] %v8775_v34  ;;  %v8781_v26 = vpop.eup %4645  ;;  %4665 = vpow2.f32 %v7974_v30  ;;  %v2640_v14 = vadd.f32 %v8192_v36, %v2639_v15  ;;  %v11597_v5 = vld [vmem:[#allocation253_spill] sm:$0xff]  ;;  %v11602_v30 = vpack.c.bf16 %v11546_v33, %v11543_v59  ;;  %v11604_v54 = vld [vmem:[#allocation154_spill] sm:$0xff]  ;;  %v11636_v34 = vld [vmem:[#allocation132_spill] sm:$0xff] }
 0x3fa   : > { %v8789_v16 = vpop.eup %4647  ;;  %4667 = vpow2.f32 %v11599_v60  ;;  %v2704_v8 = vadd.f32 %v11553_v22, %v2703_v38  ;;  %v2773_v10 = vadd.f32 %v11600_v32, %v2772_v40  ;;  %v2842_v13 = vadd.f32 %v11601_v11, %v2841_v3  ;;  %v11606_v40 = vld [vmem:[#allocation35_spill] sm:$0xff]  ;;  %v11609_v33 = vld [vmem:[#allocation153_spill] sm:$0xff]  ;;  %v11614_v3 = vld [vmem:[#allocation254_spill] sm:$0xff] }
 0x3fb   : > { %11598 = vst [vmem:[#allocation36_spill] sm:$0xff] %v8789_v16  ;;  %3358 = vmatpush1.bf16.msra.mxu0 %v11602_v30  ;;  %v8798_v15 = vpop.eup %4649  ;;  %4669 = vpow2.f32 %v11604_v54  ;;  %v2641_v2 = vadd.f32 %v8256_v31, %v2640_v14  ;;  %v3037_v43 = vpack.c.bf16 %v8789_v16, %v8755_v0  ;;  %v11605_v38 = vpack.c.bf16 %v11553_v22, %v11552_v51  ;;  %v11607_v60 = vld [vmem:[#allocation39_spill] sm:$0xff]  ;;  %v11610_v30 = vld [vmem:[#allocation150_spill] sm:$0xff] }
 0x3fc   : > { %11603 = vst [vmem:[#allocation40_spill] sm:$0xff] %v8798_v15  ;;  %v8809_v32 = vpop.eup %4651  ;;  %4671 = vpow2.f32 %v11609_v33  ;;  %v2705_v59 = vadd.f32 %v7966_v23, %v2704_v8  ;;  %v2774_v54 = vadd.f32 %v11610_v30, %v2773_v10  ;;  %v11611_v11 = vld [vmem:[#allocation155_spill] sm:$0xff]  ;;  %v3038_v22 = vpack.c.bf16 %v8798_v15, %v8764_v28  ;;  %v11616_v33 = vld [vmem:[#allocation157_spill] sm:$0xff]  ;;  %v11624_v28 = vld [vmem:[#allocation48_spill] sm:$0xff] }
 0x3fd   : > { %3359 = vmatprep.subr.bf16.mxu0 %v11605_v38  ;;  %11608 = vst [vmem:[#allocation145_spill] sm:$0xff] %v8809_v32  ;;  %v2843_v14 = vadd.f32 %v11611_v11, %v2842_v13  ;;  %v8815_v48 = vpop.eup %4653  ;;  %4673 = vpow2.f32 %v11612_v12  ;;  %v2642_v51 = vadd.f32 %v8323_v47, %v2641_v2  ;;  %v11613_v38 = vld [vmem:[#allocation34_spill] sm:$0xff]  ;;  %v11617_v10 = vld [vmem:[#allocation165_spill] sm:$0xff]  ;;  %v11619_v12 = vpack.c.bf16 %v11561_v27, %v11560_v6  ;;  %v11621_v15 = vld [vmem:[#allocation159_spill] sm:$0xff] }
 0x3fe   : > { %v8823_v41 = vpop.eup %4655  ;;  %4675 = vpow2.f32 %v11616_v33  ;;  %v2706_v8 = vadd.f32 %v8015_v4, %v2705_v59  ;;  %v2775_v13 = vadd.f32 %v11617_v10, %v2774_v54  ;;  %v11618_v30 = vld [vmem:[#allocation169_spill] sm:$0xff]  ;;  %3388 = vmatprep.subr.bf16.mxu1 %v3038_v22  ;;  %v11622_v33 = vpack.c.bf16 %v8015_v4, %v7966_v23  ;;  %v11623_v59 = vld [vmem:[#allocation44_spill] sm:$0xff]  ;;  %v11628_v6 = vld [vmem:[#allocation162_spill] sm:$0xff] }
 0x3ff   : > { %11615 = vst [vmem:[#allocation62_spill] sm:$0xff] %v8823_v41  ;;  %v2844_v11 = vadd.f32 %v11618_v30, %v2843_v14  ;;  %3360 = vmatpush1.bf16.msra.mxu0 %v11619_v12  ;;  %v8832_v2 = vpop.eup %4657  ;;  %4677 = vpow2.f32 %v11621_v15  ;;  %v2643_v62 = vadd.f32 %v8387_v24, %v2642_v51  ;;  %v11625_v10 = vld [vmem:[#allocation256_spill] sm:$0xff]  ;;  %v11629_v15 = vld [vmem:[#allocation179_spill] sm:$0xff]  ;;  %3389 = vmatpush1.bf16.msra.mxu1 %v3037_v43  ;;  %v11632_v23 = vld [vmem:[#allocation161_spill] sm:$0xff] }
 0x400   : > { %11620 = vst [vmem:[#allocation41_spill] sm:$0xff] %v8832_v2  ;;  %3361 = vmatprep.subr.bf16.mxu0 %v11622_v33  ;;  %v11626_v14 = vld [vmem:[#allocation260_spill] sm:$0xff]  ;;  %v8843_v45 = vpop.eup %4659  ;;  %4679 = vpow2.f32 %v11628_v6  ;;  %v2707_v27 = vadd.f32 %v8079_v21, %v2706_v8  ;;  %v2776_v12 = vadd.f32 %v11629_v15, %v2775_v13  ;;  %v11630_v51 = vld [vmem:[#allocation183_spill] sm:$0xff]  ;;  %v11633_v4 = vld [vmem:[#allocation250_spill] sm:$0xff] }
 0x401   : > { %11627 = vst [vmem:[#allocation66_spill] sm:$0xff] %v8843_v45  ;;  %v2845_v22 = vadd.f32 %v11630_v51, %v2844_v11  ;;  %v8849_v37 = vpop.eup %4661  ;;  %4681 = vpow2.f32 %v11632_v23  ;;  %v2644_v33 = vadd.f32 %v11633_v4, %v2643_v62  ;;  %v11634_v54 = vld [vmem:[#allocation43_spill] sm:$0xff]  ;;  %v11642_v23 = vpack.c.bf16 %v8003_v25, %v7948_v63  ;;  %v11644_v4 = vld [vmem:[#allocation166_spill] sm:$0xff] }
 0x402   : > { %11631 = vst [vmem:[#allocation45_spill] sm:$0xff] %v8849_v37  ;;  %v11635_v32 = vld [vmem:[#allocation47_spill] sm:$0xff]  ;;  %v8857_v6 = vpop.eup %4663  ;;  %v2708_v13 = vadd.f32 %v8143_v55, %v2707_v27  ;;  %v11646_v27 = vpack.c.bf16 %v8143_v55, %v8079_v21 }
 0x403   : > { %v11637_v45 = vld [vmem:[#allocation259_spill] sm:$0xff]  ;;  %11638 = vst [vmem:[#allocation149_spill] sm:$0xff] %v8857_v6  ;;  %3362 = vmatpush1.bf16.msra.mxu0 %v11642_v23  ;;  %v8866_v62 = vpop.eup %4665  ;;  %v3041_v37 = vpack.c.bf16 %v8857_v6, %v8823_v41  ;;  %v11651_v23 = vld [vmem:[#allocation205_spill] sm:$0xff]  ;;  %v11653_v6 = vld [vmem:[#allocation170_spill] sm:$0xff] }
 0x404   : > { %v11639_v8 = vld [vmem:[#allocation163_spill] sm:$0xff]  ;;  %11643 = vst [vmem:[#allocation70_spill] sm:$0xff] %v8866_v62  ;;  %3363 = vmatprep.subr.bf16.mxu0 %v11646_v27  ;;  %v2709_v25 = vadd.f32 %v8210_v44, %v2708_v13  ;;  %v3042_v55 = vpack.c.bf16 %v8866_v62, %v8832_v2  ;;  %v11661_v62 = vld [vmem:[#allocation258_spill] sm:$0xff] }
 0x405   : > { %4683 = vpow2.f32 %v11639_v8  ;;  %v11640_v11 = vld [vmem:[#allocation191_spill] sm:$0xff]  ;;  %v11648_v8 = vld [vmem:[#allocation56_spill] sm:$0xff] }
 0x406   : > { %v2777_v43 = vadd.f32 %v11640_v11, %v2776_v12  ;;  %v11641_v15 = vld [vmem:[#allocation195_spill] sm:$0xff]  ;;  %4685 = vpow2.f32 %v11644_v4  ;;  %v11647_v12 = vld [vmem:[#allocation52_spill] sm:$0xff]  ;;  %v8877_v11 = vpop.eup %4667  ;;  %v2710_v13 = vadd.f32 %v8274_v52, %v2709_v25  ;;  %3390 = vmatprep.subr.bf16.mxu1 %v3042_v55 }
 0x407   : > { %v2846_v51 = vadd.f32 %v11641_v15, %v2845_v22  ;;  %v11645_v30 = vld [vmem:[#allocation251_spill] sm:$0xff]  ;;  %11649 = vst [vmem:[#allocation49_spill] sm:$0xff] %v8877_v11  ;;  %v11652_v15 = vld [vmem:[#allocation212_spill] sm:$0xff]  ;;  %3391 = vmatpush1.bf16.msra.mxu1 %v3041_v37 }
 0x408   : > { %v2645_v16 = vadd.f32 %v11645_v30, %v2644_v33  ;;  %v11650_v63 = vld [vmem:[#allocation167_spill] sm:$0xff]  ;;  %v2778_v4 = vadd.f32 %v11651_v23, %v2777_v43  ;;  %v8883_v33 = vpop.eup %4669  ;;  %v11657_v43 = vld [vmem:[#allocation117_spill] sm:$0xff]  ;;  %v11674_v25 = vld [vmem:[#allocation64_spill] sm:$0xff] }
 0x409   : > { %4687 = vpow2.f32 %v11650_v63  ;;  %v2847_v30 = vadd.f32 %v11652_v15, %v2846_v51  ;;  %v11654_v41 = vld [vmem:[#allocation255_spill] sm:$0xff]  ;;  %v8891_v11 = vpop.eup %4671  ;;  %v11656_v63 = vld [vmem:[#allocation200_spill] sm:$0xff] }
 0x40a   : > { %4689 = vpow2.f32 %v11653_v6  ;;  %v2646_v21 = vadd.f32 %v11654_v41, %v2645_v16  ;;  %v11655_v27 = vld [vmem:[#allocation263_spill] sm:$0xff]  ;;  %v2779_v51 = vadd.f32 %v11657_v43, %v2778_v4  ;;  %v11659_v6 = vpack.c.bf16 %v8125_v19, %v8061_v58  ;;  %v8900_v41 = vpop.eup %4673  ;;  %v11665_v43 = vld [vmem:[#allocation261_spill] sm:$0xff]  ;;  %v11667_v58 = vld [vmem:[#allocation174_spill] sm:$0xff] }
 0x40b   : > { %4691 = vpow2.f32 %v11656_v63  ;;  %v11658_v23 = vld [vmem:[#allocation223_spill] sm:$0xff]  ;;  %v11662_v63 = vpack.c.bf16 %v8274_v52, %v8210_v44  ;;  %v2711_v19 = vadd.f32 %v8341_v53, %v2710_v13  ;;  %v11671_v44 = vld [vmem:[#allocation173_spill] sm:$0xff]  ;;  %v11672_v52 = vld [vmem:[#allocation46_spill] sm:$0xff] }
 0x40c   : > { %v2848_v15 = vadd.f32 %v11658_v23, %v2847_v30  ;;  %3364 = vmatpush1.bf16.msra.mxu0 %v11659_v6  ;;  %v11660_v16 = vld [vmem:[#allocation171_spill] sm:$0xff]  ;;  %v2647_v22 = vadd.f32 %v11661_v62, %v2646_v21  ;;  %v8911_v23 = vpop.eup %4675  ;;  %v11669_v62 = vld [vmem:[#allocation233_spill] sm:$0xff]  ;;  %v11673_v4 = vld [vmem:[#allocation60_spill] sm:$0xff] }
 0x40d   : > { %4693 = vpow2.f32 %v11660_v16  ;;  %3365 = vmatprep.subr.bf16.mxu0 %v11662_v63  ;;  %v11664_v2 = vld [vmem:[#allocation55_spill] sm:$0xff]  ;;  %11666 = vst [vmem:[#allocation53_spill] sm:$0xff] %v8911_v23  ;;  %v8917_v55 = vpop.eup %4677  ;;  %v11676_v13 = vld [vmem:[#allocation202_spill] sm:$0xff]  ;;  %v11681_v30 = vld [vmem:[#allocation136_spill] sm:$0xff] }
 0x40e   : > { %4695 = vpow2.f32 %v11667_v58  ;;  %v11668_v6 = vld [vmem:[#allocation231_spill] sm:$0xff]  ;;  %v2849_v21 = vadd.f32 %v11669_v62, %v2848_v15  ;;  %11670 = vst [vmem:[#allocation156_spill] sm:$0xff] %v8917_v55  ;;  %v2648_v63 = vadd.f32 %v11672_v52, %v2647_v22  ;;  %v8925_v58 = vpop.eup %4679  ;;  %v11677_v15 = vld [vmem:[#allocation241_spill] sm:$0xff] }
 0x40f   : > { %v2780_v16 = vadd.f32 %v11668_v6, %v2779_v51  ;;  %4697 = vpow2.f32 %v11671_v44  ;;  %11675 = vst [vmem:[#allocation74_spill] sm:$0xff] %v8925_v58  ;;  %v2712_v51 = vadd.f32 %v8405_v7, %v2711_v19  ;;  %v11678_v6 = vld [vmem:[#allocation245_spill] sm:$0xff]  ;;  %v11679_v44 = vpack.c.bf16 %v8256_v31, %v8192_v36  ;;  %v8934_v22 = vpop.eup %4681  ;;  %v11680_v52 = vld [vmem:[#allocation175_spill] sm:$0xff]  ;;  %v11686_v36 = vld [vmem:[#allocation178_spill] sm:$0xff] }
 0x410   : > { %4699 = vpow2.f32 %v11676_v13  ;;  %v2850_v62 = vadd.f32 %v11678_v6, %v2849_v21  ;;  %v2649_v23 = vadd.f32 %v11681_v30, %v2648_v63  ;;  %v3045_v55 = vpack.c.bf16 %v8925_v58, %v8891_v11  ;;  %v11684_v13 = vld [vmem:[#allocation63_spill] sm:$0xff]  ;;  %v11687_v31 = vld [vmem:[#allocation249_spill] sm:$0xff] }
 0x411   : > { %v2781_v37 = vadd.f32 %v11677_v15, %v2780_v16  ;;  %3366 = vmatpush1.bf16.msra.mxu0 %v11679_v44  ;;  %4701 = vpow2.f32 %v11680_v52  ;;  %v11682_v19 = vpack.c.bf16 %v8405_v7, %v8341_v53  ;;  %v11683_v16 = vld [vmem:[#allocation59_spill] sm:$0xff]  ;;  %v8945_v15 = vpop.eup %4683  ;;  %v2713_v44 = vadd.f32 %v11687_v31, %v2712_v51  ;;  %v11688_v6 = vld [vmem:[#allocation177_spill] sm:$0xff]  ;;  %v11692_v51 = vld [vmem:[#allocation252_spill] sm:$0xff] }
 0x412   : > { %11685 = vst [vmem:[#allocation164_spill] sm:$0xff] %v8945_v15  ;;  %4703 = vpow2.f32 %v11686_v36  ;;  %v2851_v30 = vadd.f32 %v8474_v42, %v2850_v62  ;;  %v8951_v63 = vpop.eup %4685  ;;  %v2650_v53 = vadd.f32 %v8622_v9, %v2649_v23  ;;  %v3046_v7 = vpack.c.bf16 %v8934_v22, %v8900_v41  ;;  %v11690_v21 = vld [vmem:[#allocation269_spill] sm:$0xff]  ;;  %v11691_v36 = vld [vmem:[#allocation204_spill] sm:$0xff]  ;;  %v11694_v23 = vld [vmem:[#allocation182_spill] sm:$0xff] }
 0x413   : > { %3367 = vmatprep.subr.bf16.mxu0 %v11682_v19  ;;  %v2782_v52 = vadd.f32 %v11613_v38, %v2781_v37  ;;  %4705 = vpow2.f32 %v11688_v6  ;;  %v11689_v19 = vld [vmem:[#allocation267_spill] sm:$0xff]  ;;  %v8959_v58 = vpop.eup %4687  ;;  %v2714_v37 = vadd.f32 %v11692_v51, %v2713_v44  ;;  %v11693_v6 = vpack.c.bf16 %v8387_v24, %v8323_v47  ;;  %v11695_v38 = vld [vmem:[#allocation140_spill] sm:$0xff]  ;;  %v8975_v44 = vpop.trf.xlu0  ;;  %v11762_v42 = vld [vmem:[#allocation209_spill] sm:$0xff] }
 0x414   : > { %4707 = vpow2.f32 %v11691_v36  ;;  %v2852_v31 = vadd.f32 %v11597_v5, %v2851_v30  ;;  %v8968_v9 = vpop.eup %4689  ;;  %v2651_v15 = vadd.f32 %v11695_v38, %v2650_v53  ;;  %3392 = vmatprep.subr.bf16.mxu1 %v3046_v7  ;;  %v11696_v36 = vpack.c.bf16 %v11444_v29, %v11443_v1  ;;  %11697 = vst [vmem:[#allocation78_spill] sm:$0xff] %v8975_v44  ;;  %v11699_v51 = vld [vmem:[#allocation72_spill] sm:$0xff]  ;;  %v11702_v29 = vld [vmem:[#allocation206_spill] sm:$0xff]  ;;  %v11704_v24 = vld [vmem:[#allocation71_spill] sm:$0xff] }
 0x415   : > { %v2783_v62 = vadd.f32 %v11614_v3, %v2782_v52  ;;  %3368 = vmatpush1.bf16.msra.mxu0 %v11693_v6  ;;  %4709 = vpow2.f32 %v11694_v23  ;;  %v11698_v52 = vld [vmem:[#allocation68_spill] sm:$0xff]  ;;  %v8981_v47 = vpop.eup %4691  ;;  %v11700_v6 = vld [vmem:[#allocation181_spill] sm:$0xff]  ;;  %v11701_v23 = vld [vmem:[#allocation42_spill] sm:$0xff]  ;;  %3393 = vmatpush1.bf16.msra.mxu1 %v3045_v55 }
 0x416   : > { %3419 = vmatprep.subr.bf16.mxu0 %v11696_v36  ;;  %4711 = vpow2.f32 %v11700_v6  ;;  %v2715_v3 = vadd.f32 %v11701_v23, %v2714_v37  ;;  %v2853_v53 = vadd.f32 %v11625_v10, %v2852_v31  ;;  %v2652_v7 = vadd.f32 %v8681_v56, %v2651_v15  ;;  %v11703_v36 = vld [vmem:[#allocation67_spill] sm:$0xff]  ;;  %v11706_v31 = vld [vmem:[#allocation257_spill] sm:$0xff] }
 0x417   : > { %v2784_v38 = vadd.f32 %v11636_v34, %v2783_v62  ;;  %v8987_v1 = vpop.eup %4693  ;;  %4713 = vpow2.f32 %v11702_v29  ;;  %v11705_v62 = vld [vmem:[#allocation186_spill] sm:$0xff]  ;;  %v11707_v56 = vpack.c.bf16 %v11607_v60, %v11606_v40  ;;  %v11708_v30 = vld [vmem:[#allocation185_spill] sm:$0xff]  ;;  %v11712_v60 = vld [vmem:[#allocation187_spill] sm:$0xff] }
 0x418   : > { %3370 = vmatmul.mubr.bf16.vlgmr.msra.gmra.mrb[128].mxu0 %v8975_v44  ;;  %v8996_v37 = vpop.eup %4695  ;;  %4715 = vpow2.f32 %v11705_v62  ;;  %v2716_v55 = vadd.f32 %v11706_v31, %v2715_v3  ;;  %v2854_v29 = vadd.f32 %v11626_v14, %v2853_v53  ;;  %v2653_v6 = vadd.f32 %v8721_v18, %v2652_v7  ;;  %v11711_v53 = vld [vmem:[#allocation80_spill] sm:$0xff]  ;;  %v11714_v34 = vld [vmem:[#allocation190_spill] sm:$0xff] }
 0x419   : > { %v2785_v23 = vadd.f32 %v11637_v45, %v2784_v38  ;;  %3420 = vmatpush1.bf16.msra.mxu0 %v11707_v56  ;;  %3451 = vmatprep.mubr.bf16.mxu0 %v8703_v35  ;;  %v9006_v15 = vpop.eup %4697  ;;  %4717 = vpow2.f32 %v11708_v30  ;;  %v3049_v62 = vpack.c.bf16 %v8996_v37, %v8959_v58  ;;  %v11709_v3 = vpack.c.bf16 %v11624_v28, %v11623_v59  ;;  %v11710_v38 = vld [vmem:[#allocation76_spill] sm:$0xff]  ;;  %v11713_v35 = vld [vmem:[#allocation262_spill] sm:$0xff]  ;;  %v11731_v45 = vld [vmem:[#allocation45_spill] sm:$0xff] }
 0x41a   : > { %v9017_v40 = vpop.eup %4699  ;;  %4719 = vpow2.f32 %v11712_v60  ;;  %v2717_v56 = vadd.f32 %v11713_v35, %v2716_v55  ;;  %v2855_v18 = vadd.f32 %v11655_v27, %v2854_v29  ;;  %v2654_v28 = vadd.f32 %v8755_v0, %v2653_v6  ;;  %v11715_v60 = vld [vmem:[#allocation208_spill] sm:$0xff]  ;;  %v11718_v6 = vld [vmem:[#allocation189_spill] sm:$0xff] }
 0x41b   : > { %3421 = vmatprep.subr.bf16.mxu0 %v11709_v3  ;;  %v2786_v30 = vadd.f32 %v11665_v43, %v2785_v23  ;;  %v9023_v7 = vpop.eup %4701  ;;  %4721 = vpow2.f32 %v11714_v34  ;;  %v3050_v59 = vpack.c.bf16 %v9006_v15, %v8968_v9  ;;  %v11716_v55 = vld [vmem:[#allocation264_spill] sm:$0xff]  ;;  %v11717_v34 = vpack.c.bf16 %v11635_v32, %v11634_v54  ;;  %v11725_v32 = vld [vmem:[#allocation194_spill] sm:$0xff]  ;;  %v11726_v54 = vld [vmem:[#allocation265_spill] sm:$0xff] }
 0x41c   : > { %v9031_v31 = vpop.eup %4703  ;;  %4723 = vpow2.f32 %v11715_v60  ;;  %v2718_v23 = vadd.f32 %v11716_v55, %v2717_v56  ;;  %v2856_v35 = vadd.f32 %v8614_v46, %v2855_v18  ;;  %v11719_v43 = vld [vmem:[#allocation36_spill] sm:$0xff]  ;;  %v11720_v60 = vpack.c.bf16 %v11648_v8, %v11647_v12  ;;  %v11721_v56 = vld [vmem:[#allocation75_spill] sm:$0xff]  ;;  %v11724_v18 = vld [vmem:[#allocation145_spill] sm:$0xff] }
 0x41d   : > { %v2787_v29 = vadd.f32 %v8608_v50, %v2786_v30  ;;  %3422 = vmatpush1.bf16.msra.mxu0 %v11717_v34  ;;  %v9040_v0 = vpop.eup %4705  ;;  %4725 = vpow2.f32 %v11718_v6  ;;  %v2655_v3 = vadd.f32 %v11719_v43, %v2654_v28  ;;  %3394 = vmatprep.subr.bf16.mxu1 %v3050_v59  ;;  %v11722_v55 = vld [vmem:[#allocation79_spill] sm:$0xff]  ;;  %v11723_v50 = vld [vmem:[#allocation37_spill] sm:$0xff]  ;;  %v11728_v8 = vld [vmem:[#allocation62_spill] sm:$0xff] }
 0x41e   : > { %3423 = vmatprep.subr.bf16.mxu0 %v11720_v60  ;;  %v9051_v46 = vpop.eup %4707  ;;  %4727 = vpow2.f32 %v11725_v32  ;;  %v2719_v34 = vadd.f32 %v11726_v54, %v2718_v23  ;;  %v2857_v43 = vadd.f32 %v8642_v61, %v2856_v35  ;;  %3395 = vmatpush1.bf16.msra.mxu1 %v3049_v62  ;;  %v11727_v12 = vld [vmem:[#allocation193_spill] sm:$0xff]  ;;  %v11729_v60 = vld [vmem:[#allocation84_spill] sm:$0xff] }
 0x41f   : > { %v2788_v6 = vadd.f32 %v11689_v19, %v2787_v29  ;;  %v9057_v28 = vpop.eup %4709  ;;  %4729 = vpow2.f32 %v11727_v12  ;;  %v2656_v59 = vadd.f32 %v11728_v8, %v2655_v3  ;;  %v11730_v30 = vld [vmem:[#allocation88_spill] sm:$0xff]  ;;  %v11733_v29 = vld [vmem:[#allocation270_spill] sm:$0xff]  ;;  %v11734_v12 = vld [vmem:[#allocation51_spill] sm:$0xff] }
 0x420   : > { %v9065_v32 = vpop.eup %4711  ;;  %v11732_v23 = vld [vmem:[#allocation196_spill] sm:$0xff]  ;;  %v2720_v54 = vadd.f32 %v11733_v29, %v2719_v34  ;;  %v2858_v35 = vadd.f32 %v8673_v49, %v2857_v43  ;;  %v11735_v19 = vpack.c.bf16 %v11664_v2, %v11734_v12  ;;  %v11736_v8 = vld [vmem:[#allocation198_spill] sm:$0xff]  ;;  %v11737_v27 = vld [vmem:[#allocation149_spill] sm:$0xff]  ;;  %v11738_v34 = vpack.c.bf16 %v11674_v25, %v11673_v4 }
 0x421   : > { %4731 = vpow2.f32 %v11732_v23  ;;  %v2789_v62 = vadd.f32 %v11690_v21, %v2788_v6  ;;  %v9074_v3 = vpop.eup %4713  ;;  %v2657_v10 = vadd.f32 %v11737_v27, %v2656_v59  ;;  %v3053_v61 = vpack.c.bf16 %v9065_v32, %v9031_v31  ;;  %v11739_v6 = vld [vmem:[#allocation83_spill] sm:$0xff]  ;;  %v11741_v2 = vld [vmem:[#allocation197_spill] sm:$0xff] }
 0x422   : > { %3424 = vmatpush1.bf16.msra.mxu0 %v11735_v19  ;;  %4733 = vpow2.f32 %v11736_v8  ;;  %v11740_v23 = vld [vmem:[#allocation87_spill] sm:$0xff]  ;;  %v9085_v29 = vpop.eup %4715  ;;  %v2859_v27 = vadd.f32 %v8712_v39, %v2858_v35  ;;  %v3054_v4 = vpack.c.bf16 %v9074_v3, %v9040_v0  ;;  %v11745_v43 = vld [vmem:[#allocation49_spill] sm:$0xff] }
 0x423   : > { %3425 = vmatprep.subr.bf16.mxu0 %v11738_v34  ;;  %4735 = vpow2.f32 %v11741_v2  ;;  %v11742_v19 = vld [vmem:[#allocation271_spill] sm:$0xff]  ;;  %v2790_v8 = vadd.f32 %v8705_v57, %v2789_v62  ;;  %v9091_v59 = vpop.eup %4717  ;;  %v2658_v25 = vadd.f32 %v8891_v11, %v2657_v10  ;;  %v11744_v34 = vld [vmem:[#allocation66_spill] sm:$0xff]  ;;  %v11746_v2 = vld [vmem:[#allocation201_spill] sm:$0xff] }
 0x424   : > { %v2721_v12 = vadd.f32 %v11742_v19, %v2720_v54  ;;  %v11743_v21 = vld [vmem:[#allocation199_spill] sm:$0xff]  ;;  %v9099_v14 = vpop.eup %4719  ;;  %v2860_v19 = vadd.f32 %v8747_v17, %v2859_v27  ;;  %v11750_v57 = vld [vmem:[#allocation74_spill] sm:$0xff]  ;;  %3396 = vmatprep.subr.bf16.mxu1 %v3054_v4  ;;  %v11761_v17 = vld [vmem:[#allocation164_spill] sm:$0xff] }
 0x425   : > { %4737 = vpow2.f32 %v11743_v21  ;;  %v11747_v54 = vld [vmem:[#allocation275_spill] sm:$0xff]  ;;  %v2791_v35 = vadd.f32 %v8741_v20, %v2790_v8  ;;  %v11748_v21 = vpack.c.bf16 %v11684_v13, %v11683_v16  ;;  %v9108_v10 = vpop.eup %4721  ;;  %v2659_v49 = vadd.f32 %v11750_v57, %v2658_v25  ;;  %v11754_v20 = vld [vmem:[#allocation156_spill] sm:$0xff]  ;;  %v11756_v13 = vld [vmem:[#allocation33_spill] sm:$0xff]  ;;  %3397 = vmatpush1.bf16.msra.mxu1 %v3053_v61 }
 0x426   : > { %4739 = vpow2.f32 %v11746_v2  ;;  %v2722_v62 = vadd.f32 %v11747_v54, %v2721_v12  ;;  %v11749_v11 = vld [vmem:[#allocation203_spill] sm:$0xff]  ;;  %v11751_v2 = vpack.c.bf16 %v11699_v51, %v11698_v52  ;;  %v11752_v12 = vld [vmem:[#allocation92_spill] sm:$0xff]  ;;  %v9119_v39 = vpop.eup %4723  ;;  %v2861_v57 = vadd.f32 %v8781_v26, %v2860_v19  ;;  %v11760_v8 = vld [vmem:[#allocation53_spill] sm:$0xff] }
 0x427   : > { %3426 = vmatpush1.bf16.msra.mxu0 %v11748_v21  ;;  %4741 = vpow2.f32 %v11749_v11  ;;  %v11753_v54 = vld [vmem:[#allocation96_spill] sm:$0xff]  ;;  %v2792_v11 = vadd.f32 %v11723_v50, %v2791_v35  ;;  %v9125_v25 = vpop.eup %4725  ;;  %v11757_v52 = vld [vmem:[#allocation207_spill] sm:$0xff]  ;;  %v2660_v51 = vadd.f32 %v8959_v58, %v2659_v49  ;;  %v11769_v27 = vld [vmem:[#allocation214_spill] sm:$0xff] }
 0x428   : > { %3427 = vmatprep.subr.bf16.mxu0 %v11751_v2  ;;  %v11755_v16 = vld [vmem:[#allocation112_spill] sm:$0xff]  ;;  %v2723_v21 = vadd.f32 %v11756_v13, %v2722_v62  ;;  %v11758_v4 = vld [vmem:[#allocation91_spill] sm:$0xff]  ;;  %v2862_v61 = vadd.f32 %v8815_v48, %v2861_v57  ;;  %v11764_v13 = vpack.c.bf16 %v11704_v24, %v11703_v36  ;;  %v11770_v24 = vld [vmem:[#allocation41_spill] sm:$0xff] }
 0x429   : > { %4743 = vpow2.f32 %v11755_v16  ;;  %v11759_v2 = vld [vmem:[#allocation95_spill] sm:$0xff]  ;;  %v4728_v16 = vpop.eup %4727  ;;  %v11763_v62 = vld [vmem:[#allocation40_spill] sm:$0xff]  ;;  %v2793_v19 = vadd.f32 %v11724_v18, %v2792_v11  ;;  %v11768_v11 = vld [vmem:[#allocation109_spill] sm:$0xff] }
 0x42a   : > { %4745 = vpow2.f32 %v11757_v52  ;;  %v2724_v35 = vadd.f32 %v11763_v62, %v2723_v21  ;;  %v9140_v49 = vpop.eup %4729  ;;  %v11765_v58 = vld [vmem:[#allocation211_spill] sm:$0xff]  ;;  %v2661_v52 = vadd.f32 %v8996_v37, %v2660_v51  ;;  %v3057_v44 = vpack.c.bf16 %v4728_v16, %v9099_v14  ;;  %v11767_v21 = vld [vmem:[#allocation101_spill] sm:$0xff] }
 0x42b   : > { %4747 = vpow2.f32 %v11762_v42  ;;  %3428 = vmatpush1.bf16.msra.mxu0 %v11764_v13  ;;  %v11766_v42 = vpack.c.bf16 %v11711_v53, %v11710_v38  ;;  %v9150_v57 = vpop.eup %4731  ;;  %v2794_v13 = vadd.f32 %v11744_v34, %v2793_v19  ;;  %v11771_v51 = vld [vmem:[#allocation213_spill] sm:$0xff]  ;;  %v3058_v53 = vpack.c.bf16 %v9140_v49, %v9108_v10 }
 0x42c   : > { %4749 = vpow2.f32 %v11765_v58  ;;  %v2725_v36 = vadd.f32 %v11770_v24, %v2724_v35  ;;  %v2863_v58 = vadd.f32 %v11731_v45, %v2862_v61  ;;  %v9156_v37 = vpop.eup %4733  ;;  %v2662_v38 = vadd.f32 %v9031_v31, %v2661_v52  ;;  %v11773_v35 = vld [vmem:[#allocation70_spill] sm:$0xff]  ;;  %v11775_v52 = vld [vmem:[#allocation216_spill] sm:$0xff] }
 0x42d   : > { %3429 = vmatprep.subr.bf16.mxu0 %v11766_v42  ;;  %4751 = vpow2.f32 %v11769_v27  ;;  %v9164_v62 = vpop.eup %4735  ;;  %v11772_v27 = vld [vmem:[#allocation215_spill] sm:$0xff]  ;;  %v2795_v61 = vadd.f32 %v11745_v43, %v2794_v13  ;;  %3398 = vmatprep.subr.bf16.mxu1 %v3058_v53  ;;  %v11781_v53 = vld [vmem:[#allocation121_spill] sm:$0xff] }
 0x42e   : > { %4753 = vpow2.f32 %v11771_v51  ;;  %v2726_v19 = vadd.f32 %v11773_v35, %v2725_v36  ;;  %v2864_v24 = vadd.f32 %v8883_v33, %v2863_v58  ;;  %v11774_v51 = vpack.c.bf16 %v11722_v55, %v11721_v56  ;;  %v11777_v36 = vld [vmem:[#allocation100_spill] sm:$0xff]  ;;  %v11779_v56 = vld [vmem:[#allocation218_spill] sm:$0xff]  ;;  %3399 = vmatpush1.bf16.msra.mxu1 %v3057_v44  ;;  %v11783_v13 = vld [vmem:[#allocation219_spill] sm:$0xff] }
 0x42f   : > { %4755 = vpow2.f32 %v11772_v27  ;;  %v9173_v31 = vpop.eup %4737  ;;  %v2663_v42 = vadd.f32 %v9065_v32, %v2662_v38  ;;  %v11776_v27 = vpack.c.bf16 %v11730_v30, %v11729_v60  ;;  %v11778_v35 = vld [vmem:[#allocation108_spill] sm:$0xff]  ;;  %v11780_v30 = vld [vmem:[#allocation217_spill] sm:$0xff] }
 0x430   : > { %3430 = vmatpush1.bf16.msra.mxu0 %v11774_v51  ;;  %4757 = vpow2.f32 %v11775_v52  ;;  %v9184_v34 = vpop.eup %4739  ;;  %v2727_v55 = vadd.f32 %v8900_v41, %v2726_v19  ;;  %v2796_v51 = vadd.f32 %v11760_v8, %v2795_v61  ;;  %v2865_v32 = vadd.f32 %v11754_v20, %v2864_v24  ;;  %v11782_v52 = vld [vmem:[#allocation133_spill] sm:$0xff] }
 0x431   : > { %3431 = vmatprep.subr.bf16.mxu0 %v11776_v27  ;;  %4759 = vpow2.f32 %v11779_v56  ;;  %v9190_v38 = vpop.eup %4741  ;;  %v2664_v60 = vadd.f32 %v9099_v14, %v2663_v42  ;;  %v2992_v27 = vpack.c.bf16 %v11782_v52, %v11781_v53  ;;  %v11784_v61 = vpack.c.bf16 %v11740_v23, %v11739_v6  ;;  %v11785_v42 = vld [vmem:[#allocation220_spill] sm:$0xff]  ;;  %v11839_v58 = vld [vmem:[#allocation241_spill] sm:$0xff] }
 0x432   : > { %4761 = vpow2.f32 %v11780_v30  ;;  %v2728_v41 = vadd.f32 %v8934_v22, %v2727_v55  ;;  %v2797_v19 = vadd.f32 %v11761_v17, %v2796_v51  ;;  %v2866_v44 = vadd.f32 %v8951_v63, %v2865_v32  ;;  %v11787_v22 = vld [vmem:[#allocation120_spill] sm:$0xff]  ;;  %v11788_v55 = vld [vmem:[#allocation129_spill] sm:$0xff]  ;;  %v11789_v32 = vld [vmem:[#allocation222_spill] sm:$0xff] }
 0x433   : > { %v4744_v56 = vpop.eup %4743  ;;  %4763 = vpow2.f32 %v11783_v13  ;;  %v2665_v24 = vadd.f32 %v4728_v16, %v2664_v60  ;;  %v11786_v13 = vpack.c.bf16 %v11753_v54, %v11752_v12  ;;  %v2991_v51 = vpack.c.bf16 %v11788_v55, %v11787_v22  ;;  %v11790_v60 = vld [vmem:[#allocation221_spill] sm:$0xff] }
 0x434   : > { %3432 = vmatpush1.bf16.msra.mxu0 %v11784_v61  ;;  %v9205_v14 = vpop.eup %4745  ;;  %4765 = vpow2.f32 %v11785_v42  ;;  %v3061_v30 = vpack.c.bf16 %v4744_v56, %v9164_v62  ;;  %v2729_v6 = vadd.f32 %v8968_v9, %v2728_v41  ;;  %v2798_v23 = vadd.f32 %v8981_v47, %v2797_v19  ;;  %v11837_v61 = vld [vmem:[#allocation245_spill] sm:$0xff] }
 0x435   : > { %3433 = vmatprep.subr.bf16.mxu0 %v11786_v13  ;;  %v9214_v53 = vpop.eup %4747  ;;  %4767 = vpow2.f32 %v11789_v32  ;;  %v2867_v52 = vadd.f32 %v8987_v1, %v2866_v44  ;;  %v2666_v12 = vadd.f32 %v9164_v62, %v2665_v24  ;;  %v3062_v54 = vpack.c.bf16 %v9205_v14, %v9173_v31  ;;  %v11791_v13 = vld [vmem:[#allocation224_spill] sm:$0xff]  ;;  %v11793_v24 = vld [vmem:[#allocation226_spill] sm:$0xff] }
 0x436   : > { %v9220_v16 = vpop.eup %4749  ;;  %4769 = vpow2.f32 %v11790_v60  ;;  %v2730_v9 = vadd.f32 %v9006_v15, %v2729_v6  ;;  %v2799_v41 = vadd.f32 %v9017_v40, %v2798_v23  ;;  %v11792_v44 = vpack.c.bf16 %v11759_v2, %v11758_v4  ;;  %v11795_v32 = vld [vmem:[#allocation152_spill] sm:$0xff]  ;;  %v11796_v15 = vld [vmem:[#allocation99_spill] sm:$0xff]  ;;  %v11798_v4 = vld [vmem:[#allocation225_spill] sm:$0xff] }
 0x437   : > { %v9228_v42 = vpop.eup %4751  ;;  %4771 = vpow2.f32 %v11791_v13  ;;  %v2868_v19 = vadd.f32 %v9023_v7, %v2867_v52  ;;  %v2667_v22 = vadd.f32 %v4744_v56, %v2666_v12  ;;  %3400 = vmatprep.subr.bf16.mxu1 %v3062_v54  ;;  %v11794_v55 = vpack.c.bf16 %v11768_v11, %v11767_v21  ;;  %v11799_v21 = vld [vmem:[#allocation227_spill] sm:$0xff]  ;;  %v11800_v54 = vld [vmem:[#allocation148_spill] sm:$0xff] }
 0x438   : > { %3434 = vmatpush1.bf16.msra.mxu0 %v11792_v44  ;;  %v9237_v62 = vpop.eup %4753  ;;  %4773 = vpow2.f32 %v11793_v24  ;;  %v2996_v6 = vpack.c.bf16 %v11796_v15, %v11795_v32  ;;  %v2731_v2 = vadd.f32 %v9040_v0, %v2730_v9  ;;  %v2800_v60 = vadd.f32 %v9051_v46, %v2799_v41  ;;  %3401 = vmatpush1.bf16.msra.mxu1 %v3061_v30  ;;  %v11801_v13 = vld [vmem:[#allocation188_spill] sm:$0xff] }
 0x439   : > { %3435 = vmatprep.subr.bf16.mxu0 %v11794_v55  ;;  %v9247_v52 = vpop.eup %4755  ;;  %4775 = vpow2.f32 %v11798_v4  ;;  %v2869_v56 = vadd.f32 %v9057_v28, %v2868_v19  ;;  %v2668_v11 = vadd.f32 %v9228_v42, %v2667_v22  ;;  %v2995_v44 = vpack.c.bf16 %v11801_v13, %v11800_v54  ;;  %v11802_v32 = vld [vmem:[#allocation228_spill] sm:$0xff]  ;;  %v11804_v22 = vld [vmem:[#allocation230_spill] sm:$0xff]  ;;  %v11806_v54 = vld [vmem:[#allocation139_spill] sm:$0xff] }
 0x43a   : > { %11797 = vst [vmem:[#allocation57_spill] sm:$0xff] %v9247_v52  ;;  %v9253_v12 = vpop.eup %4757  ;;  %4777 = vpow2.f32 %v11799_v21  ;;  %v2732_v0 = vadd.f32 %v9074_v3, %v2731_v2  ;;  %v2801_v9 = vadd.f32 %v9085_v29, %v2800_v60  ;;  %v11803_v41 = vpack.c.bf16 %v11778_v35, %v11777_v36  ;;  %v11805_v21 = vld [vmem:[#allocation118_spill] sm:$0xff]  ;;  %v11807_v2 = vld [vmem:[#allocation229_spill] sm:$0xff] }
 0x43b   : > { %v4760_v55 = vpop.eup %4759  ;;  %4779 = vpow2.f32 %v11802_v32  ;;  %v2870_v30 = vadd.f32 %v9091_v59, %v2869_v56  ;;  %v3000_v13 = vpack.c.bf16 %v11806_v54, %v11805_v21  ;;  %v11808_v32 = vld [vmem:[#allocation232_spill] sm:$0xff] }
 0x43c   : > { %3436 = vmatpush1.bf16.msra.mxu0 %v11803_v41  ;;  %v9268_v19 = vpop.eup %4761  ;;  %4781 = vpow2.f32 %v11804_v22  ;;  %v2669_v15 = vadd.f32 %v4760_v55, %v2668_v11  ;;  %v3065_v4 = vpack.c.bf16 %v4760_v55, %v9228_v42  ;;  %v2733_v60 = vadd.f32 %v9108_v10, %v2732_v0  ;;  %v11809_v11 = vld [vmem:[#allocation114_spill] sm:$0xff]  ;;  %v11812_v54 = vld [vmem:[#allocation124_spill] sm:$0xff] }
 0x43d   : > { %3437 = vmatprep.subr.bf16.mxu0 %v2992_v27  ;;  %v9274_v3 = vpop.eup %4763  ;;  %4783 = vpow2.f32 %v11807_v2  ;;  %v2802_v36 = vadd.f32 %v9119_v39, %v2801_v9  ;;  %v2871_v35 = vadd.f32 %v9125_v25, %v2870_v30  ;;  %v3066_v27 = vpack.c.bf16 %v9268_v19, %v9237_v62  ;;  %v11810_v55 = vld [vmem:[#allocation134_spill] sm:$0xff] }
 0x43e   : > { %v9280_v56 = vpop.eup %4765  ;;  %4785 = vpow2.f32 %v11808_v32  ;;  %v2999_v41 = vpack.c.bf16 %v11810_v55, %v11809_v11  ;;  %v11811_v10 = vld [vmem:[#allocation234_spill] sm:$0xff]  ;;  %v2734_v0 = vadd.f32 %v9140_v49, %v2733_v60  ;;  %v11813_v11 = vld [vmem:[#allocation155_spill] sm:$0xff]  ;;  %v11814_v55 = vld [vmem:[#allocation169_spill] sm:$0xff] }
 0x43f   : > { %v9289_v22 = vpop.eup %4767  ;;  %4787 = vpow2.f32 %v11811_v10  ;;  %v2803_v9 = vadd.f32 %v9150_v57, %v2802_v36  ;;  %v2872_v30 = vadd.f32 %v9156_v37, %v2871_v35  ;;  %3402 = vmatprep.subr.bf16.mxu1 %v3066_v27  ;;  %v3004_v10 = vpack.c.bf16 %v11814_v55, %v11813_v11  ;;  %v11816_v49 = vld [vmem:[#allocation235_spill] sm:$0xff]  ;;  %v11818_v27 = vld [vmem:[#allocation150_spill] sm:$0xff] }
 0x440   : > { %3438 = vmatpush1.bf16.msra.mxu0 %v2991_v51  ;;  %v4770_v21 = vpop.eup %4769  ;;  %4789 = vpow2.f32 %v11812_v54  ;;  %v2670_v2 = vadd.f32 %v9289_v22, %v2669_v15  ;;  %v2735_v60 = vadd.f32 %v9173_v31, %v2734_v0  ;;  %3403 = vmatpush1.bf16.msra.mxu1 %v3065_v4  ;;  %v11819_v54 = vld [vmem:[#allocation165_spill] sm:$0xff]  ;;  %v11820_v31 = vld [vmem:[#allocation238_spill] sm:$0xff] }
 0x441   : > { %3439 = vmatprep.subr.bf16.mxu0 %v2996_v6  ;;  %v9301_v42 = vpop.eup %4771  ;;  %4791 = vpow2.f32 %v11816_v49  ;;  %v2804_v51 = vadd.f32 %v9184_v34, %v2803_v9  ;;  %v2873_v36 = vadd.f32 %v9190_v38, %v2872_v30  ;;  %v11817_v6 = vld [vmem:[#allocation236_spill] sm:$0xff]  ;;  %v3003_v11 = vpack.c.bf16 %v11819_v54, %v11818_v27  ;;  %v11822_v27 = vld [vmem:[#allocation183_spill] sm:$0xff] }
 0x442   : > { %11815 = vst [vmem:[#allocation61_spill] sm:$0xff] %v9301_v42  ;;  %v9307_v15 = vpop.eup %4773  ;;  %4793 = vpow2.f32 %v11817_v6  ;;  %v2736_v0 = vadd.f32 %v9205_v14, %v2735_v60  ;;  %v11821_v6 = vld [vmem:[#allocation237_spill] sm:$0xff]  ;;  %v11823_v54 = vld [vmem:[#allocation195_spill] sm:$0xff] }
 0x443   : > { %v4776_v49 = vpop.eup %4775  ;;  %4795 = vpow2.f32 %v11820_v31  ;;  %v2805_v4 = vadd.f32 %v9214_v53, %v2804_v51  ;;  %v2874_v9 = vadd.f32 %v9220_v16, %v2873_v36  ;;  %v3008_v55 = vpack.c.bf16 %v11823_v54, %v11822_v27  ;;  %v11824_v31 = vld [vmem:[#allocation239_spill] sm:$0xff]  ;;  %v11825_v36 = vld [vmem:[#allocation240_spill] sm:$0xff]  ;;  %v11828_v54 = vld [vmem:[#allocation242_spill] sm:$0xff] }
 0x444   : > { %3440 = vmatpush1.bf16.msra.mxu0 %v2995_v44  ;;  %v4778_v30 = vpop.eup %4777  ;;  %4797 = vpow2.f32 %v11821_v6  ;;  %v2671_v35 = vadd.f32 %v4776_v49, %v2670_v2  ;;  %v3069_v32 = vpack.c.bf16 %v4776_v49, %v9289_v22  ;;  %v2737_v14 = vadd.f32 %v9237_v62, %v2736_v0  ;;  %v11826_v22 = vld [vmem:[#allocation179_spill] sm:$0xff] }
 0x445   : > { %3441 = vmatprep.subr.bf16.mxu0 %v3000_v13  ;;  %v9324_v24 = vpop.eup %4779  ;;  %4799 = vpow2.f32 %v11824_v31  ;;  %v2806_v60 = vadd.f32 %v9247_v52, %v2805_v4  ;;  %v2875_v44 = vadd.f32 %v9253_v12, %v2874_v9  ;;  %v3070_v2 = vpack.c.bf16 %v4778_v30, %v4770_v21  ;;  %v11827_v13 = vld [vmem:[#allocation191_spill] sm:$0xff] }
 0x446   : > { %v9330_v51 = vpop.eup %4781  ;;  %4801 = vpow2.f32 %v11825_v36  ;;  %v3007_v49 = vpack.c.bf16 %v11827_v13, %v11826_v22  ;;  %v2738_v62 = vadd.f32 %v9268_v19, %v2737_v14  ;;  %v11829_v31 = vld [vmem:[#allocation243_spill] sm:$0xff]  ;;  %v11830_v13 = vld [vmem:[#allocation212_spill] sm:$0xff]  ;;  %v11836_v22 = vld [vmem:[#allocation233_spill] sm:$0xff] }
 0x447   : > { %v4784_v27 = vpop.eup %4783  ;;  %4803 = vpow2.f32 %v11828_v54  ;;  %v2807_v0 = vadd.f32 %v9274_v3, %v2806_v60  ;;  %v2876_v4 = vadd.f32 %v9280_v56, %v2875_v44  ;;  %3404 = vmatprep.subr.bf16.mxu1 %v3070_v2  ;;  %v11831_v6 = vld [vmem:[#allocation223_spill] sm:$0xff]  ;;  %v11832_v19 = vld [vmem:[#allocation244_spill] sm:$0xff]  ;;  %v11835_v2 = vld [vmem:[#allocation117_spill] sm:$0xff] }
 0x448   : > { %3442 = vmatpush1.bf16.msra.mxu0 %v2999_v41  ;;  %v4786_v9 = vpop.eup %4785  ;;  %4805 = vpow2.f32 %v11829_v31  ;;  %v2672_v36 = vadd.f32 %v4784_v27, %v2671_v35  ;;  %v3012_v23 = vpack.c.bf16 %v11831_v6, %v11830_v13  ;;  %v2739_v14 = vadd.f32 %v4770_v21, %v2738_v62  ;;  %3405 = vmatpush1.bf16.msra.mxu1 %v3069_v32  ;;  %v11833_v35 = vld [vmem:[#allocation246_spill] sm:$0xff]  ;;  %v11838_v13 = vld [vmem:[#allocation231_spill] sm:$0xff] }
 0x449   : > { %3443 = vmatprep.subr.bf16.mxu0 %v3004_v10  ;;  %v9346_v54 = vpop.eup %4787  ;;  %4807 = vpow2.f32 %v11832_v19  ;;  %v2808_v60 = vadd.f32 %v9301_v42, %v2807_v0  ;;  %v2877_v41 = vadd.f32 %v9307_v15, %v2876_v4  ;;  %v11834_v10 = vld [vmem:[#allocation205_spill] sm:$0xff]  ;;  %v3016_v6 = vpack.c.bf16 %v11837_v61, %v11836_v22  ;;  %v11840_v21 = vld [vmem:[#allocation247_spill] sm:$0xff] }
 0x44a   : > { %v9351_v44 = vpop.eup %4789  ;;  %4809 = vpow2.f32 %v11833_v35  ;;  %v3011_v31 = vpack.c.bf16 %v11835_v2, %v11834_v10  ;;  %v3015_v52 = vpack.c.bf16 %v11839_v58, %v11838_v13  ;;  %v2740_v62 = vadd.f32 %v4778_v30, %v2739_v14  ;;  %v11841_v35 = vld [vmem:[#allocation248_spill] sm:$0xff] }
 0x44b   : > { %v4792_v19 = vpop.eup %4791  ;;  %4811 = vpow2.f32 %v11840_v21  ;;  %v2809_v0 = vadd.f32 %v9324_v24, %v2808_v60  ;;  %v2878_v32 = vadd.f32 %v9330_v51, %v2877_v41 }
 0x44c   : > { %3444 = vmatpush1.bf16.msra.mxu0 %v3003_v11  ;;  %v4794_v4 = vpop.eup %4793  ;;  %4813 = vpow2.f32 %v11841_v35  ;;  %v2673_v42 = vadd.f32 %v4792_v19, %v2672_v36  ;;  %v3073_v10 = vpack.c.bf16 %v4792_v19, %v4784_v27  ;;  %v2741_v61 = vadd.f32 %v4786_v9, %v2740_v62 }
 0x44d   : > { %3445 = vmatprep.subr.bf16.mxu0 %v3008_v55  ;;  %v9364_v2 = vpop.eup %4795  ;;  %v2810_v58 = vadd.f32 %v9346_v54, %v2809_v0  ;;  %v2879_v22 = vadd.f32 %v9351_v44, %v2878_v32  ;;  %v3074_v13 = vpack.c.bf16 %v4794_v4, %v4786_v9 }
 0x44e   : > { %v9368_v30 = vpop.eup %4797  ;;  %v2742_v60 = vadd.f32 %v4794_v4, %v2741_v61 }
 0x44f   : > { %v4800_v11 = vpop.eup %4799  ;;  %v2811_v41 = vadd.f32 %v9364_v2, %v2810_v58  ;;  %v2880_v27 = vadd.f32 %v9368_v30, %v2879_v22  ;;  %3406 = vmatprep.subr.bf16.mxu1 %v3074_v13  ;;  %v11844_v22 = vld [vmem:[#allocation280_spill] sm:$0xff]  ;;  %v11845_v13 = vld [vmem:[#allocation277_spill] sm:$0xff] }
 0x450   : > { %3446 = vmatpush1.bf16.msra.mxu0 %v3007_v49  ;;  %v4802_v55 = vpop.eup %4801  ;;  %v2674_v36 = vadd.f32 %v4800_v11, %v2673_v42  ;;  %3407 = vmatpush1.bf16.msra.mxu1 %v3073_v10 }
 0x451   : > { %3447 = vmatprep.subr.bf16.mxu0 %v3012_v23  ;;  %v9376_v19 = vpop.eup %4803  ;;  %v2743_v21 = vadd.f32 %v4802_v55, %v2742_v60  ;;  %v1819_v60 = vsub.f32 %v11845_v13, %v11844_v22 }
 0x452   : > { %11842 = vst [vmem:[#allocation168_spill] sm:$0xff] %v9376_v19  ;;  %v9378_v62 = vpop.eup %4805  ;;  %v2812_v0 = vadd.f32 %v9376_v19, %v2811_v41 }
 0x453   : > { %v4808_v32 = vpop.eup %4807  ;;  %v2881_v4 = vadd.f32 %v9378_v62, %v2880_v27  ;;  %v1820_v13 = vmul.f32 1.442695, %v1819_v60  ;;  %v11855_v60 = vld [vmem:[#allocation256_spill] sm:$0xff] }
 0x454   : > { %3448 = vmatpush1.bf16.msra.mxu0 %v3011_v31  ;;  %v4810_v35 = vpop.eup %4809  ;;  %v2675_v49 = vadd.f32 %v4808_v32, %v2674_v36  ;;  %v3077_v61 = vpack.c.bf16 %v4808_v32, %v4800_v11 }
 0x455   : > { %3449 = vmatprep.subr.bf16.mxu0 %v3016_v6  ;;  %v9382_v42 = vpop.eup %4811  ;;  %v2744_v23 = vadd.f32 %v4810_v35, %v2743_v21  ;;  %v3078_v10 = vpack.c.bf16 %v4810_v35, %v4802_v55  ;;  %v9394_v21 = vpop.trf.xlu1  ;;  %4815 = vpow2.f32 %v1820_v13  ;;  %v11863_v13 = vld [vmem:[#allocation266_spill] sm:$0xff] }
 0x456   : > { %11843 = vst [vmem:[#allocation172_spill] sm:$0xff] %v9382_v42  ;;  %v9384_v58 = vpop.eup %4813  ;;  %v2676_v14 = vrot.slane %v2675_v49, 4  ;;  %v2813_v41 = vadd.f32 %v9382_v42, %v2812_v0  ;;  %11846 = vst [vmem:[#allocation82_spill] sm:$0xff] %v9394_v21  ;;  %v11847_v0 = vld [vmem:[#allocation38_spill] sm:$0xff] }
 0x457   : > { %v2745_v31 = vrot.slane %v2744_v23, 4  ;;  %v2882_v36 = vadd.f32 %v9384_v58, %v2881_v4  ;;  %3408 = vmatprep.subr.bf16.mxu1 %v3078_v10  ;;  %v11848_v22 = vpack.c.bf16 %v11597_v5, %v11847_v0  ;;  %v11849_v4 = vld [vmem:[#allocation78_spill] sm:$0xff]  ;;  %v11854_v0 = vld [vmem:[#allocation260_spill] sm:$0xff] }
 0x458   : > { %3450 = vmatpush1.bf16.msra.mxu0 %v3015_v52  ;;  %v2677_v11 = vadd.f32 %v2676_v14, %v2675_v49  ;;  %v2814_v55 = vrot.slane %v2813_v41, 4  ;;  %3409 = vmatpush1.bf16.msra.mxu1 %v3077_v61  ;;  %v11850_v49 = vld [vmem:[#allocation254_spill] sm:$0xff] }
 0x459   : > { %v2746_v32 = vadd.f32 %v2745_v31, %v2744_v23  ;;  %v2883_v35 = vrot.slane %v2882_v36, 4  ;;  %3460 = vmatprep.subr.bf16.mxu1 %v11848_v22  ;;  %v11851_v61 = vld [vmem:[#allocation34_spill] sm:$0xff]  ;;  %v11853_v23 = vld [vmem:[#allocation272_spill] sm:$0xff]  ;;  %v11856_v22 = vpack.c.bf16 %v11854_v0, %v11855_v60 }
 0x45a   : > { %v2678_v27 = vrot.slane %v2677_v11, 2  ;;  %v2815_v9 = vadd.f32 %v2814_v55, %v2813_v41  ;;  %v11852_v6 = vpack.c.bf16 %v11850_v49, %v11851_v61  ;;  %v11860_v61 = vld [vmem:[#allocation50_spill] sm:$0xff] }
 0x45b   : > { %3452 = vmatmul.mubr.bf16.vlgmr.msra.gmra.mrb[132].mxu0 %v11849_v4  ;;  %v2747_v10 = vrot.slane %v2746_v32, 2  ;;  %v2884_v19 = vadd.f32 %v2883_v35, %v2882_v36  ;;  %3411 = vmatmul.mubr.bf16.vlgmr.msra.gmra.mrb[128].mxu1 %v9394_v21  ;;  %v11858_v21 = vld [vmem:[#allocation132_spill] sm:$0xff] }
 0x45c   : > { %v2679_v52 = vadd.f32 %v2678_v27, %v2677_v11  ;;  %v2816_v14 = vrot.slane %v2815_v9, 2  ;;  %3461 = vmatpush1.bf16.msra.mxu1 %v11852_v6  ;;  %3492 = vmatprep.mubr.bf16.mxu1 %v11853_v23  ;;  %v11857_v11 = vld [vmem:[#allocation259_spill] sm:$0xff] }
 0x45d   : > { %v2748_v31 = vadd.f32 %v2747_v10, %v2746_v32  ;;  %v2885_v5 = vrot.slane %v2884_v19, 2  ;;  %3462 = vmatprep.subr.bf16.mxu1 %v11856_v22  ;;  %v11859_v42 = vpack.c.bf16 %v11857_v11, %v11858_v21  ;;  %v11861_v32 = vld [vmem:[#allocation263_spill] sm:$0xff]  ;;  %v11864_v22 = vld [vmem:[#allocation261_spill] sm:$0xff] }
 0x45e   : > { %v2680_v41 = vrot.slane %v2679_v52, 1  ;;  %v2817_v55 = vadd.f32 %v2816_v14, %v2815_v9  ;;  %v11862_v10 = vpack.c.bf16 %v11860_v61, %v11861_v32  ;;  %v11865_v9 = vpack.c.bf16 %v11863_v13, %v11864_v22  ;;  %v11870_v11 = vld [vmem:[#allocation269_spill] sm:$0xff] }
 0x45f   : > { %v2749_v36 = vrot.slane %v2748_v31, 1  ;;  %v2886_v35 = vadd.f32 %v2885_v5, %v2884_v19  ;;  %v11867_v5 = vld [vmem:[#allocation54_spill] sm:$0xff]  ;;  %v11879_v13 = vpack.c.bf16 %v8815_v48, %v8781_v26  ;;  %v11886_v48 = vpack.c.bf16 %v11761_v17, %v11760_v8 }
 0x460   : > { %v2681_v4 = vadd.f32 %v2680_v41, %v2679_v52  ;;  %v2818_v27 = vrot.slane %v2817_v55, 1  ;;  %3463 = vmatpush1.bf16.msra.mxu1 %v11859_v42  ;;  %v11866_v52 = vld [vmem:[#allocation276_spill] sm:$0xff]  ;;  %v11889_v26 = vpack.c.bf16 %v9091_v59, %v9057_v28  ;;  %v11891_v17 = vpack.c.bf16 %v9156_v37, %v9125_v25  ;;  %v11907_v25 = vld [vmem:[#allocation82_spill] sm:$0xff] }
 0x461   : > { %v2750_v6 = vadd.f32 %v2749_v36, %v2748_v31  ;;  %v2887_v49 = vrot.slane %v2886_v35, 1  ;;  %3464 = vmatprep.subr.bf16.mxu1 %v11862_v10  ;;  %v11868_v41 = vld [vmem:[#allocation268_spill] sm:$0xff]  ;;  %v9422_v31 = vpop.eup %4815  ;;  %v2611_v36 = vld [vmem:[#allocation3] sm:$0xf]  ;;  %v11876_v10 = vld [vmem:[#allocation58_spill] sm:$0xff]  ;;  %v11901_v28 = vpack.c.bf16 %v9368_v30, %v9351_v44 }
 0x462   : > { %v2819_v23 = vadd.f32 %v2818_v27, %v2817_v55  ;;  %v11869_v21 = vpack.c.bf16 %v11867_v5, %v11868_v41  ;;  %v11871_v55 = vld [vmem:[#allocation267_spill] sm:$0xff]  ;;  %v11873_v27 = vld [vmem:[#allocation144_spill] sm:$0xff]  ;;  %v2612_v61 = vmul.f32 %v9422_v31, %v2611_v36  ;;  %v11885_v5 = vpack.c.bf16 %v8951_v63, %v11754_v20 }
 0x463   : > { %v2888_v0 = vadd.f32 %v2887_v49, %v2886_v35  ;;  %v2893_v60 = vcombine.low %v2681_v4, %v2750_v6  ;;  %v11872_v35 = vpack.c.bf16 %v11870_v11, %v11871_v55  ;;  %v11874_v6 = vld [vmem:[#allocation273_spill] sm:$0xff]  ;;  %v11890_v20 = vpack.c.bf16 %v9085_v29, %v9051_v46  ;;  %v11904_v59 = vld [vmem:[#allocation172_spill] sm:$0xff] }
 0x464   : > { %3465 = vmatpush1.bf16.msra.mxu1 %v11865_v9  ;;  %v11875_v49 = vpack.c.bf16 %v11873_v27, %v11874_v6  ;;  %v11881_v9 = vpack.c.bf16 %v11724_v18, %v11723_v50  ;;  %v11887_v50 = vpack.c.bf16 %v9023_v7, %v8987_v1  ;;  %v11893_v63 = vpack.c.bf16 %v9220_v16, %v9190_v38  ;;  %v11896_v1 = vld [vmem:[#allocation57_spill] sm:$0xff]  ;;  %v2926_v6 = vld [vmem:[#allocation4 + $0x10] sm:$0xff] }
 0x465   : > { %v2894_v19 = vcombine.low %v2819_v23, %v2888_v0  ;;  %v2901_v14 = vrot.slane %v2893_v60, %v11866_v52  ;;  %3466 = vmatprep.subr.bf16.mxu1 %v11869_v21  ;;  %v11877_v23 = vld [vmem:[#allocation274_spill] sm:$0xff]  ;;  %v11895_v46 = vpack.c.bf16 %v9280_v56, %v9253_v12  ;;  %v11899_v7 = vld [vmem:[#allocation61_spill] sm:$0xff]  ;;  %v11903_v29 = vpack.c.bf16 %v9384_v58, %v9378_v62 }
 0x466   : > { %v11878_v0 = vpack.c.bf16 %v11876_v10, %v11877_v23  ;;  %v11900_v18 = vpack.c.bf16 %v9324_v24, %v11899_v7  ;;  %v11908_v16 = vld [vmem:[#allocation281_spill] sm:$0xff]  ;;  %v2924_v24 = vld [vmem:[#allocation4] sm:$0xff] }
 0x467   : > { %v2908_v42 = vrot.slane %v2894_v19, %v11866_v52  ;;  %v11882_v19 = vpack.c.bf16 %v8883_v33, %v11731_v45  ;;  %v11888_v45 = vpack.c.bf16 %v9017_v40, %v8981_v47  ;;  %v11892_v33 = vpack.c.bf16 %v9150_v57, %v9119_v39  ;;  %v11915_v7 = vld [vmem:[#allocation278_spill] sm:$0xff] (!%p4052_p2) }
 0x468   : > { %3467 = vmatpush1.bf16.msra.mxu1 %v11872_v35  ;;  %v11894_v47 = vpack.c.bf16 %v9214_v53, %v9184_v34  ;;  %v11897_v40 = vpack.c.bf16 %v9274_v3, %v11896_v1  ;;  %v11898_v39 = vpack.c.bf16 %v9330_v51, %v9307_v15  ;;  %v11905_v34 = vld [vmem:[#allocation168_spill] sm:$0xff]  ;;  %v2932_v12 = vrot.slane %v9422_v31, %v11908_v16  ;;  %v11909_v3 = vld [vmem:[#allocation282_spill] sm:$0xff]  ;;  %v2925_v15 = vld [vmem:[#allocation4 + $0x8] sm:$0xff] }
 0x469   : > { %v2909_v4 = vcombine.low %v2901_v14, %v2908_v42  ;;  %3468 = vmatprep.subr.bf16.mxu1 %v11875_v49  ;;  %v11906_v8 = vpack.c.bf16 %v11904_v59, %v11905_v34  ;;  %v2936_v56 = vrot.slane %v9422_v31, %v11909_v3  ;;  %v11911_v49 = vld [vmem:[#allocation279_spill] sm:$0xff] }
 0x46b   : > { %v2916_v32 = vrot.slane %v2909_v4, %v11866_v52  ;;  %v11883_v52 = vld [vmem:[#allocation66_spill] sm:$0xff]  ;;  %v2950_v41 = vmul.f32 %v2936_v56, %v2925_v15 }
 0x46c   : > { %3469 = vmatpush1.bf16.msra.mxu1 %v11878_v0  ;;  %v11884_v14 = vpack.c.bf16 %v11745_v43, %v11883_v52  ;;  %v11902_v43 = vpack.c.bf16 %v9364_v2, %v9346_v54  ;;  %v2949_v2 = vmul.f32 %v2932_v12, %v2924_v24  ;;  %v11910_v4 = vld [vmem:[#allocation278_spill] sm:$0xff] }
 0x46d   : > { %v2918_v60 = vadd.f32 %v2916_v32, %v2612_v61  ;;  %3470 = vmatprep.subr.bf16.mxu1 %v11879_v13  ;;  %v2940_v27 = vrot.slane %v9422_v31, %v11910_v4  ;;  %v2944_v61 = vrot.slane %v9422_v31, %v11911_v49  ;;  %v2927_v32 = vld [vmem:[#allocation4 + $0x18] sm:$0xff]  ;;  %v3551_v31 = vld [vmem:[#allocation13] sm:$0xff] (!%p4052_p2) }
 0x46f   : > { %2923 = vst.msk [vmem:[#allocation3] sm:$0xf] %vm8172_vm3, %v2918_v60  ;;  %v2951_v23 = vmul.f32 %v2940_v27, %v2926_v6  ;;  %v2952_v13 = vmul.f32 %v2944_v61, %v2927_v32 }
 0x470   : > { %3471 = vmatpush1.bf16.msra.mxu1 %v11881_v9 }
 0x471   : > { %3472 = vmatprep.subr.bf16.mxu1 %v11882_v19 }
 0x474   : > { %3473 = vmatpush1.bf16.msra.mxu1 %v11884_v14 }
 0x475   : > { %3474 = vmatprep.subr.bf16.mxu1 %v11885_v5 }
 0x476   : > { %v3518_v5 = vld [vmem:[#allocation3] sm:$0xf] (!%p4052_p2) }
 0x477   : > { %4819 = vrcp.f32 (!%p4052_p2), %v3518_v5 }
 0x478   : > { %3475 = vmatpush1.bf16.msra.mxu1 %v11886_v48  ;;  %v5128_v48 = vmov (!%p4052_p2), 0  }
 0x479   : > { %3476 = vmatprep.subr.bf16.mxu1 %v11887_v50  ;;  %3615 = vmatprep.mubr.bf16.mxu0 (!%p4052_p2), %v5128_v48  ;;  %v3552_v50 = vld [vmem:[#allocation13 + $0x8] sm:$0xff] (!%p4052_p2) }
 0x47a   : > { %4817 = vset.pattern.permute.xlu0 (!%p4052_p2), %v5128_v48 }
 0x47b   : > { %3555 = vperm.xlu0 (!%p4052_p2), %4817, %v3551_v31  }
 0x47c   : > { %3477 = vmatpush1.bf16.msra.mxu1 %v11888_v45 }
 0x47d   : > { %3478 = vmatprep.subr.bf16.mxu1 %v11889_v26 }
 0x47f   : > { %3560 = vperm.xlu0 (!%p4052_p2), %4817, %v3552_v50  }
 0x480   : > { %3479 = vmatpush1.bf16.msra.mxu1 %v11890_v20 }
 0x481   : > { %3480 = vmatprep.subr.bf16.mxu1 %v11891_v17  ;;  %v4820_v26 = vpop.eup (!%p4052_p2), %4819 }
 0x484   : > { %3481 = vmatpush1.bf16.msra.mxu1 %v11892_v33 }
 0x485   : > { %3482 = vmatprep.subr.bf16.mxu1 %v11893_v63  ;;  %v11912_v63 = vld [vmem:[#allocation282_spill] sm:$0xff] (!%p4052_p2) }
 0x488   : > { %3483 = vmatpush1.bf16.msra.mxu1 %v11894_v47  ;;  %v3528_v47 = vrot.slane (!%p4052_p2), %v4820_v26, %v11912_v63 }
 0x489   : > { %3484 = vmatprep.subr.bf16.mxu1 %v11895_v46  ;;  %v11913_v46 = vld [vmem:[#allocation279_spill] sm:$0xff] (!%p4052_p2) }
 0x48a   : > { %v3536_v1 = vrot.slane (!%p4052_p2), %v4820_v26, %v11913_v46 }
 0x48c   : > { %3485 = vmatpush1.bf16.msra.mxu1 %v11897_v40  ;;  %v11914_v40 = vld [vmem:[#allocation281_spill] sm:$0xff] (!%p4052_p2) }
 0x48d   : > { %3486 = vmatprep.subr.bf16.mxu1 %v11898_v39  ;;  %v3524_v39 = vrot.slane (!%p4052_p2), %v4820_v26, %v11914_v40 }
 0x490   : > { %3487 = vmatpush1.bf16.msra.mxu1 %v11900_v18  ;;  %v3532_v18 = vrot.slane (!%p4052_p2), %v4820_v26, %v11915_v7 }
 0x491   : > { %3488 = vmatprep.subr.bf16.mxu1 %v11901_v28 }
 0x494   : > { %3489 = vmatpush1.bf16.msra.mxu1 %v11902_v43 }
 0x495   : > { %3490 = vmatprep.subr.bf16.mxu1 %v11903_v29 }
 0x498   : > { %3491 = vmatpush1.bf16.msra.mxu1 %v11906_v8 }
 0x49b   : > { %3493 = vmatmul.mubr.bf16.vlgmr.msra.gmra.mrb[132].mxu1 %v11907_v25 }
 0x49c   : > { %3658 = vmatprep.mubr.bf16.mxu1 (!%p4052_p2), %v5128_v48 }
 0x4eb   : > { %v3371_v57 = vpop.f32.mrb[128].mxu0 }
 0x4ec   : > { %v3373_v37 = vpop.f32.mrb[129].mxu0 }
 0x4ed   : > { %v3375_v38 = vpop.f32.mrb[130].mxu0 }
 0x4ee   : > { %v3376_v53 = vpop.f32.mrb[131].mxu0 }
 0x4ef   : > { %v4818_v53 = vld [vmem:[#allocation11] sm:$0xff] (!%p4052_p2)  }
 0x4fa   : > { %v3556_v16 = vpop.permute.xlu0 (!%p4052_p2), %3555 }
 0x4fe   : > { %v3561_v12 = vpop.permute.xlu0 (!%p4052_p2), %3560 }
 0x52e   : > { %v3453_v51 = vpop.f32.mrb[132].mxu0  ;;  %v3412_v54 = vpop.f32.mrb[128].mxu1 }
 0x52f   : > { %v3455_v44 = vpop.f32.mrb[133].mxu0  ;;  %v3413_v30 = vadd.f32 %v3412_v54, %v3371_v57  ;;  %v3414_v62 = vpop.f32.mrb[129].mxu1 }
 0x530   : > { %v3457_v58 = vpop.f32.mrb[134].mxu0  ;;  %v3415_v21 = vadd.f32 %v3414_v62, %v3373_v37  ;;  %v3416_v42 = vpop.f32.mrb[130].mxu1 }
 0x531   : > { %v3458_v36 = vpop.f32.mrb[135].mxu0  ;;  %v3501_v11 = vadd.f32 %v3413_v30, %v2949_v2  ;;  %v3417_v55 = vpop.f32.mrb[131].mxu1 }
 0x532   : > { %v3502_v35 = vadd.f32 %v3415_v21, %v2950_v41 }
 0x533   : > { %3505 = vst [vmem:[#allocation4] sm:$0xff] %v3501_v11 }
 0x534   : > { %3506 = vst [vmem:[#allocation4 + $0x8] sm:$0xff] %v3502_v35 }
 0x53a   : > { %v3514_v17 = vld [vmem:[#allocation4] sm:$0xff] (!%p4052_p2) }
 0x53b   : > { %v3515_v45 = vld [vmem:[#allocation4 + $0x8] sm:$0xff] (!%p4052_p2)  ;;  %v3541_v29 = vmul.f32 (!%p4052_p2), %v3524_v39, %v3514_v17 }
 0x53c   : > { %v3542_v28 = vmul.f32 (!%p4052_p2), %v3528_v47, %v3515_v45 }
 0x53d   : > { %v3547_v25 = vpack.c.bf16 (!%p4052_p2), %v3541_v29, %v3541_v29 }
 0x53e   : > { %v3548_v34 = vpack.c.bf16 (!%p4052_p2), %v3542_v28, %v3542_v28 }
 0x53f   : > { %v3572_v37 = vsel (!%p4052_p2), %vm793_vm1, %v3547_v25, 0 }
 0x540   : > { %4054 = vmatprep.subr.msk.bf16.mxu0 (!%p4052_p2), %vm793_vm1, %v3548_v34 }
 0x541   : > { %3584 = vmatpush1.bf16.msra.mxu0 (!%p4052_p2), %v3572_v37 }
 0x544   : > { %4055 = vmatmul.mubr.msk.bf16.vlgmr.msra.gmra.mrb[0].mxu0 (!%p4052_p2), %vm696_vm2, %v4818_v53 }
 0x56e   : > { %v3494_v10 = vpop.f32.mrb[132].mxu1  ;;  %3513 = sbr.rel (%p4052_p2) target bundleno = 1636 (0x664), region = 68 }
 0x56f   : > { %v3495_v0 = vadd.f32 %v3494_v10, %v3453_v51  ;;  %v3496_v60 = vpop.f32.mrb[133].mxu1 }
 0x570   : > { %v3497_v22 = vadd.f32 %v3496_v60, %v3455_v44  ;;  %v3498_v9 = vpop.f32.mrb[134].mxu1 }
 0x571   : > { %v3503_v19 = vadd.f32 %v3495_v0, %v2951_v23  ;;  %v3499_v52 = vpop.f32.mrb[135].mxu1 }
 0x572   : > { %v3504_v14 = vadd.f32 %v3497_v22, %v2952_v13 }
 0x573   : > { %3507 = vst [vmem:[#allocation4 + $0x10] sm:$0xff] %v3503_v19 }
 0x574   : > { %3508 = vst [vmem:[#allocation4 + $0x18] sm:$0xff] %v3504_v14 }
 0x57a   : > { %v3516_v33 = vld [vmem:[#allocation4 + $0x10] sm:$0xff] }
 0x57b   : > { %v3517_v20 = vld [vmem:[#allocation4 + $0x18] sm:$0xff]  ;;  %v3543_v59 = vmul.f32 %v3532_v18, %v3516_v33 }
 0x57c   : > { %v3544_v43 = vmul.f32 %v3536_v1, %v3517_v20 }
 0x57d   : > { %v3549_v57 = vpack.c.bf16 %v3543_v59, %v3543_v59 }
 0x57e   : > { %v3550_v8 = vpack.c.bf16 %v3544_v43, %v3544_v43 }
 0x57f   : > { %v3578_v38 = vsel %vm793_vm1, %v3549_v57, 0 }
 0x580   : > { %4056 = vmatprep.subr.msk.bf16.mxu1 %vm793_vm1, %v3550_v8 }
 0x581   : > { %3627 = vmatpush1.bf16.msra.mxu1 %v3578_v38 }
 0x584   : > { %4057 = vmatmul.mubr.msk.bf16.vlgmr.msra.gmra.mrb[0].mxu1 %vm696_vm2, %v4818_v53 }
 0x617   : > { %v3617_v24 = vpop.f32.mrb[0].mxu0 }
 0x618   : > { %v3618_v56 = vadd.f32 %v3617_v24, %v3556_v16  ;;  %v3619_v51 = vpop.f32.mrb[1].mxu0 }
 0x619   : > { %v3620_v44 = vadd.f32 %v3619_v51, %v3556_v16  ;;  %v3621_v30 = vpop.f32.mrb[2].mxu0 }
 0x61a   : > { %v3669_v58 = vmax.f32 %v3618_v56, 0.0  ;;  %v3622_v21 = vadd.f32 %v3621_v30, %v3561_v12  ;;  %v3623_v36 = vpop.f32.mrb[3].mxu0 }
 0x61b   : > { %v3670_v55 = vmax.f32 %v3620_v44, 0.0  ;;  %v3624_v4 = vadd.f32 %v3623_v36, %v3561_v12 }
 0x61c   : > { %v3677_v6 = vmin.f32 %v3669_v58, 6.0  ;;  %v3673_v61 = vmax.f32 %v3622_v21, 0.0 }
 0x61d   : > { %v3678_v10 = vmin.f32 %v3670_v55, 6.0  ;;  %v3674_v0 = vmax.f32 %v3624_v4, 0.0 }
 0x61e   : > { %v3681_v13 = vmin.f32 %v3673_v61, 6.0 }
 0x61f   : > { %v4070_v9 = vpack.c.bf16 %v3678_v10, %v3677_v6  ;;  %v3682_v52 = vmin.f32 %v3674_v0, 6.0 }
 0x621   : > { %3709 = vst [vmem:[%s5520_s16] sm:$0xff] %v4070_v9  ;;  %v4072_v5 = vpack.c.bf16 %v3682_v52, %v3681_v13 }
 0x623   : > { %3711 = vst [vmem:[%s5520_s16 + $0x10] sm:$0xff] %v4072_v5 }
 0x657   : > { %v3660_v3 = vpop.f32.mrb[0].mxu1 }
 0x658   : > { %v3661_v15 = vadd.f32 %v3660_v3, %v3556_v16  ;;  %v3662_v54 = vpop.f32.mrb[1].mxu1 }
 0x659   : > { %v3663_v2 = vadd.f32 %v3662_v54, %v3556_v16  ;;  %v3664_v62 = vpop.f32.mrb[2].mxu1 }
 0x65a   : > { %v3671_v41 = vmax.f32 %v3661_v15, 0.0  ;;  %v3665_v42 = vadd.f32 %v3664_v62, %v3561_v12  ;;  %v3666_v11 = vpop.f32.mrb[3].mxu1 }
 0x65b   : > { %v3672_v35 = vmax.f32 %v3663_v2, 0.0  ;;  %v3667_v27 = vadd.f32 %v3666_v11, %v3561_v12 }
 0x65c   : > { %v3679_v49 = vmin.f32 %v3671_v41, 6.0  ;;  %v3675_v32 = vmax.f32 %v3665_v42, 0.0 }
 0x65d   : > { %v3680_v23 = vmin.f32 %v3672_v35, 6.0  ;;  %v3676_v60 = vmax.f32 %v3667_v27, 0.0 }
 0x65e   : > { %v3683_v22 = vmin.f32 %v3675_v32, 6.0 }
 0x65f   : > { %v4071_v19 = vpack.c.bf16 %v3680_v23, %v3679_v49  ;;  %v3684_v14 = vmin.f32 %v3676_v60, 6.0 }
 0x661   : > { %3710 = vst [vmem:[%s5520_s16 + $0x8] sm:$0xff] %v4071_v19  ;;  %v4073_v48 = vpack.c.bf16 %v3684_v14, %v3683_v22 }
 0x663   : > { %3712 = vst [vmem:[%s5520_s16 + $0x18] sm:$0xff] %v4073_v48 }
 0x664 PF: > { %s11916_s7 = sld [smem:[#allocation22_spill]]  ;;  %s11917_s26 = sld [smem:[#allocation23_spill]] }
 0x665   : > { %s3729_s17 = sshll.u32 %s5520_s16, 4  ;;  %s11918_s21 = sld [smem:[#allocation287_spill]]  ;;  %s9530_s17 = int_to_ptr.vmem [resolvable:$true] %s3729_s17 }
 0x666   : > { %s3714_s9 = scalar_lea.sflag [#allocation7], %s5497_s3  ;;  %s4967_s27 = scalar_lea.vmem %s9530_s17, 512 }
 0x667   : > { %p4968_p10 = scmp.ne.s32.totalorder %s9530_s17, %s4967_s27  ;;  %p11920_p3 = scmp.ne.s32.totalorder %s10330_s15, 0 }
 0x668   : > { %s5129_s24 = smov [#allocation14]  }
 0x669   : > { %p4969_p7 = pnand %p4968_p10, %p11920_p3  ;;  %s4971_s16 = sshll.u32 %s5129_s24, 4  ;;  %s4972_s16 = int_to_ptr.vmem [resolvable:$false] %s4971_s16 }
 0x66a   : > { %s4063_s0 = sshll.u32 %s11916_s7, 2  ;;  %s4064_s1 = sshll.u32 %s11917_s26, 4 }
 0x66b   : > { %s3726_s12 = sadd.s32 %s4064_s1, %s4063_s0  ;;  %s11919_s11 = smov %s11918_s21 }
 0x66c   : > { %s4065_s13 = sshll.u32 %s3726_s12, 6  ;;  %p4970_p4 = pneg %p4969_p7 }
 0x66d   : > { %s9535_s28 = scalar_lea.hbm %s11918_s21, %s4065_s13  ;;  %s4973_s5 = scalar_lea.vmem %s4972_s16, 1024 }
 0x66e   : > { %p4974_p9 = scmp.lt.s32.totalorder %s9530_s17, %s4972_s16  ;;  %p4975_p13 = scmp.lt.s32.totalorder %s4973_s5, %s4967_s27 }
 0x670   : > { %p4976_p6 = por %p4975_p13, %p4974_p9 }
 0x672   : > { %p4977_p0 = pnand %p4976_p6, %p4970_p4 }
 0x674   : > { %4980 = shalt.err (!%p4977_p0)
}
 0x675   : > { %s4981_s25 = scalar_lea.hbm %s9535_s28, 512  ;;  %s4985_s26 = scalar_lea.hbm %s11919_s11, 2048 }
 0x676   : > { %p4982_p12 = scmp.ne.s32.totalorder %s9535_s28, %s4981_s25  ;;  %p4986_p11 = scmp.lt.u32.totalorder %s9535_s28, %s11919_s11 }
 0x677   : > { %p4987_p8 = scmp.lt.u32.totalorder %s4985_s26, %s4981_s25  ;;  %p4989_p10 = scmp.lt.u32.totalorder %s4981_s25, %s9535_s28 }
 0x678   : > { %p4983_p5 = pnand %p4982_p12, %p11920_p3 }
 0x679   : > { %p4988_p2 = por %p4987_p8, %p4986_p11 }
 0x67a   : > { %p4984_p1 = pneg %p4983_p5 }
 0x67b   : > { %p4990_p7 = por %p4989_p10, %p4988_p2 }
 0x67d   : > { %p4991_p4 = pnand %p4990_p7, %p4984_p1 }
 0x67f   : > { %4994 = shalt.err (!%p4991_p4)
}
 0x680   : > { %s5130_s12 = smov 256   ;;  %s5131_s13 = smov 512  }
 0x681   : > { %s5132_s14 = smov 16  }
 0x682   : > { %4088 = dma.vmem_to_hbm [thread:$0]  (%p11920_p3), %s9530_s17, 512, %s9535_s28, %s3714_s9, %s5130_s12, %s5131_s13, %s5132_s14  }
 0x683 PF: > { %s11921_s8 = sld [smem:[#allocation20_spill]]  ;;  %p4116_p9 = scmp.ge.s32.totalorder %s5113_s30, 2 }
 0x684   : > { %p11922_p13 = scmp.ne.s32.totalorder %s10332_s19, 0 }
 0x686   : > { %p4108_p6 = pnand %p4116_p9, %p11922_p13 }
 0x689   : > { %s3744_s21 = sand.u32 1, %s11921_s8  }
 0x68a   : > { %s3745_s27 = scalar_lea.sflag [#allocation7], %s3744_s21 }
 0x68b   : > { %5060 = dma.done.wait (!%p4108_p6), %s3745_s27, 512  }
 0x68c   : > { %5062 = vsyncadd (!%p4108_p6), %s3745_s27, 4294966784  ;;  %s25_s30 = sadd.s32 1, %s5113_s30   ;;  %s11924_s18 = sld [smem:[#allocation19_spill]] }
 0x68d   : > { %p9566_p0 = scmp.ge.s32.totalorder %s25_s30, 10   ;;  %s11925_s15 = sld [smem:[#allocation24_spill]] }
 0x68e   : > { %s11926_s25 = sld [smem:[#allocation25_spill]]  ;;  %s11927_s27 = sld [smem:[#allocation30_spill]] }
 0x68f   : > { %s11928_s28 = sld [smem:[#allocation31_spill]]  ;;  %s11929_s3 = sld [smem:[#allocation32_spill]] }
 0x690   : > { %s11931_s19 = smov %s5073_s20  ;;  %s11932_s20 = smov %s5418_s10 }
 0x691   : > { %s11933_s21 = smov %s5081_s22  ;;  %s11934_s22 = smov %s5085_s23 }
 0x692   : > { %s11935_s23 = smov %s5421_s4  ;;  %s11937_s26 = smov %s5109_s29 }
 0x693   : > { %s11936_s24 = smov %s11925_s15  ;;  %24 = sbr.rel (!%p9566_p0) target bundleno = 19 (0x13), region = 127 }
 0x695   : > { %s11938_s29 = smov %s11929_s3 }
 0x69a   :  { %3750 = vsyncpa [#allocation6], 1 }
 0x69b   :  { %3752 = vsyncpa [#allocation6 + $0x1], 1 }
 0x69c   :  { %3753 = vsyncpa [#allocation9], 1 }
 0x69d   :  { %3755 = vsyncpa [#allocation9 + $0x1], 1 }
 0x69e   :  { %3756 = vsyncpa [#allocation12], 1 }
 0x69f   :  { %3757 = vsyncpa [#allocation7], 1 }
 0x6a0   :  { %3759 = vsyncpa [#allocation7 + $0x1], 1 }

// kernel: attention_unit_forward.8
= control target key start
LH: loop header
LB: loop body
LE: loop exit
PB: predicated region body
PF: predicated region fallthrough
CT: control target
= control target key end

     0   :  { %s7451_s0 = inlined_call_operand.hbm [shape: bf16[2,16,1024], index: 0, kind: input, shape index: {}]   ;;  %s7452_s1 = inlined_call_operand.hbm [shape: f32[2,16,1], index: 1, kind: input, shape index: {}]   ;;  %s7453_s2 = inlined_call_operand.hbm [shape: f32[2,16,1], index: 2, kind: input, shape index: {}]   ;;  %s7454_s3 = inlined_call_operand.hbm [shape: bf16[8,16], index: 3, kind: input, shape index: {}]   ;;  %s7455_s4 = inlined_call_operand.hbm [shape: f32[1,8], index: 4, kind: input, shape index: {}]   ;;  %s7456_s5 = inlined_call_operand.hbm [shape: bf16[8,16], index: 5, kind: input, shape index: {}]   ;;  %s7457_s6 = inlined_call_operand.hbm [shape: f32[1,8], index: 6, kind: input, shape index: {}]   ;;  %s7458_s7 = inlined_call_operand.hbm [shape: bf16[2,1024,8], index: 7, kind: output, shape index: {0}]   ;;  %s7459_s8 = inlined_call_operand.hbm [shape: bf16[2,1024,8], index: 8, kind: output, shape index: {1}]  }
   0x1   :  { %7488 = sst [smem:[#allocation32_spill]] %s7452_s1 }
   0x2   :  { %7489 = sst [smem:[#allocation33_spill]] %s7454_s3 }
   0x3   :  { %7490 = sst [smem:[#allocation34_spill]] %s7456_s5 }
   0x4   :  { %7491 = sst [smem:[#allocation35_spill]] %s7458_s7 }
   0x5   :  { %7492 = sst [smem:[#allocation36_spill]] %s7459_s8 }
   0x6   :  { %14 = vsyncpa [#allocation3], 0 }
   0x7   :  { %16 = vsyncpa [#allocation3 + $0x1], 0 }
   0x8   :  { %17 = vsyncpa [#allocation6], 0 }
   0x9   :  { %19 = vsyncpa [#allocation6 + $0x1], 0 }
   0xa   :  { %20 = vsyncpa [#allocation9], 0 }
   0xb   :  { %21 = vsyncpa [#allocation12], 0 }
   0xc   :  { %22 = vsyncpa [#allocation4], 0 }
   0xd   :  { %24 = vsyncpa [#allocation4 + $0x1], 0 }
   0xe   :  { %25 = vsyncpa [#allocation16], 0 }
   0xf   :  { %27 = vsyncpa [#allocation16 + $0x1], 0  ;;  %s6006_s27 = smov 0   ;;  %s6008_s28 = smov 0  }
  0x10   :  { %s6010_s29 = smov 0   ;;  %s6012_s30 = smov 0  }
  0x11   :  { %s6014_s9 = smov 0   ;;  %s6016_s10 = smov 0  }
  0x12 LB: > { %7493 = sst [smem:[#allocation23_spill]] %s5923_s27  ;;  %s6037_s11 = sadd.s32 4294967295, %s5943_s10   ;;  %s5943_s10 = sphi %s6016_s10, %s33_s10   ;;  %s5939_s9 = sphi %s6014_s9, %s7544_s9   ;;  %s5935_s30 = sphi %s6012_s30, %s7543_s30   ;;  %s5931_s29 = sphi %s6010_s29, %s7539_s29   ;;  %s5927_s28 = sphi %s6008_s28, %s7542_s28   ;;  %s5923_s27 = sphi %s6006_s27, %s7541_s27  }
  0x13   : > { %7494 = sst [smem:[#allocation24_spill]] %s5931_s29  ;;  %s4403_s12 = sadd.s32 4294967294, %s5943_s10  }
  0x14   : > { %7495 = sst [smem:[#allocation25_spill]] %s5935_s30  ;;  %p67_p0 = scmp.ne.s32.totalorder %s5927_s28, %s5923_s27 }
  0x15   : > { %7496 = sst [smem:[#allocation26_spill]] %s5943_s10  ;;  %p7460_p1 = scmp.eq.s32.totalorder %s6037_s11, 0 }
  0x16   : > { %7497 = sst [smem:[#allocation27_spill]] %s6037_s11  ;;  %p235_p3 = scmp.eq.s32.totalorder %s4403_s12, 1 }
  0x17   : > { %p6046_p4 = por %p7460_p1, %p67_p0  ;;  %p4404_p5 = scmp.ge.s32.totalorder %s5943_s10, 1 }
  0x18   : > { %p6051_p6 = por %p235_p3, %p67_p0  ;;  %p270_p7 = scmp.lt.s32.totalorder %s5943_s10, 3 }
  0x19   : > { %s7498_s13 = scalar_select %p6046_p4, 1, 0 }
  0x1a   : > { %s7499_s14 = scalar_select %p6051_p6, 1, 0 }
  0x1b   : > { %p6056_p8 = pnand %p4404_p5, %p270_p7  ;;  %s5945_s16 = smov [#allocation8]  }
  0x1c   : > { %7500 = sst [smem:[#allocation28_spill]] %s7499_s14  ;;  %s283_s17 = sshll.u32 %s5945_s16, 4  ;;  %s284_s17 = int_to_ptr.vmem [resolvable:$true] %s283_s17 }
  0x1d   : > { %s7501_s15 = scalar_select %p6056_p8, 1, 0 }
  0x1e   : > { %p5510_p10 = pneg %p6056_p8  ;;  %s5946_s18 = smov [#allocation11]  }
  0x1f   : > { %s305_s19 = sshll.u32 %s5946_s18, 4  ;;  %s7503_s3 = sld [smem:[#allocation33_spill]]  ;;  %s6069_s19 = int_to_ptr.vmem [resolvable:$true] %s305_s19 }
  0x20   : > { %p6065_p11 = pnand %p5510_p10, %p7460_p1 }
  0x22   : > { %s7502_s20 = scalar_select %p6065_p11, 1, 0 }
  0x23   : > { %p6079_p13 = pneg %p6065_p11 }
  0x25   : > { %s5615_s23 = scalar_lea.hbm %s7503_s3, 64 }
  0x26   : > { %p5616_p12 = scmp.ne.s32.totalorder %s7503_s3, %s5615_s23  ;;  %p5622_p5 = scmp.lt.u32.totalorder %s5615_s23, %s7503_s3 }
  0x27   : > { %s7504_s26 = scalar_select %p6079_p13, 1, 0 }
  0x28   : > { %p5618_p0 = pnand %p6079_p13, %p5616_p12 }
  0x2a   : > { %p5619_p3 = pneg %p5618_p0 }
  0x2c   : > { %p5624_p7 = pnand %p5622_p5, %p5619_p3 }
  0x2e   : > { %5627 = shalt.err (!%p5624_p7)
}
  0x2f   : > { %s5628_s18 = scalar_lea.vmem %s284_s17, 64  ;;  %p5636_p2 = scmp.lt.s32.totalorder %s284_s17, %s284_s17 }
  0x30   : > { %p5629_p10 = scmp.ne.s32.totalorder %s284_s17, %s5628_s18  ;;  %p5637_p6 = scmp.lt.s32.totalorder %s5628_s18, %s5628_s18 }
  0x32   : > { %p5631_p9 = pnand %p5629_p10, %p6079_p13  ;;  %p5638_p4 = por %p5637_p6, %p5636_p2 }
  0x34   : > { %p5632_p1 = pneg %p5631_p9 }
  0x36   : > { %p5639_p8 = pnand %p5638_p4, %p5632_p1 }
  0x38   : > { %5642 = shalt.err (!%p5639_p8)
}
  0x39   : > { %5513 = dma.hbm_to_vmem [thread:$0]  (!%p6065_p11), %s7503_s3, 64, %s284_s17, [#allocation9]  }
  0x3a   : > { %s7505_s5 = sld [smem:[#allocation34_spill]] }
  0x40   : > { %s5643_s25 = scalar_lea.hbm %s7505_s5, 64 }
  0x41   : > { %p5644_p9 = scmp.ne.s32.totalorder %s7505_s5, %s5643_s25  ;;  %p5650_p1 = scmp.lt.u32.totalorder %s5643_s25, %s7505_s5 }
  0x43   : > { %p5646_p12 = pnand %p5644_p9, %p6079_p13 }
  0x45   : > { %p5647_p2 = pneg %p5646_p12 }
  0x47   : > { %p5652_p4 = pnand %p5650_p1, %p5647_p2 }
  0x49   : > { %5655 = shalt.err (!%p5652_p4)
}
  0x4a   : > { %s5656_s17 = scalar_lea.vmem %s6069_s19, 64  ;;  %p5664_p3 = scmp.lt.s32.totalorder %s6069_s19, %s6069_s19 }
  0x4b   : > { %p5657_p6 = scmp.ne.s32.totalorder %s6069_s19, %s5656_s17  ;;  %p5665_p5 = scmp.lt.s32.totalorder %s5656_s17, %s5656_s17 }
  0x4d   : > { %p5659_p8 = pnand %p5657_p6, %p6079_p13  ;;  %p5666_p7 = por %p5665_p5, %p5664_p3 }
  0x4f   : > { %p5660_p0 = pneg %p5659_p8 }
  0x51   : > { %p5667_p10 = pnand %p5666_p7, %p5660_p0 }
  0x53   : > { %5670 = shalt.err (!%p5667_p10)
}
  0x54   : > { %5519 = dma.hbm_to_vmem [thread:$0]  (!%p6065_p11), %s7505_s5, 64, %s6069_s19, [#allocation12]  }
  0x55   : > { %s45_s22 = sadd.s32 1, %s5939_s9  ;;  %s54_s23 = sadd.s32 1, %s5931_s29 }
  0x56   : > { %p47_p9 = scmp.ge.s32.totalorder %s45_s22, 2  ;;  %p61_p12 = scmp.ne.s32.totalorder %s5931_s29, %s5927_s28 }
  0x57   : > { %p62_p2 = scmp.eq.s32.totalorder %s5943_s10, 0  ;;  %p5544_p1 = scmp.lt.s32.totalorder %s5943_s10, 2 }
  0x58   : > { %s7546_s22 = smov (%p47_p9, %s45_s22), 0  ;;  %p7507_p6 = scmp.eq.s32.totalorder %s6037_s11, 1 }
  0x59   : > { %7506 = sst [smem:[#allocation29_spill]] %s7546_s22  ;;  %p63_p4 = por %p62_p2, %p61_p12 }
  0x5a   : > { %p6128_p8 = por %p7507_p6, %p61_p12  ;;  %s49_s25 = ssub.s32 %s5939_s9, %s7546_s22 }
  0x5b   : > { %s6135_s19 = sand.u32 1, %s5931_s29   ;;  %p52_p0 = scmp.eq.s32.totalorder %s49_s25, 0 }
  0x5c   : > { %s7508_s24 = scalar_select %p6128_p8, 1, 0 }
  0x5d   : > { %p6137_p3 = pnand %p5544_p1, %p63_p4  ;;  %s350_s16 = sand.u32 1, %s5943_s10  }
  0x5e   : > { %7509 = sst [smem:[#allocation30_spill]] %s7508_s24  ;;  %s7467_s18 = sshll.u32 %s6135_s19, 4 }
  0x5f   : > { %s7510_s12 = scalar_select %p6137_p3, 1, 0 }
  0x60   : > { %s6144_s17 = scalar_select %p52_p0, %s5931_s29, %s54_s23  }
  0x61   : > { %s7468_s14 = sshll.u32 %s5939_s9, 8  ;;  %s7512_s1 = sld [smem:[#allocation32_spill]] }
  0x62   : > { %7511 = sst [smem:[#allocation31_spill]] %s6144_s17  ;;  %s354_s25 = scalar_lea.vmem [#allocation5], %s7467_s18 }
  0x63   : > { %s361_s22 = sshll.u32 %s354_s25, 4  ;;  %s6158_s10 = scalar_lea.sflag [#allocation6], %s350_s16  ;;  %s6156_s22 = int_to_ptr.vmem [resolvable:$true] %s361_s22 }
  0x64   : > { %p6164_p7 = pneg %p6137_p3 }
  0x66   : > { %s7513_s17 = scalar_select %p6164_p7, 1, 0 }
  0x67   : > { %s6152_s5 = scalar_lea.hbm %s7512_s1, %s7468_s14  ;;  %s5676_s18 = scalar_lea.hbm %s7512_s1, 512 }
  0x68   : > { %s5671_s23 = scalar_lea.hbm %s6152_s5, 256  ;;  %p5677_p12 = scmp.lt.u32.totalorder %s6152_s5, %s7512_s1 }
  0x69   : > { %p5672_p5 = scmp.ne.s32.totalorder %s6152_s5, %s5671_s23  ;;  %p5678_p2 = scmp.lt.u32.totalorder %s5676_s18, %s5671_s23 }
  0x6a   : > { %p5680_p4 = scmp.lt.u32.totalorder %s5671_s23, %s6152_s5 }
  0x6b   : > { %p5674_p10 = pnand %p6164_p7, %p5672_p5  ;;  %p5679_p1 = por %p5678_p2, %p5677_p12 }
  0x6d   : > { %p5675_p9 = pneg %p5674_p10  ;;  %p5681_p6 = por %p5680_p4, %p5679_p1 }
  0x6f   : > { %p5682_p0 = pnand %p5681_p6, %p5675_p9 }
  0x71   : > { %5685 = shalt.err (!%p5682_p0)
}
  0x72   : > { %s5686_s16 = scalar_lea.vmem %s6156_s22, 256  ;;  %s5947_s3 = smov [#allocation5]  }
  0x73   : > { %p5687_p5 = scmp.ne.s32.totalorder %s6156_s22, %s5686_s16  ;;  %s5691_s21 = sshll.u32 %s5947_s3, 4  ;;  %s5692_s21 = int_to_ptr.vmem [resolvable:$false] %s5691_s21 }
  0x74   : > { %s5693_s14 = scalar_lea.vmem %s5692_s21, 512  ;;  %p5694_p11 = scmp.lt.s32.totalorder %s6156_s22, %s5692_s21 }
  0x75   : > { %p5689_p10 = pnand %p5687_p5, %p6164_p7  ;;  %p5695_p13 = scmp.lt.s32.totalorder %s5693_s14, %s5686_s16 }
  0x77   : > { %p5690_p8 = pneg %p5689_p10  ;;  %p5696_p12 = por %p5695_p13, %p5694_p11 }
  0x79   : > { %p5697_p2 = pnand %p5696_p12, %p5690_p8 }
  0x7b   : > { %5700 = shalt.err (!%p5697_p2)
}
  0x7c   : > { %s7483_s18 = smov 128   ;;  %s5949_s23 = smov 8  }
  0x7d   : > { %5529 = dma.hbm_to_vmem [thread:$0]  (!%p6137_p3), %s6152_s5, 256, %s6156_s22, %s6158_s10, %s7483_s18, %s7483_s18, %s5949_s23  }
  0x7e   : > { %s7514_s25 = sshll.u32 %s5939_s9, 8  ;;  %s7515_s14 = sshll.u32 %s6135_s19, 4 }
  0x7f   : > { %s6196_s21 = scalar_lea.hbm %s7453_s2, %s7514_s25  ;;  %s375_s1 = scalar_lea.vmem [#allocation7], %s7515_s14 }
  0x80   : > { %s382_s29 = sshll.u32 %s375_s1, 4  ;;  %s5950_s27 = smov [#allocation10]   ;;  %s6200_s29 = int_to_ptr.vmem [resolvable:$true] %s382_s29 }
  0x81   : > { %s294_s7 = sshll.u32 %s5950_s27, 4  ;;  %s5951_s24 = smov [#allocation13]   ;;  %s295_s7 = int_to_ptr.vmem [resolvable:$true] %s294_s7 }
  0x82   : > { %s316_s8 = sshll.u32 %s5951_s24, 4  ;;  %s5701_s5 = scalar_lea.hbm %s7455_s4, 16  ;;  %s317_s8 = int_to_ptr.vmem [resolvable:$true] %s316_s8 }
  0x83   : > { %p5702_p11 = scmp.ne.s32.totalorder %s7455_s4, %s5701_s5  ;;  %p7516_p13 = scmp.ne.s32.totalorder %s7504_s26, 0 }
  0x84   : > { %p5708_p1 = scmp.lt.u32.totalorder %s5701_s5, %s7455_s4 }
  0x85   : > { %p5704_p8 = pnand %p5702_p11, %p7516_p13 }
  0x87   : > { %p5705_p9 = pneg %p5704_p8 }
  0x89   : > { %p5710_p4 = pnand %p5708_p1, %p5705_p9 }
  0x8b   : > { %5713 = shalt.err (!%p5710_p4)
}
  0x8c   : > { %s5714_s27 = scalar_lea.vmem %s295_s7, 16  ;;  %s5721_s30 = scalar_lea.vmem %s295_s7, 32 }
  0x8d   : > { %p5715_p6 = scmp.ne.s32.totalorder %s295_s7, %s5714_s27  ;;  %p5722_p10 = scmp.lt.s32.totalorder %s295_s7, %s295_s7 }
  0x8e   : > { %p5723_p12 = scmp.lt.s32.totalorder %s5721_s30, %s5714_s27 }
  0x8f   : > { %p5717_p0 = pnand %p5715_p6, %p7516_p13 }
  0x90   : > { %p5724_p2 = por %p5723_p12, %p5722_p10 }
  0x91   : > { %p5718_p5 = pneg %p5717_p0 }
  0x93   : > { %p5725_p3 = pnand %p5724_p2, %p5718_p5 }
  0x95   : > { %5728 = shalt.err (!%p5725_p3)
}
  0x96   : > { %p7517_p11 = scmp.ne.s32.totalorder %s7502_s20, 0  ;;  %s5729_s16 = scalar_lea.hbm %s7457_s6, 16 }
  0x97   : > { %p5730_p8 = scmp.ne.s32.totalorder %s7457_s6, %s5729_s16  ;;  %p5736_p3 = scmp.lt.u32.totalorder %s5729_s16, %s7457_s6 }
  0x98   : > { %5516 = dma.hbm_to_vmem [thread:$0]  (!%p7517_p11), %s7455_s4, 16, %s295_s7, [#allocation9]  }
  0x99   : > { %p5732_p9 = pnand %p5730_p8, %p7516_p13 }
  0x9b   : > { %p5733_p1 = pneg %p5732_p9 }
  0x9d   : > { %p5738_p4 = pnand %p5736_p3, %p5733_p1 }
  0x9f   : > { %5741 = shalt.err (!%p5738_p4)
}
  0xa0   : > { %s5742_s1 = scalar_lea.vmem %s317_s8, 16  ;;  %s5749_s7 = scalar_lea.vmem %s317_s8, 32 }
  0xa1   : > { %p5743_p6 = scmp.ne.s32.totalorder %s317_s8, %s5742_s1  ;;  %p5750_p10 = scmp.lt.s32.totalorder %s317_s8, %s317_s8 }
  0xa2   : > { %p5751_p12 = scmp.lt.s32.totalorder %s5749_s7, %s5742_s1 }
  0xa3   : > { %p5745_p0 = pnand %p5743_p6, %p7516_p13 }
  0xa4   : > { %p5752_p2 = por %p5751_p12, %p5750_p10 }
  0xa5   : > { %p5746_p5 = pneg %p5745_p0 }
  0xa7   : > { %p5753_p7 = pnand %p5752_p2, %p5746_p5 }
  0xa9   : > { %5756 = shalt.err (!%p5753_p7)
}
  0xaa   : > { %5522 = dma.hbm_to_vmem [thread:$0]  (!%p7517_p11), %s7457_s6, 16, %s317_s8, [#allocation12]  }
  0xab   : > { %s4410_s11 = sshll.u32 %s6135_s19, 6  ;;  %s4831_s26 = sshll.u32 %s5939_s9, 10 }
  0xac   : > { %s6243_s3 = scalar_lea.hbm %s7451_s0, %s4831_s26  ;;  %s331_s20 = scalar_lea.vmem [#allocation2], %s4410_s11 }
  0xad   : > { %s340_s16 = sshll.u32 %s331_s20, 4  ;;  %s328_s14 = scalar_lea.sflag [#allocation3], %s6135_s19  ;;  %s6245_s16 = int_to_ptr.vmem [resolvable:$true] %s340_s16 }
  0xae   : > { %s5757_s5 = scalar_lea.hbm %s6243_s3, 1024  ;;  %p7518_p13 = scmp.ne.s32.totalorder %s7513_s17, 0 }
  0xaf   : > { %p5758_p7 = scmp.ne.s32.totalorder %s6243_s3, %s5757_s5  ;;  %s5762_s25 = scalar_lea.hbm %s7451_s0, 2048 }
  0xb0   : > { %p5763_p9 = scmp.lt.u32.totalorder %s6243_s3, %s7451_s0  ;;  %p5764_p1 = scmp.lt.u32.totalorder %s5762_s25, %s5757_s5 }
  0xb1   : > { %p5760_p11 = pnand %p5758_p7, %p7518_p13  ;;  %p5766_p4 = scmp.lt.u32.totalorder %s5757_s5, %s6243_s3 }
  0xb2   : > { %p5765_p3 = por %p5764_p1, %p5763_p9 }
  0xb3   : > { %p5761_p8 = pneg %p5760_p11 }
  0xb4   : > { %p5767_p6 = por %p5766_p4, %p5765_p3 }
  0xb6   : > { %p5768_p0 = pnand %p5767_p6, %p5761_p8 }
  0xb8   : > { %5771 = shalt.err (!%p5768_p0)
}
  0xb9   : > { %s5772_s27 = scalar_lea.vmem %s6245_s16, 1024  ;;  %s5952_s30 = smov [#allocation2]  }
  0xba   : > { %p5773_p5 = scmp.ne.s32.totalorder %s6245_s16, %s5772_s27  ;;  %s5777_s11 = sshll.u32 %s5952_s30, 4  ;;  %s5778_s11 = int_to_ptr.vmem [resolvable:$false] %s5777_s11 }
  0xbb   : > { %s5779_s26 = scalar_lea.vmem %s5778_s11, 2048  ;;  %p5780_p2 = scmp.lt.s32.totalorder %s6245_s16, %s5778_s11 }
  0xbc   : > { %p5775_p10 = pnand %p5773_p5, %p7518_p13  ;;  %p5781_p7 = scmp.lt.s32.totalorder %s5779_s26, %s5772_s27 }
  0xbe   : > { %p5776_p12 = pneg %p5775_p10  ;;  %p5782_p11 = por %p5781_p7, %p5780_p2 }
  0xc0   : > { %p5783_p9 = pnand %p5782_p11, %p5776_p12 }
  0xc2   : > { %5786 = shalt.err (!%p5783_p9)
}
  0xc3   : > { %s5953_s24 = smov 512   ;;  %s5954_s18 = smov 32  }
  0xc4   : > { %p7519_p8 = scmp.ne.s32.totalorder %s7510_s12, 0  ;;  %s5787_s20 = scalar_lea.hbm %s6196_s21, 256 }
  0xc5   : > { %p5788_p1 = scmp.ne.s32.totalorder %s6196_s21, %s5787_s20  ;;  %s5792_s22 = scalar_lea.hbm %s7453_s2, 512 }
  0xc6   : > { %5526 = dma.hbm_to_vmem [thread:$0]  (!%p7519_p8), %s6243_s3, 1024, %s6245_s16, %s328_s14, %s5953_s24, %s5953_s24, %s5954_s18  }
  0xc7   : > { %p5790_p3 = pnand %p5788_p1, %p7518_p13  ;;  %p5793_p6 = scmp.lt.u32.totalorder %s6196_s21, %s7453_s2 }
  0xc8   : > { %p5794_p0 = scmp.lt.u32.totalorder %s5792_s22, %s5787_s20  ;;  %p5796_p10 = scmp.lt.u32.totalorder %s5787_s20, %s6196_s21 }
  0xc9   : > { %p5791_p4 = pneg %p5790_p3 }
  0xca   : > { %p5795_p5 = por %p5794_p0, %p5793_p6 }
  0xcc   : > { %p5797_p12 = por %p5796_p10, %p5795_p5 }
  0xce   : > { %p5798_p2 = pnand %p5797_p12, %p5791_p4 }
  0xd0   : > { %5801 = shalt.err (!%p5798_p2)
}
  0xd1   : > { %s5802_s19 = scalar_lea.vmem %s6200_s29, 256  ;;  %s5955_s3 = smov [#allocation7]  }
  0xd2   : > { %p5803_p7 = scmp.ne.s32.totalorder %s6200_s29, %s5802_s19  ;;  %s5807_s16 = sshll.u32 %s5955_s3, 4  ;;  %s5808_s16 = int_to_ptr.vmem [resolvable:$false] %s5807_s16 }
  0xd3   : > { %s5809_s14 = scalar_lea.vmem %s5808_s16, 512  ;;  %p5810_p1 = scmp.lt.s32.totalorder %s6200_s29, %s5808_s16 }
  0xd4   : > { %p5805_p11 = pnand %p5803_p7, %p7518_p13  ;;  %p5811_p3 = scmp.lt.s32.totalorder %s5809_s14, %s5802_s19 }
  0xd6   : > { %p5806_p9 = pneg %p5805_p11  ;;  %p5812_p6 = por %p5811_p3, %p5810_p1 }
  0xd8   : > { %p5813_p0 = pnand %p5812_p6, %p5806_p9 }
  0xda   : > { %5816 = shalt.err (!%p5813_p0)
}
  0xdb   : > { %s7520_s7 = smov 128   ;;  %p7521_p13 = scmp.ne.s32.totalorder %s7501_s15, 0 }
  0xdc   : > { %5532 = dma.hbm_to_vmem [thread:$0]  (!%p7519_p8), %s6196_s21, 256, %s6200_s29, %s6158_s10, %s7520_s7, %s7520_s7, %s5949_s23  }
  0xdd   : > { %394 = sbr.rel (%p7521_p13) target bundleno = 977 (0x3d1), region = 48  ;;  %s6299_s17 = sand.u32 (!%p7521_p13), 1, %s5927_s28  }
  0xde   : > { %s4420_s27 = sshll.u32 (!%p7521_p13), %s6299_s17, 6  ;;  %s397_s30 = scalar_lea.sflag (!%p7521_p13), [#allocation3], %s6299_s17 }
  0xdf   : > { %s6303_s11 = scalar_lea.vmem (!%p7521_p13), [#allocation2], %s4420_s27  ;;  %p7522_p4 = scmp.ne.s32.totalorder (!%p7521_p13), %s7498_s13, 0 }
  0xe4   : > { %5898 = dma.done.wait (%p7522_p4), %s397_s30, 1024  }
  0xe5   : > { %5900 = vsyncadd (%p7522_p4), %s397_s30, 4294966272  ;;  %s7523_s12 = sld [smem:[#allocation27_spill]]  ;;  %s4421_s10 = sshll.u32 %s6299_s17, 4 }
  0xe6   : > { %s409_s23 = scalar_lea.vmem [#allocation5], %s4421_s10 }
  0xeb   : > { %s405_s29 = sand.u32 1, %s7523_s12  }
  0xec   : > { %s406_s15 = scalar_lea.sflag [#allocation6], %s405_s29 }
  0xed   : > { %5902 = dma.done.wait (%p7522_p4), %s406_s15, 512  }
  0xee   : > { %5904 = vsyncadd (%p7522_p4), %s406_s15, 4294966784  ;;  %s418_s21 = scalar_lea.vmem [#allocation7], %s4421_s10  ;;  %p7524_p8 = scmp.eq.s32.totalorder %s7523_s12, 0 }
  0xf0   : > { %5906 = dma.done.wait (%p7524_p8), [#allocation9], 80   ;;  %p7525_p5 = pmov %p7524_p8 }
  0xf2   : > { %5908 = vsyncadd (%p7525_p5), [#allocation9], 4294967216  ;;  %p7526_p10 = pmov %p7525_p5 }
  0xf3   : > { %p7527_p12 = pmov %p7525_p5 }
  0xf4   : > { %5910 = dma.done.wait (%p7526_p10), [#allocation12], 80  }
  0xf5   : > { %5912 = vsyncadd (%p7527_p12), [#allocation12], 4294967216  ;;  %v5956_v0 = vmov 0   ;;  %v538_v1 = vld [vmem:[%s418_s21] sm:$0xff]  ;;  %v539_v3 = vld [vmem:[%s418_s21 + $0x8] sm:$0xff]  ;;  %vm711_vm0 = vcmask 130048  }
  0xf6   : > { %5610 = vset.pattern.permute.xlu1 %v5956_v0  ;;  %5609 = vset.pattern.permute.xlu0 %v5956_v0  ;;  %v510_v2 = vld [vmem:[%s409_s23] sm:$0xff]  ;;  %v511_v4 = vld [vmem:[%s409_s23 + $0x8] sm:$0xff]  ;;  %s4427_s13 = sshll.u32 %s6299_s17, 9  ;;  %vm2220_vm1 = vcmask 60416   ;;  %s7528_s18 = sld [smem:[#allocation25_spill]] }
  0xf7   : > { %542 = vperm.xlu1 %5610, %v538_v1   ;;  %514 = vperm.xlu0 %5609, %v510_v2   ;;  %v486_v5 = vld [vmem:[%s6303_s11] sm:$0xff]  ;;  %v6326_v9 = vld [vmem:[%s6303_s11 + $0x8] sm:$0xff]  ;;  %v6340_v17 = vld [vmem:[%s6303_s11 + $0x10] sm:$0xff]  ;;  %s6533_s26 = scalar_lea.vmem [#allocation15], %s4427_s13  ;;  %s6728_s24 = scalar_lea.vmem [#allocation14], %s4427_s13 }
  0xf8   : > { %v490_v6 = vld [vmem:[%s6303_s11 + $0x20] sm:$0xff]  ;;  %v6329_v10 = vld [vmem:[%s6303_s11 + $0x28] sm:$0xff]  ;;  %v6343_v18 = vld [vmem:[%s6303_s11 + $0x18] sm:$0xff]  ;;  %v494_v19 = vunpack.c.l.bf16 %v486_v5  ;;  %v495_v20 = vunpack.c.h.bf16 %v486_v5  ;;  %v497_v21 = vunpack.c.h.bf16 %v6326_v9  ;;  %v498_v23 = vunpack.c.l.bf16 %v6340_v17  ;;  %s4199_s5 = sshll.u32 %s6533_s26, 4  ;;  %s7529_s25 = sld [smem:[#allocation36_spill]]  ;;  %s7209_s5 = int_to_ptr.vmem [resolvable:$true] %s4199_s5 }
  0xf9   : > { %v4623_v7 = vcombine.low %v486_v5, %v490_v6  ;;  %v4624_v8 = vcombine.high %v486_v5, %v490_v6  ;;  %v4625_v11 = vcombine.low %v6326_v9, %v6329_v10  ;;  %v575_v12 = vld [vmem:[#allocation11] sm:$0xf]  ;;  %v574_v13 = vld [vmem:[#allocation8] sm:$0xf]  ;;  %v4626_v16 = vcombine.high %v6326_v9, %v6329_v10  ;;  %v6347_v22 = vld [vmem:[%s6303_s11 + $0x30] sm:$0xff]  ;;  %s7530_s19 = sld [smem:[#allocation30_spill]] }
  0xfa   : > { %5483 = vmatprep.subr.msk.bf16.mxu1 %vm711_vm0, %v575_v12  ;;  %v2717_v14 = vsel %vm711_vm0, %v575_v12, 0  ;;  %5482 = vmatprep.subr.msk.bf16.mxu0 %vm711_vm0, %v574_v13  ;;  %v905_v15 = vsel %vm711_vm0, %v574_v13, 0  ;;  %v499_v24 = vunpack.c.h.bf16 %v6340_v17  ;;  %v6352_v25 = vld [vmem:[%s6303_s11 + $0x38] sm:$0xff]  ;;  %v500_v26 = vunpack.c.l.bf16 %v6343_v18  ;;  %s4166_s3 = scalar_lea.sflag [#allocation16], %s6299_s17  ;;  %s5817_s16 = scalar_lea.vmem %s7209_s5, 8192 }
  0xfb   : > { %547 = vperm.xlu1 %5610, %v539_v3   ;;  %519 = vperm.xlu0 %5609, %v511_v4   ;;  %v502_v29 = vunpack.c.l.bf16 %v490_v6  ;;  %v503_v30 = vunpack.c.h.bf16 %v490_v6  ;;  %v505_v31 = vunpack.c.h.bf16 %v6329_v10  ;;  %v501_v32 = vunpack.c.h.bf16 %v6343_v18  ;;  %p5818_p2 = scmp.ne.s32.totalorder %s7209_s5, %s5817_s16  ;;  %s5957_s14 = smov [#allocation15]  }
  0xfc   : > { %5353 = vmatpush3.bf16.xpose.msra.mxu1 %v2717_v14  ;;  %5223 = vmatpush3.bf16.xpose.msra.mxu0 %v905_v15  ;;  %v506_v36 = vunpack.c.l.bf16 %v6347_v22  ;;  %v507_v38 = vunpack.c.h.bf16 %v6347_v22  ;;  %v508_v40 = vunpack.c.l.bf16 %v6352_v25  ;;  %v509_v42 = vunpack.c.h.bf16 %v6352_v25  ;;  %s5090_s20 = sshll.u32 %s7528_s18, 13  ;;  %s5821_s7 = sshll.u32 %s5957_s14, 4  ;;  %s5822_s7 = int_to_ptr.vmem [resolvable:$false] %s5821_s7 }
  0xfd   : > { %v4627_v15 = vcombine.low %v6340_v17, %v6347_v22  ;;  %s5823_s27 = scalar_lea.vmem %s5822_s7, 16384  ;;  %p5824_p1 = scmp.lt.s32.totalorder %s7209_s5, %s5822_s7 }
  0xfe   : > { %s7207_s1 = scalar_lea.hbm %s7529_s25, %s5090_s20  ;;  %p5825_p3 = scmp.lt.s32.totalorder %s5823_s27, %s5817_s16 }
  0xff   : > { %p7531_p7 = scmp.ne.s32.totalorder %s7530_s19, 0 }
 0x100   : > { %p5826_p6 = por %p5825_p3, %p5824_p1 }
 0x101   : > { %p5819_p11 = pnand %p5818_p2, %p7531_p7 }
 0x103   : > { %p5820_p9 = pneg %p5819_p11 }
 0x105   : > { %p5827_p0 = pnand %p5826_p6, %p5820_p9 }
 0x11e   : > { %2396 = vxpose.xlu1.c.b16.start.end [1/1] (short) %v4623_v7, 128 }
 0x13b   : > { %2412 = vxpose.xlu1.c.b16.start.end [1/1] (short) %v4624_v8, 128 }
 0x158   : > { %2428 = vxpose.xlu1.c.b16.start.end [1/1] (short) %v4625_v11, 128 }
 0x175   : > { %2444 = vxpose.xlu1.c.b16.start.end [1/1] (short) %v4626_v16, 128 }
 0x176   : > { %v6355_v27 = vpop.permute.xlu1 %542  ;;  %v6357_v28 = vpop.permute.xlu0 %514 }
 0x177   : > { %v522_v33 = vsub.f32 %v494_v19, %v6357_v28  ;;  %v523_v34 = vsub.f32 %v495_v20, %v6357_v28  ;;  %v525_v35 = vsub.f32 %v497_v21, %v6357_v28  ;;  %v526_v37 = vsub.f32 %v498_v23, %v6357_v28 }
 0x178   : > { %v527_v39 = vsub.f32 %v499_v24, %v6357_v28  ;;  %v528_v41 = vsub.f32 %v500_v26, %v6357_v28  ;;  %v529_v47 = vsub.f32 %v501_v32, %v6357_v28  ;;  %v496_v32 = vunpack.c.l.bf16 %v6326_v9 }
 0x179   : > { %v550_v44 = vmul.f32 %v6355_v27, %v522_v33  ;;  %v551_v45 = vmul.f32 %v6355_v27, %v523_v34  ;;  %v6374_v46 = vmul.f32 %v6355_v27, %v525_v35  ;;  %v6378_v51 = vmul.f32 %v6355_v27, %v526_v37 }
 0x17a   : > { %v520_v43 = vpop.permute.xlu0 %519  ;;  %v548_v52 = vpop.permute.xlu1 %547  ;;  %v6381_v55 = vmul.f32 %v6355_v27, %v527_v39  ;;  %v6386_v60 = vmul.f32 %v6355_v27, %v528_v41  ;;  %v6397_v4 = vmul.f32 %v6355_v27, %v529_v47  ;;  %v524_v35 = vsub.f32 %v496_v32, %v6357_v28 }
 0x17b   : > { %v530_v48 = vsub.f32 %v502_v29, %v520_v43  ;;  %v531_v49 = vsub.f32 %v503_v30, %v520_v43  ;;  %v533_v50 = vsub.f32 %v505_v31, %v520_v43  ;;  %v534_v53 = vsub.f32 %v506_v36, %v520_v43 }
 0x17c   : > { %v535_v54 = vsub.f32 %v507_v38, %v520_v43  ;;  %v536_v56 = vsub.f32 %v508_v40, %v520_v43  ;;  %v537_v0 = vsub.f32 %v509_v42, %v520_v43  ;;  %v4628_v29 = vcombine.high %v6340_v17, %v6347_v22 }
 0x17d   : > { %v558_v57 = vmul.f32 %v548_v52, %v530_v48  ;;  %v559_v58 = vmul.f32 %v548_v52, %v531_v49  ;;  %v6383_v59 = vmul.f32 %v548_v52, %v533_v50  ;;  %v6388_v61 = vmul.f32 %v548_v52, %v534_v53 }
 0x17e   : > { %v6390_v62 = vmul.f32 %v548_v52, %v535_v54  ;;  %v6392_v63 = vmul.f32 %v548_v52, %v536_v56  ;;  %v6405_v8 = vmul.f32 %v548_v52, %v537_v0  ;;  %v504_v31 = vunpack.c.l.bf16 %v6329_v10 }
 0x17f   : > { %v566_v1 = vpack.c.bf16 %v558_v57, %v550_v44  ;;  %v567_v2 = vpack.c.bf16 %v559_v58, %v551_v45  ;;  %v569_v3 = vpack.c.bf16 %v6383_v59, %v6374_v46  ;;  %v570_v5 = vpack.c.bf16 %v6388_v61, %v6378_v51 }
 0x180   : > { %v571_v6 = vpack.c.bf16 %v6390_v62, %v6381_v55  ;;  %v572_v7 = vpack.c.bf16 %v6392_v63, %v6386_v60  ;;  %v573_v11 = vpack.c.bf16 %v6405_v8, %v6397_v4  ;;  %v532_v34 = vsub.f32 %v504_v31, %v520_v43 }
 0x181   : > { %583 = vxpose.xlu0.c.b16.start.end [1/1] (short) %v566_v1, 128  ;;  %v552_v17 = vmul.f32 %v6355_v27, %v524_v35  ;;  %v4629_v40 = vcombine.low %v6343_v18, %v6352_v25  ;;  %v4630_v48 = vcombine.high %v6343_v18, %v6352_v25 }
 0x182   : > { %v560_v37 = vmul.f32 %v548_v52, %v532_v34 }
 0x184   : > { %v2404_v12 = vpop.trf.xlu1  ;;  %v568_v38 = vpack.c.bf16 %v560_v37, %v552_v17 }
 0x185   : > { %5354 = vmatprep.mubr.msk.bf16.mxu1 %vm711_vm0, %v2404_v12 }
 0x188   : > { %v2405_v13 = vpop.trf.xlu1 }
 0x189   : > { %5355 = vmatmul.mubr.msk.bf16.vlgmr.msra.gmra.mrb[0].mxu1 %vm711_vm0, %v2405_v13 }
 0x18c   : > { %v2406_v14 = vpop.trf.xlu1 }
 0x18d   : > { %5358 = vmatprep.mubr.msk.bf16.mxu1 %vm711_vm0, %v2406_v14 }
 0x190   : > { %v2407_v16 = vpop.trf.xlu1 }
 0x191   : > { %5359 = vmatmul.mubr.msk.bf16.gmra.mrb[4].mxu1 %vm711_vm0, %v2407_v16 }
 0x192   : > { %2460 = vxpose.xlu1.c.b16.start.end [1/1] (short) %v4627_v15, 128 }
 0x194   : > { %v2408_v19 = vpop.trf.xlu1 }
 0x195   : > { %5362 = vmatprep.mubr.msk.bf16.mxu1 %vm711_vm0, %v2408_v19 }
 0x198   : > { %v2409_v20 = vpop.trf.xlu1 }
 0x199   : > { %5363 = vmatmul.mubr.msk.bf16.gmra.mrb[8].mxu1 %vm711_vm0, %v2409_v20 }
 0x19c   : > { %v2410_v21 = vpop.trf.xlu1 }
 0x19d   : > { %5366 = vmatprep.mubr.msk.bf16.mxu1 %vm711_vm0, %v2410_v21 }
 0x19e   : > { %599 = vxpose.xlu0.c.b16.start.end [1/1] (short) %v567_v2, 128 }
 0x1a0   : > { %v2411_v23 = vpop.trf.xlu1 }
 0x1a1   : > { %5367 = vmatmul.mubr.msk.bf16.gmra.mrb[12].mxu1 %vm711_vm0, %v2411_v23 }
 0x1a4   : > { %v2420_v24 = vpop.trf.xlu1 }
 0x1a5   : > { %5370 = vmatprep.mubr.msk.bf16.mxu1 %vm711_vm0, %v2420_v24 }
 0x1a8   : > { %v2421_v26 = vpop.trf.xlu1 }
 0x1a9   : > { %5371 = vmatmul.mubr.msk.bf16.gmra.mrb[16].mxu1 %vm711_vm0, %v2421_v26 }
 0x1ac   : > { %v2422_v30 = vpop.trf.xlu1 }
 0x1ad   : > { %5374 = vmatprep.mubr.msk.bf16.mxu1 %vm711_vm0, %v2422_v30 }
 0x1af   : > { %2476 = vxpose.xlu1.c.b16.start.end [1/1] (short) %v4628_v29, 128 }
 0x1b0   : > { %v2423_v33 = vpop.trf.xlu1 }
 0x1b1   : > { %5375 = vmatmul.mubr.msk.bf16.gmra.mrb[20].mxu1 %vm711_vm0, %v2423_v33 }
 0x1b4   : > { %v2424_v36 = vpop.trf.xlu1 }
 0x1b5   : > { %5378 = vmatprep.mubr.msk.bf16.mxu1 %vm711_vm0, %v2424_v36 }
 0x1b8   : > { %v2425_v22 = vpop.trf.xlu1 }
 0x1b9   : > { %5379 = vmatmul.mubr.msk.bf16.gmra.mrb[24].mxu1 %vm711_vm0, %v2425_v22 }
 0x1bb   : > { %615 = vxpose.xlu0.c.b16.start.end [1/1] (short) %v568_v38, 128 }
 0x1bc   : > { %v2426_v10 = vpop.trf.xlu1 }
 0x1bd   : > { %5382 = vmatprep.mubr.msk.bf16.mxu1 %vm711_vm0, %v2426_v10 }
 0x1c0   : > { %v2427_v9 = vpop.trf.xlu1 }
 0x1c1   : > { %5383 = vmatmul.mubr.msk.bf16.gmra.mrb[28].mxu1 %vm711_vm0, %v2427_v9 }
 0x1c4   : > { %v2436_v39 = vpop.trf.xlu1 }
 0x1c5   : > { %5386 = vmatprep.mubr.msk.bf16.mxu1 %vm711_vm0, %v2436_v39 }
 0x1c8   : > { %v2437_v28 = vpop.trf.xlu1 }
 0x1c9   : > { %5387 = vmatmul.mubr.msk.bf16.gmra.mrb[32].mxu1 %vm711_vm0, %v2437_v28 }
 0x1cc   : > { %v2438_v27 = vpop.trf.xlu1  ;;  %2492 = vxpose.xlu1.c.b16.start.end [1/1] (short) %v4629_v40, 128 }
 0x1cd   : > { %5390 = vmatprep.mubr.msk.bf16.mxu1 %vm711_vm0, %v2438_v27 }
 0x1d0   : > { %v2439_v41 = vpop.trf.xlu1 }
 0x1d1   : > { %5391 = vmatmul.mubr.msk.bf16.gmra.mrb[36].mxu1 %vm711_vm0, %v2439_v41 }
 0x1d4   : > { %v2440_v42 = vpop.trf.xlu1 }
 0x1d5   : > { %5394 = vmatprep.mubr.msk.bf16.mxu1 %vm711_vm0, %v2440_v42 }
 0x1d8   : > { %631 = vxpose.xlu0.c.b16.start.end [1/1] (short) %v569_v3, 128  ;;  %v2441_v43 = vpop.trf.xlu1 }
 0x1d9   : > { %5395 = vmatmul.mubr.msk.bf16.gmra.mrb[40].mxu1 %vm711_vm0, %v2441_v43 }
 0x1dc   : > { %v2442_v44 = vpop.trf.xlu1 }
 0x1dd   : > { %5398 = vmatprep.mubr.msk.bf16.mxu1 %vm711_vm0, %v2442_v44 }
 0x1e0   : > { %v2443_v45 = vpop.trf.xlu1 }
 0x1e1   : > { %5399 = vmatmul.mubr.msk.bf16.gmra.mrb[44].mxu1 %vm711_vm0, %v2443_v45 }
 0x1e4   : > { %v2452_v47 = vpop.trf.xlu1 }
 0x1e5   : > { %5402 = vmatprep.mubr.msk.bf16.mxu1 %vm711_vm0, %v2452_v47 }
 0x1e7   : > { %v591_v49 = vpop.trf.xlu0 }
 0x1e8   : > { %5224 = vmatprep.mubr.msk.bf16.mxu0 %vm711_vm0, %v591_v49  ;;  %v2453_v46 = vpop.trf.xlu1 }
 0x1e9   : > { %5403 = vmatmul.mubr.msk.bf16.gmra.mrb[48].mxu1 %vm711_vm0, %v2453_v46  ;;  %2508 = vxpose.xlu1.c.b16.start.end [1/1] (short) %v4630_v48, 128 }
 0x1eb   : > { %v592_v50 = vpop.trf.xlu0 }
 0x1ec   : > { %5225 = vmatmul.mubr.msk.bf16.vlgmr.msra.gmra.mrb[0].mxu0 %vm711_vm0, %v592_v50  ;;  %v2454_v52 = vpop.trf.xlu1 }
 0x1ed   : > { %5406 = vmatprep.mubr.msk.bf16.mxu1 %vm711_vm0, %v2454_v52 }
 0x1ef   : > { %v593_v53 = vpop.trf.xlu0 }
 0x1f0   : > { %5228 = vmatprep.mubr.msk.bf16.mxu0 %vm711_vm0, %v593_v53  ;;  %v2455_v54 = vpop.trf.xlu1 }
 0x1f1   : > { %5407 = vmatmul.mubr.msk.bf16.gmra.mrb[52].mxu1 %vm711_vm0, %v2455_v54 }
 0x1f3   : > { %v594_v18 = vpop.trf.xlu0 }
 0x1f4   : > { %5229 = vmatmul.mubr.msk.bf16.gmra.mrb[4].mxu0 %vm711_vm0, %v594_v18  ;;  %v2456_v25 = vpop.trf.xlu1 }
 0x1f5   : > { %647 = vxpose.xlu0.c.b16.start.end [1/1] (short) %v570_v5, 128  ;;  %5410 = vmatprep.mubr.msk.bf16.mxu1 %vm711_vm0, %v2456_v25 }
 0x1f7   : > { %v595_v56 = vpop.trf.xlu0 }
 0x1f8   : > { %5232 = vmatprep.mubr.msk.bf16.mxu0 %vm711_vm0, %v595_v56  ;;  %v2457_v57 = vpop.trf.xlu1 }
 0x1f9   : > { %5411 = vmatmul.mubr.msk.bf16.gmra.mrb[56].mxu1 %vm711_vm0, %v2457_v57 }
 0x1fb   : > { %v596_v58 = vpop.trf.xlu0 }
 0x1fc   : > { %5233 = vmatmul.mubr.msk.bf16.gmra.mrb[8].mxu0 %vm711_vm0, %v596_v58  ;;  %v2458_v59 = vpop.trf.xlu1 }
 0x1fd   : > { %5414 = vmatprep.mubr.msk.bf16.mxu1 %vm711_vm0, %v2458_v59 }
 0x1ff   : > { %v597_v0 = vpop.trf.xlu0 }
 0x200   : > { %5236 = vmatprep.mubr.msk.bf16.mxu0 %vm711_vm0, %v597_v0  ;;  %v2459_v1 = vpop.trf.xlu1 }
 0x201   : > { %5415 = vmatmul.mubr.msk.bf16.gmra.mrb[60].mxu1 %vm711_vm0, %v2459_v1 }
 0x203   : > { %v598_v51 = vpop.trf.xlu0 }
 0x204   : > { %5237 = vmatmul.mubr.msk.bf16.gmra.mrb[12].mxu0 %vm711_vm0, %v598_v51  ;;  %v2468_v61 = vpop.trf.xlu1 }
 0x205   : > { %5418 = vmatprep.mubr.msk.bf16.mxu1 %vm711_vm0, %v2468_v61 }
 0x207   : > { %v607_v2 = vpop.trf.xlu0 }
 0x208   : > { %5240 = vmatprep.mubr.msk.bf16.mxu0 %vm711_vm0, %v607_v2  ;;  %v2469_v3 = vpop.trf.xlu1 }
 0x209   : > { %5419 = vmatmul.mubr.msk.bf16.gmra.mrb[64].mxu1 %vm711_vm0, %v2469_v3 }
 0x20b   : > { %v608_v5 = vpop.trf.xlu0 }
 0x20c   : > { %5241 = vmatmul.mubr.msk.bf16.gmra.mrb[16].mxu0 %vm711_vm0, %v608_v5  ;;  %v2470_v12 = vpop.trf.xlu1 }
 0x20d   : > { %5422 = vmatprep.mubr.msk.bf16.mxu1 %vm711_vm0, %v2470_v12 }
 0x20f   : > { %v609_v13 = vpop.trf.xlu0 }
 0x210   : > { %5244 = vmatprep.mubr.msk.bf16.mxu0 %vm711_vm0, %v609_v13  ;;  %v2471_v14 = vpop.trf.xlu1 }
 0x211   : > { %5423 = vmatmul.mubr.msk.bf16.gmra.mrb[68].mxu1 %vm711_vm0, %v2471_v14 }
 0x212   : > { %663 = vxpose.xlu0.c.b16.start.end [1/1] (short) %v571_v6, 128 }
 0x213   : > { %v610_v15 = vpop.trf.xlu0 }
 0x214   : > { %5245 = vmatmul.mubr.msk.bf16.gmra.mrb[20].mxu0 %vm711_vm0, %v610_v15  ;;  %v2472_v16 = vpop.trf.xlu1 }
 0x215   : > { %5426 = vmatprep.mubr.msk.bf16.mxu1 %vm711_vm0, %v2472_v16 }
 0x217   : > { %v611_v19 = vpop.trf.xlu0 }
 0x218   : > { %5248 = vmatprep.mubr.msk.bf16.mxu0 %vm711_vm0, %v611_v19  ;;  %v2473_v20 = vpop.trf.xlu1 }
 0x219   : > { %5427 = vmatmul.mubr.msk.bf16.gmra.mrb[72].mxu1 %vm711_vm0, %v2473_v20 }
 0x21b   : > { %v612_v21 = vpop.trf.xlu0 }
 0x21c   : > { %5249 = vmatmul.mubr.msk.bf16.gmra.mrb[24].mxu0 %vm711_vm0, %v612_v21  ;;  %v2474_v23 = vpop.trf.xlu1 }
 0x21d   : > { %5430 = vmatprep.mubr.msk.bf16.mxu1 %vm711_vm0, %v2474_v23 }
 0x21f   : > { %v613_v55 = vpop.trf.xlu0 }
 0x220   : > { %5252 = vmatprep.mubr.msk.bf16.mxu0 %vm711_vm0, %v613_v55  ;;  %v2475_v62 = vpop.trf.xlu1 }
 0x221   : > { %5431 = vmatmul.mubr.msk.bf16.gmra.mrb[76].mxu1 %vm711_vm0, %v2475_v62 }
 0x223   : > { %v614_v6 = vpop.trf.xlu0 }
 0x224   : > { %5253 = vmatmul.mubr.msk.bf16.gmra.mrb[28].mxu0 %vm711_vm0, %v614_v6  ;;  %v2484_v24 = vpop.trf.xlu1 }
 0x225   : > { %5434 = vmatprep.mubr.msk.bf16.mxu1 %vm711_vm0, %v2484_v24 }
 0x227   : > { %v623_v26 = vpop.trf.xlu0 }
 0x228   : > { %5256 = vmatprep.mubr.msk.bf16.mxu0 %vm711_vm0, %v623_v26  ;;  %v2485_v29 = vpop.trf.xlu1 }
 0x229   : > { %5435 = vmatmul.mubr.msk.bf16.gmra.mrb[80].mxu1 %vm711_vm0, %v2485_v29 }
 0x22b   : > { %v624_v30 = vpop.trf.xlu0 }
 0x22c   : > { %5257 = vmatmul.mubr.msk.bf16.gmra.mrb[32].mxu0 %vm711_vm0, %v624_v30  ;;  %v2486_v31 = vpop.trf.xlu1 }
 0x22d   : > { %5438 = vmatprep.mubr.msk.bf16.mxu1 %vm711_vm0, %v2486_v31 }
 0x22f   : > { %679 = vxpose.xlu0.c.b16.start.end [1/1] (short) %v572_v7, 128  ;;  %v625_v32 = vpop.trf.xlu0 }
 0x230   : > { %5260 = vmatprep.mubr.msk.bf16.mxu0 %vm711_vm0, %v625_v32  ;;  %v2487_v33 = vpop.trf.xlu1 }
 0x231   : > { %5439 = vmatmul.mubr.msk.bf16.gmra.mrb[84].mxu1 %vm711_vm0, %v2487_v33 }
 0x233   : > { %v626_v34 = vpop.trf.xlu0 }
 0x234   : > { %5261 = vmatmul.mubr.msk.bf16.gmra.mrb[36].mxu0 %vm711_vm0, %v626_v34  ;;  %v2488_v35 = vpop.trf.xlu1 }
 0x235   : > { %5442 = vmatprep.mubr.msk.bf16.mxu1 %vm711_vm0, %v2488_v35 }
 0x237   : > { %v627_v36 = vpop.trf.xlu0 }
 0x238   : > { %5264 = vmatprep.mubr.msk.bf16.mxu0 %vm711_vm0, %v627_v36  ;;  %v2489_v37 = vpop.trf.xlu1 }
 0x239   : > { %5443 = vmatmul.mubr.msk.bf16.gmra.mrb[88].mxu1 %vm711_vm0, %v2489_v37 }
 0x23b   : > { %v628_v60 = vpop.trf.xlu0 }
 0x23c   : > { %5265 = vmatmul.mubr.msk.bf16.gmra.mrb[40].mxu0 %vm711_vm0, %v628_v60  ;;  %v2490_v63 = vpop.trf.xlu1 }
 0x23d   : > { %5446 = vmatprep.mubr.msk.bf16.mxu1 %vm711_vm0, %v2490_v63 }
 0x23f   : > { %v629_v7 = vpop.trf.xlu0 }
 0x240   : > { %5268 = vmatprep.mubr.msk.bf16.mxu0 %vm711_vm0, %v629_v7  ;;  %v2491_v17 = vpop.trf.xlu1 }
 0x241   : > { %5447 = vmatmul.mubr.msk.bf16.gmra.mrb[92].mxu1 %vm711_vm0, %v2491_v17 }
 0x243   : > { %v630_v22 = vpop.trf.xlu0 }
 0x244   : > { %5269 = vmatmul.mubr.msk.bf16.gmra.mrb[44].mxu0 %vm711_vm0, %v630_v22  ;;  %v2500_v38 = vpop.trf.xlu1 }
 0x245   : > { %5450 = vmatprep.mubr.msk.bf16.mxu1 %vm711_vm0, %v2500_v38 }
 0x247   : > { %v639_v10 = vpop.trf.xlu0 }
 0x248   : > { %5272 = vmatprep.mubr.msk.bf16.mxu0 %vm711_vm0, %v639_v10  ;;  %v2501_v9 = vpop.trf.xlu1 }
 0x249   : > { %5451 = vmatmul.mubr.msk.bf16.gmra.mrb[96].mxu1 %vm711_vm0, %v2501_v9 }
 0x24b   : > { %v640_v39 = vpop.trf.xlu0 }
 0x24c   : > { %695 = vxpose.xlu0.c.b16.start.end [1/1] (short) %v573_v11, 128  ;;  %5273 = vmatmul.mubr.msk.bf16.gmra.mrb[48].mxu0 %vm711_vm0, %v640_v39  ;;  %v2502_v28 = vpop.trf.xlu1  ;;  %v6519_v11 = vld [vmem:[#allocation13] ss:$0 sm:$0xff] }
 0x24d   : > { %5454 = vmatprep.mubr.msk.bf16.mxu1 %vm711_vm0, %v2502_v28 }
 0x24f   : > { %v641_v40 = vpop.trf.xlu0 }
 0x250   : > { %5276 = vmatprep.mubr.msk.bf16.mxu0 %vm711_vm0, %v641_v40  ;;  %v2503_v27 = vpop.trf.xlu1 }
 0x251   : > { %5455 = vmatmul.mubr.msk.bf16.gmra.mrb[100].mxu1 %vm711_vm0, %v2503_v27 }
 0x253   : > { %v642_v41 = vpop.trf.xlu0 }
 0x254   : > { %5277 = vmatmul.mubr.msk.bf16.gmra.mrb[52].mxu0 %vm711_vm0, %v642_v41  ;;  %v2504_v42 = vpop.trf.xlu1 }
 0x255   : > { %5458 = vmatprep.mubr.msk.bf16.mxu1 %vm711_vm0, %v2504_v42 }
 0x257   : > { %v643_v4 = vpop.trf.xlu0 }
 0x258   : > { %5280 = vmatprep.mubr.msk.bf16.mxu0 %vm711_vm0, %v643_v4  ;;  %v2505_v8 = vpop.trf.xlu1 }
 0x259   : > { %5459 = vmatmul.mubr.msk.bf16.gmra.mrb[104].mxu1 %vm711_vm0, %v2505_v8 }
 0x25b   : > { %v644_v43 = vpop.trf.xlu0 }
 0x25c   : > { %5281 = vmatmul.mubr.msk.bf16.gmra.mrb[56].mxu0 %vm711_vm0, %v644_v43  ;;  %v5356_v44 = vpop.f32.mrb[0].mxu1  ;;  %v2506_v45 = vpop.trf.xlu1 }
 0x25d   : > { %v2762_v47 = vadd.f32 %v5356_v44, %v6519_v11  ;;  %v2753_v48 = vpop.f32.mrb[1].mxu1  ;;  %5462 = vmatprep.mubr.msk.bf16.mxu1 %vm711_vm0, %v2506_v45 }
 0x25e   : > { %v2754_v49 = vadd.f32 %v6519_v11, %v2753_v48  ;;  %v5357_v46 = vpop.f32.mrb[2].mxu1 }
 0x25f   : > { %v645_v50 = vpop.trf.xlu0  ;;  %v3266_v52 = vmax.f32 %v2762_v47, 0.0  ;;  %v2765_v53 = vadd.f32 %v5357_v46, %v6519_v11  ;;  %v2756_v54 = vpop.f32.mrb[3].mxu1 }
 0x260   : > { %5284 = vmatprep.mubr.msk.bf16.mxu0 %vm711_vm0, %v645_v50  ;;  %v3264_v18 = vmax.f32 %v2754_v49, 0.0  ;;  %v2757_v25 = vadd.f32 %v6519_v11, %v2756_v54  ;;  %v2507_v56 = vpop.trf.xlu1 }
 0x261   : > { %v3394_v57 = vmin.f32 %v3266_v52, 6.0  ;;  %v3267_v58 = vmax.f32 %v2765_v53, 0.0  ;;  %5463 = vmatmul.mubr.msk.bf16.gmra.mrb[108].mxu1 %vm711_vm0, %v2507_v56 }
 0x262   : > { %v3392_v59 = vmin.f32 %v3264_v18, 6.0  ;;  %v3265_v0 = vmax.f32 %v2757_v25, 0.0 }
 0x263   : > { %v646_v1 = vpop.trf.xlu0  ;;  %v4964_v51 = vpack.c.bf16 %v3394_v57, %v3394_v57  ;;  %v3395_v61 = vmin.f32 %v3267_v58, 6.0 }
 0x264   : > { %5285 = vmatmul.mubr.msk.bf16.gmra.mrb[60].mxu0 %vm711_vm0, %v646_v1  ;;  %v4962_v2 = vpack.c.bf16 %v3392_v59, %v3392_v59  ;;  %v3393_v3 = vmin.f32 %v3265_v0, 6.0  ;;  %v5360_v5 = vpop.f32.mrb[4].mxu1  ;;  %v2516_v12 = vpop.trf.xlu1 }
 0x265   : > { %4034 = vst.msk [vmem:[%s6533_s26 + $0x8] sm:$0xf] %vm2220_vm1, %v4964_v51  ;;  %v4965_v13 = vpack.c.bf16 %v3395_v61, %v3395_v61  ;;  %v2778_v14 = vadd.f32 %v5360_v5, %v6519_v11  ;;  %v2769_v15 = vpop.f32.mrb[5].mxu1  ;;  %5466 = vmatprep.mubr.msk.bf16.mxu1 %vm711_vm0, %v2516_v12 }
 0x266   : > { %4032 = vst.msk [vmem:[%s6533_s26] sm:$0xf] %vm2220_vm1, %v4962_v2  ;;  %v4963_v16 = vpack.c.bf16 %v3393_v3, %v3393_v3  ;;  %v2770_v19 = vadd.f32 %v6519_v11, %v2769_v15  ;;  %v5361_v20 = vpop.f32.mrb[6].mxu1 }
 0x267   : > { %v655_v21 = vpop.trf.xlu0  ;;  %4035 = vst.msk [vmem:[%s6533_s26 + $0xc] sm:$0xf] %vm2220_vm1, %v4965_v13  ;;  %v3270_v23 = vmax.f32 %v2778_v14, 0.0  ;;  %v2781_v55 = vadd.f32 %v5361_v20, %v6519_v11  ;;  %v2772_v62 = vpop.f32.mrb[7].mxu1 }
 0x268   : > { %5288 = vmatprep.mubr.msk.bf16.mxu0 %vm711_vm0, %v655_v21  ;;  %4033 = vst.msk [vmem:[%s6533_s26 + $0x4] sm:$0xf] %vm2220_vm1, %v4963_v16  ;;  %v3268_v6 = vmax.f32 %v2770_v19, 0.0  ;;  %v2773_v24 = vadd.f32 %v6519_v11, %v2772_v62  ;;  %v2517_v26 = vpop.trf.xlu1 }
 0x269   : > { %v3398_v29 = vmin.f32 %v3270_v23, 6.0  ;;  %v3271_v30 = vmax.f32 %v2781_v55, 0.0  ;;  %5467 = vmatmul.mubr.msk.bf16.gmra.mrb[112].mxu1 %vm711_vm0, %v2517_v26 }
 0x26a   : > { %v3396_v31 = vmin.f32 %v3268_v6, 6.0  ;;  %v3269_v32 = vmax.f32 %v2773_v24, 0.0 }
 0x26b   : > { %v656_v33 = vpop.trf.xlu0  ;;  %v4968_v34 = vpack.c.bf16 %v3398_v29, %v3398_v29  ;;  %v3399_v35 = vmin.f32 %v3271_v30, 6.0 }
 0x26c   : > { %5289 = vmatmul.mubr.msk.bf16.gmra.mrb[64].mxu0 %vm711_vm0, %v656_v33  ;;  %v4966_v36 = vpack.c.bf16 %v3396_v31, %v3396_v31  ;;  %v3397_v37 = vmin.f32 %v3269_v32, 6.0  ;;  %v5364_v60 = vpop.f32.mrb[8].mxu1  ;;  %v2518_v63 = vpop.trf.xlu1 }
 0x26d   : > { %4038 = vst.msk [vmem:[%s6533_s26 + $0x18] sm:$0xf] %vm2220_vm1, %v4968_v34  ;;  %v4969_v7 = vpack.c.bf16 %v3399_v35, %v3399_v35  ;;  %v2794_v17 = vadd.f32 %v5364_v60, %v6519_v11  ;;  %v2785_v22 = vpop.f32.mrb[9].mxu1  ;;  %5470 = vmatprep.mubr.msk.bf16.mxu1 %vm711_vm0, %v2518_v63 }
 0x26e   : > { %4036 = vst.msk [vmem:[%s6533_s26 + $0x10] sm:$0xf] %vm2220_vm1, %v4966_v36  ;;  %v4967_v38 = vpack.c.bf16 %v3397_v37, %v3397_v37  ;;  %v2786_v10 = vadd.f32 %v6519_v11, %v2785_v22  ;;  %v5365_v9 = vpop.f32.mrb[10].mxu1 }
 0x26f   : > { %v657_v39 = vpop.trf.xlu0  ;;  %4039 = vst.msk [vmem:[%s6533_s26 + $0x1c] sm:$0xf] %vm2220_vm1, %v4969_v7  ;;  %v3274_v28 = vmax.f32 %v2794_v17, 0.0  ;;  %v2797_v40 = vadd.f32 %v5365_v9, %v6519_v11  ;;  %v2788_v27 = vpop.f32.mrb[11].mxu1 }
 0x270   : > { %5292 = vmatprep.mubr.msk.bf16.mxu0 %vm711_vm0, %v657_v39  ;;  %4037 = vst.msk [vmem:[%s6533_s26 + $0x14] sm:$0xf] %vm2220_vm1, %v4967_v38  ;;  %v3272_v41 = vmax.f32 %v2786_v10, 0.0  ;;  %v2789_v42 = vadd.f32 %v6519_v11, %v2788_v27  ;;  %v2519_v4 = vpop.trf.xlu1 }
 0x271   : > { %v3402_v8 = vmin.f32 %v3274_v28, 6.0  ;;  %v3275_v43 = vmax.f32 %v2797_v40, 0.0  ;;  %5471 = vmatmul.mubr.msk.bf16.gmra.mrb[116].mxu1 %vm711_vm0, %v2519_v4 }
 0x272   : > { %v3400_v44 = vmin.f32 %v3272_v41, 6.0  ;;  %v3273_v45 = vmax.f32 %v2789_v42, 0.0 }
 0x273   : > { %v658_v47 = vpop.trf.xlu0  ;;  %v4972_v48 = vpack.c.bf16 %v3402_v8, %v3402_v8  ;;  %v3403_v49 = vmin.f32 %v3275_v43, 6.0 }
 0x274   : > { %5293 = vmatmul.mubr.msk.bf16.gmra.mrb[68].mxu0 %vm711_vm0, %v658_v47  ;;  %v4970_v46 = vpack.c.bf16 %v3400_v44, %v3400_v44  ;;  %v3401_v50 = vmin.f32 %v3273_v45, 6.0  ;;  %v5368_v52 = vpop.f32.mrb[12].mxu1  ;;  %v2520_v53 = vpop.trf.xlu1 }
 0x275   : > { %4042 = vst.msk [vmem:[%s6533_s26 + $0x28] sm:$0xf] %vm2220_vm1, %v4972_v48  ;;  %v4973_v54 = vpack.c.bf16 %v3403_v49, %v3403_v49  ;;  %v2810_v18 = vadd.f32 %v5368_v52, %v6519_v11  ;;  %v2801_v25 = vpop.f32.mrb[13].mxu1  ;;  %5474 = vmatprep.mubr.msk.bf16.mxu1 %vm711_vm0, %v2520_v53 }
 0x276   : > { %4040 = vst.msk [vmem:[%s6533_s26 + $0x20] sm:$0xf] %vm2220_vm1, %v4970_v46  ;;  %v4971_v56 = vpack.c.bf16 %v3401_v50, %v3401_v50  ;;  %v2802_v57 = vadd.f32 %v6519_v11, %v2801_v25  ;;  %v5369_v58 = vpop.f32.mrb[14].mxu1 }
 0x277   : > { %v659_v59 = vpop.trf.xlu0  ;;  %4043 = vst.msk [vmem:[%s6533_s26 + $0x2c] sm:$0xf] %vm2220_vm1, %v4973_v54  ;;  %v3278_v0 = vmax.f32 %v2810_v18, 0.0  ;;  %v2813_v1 = vadd.f32 %v5369_v58, %v6519_v11  ;;  %v2804_v51 = vpop.f32.mrb[15].mxu1 }
 0x278   : > { %5296 = vmatprep.mubr.msk.bf16.mxu0 %vm711_vm0, %v659_v59  ;;  %4041 = vst.msk [vmem:[%s6533_s26 + $0x24] sm:$0xf] %vm2220_vm1, %v4971_v56  ;;  %v3276_v61 = vmax.f32 %v2802_v57, 0.0  ;;  %v2805_v2 = vadd.f32 %v6519_v11, %v2804_v51  ;;  %v2521_v3 = vpop.trf.xlu1 }
 0x279   : > { %v3406_v5 = vmin.f32 %v3278_v0, 6.0  ;;  %v3279_v12 = vmax.f32 %v2813_v1, 0.0  ;;  %5475 = vmatmul.mubr.msk.bf16.gmra.mrb[120].mxu1 %vm711_vm0, %v2521_v3 }
 0x27a   : > { %v3404_v13 = vmin.f32 %v3276_v61, 6.0  ;;  %v3277_v14 = vmax.f32 %v2805_v2, 0.0 }
 0x27b   : > { %v660_v15 = vpop.trf.xlu0  ;;  %v4976_v16 = vpack.c.bf16 %v3406_v5, %v3406_v5  ;;  %v3407_v19 = vmin.f32 %v3279_v12, 6.0 }
 0x27c   : > { %5297 = vmatmul.mubr.msk.bf16.gmra.mrb[72].mxu0 %vm711_vm0, %v660_v15  ;;  %v4974_v20 = vpack.c.bf16 %v3404_v13, %v3404_v13  ;;  %v3405_v21 = vmin.f32 %v3277_v14, 6.0  ;;  %v5372_v23 = vpop.f32.mrb[16].mxu1  ;;  %v2522_v55 = vpop.trf.xlu1 }
 0x27d   : > { %4046 = vst.msk [vmem:[%s6533_s26 + $0x38] sm:$0xf] %vm2220_vm1, %v4976_v16  ;;  %v4977_v62 = vpack.c.bf16 %v3407_v19, %v3407_v19  ;;  %v2826_v6 = vadd.f32 %v5372_v23, %v6519_v11  ;;  %v2817_v24 = vpop.f32.mrb[17].mxu1  ;;  %5478 = vmatprep.mubr.msk.bf16.mxu1 %vm711_vm0, %v2522_v55 }
 0x27e   : > { %4044 = vst.msk [vmem:[%s6533_s26 + $0x30] sm:$0xf] %vm2220_vm1, %v4974_v20  ;;  %v4975_v26 = vpack.c.bf16 %v3405_v21, %v3405_v21  ;;  %v2818_v29 = vadd.f32 %v6519_v11, %v2817_v24  ;;  %v5373_v30 = vpop.f32.mrb[18].mxu1 }
 0x27f   : > { %v661_v31 = vpop.trf.xlu0  ;;  %4047 = vst.msk [vmem:[%s6533_s26 + $0x3c] sm:$0xf] %vm2220_vm1, %v4977_v62  ;;  %v3282_v32 = vmax.f32 %v2826_v6, 0.0  ;;  %v2829_v33 = vadd.f32 %v5373_v30, %v6519_v11  ;;  %v2820_v34 = vpop.f32.mrb[19].mxu1 }
 0x280   : > { %5300 = vmatprep.mubr.msk.bf16.mxu0 %vm711_vm0, %v661_v31  ;;  %4045 = vst.msk [vmem:[%s6533_s26 + $0x34] sm:$0xf] %vm2220_vm1, %v4975_v26  ;;  %v3280_v35 = vmax.f32 %v2818_v29, 0.0  ;;  %v2821_v36 = vadd.f32 %v6519_v11, %v2820_v34  ;;  %v2523_v37 = vpop.trf.xlu1 }
 0x281   : > { %v3410_v60 = vmin.f32 %v3282_v32, 6.0  ;;  %v3283_v63 = vmax.f32 %v2829_v33, 0.0  ;;  %5479 = vmatmul.mubr.msk.bf16.gmra.mrb[124].mxu1 %vm711_vm0, %v2523_v37 }
 0x282   : > { %v3408_v7 = vmin.f32 %v3280_v35, 6.0  ;;  %v3281_v17 = vmax.f32 %v2821_v36, 0.0 }
 0x283   : > { %v662_v22 = vpop.trf.xlu0  ;;  %v4980_v38 = vpack.c.bf16 %v3410_v60, %v3410_v60  ;;  %v3411_v10 = vmin.f32 %v3283_v63, 6.0 }
 0x284   : > { %5301 = vmatmul.mubr.msk.bf16.gmra.mrb[76].mxu0 %vm711_vm0, %v662_v22  ;;  %v4978_v9 = vpack.c.bf16 %v3408_v7, %v3408_v7  ;;  %v3409_v39 = vmin.f32 %v3281_v17, 6.0  ;;  %v5376_v28 = vpop.f32.mrb[20].mxu1 }
 0x285   : > { %4050 = vst.msk [vmem:[%s6533_s26 + $0x48] sm:$0xf] %vm2220_vm1, %v4980_v38  ;;  %v4981_v40 = vpack.c.bf16 %v3411_v10, %v3411_v10  ;;  %v2842_v27 = vadd.f32 %v5376_v28, %v6519_v11  ;;  %v2833_v41 = vpop.f32.mrb[21].mxu1 }
 0x286   : > { %4048 = vst.msk [vmem:[%s6533_s26 + $0x40] sm:$0xf] %vm2220_vm1, %v4978_v9  ;;  %v4979_v42 = vpack.c.bf16 %v3409_v39, %v3409_v39  ;;  %v2834_v4 = vadd.f32 %v6519_v11, %v2833_v41  ;;  %v5377_v8 = vpop.f32.mrb[22].mxu1 }
 0x287   : > { %v671_v43 = vpop.trf.xlu0  ;;  %4051 = vst.msk [vmem:[%s6533_s26 + $0x4c] sm:$0xf] %vm2220_vm1, %v4981_v40  ;;  %v3286_v44 = vmax.f32 %v2842_v27, 0.0  ;;  %v2845_v45 = vadd.f32 %v5377_v8, %v6519_v11  ;;  %v2836_v47 = vpop.f32.mrb[23].mxu1 }
 0x288   : > { %5304 = vmatprep.mubr.msk.bf16.mxu0 %vm711_vm0, %v671_v43  ;;  %4049 = vst.msk [vmem:[%s6533_s26 + $0x44] sm:$0xf] %vm2220_vm1, %v4979_v42  ;;  %v3284_v48 = vmax.f32 %v2834_v4, 0.0  ;;  %v2837_v49 = vadd.f32 %v6519_v11, %v2836_v47 }
 0x289   : > { %v3414_v46 = vmin.f32 %v3286_v44, 6.0  ;;  %v3287_v50 = vmax.f32 %v2845_v45, 0.0 }
 0x28a   : > { %v3412_v52 = vmin.f32 %v3284_v48, 6.0  ;;  %v3285_v53 = vmax.f32 %v2837_v49, 0.0 }
 0x28b   : > { %v672_v54 = vpop.trf.xlu0  ;;  %v4984_v18 = vpack.c.bf16 %v3414_v46, %v3414_v46  ;;  %v3415_v25 = vmin.f32 %v3287_v50, 6.0 }
 0x28c   : > { %5305 = vmatmul.mubr.msk.bf16.gmra.mrb[80].mxu0 %vm711_vm0, %v672_v54  ;;  %v4982_v56 = vpack.c.bf16 %v3412_v52, %v3412_v52  ;;  %v3413_v57 = vmin.f32 %v3285_v53, 6.0  ;;  %v5380_v58 = vpop.f32.mrb[24].mxu1 }
 0x28d   : > { %4054 = vst.msk [vmem:[%s6533_s26 + $0x58] sm:$0xf] %vm2220_vm1, %v4984_v18  ;;  %v4985_v59 = vpack.c.bf16 %v3415_v25, %v3415_v25  ;;  %v2858_v0 = vadd.f32 %v5380_v58, %v6519_v11  ;;  %v2849_v1 = vpop.f32.mrb[25].mxu1 }
 0x28e   : > { %4052 = vst.msk [vmem:[%s6533_s26 + $0x50] sm:$0xf] %vm2220_vm1, %v4982_v56  ;;  %v4983_v51 = vpack.c.bf16 %v3413_v57, %v3413_v57  ;;  %v2850_v61 = vadd.f32 %v6519_v11, %v2849_v1  ;;  %v5381_v2 = vpop.f32.mrb[26].mxu1 }
 0x28f   : > { %v673_v3 = vpop.trf.xlu0  ;;  %4055 = vst.msk [vmem:[%s6533_s26 + $0x5c] sm:$0xf] %vm2220_vm1, %v4985_v59  ;;  %v3290_v5 = vmax.f32 %v2858_v0, 0.0  ;;  %v2861_v12 = vadd.f32 %v5381_v2, %v6519_v11  ;;  %v2852_v13 = vpop.f32.mrb[27].mxu1 }
 0x290   : > { %5308 = vmatprep.mubr.msk.bf16.mxu0 %vm711_vm0, %v673_v3  ;;  %4053 = vst.msk [vmem:[%s6533_s26 + $0x54] sm:$0xf] %vm2220_vm1, %v4983_v51  ;;  %v3288_v14 = vmax.f32 %v2850_v61, 0.0  ;;  %v2853_v15 = vadd.f32 %v6519_v11, %v2852_v13 }
 0x291   : > { %v3418_v16 = vmin.f32 %v3290_v5, 6.0  ;;  %v3291_v19 = vmax.f32 %v2861_v12, 0.0 }
 0x292   : > { %v3416_v20 = vmin.f32 %v3288_v14, 6.0  ;;  %v3289_v21 = vmax.f32 %v2853_v15, 0.0 }
 0x293   : > { %v674_v23 = vpop.trf.xlu0  ;;  %v4988_v55 = vpack.c.bf16 %v3418_v16, %v3418_v16  ;;  %v3419_v62 = vmin.f32 %v3291_v19, 6.0 }
 0x294   : > { %5309 = vmatmul.mubr.msk.bf16.gmra.mrb[84].mxu0 %vm711_vm0, %v674_v23  ;;  %v4986_v6 = vpack.c.bf16 %v3416_v20, %v3416_v20  ;;  %v3417_v24 = vmin.f32 %v3289_v21, 6.0  ;;  %v5384_v26 = vpop.f32.mrb[28].mxu1 }
 0x295   : > { %4058 = vst.msk [vmem:[%s6533_s26 + $0x68] sm:$0xf] %vm2220_vm1, %v4988_v55  ;;  %v4989_v29 = vpack.c.bf16 %v3419_v62, %v3419_v62  ;;  %v2874_v30 = vadd.f32 %v5384_v26, %v6519_v11  ;;  %v2865_v31 = vpop.f32.mrb[29].mxu1 }
 0x296   : > { %4056 = vst.msk [vmem:[%s6533_s26 + $0x60] sm:$0xf] %vm2220_vm1, %v4986_v6  ;;  %v4987_v32 = vpack.c.bf16 %v3417_v24, %v3417_v24  ;;  %v2866_v33 = vadd.f32 %v6519_v11, %v2865_v31  ;;  %v5385_v34 = vpop.f32.mrb[30].mxu1 }
 0x297   : > { %v675_v35 = vpop.trf.xlu0  ;;  %4059 = vst.msk [vmem:[%s6533_s26 + $0x6c] sm:$0xf] %vm2220_vm1, %v4989_v29  ;;  %v3294_v36 = vmax.f32 %v2874_v30, 0.0  ;;  %v2877_v37 = vadd.f32 %v5385_v34, %v6519_v11  ;;  %v2868_v60 = vpop.f32.mrb[31].mxu1 }
 0x298   : > { %5312 = vmatprep.mubr.msk.bf16.mxu0 %vm711_vm0, %v675_v35  ;;  %4057 = vst.msk [vmem:[%s6533_s26 + $0x64] sm:$0xf] %vm2220_vm1, %v4987_v32  ;;  %v3292_v63 = vmax.f32 %v2866_v33, 0.0  ;;  %v2869_v7 = vadd.f32 %v6519_v11, %v2868_v60 }
 0x299   : > { %v3422_v17 = vmin.f32 %v3294_v36, 6.0  ;;  %v3295_v22 = vmax.f32 %v2877_v37, 0.0 }
 0x29a   : > { %v3420_v38 = vmin.f32 %v3292_v63, 6.0  ;;  %v3293_v10 = vmax.f32 %v2869_v7, 0.0 }
 0x29b   : > { %v676_v9 = vpop.trf.xlu0  ;;  %v4992_v39 = vpack.c.bf16 %v3422_v17, %v3422_v17  ;;  %v3423_v28 = vmin.f32 %v3295_v22, 6.0 }
 0x29c   : > { %5313 = vmatmul.mubr.msk.bf16.gmra.mrb[88].mxu0 %vm711_vm0, %v676_v9  ;;  %v4990_v40 = vpack.c.bf16 %v3420_v38, %v3420_v38  ;;  %v3421_v27 = vmin.f32 %v3293_v10, 6.0  ;;  %v5388_v41 = vpop.f32.mrb[32].mxu1 }
 0x29d   : > { %4062 = vst.msk [vmem:[%s6533_s26 + $0x78] sm:$0xf] %vm2220_vm1, %v4992_v39  ;;  %v4993_v42 = vpack.c.bf16 %v3423_v28, %v3423_v28  ;;  %v2890_v4 = vadd.f32 %v5388_v41, %v6519_v11  ;;  %v2881_v8 = vpop.f32.mrb[33].mxu1 }
 0x29e   : > { %4060 = vst.msk [vmem:[%s6533_s26 + $0x70] sm:$0xf] %vm2220_vm1, %v4990_v40  ;;  %v4991_v43 = vpack.c.bf16 %v3421_v27, %v3421_v27  ;;  %v2882_v44 = vadd.f32 %v6519_v11, %v2881_v8  ;;  %v5389_v45 = vpop.f32.mrb[34].mxu1 }
 0x29f   : > { %v677_v47 = vpop.trf.xlu0  ;;  %4063 = vst.msk [vmem:[%s6533_s26 + $0x7c] sm:$0xf] %vm2220_vm1, %v4993_v42  ;;  %v3298_v48 = vmax.f32 %v2890_v4, 0.0  ;;  %v2893_v49 = vadd.f32 %v5389_v45, %v6519_v11  ;;  %v2884_v46 = vpop.f32.mrb[35].mxu1 }
 0x2a0   : > { %5316 = vmatprep.mubr.msk.bf16.mxu0 %vm711_vm0, %v677_v47  ;;  %4061 = vst.msk [vmem:[%s6533_s26 + $0x74] sm:$0xf] %vm2220_vm1, %v4991_v43  ;;  %v3296_v50 = vmax.f32 %v2882_v44, 0.0  ;;  %v2885_v52 = vadd.f32 %v6519_v11, %v2884_v46 }
 0x2a1   : > { %v3426_v53 = vmin.f32 %v3298_v48, 6.0  ;;  %v3299_v54 = vmax.f32 %v2893_v49, 0.0 }
 0x2a2   : > { %v3424_v18 = vmin.f32 %v3296_v50, 6.0  ;;  %v3297_v25 = vmax.f32 %v2885_v52, 0.0 }
 0x2a3   : > { %v678_v56 = vpop.trf.xlu0  ;;  %v4996_v57 = vpack.c.bf16 %v3426_v53, %v3426_v53  ;;  %v3427_v58 = vmin.f32 %v3299_v54, 6.0 }
 0x2a4   : > { %5317 = vmatmul.mubr.msk.bf16.gmra.mrb[92].mxu0 %vm711_vm0, %v678_v56  ;;  %v4994_v59 = vpack.c.bf16 %v3424_v18, %v3424_v18  ;;  %v3425_v0 = vmin.f32 %v3297_v25, 6.0  ;;  %v5392_v1 = vpop.f32.mrb[36].mxu1 }
 0x2a5   : > { %4066 = vst.msk [vmem:[%s6533_s26 + $0x88] sm:$0xf] %vm2220_vm1, %v4996_v57  ;;  %v4997_v51 = vpack.c.bf16 %v3427_v58, %v3427_v58  ;;  %v2906_v61 = vadd.f32 %v5392_v1, %v6519_v11  ;;  %v2897_v2 = vpop.f32.mrb[37].mxu1 }
 0x2a6   : > { %4064 = vst.msk [vmem:[%s6533_s26 + $0x80] sm:$0xf] %vm2220_vm1, %v4994_v59  ;;  %v4995_v3 = vpack.c.bf16 %v3425_v0, %v3425_v0  ;;  %v2898_v5 = vadd.f32 %v6519_v11, %v2897_v2  ;;  %v5393_v12 = vpop.f32.mrb[38].mxu1 }
 0x2a7   : > { %v687_v13 = vpop.trf.xlu0  ;;  %4067 = vst.msk [vmem:[%s6533_s26 + $0x8c] sm:$0xf] %vm2220_vm1, %v4997_v51  ;;  %v3302_v14 = vmax.f32 %v2906_v61, 0.0  ;;  %v2909_v15 = vadd.f32 %v5393_v12, %v6519_v11  ;;  %v2900_v16 = vpop.f32.mrb[39].mxu1 }
 0x2a8   : > { %5320 = vmatprep.mubr.msk.bf16.mxu0 %vm711_vm0, %v687_v13  ;;  %4065 = vst.msk [vmem:[%s6533_s26 + $0x84] sm:$0xf] %vm2220_vm1, %v4995_v3  ;;  %v3300_v19 = vmax.f32 %v2898_v5, 0.0  ;;  %v2901_v20 = vadd.f32 %v6519_v11, %v2900_v16  ;;  %v6697_v3 = vld [vmem:[#allocation10] ss:$0 sm:$0xff] }
 0x2a9   : > { %v3430_v21 = vmin.f32 %v3302_v14, 6.0  ;;  %v3303_v23 = vmax.f32 %v2909_v15, 0.0 }
 0x2aa   : > { %v3428_v55 = vmin.f32 %v3300_v19, 6.0  ;;  %v3301_v62 = vmax.f32 %v2901_v20, 0.0 }
 0x2ab   : > { %v688_v6 = vpop.trf.xlu0  ;;  %v5000_v24 = vpack.c.bf16 %v3430_v21, %v3430_v21  ;;  %v3431_v26 = vmin.f32 %v3303_v23, 6.0 }
 0x2ac   : > { %5321 = vmatmul.mubr.msk.bf16.gmra.mrb[96].mxu0 %vm711_vm0, %v688_v6  ;;  %v4998_v29 = vpack.c.bf16 %v3428_v55, %v3428_v55  ;;  %v3429_v30 = vmin.f32 %v3301_v62, 6.0  ;;  %v5396_v31 = vpop.f32.mrb[40].mxu1 }
 0x2ad   : > { %4070 = vst.msk [vmem:[%s6533_s26 + $0x98] sm:$0xf] %vm2220_vm1, %v5000_v24  ;;  %v5001_v32 = vpack.c.bf16 %v3431_v26, %v3431_v26  ;;  %v2922_v33 = vadd.f32 %v5396_v31, %v6519_v11  ;;  %v2913_v34 = vpop.f32.mrb[41].mxu1 }
 0x2ae   : > { %4068 = vst.msk [vmem:[%s6533_s26 + $0x90] sm:$0xf] %vm2220_vm1, %v4998_v29  ;;  %v4999_v35 = vpack.c.bf16 %v3429_v30, %v3429_v30  ;;  %v2914_v36 = vadd.f32 %v6519_v11, %v2913_v34  ;;  %v5397_v37 = vpop.f32.mrb[42].mxu1 }
 0x2af   : > { %v689_v60 = vpop.trf.xlu0  ;;  %4071 = vst.msk [vmem:[%s6533_s26 + $0x9c] sm:$0xf] %vm2220_vm1, %v5001_v32  ;;  %v3306_v63 = vmax.f32 %v2922_v33, 0.0  ;;  %v2925_v7 = vadd.f32 %v5397_v37, %v6519_v11  ;;  %v2916_v17 = vpop.f32.mrb[43].mxu1 }
 0x2b0   : > { %5324 = vmatprep.mubr.msk.bf16.mxu0 %vm711_vm0, %v689_v60  ;;  %4069 = vst.msk [vmem:[%s6533_s26 + $0x94] sm:$0xf] %vm2220_vm1, %v4999_v35  ;;  %v3304_v22 = vmax.f32 %v2914_v36, 0.0  ;;  %v2917_v38 = vadd.f32 %v6519_v11, %v2916_v17 }
 0x2b1   : > { %v3434_v10 = vmin.f32 %v3306_v63, 6.0  ;;  %v3307_v9 = vmax.f32 %v2925_v7, 0.0 }
 0x2b2   : > { %v3432_v39 = vmin.f32 %v3304_v22, 6.0  ;;  %v3305_v28 = vmax.f32 %v2917_v38, 0.0 }
 0x2b3   : > { %v690_v40 = vpop.trf.xlu0  ;;  %v5004_v27 = vpack.c.bf16 %v3434_v10, %v3434_v10  ;;  %v3435_v41 = vmin.f32 %v3307_v9, 6.0 }
 0x2b4   : > { %5325 = vmatmul.mubr.msk.bf16.gmra.mrb[100].mxu0 %vm711_vm0, %v690_v40  ;;  %v5002_v42 = vpack.c.bf16 %v3432_v39, %v3432_v39  ;;  %v3433_v4 = vmin.f32 %v3305_v28, 6.0  ;;  %v5400_v8 = vpop.f32.mrb[44].mxu1 }
 0x2b5   : > { %4074 = vst.msk [vmem:[%s6533_s26 + $0xa8] sm:$0xf] %vm2220_vm1, %v5004_v27  ;;  %v5005_v43 = vpack.c.bf16 %v3435_v41, %v3435_v41  ;;  %v2938_v44 = vadd.f32 %v5400_v8, %v6519_v11  ;;  %v2929_v45 = vpop.f32.mrb[45].mxu1 }
 0x2b6   : > { %4072 = vst.msk [vmem:[%s6533_s26 + $0xa0] sm:$0xf] %vm2220_vm1, %v5002_v42  ;;  %v5003_v47 = vpack.c.bf16 %v3433_v4, %v3433_v4  ;;  %v2930_v48 = vadd.f32 %v6519_v11, %v2929_v45  ;;  %v5401_v49 = vpop.f32.mrb[46].mxu1 }
 0x2b7   : > { %v691_v46 = vpop.trf.xlu0  ;;  %4075 = vst.msk [vmem:[%s6533_s26 + $0xac] sm:$0xf] %vm2220_vm1, %v5005_v43  ;;  %v3310_v50 = vmax.f32 %v2938_v44, 0.0  ;;  %v2941_v52 = vadd.f32 %v5401_v49, %v6519_v11  ;;  %v2932_v53 = vpop.f32.mrb[47].mxu1 }
 0x2b8   : > { %5328 = vmatprep.mubr.msk.bf16.mxu0 %vm711_vm0, %v691_v46  ;;  %4073 = vst.msk [vmem:[%s6533_s26 + $0xa4] sm:$0xf] %vm2220_vm1, %v5003_v47  ;;  %v3308_v54 = vmax.f32 %v2930_v48, 0.0  ;;  %v2933_v18 = vadd.f32 %v6519_v11, %v2932_v53 }
 0x2b9   : > { %v3438_v25 = vmin.f32 %v3310_v50, 6.0  ;;  %v3311_v56 = vmax.f32 %v2941_v52, 0.0 }
 0x2ba   : > { %v3436_v57 = vmin.f32 %v3308_v54, 6.0  ;;  %v3309_v58 = vmax.f32 %v2933_v18, 0.0 }
 0x2bb   : > { %v692_v59 = vpop.trf.xlu0  ;;  %v5008_v0 = vpack.c.bf16 %v3438_v25, %v3438_v25  ;;  %v3439_v1 = vmin.f32 %v3311_v56, 6.0 }
 0x2bc   : > { %5329 = vmatmul.mubr.msk.bf16.gmra.mrb[104].mxu0 %vm711_vm0, %v692_v59  ;;  %v5006_v51 = vpack.c.bf16 %v3436_v57, %v3436_v57  ;;  %v3437_v61 = vmin.f32 %v3309_v58, 6.0  ;;  %v5404_v2 = vpop.f32.mrb[48].mxu1 }
 0x2bd   : > { %4078 = vst.msk [vmem:[%s6533_s26 + $0xb8] sm:$0xf] %vm2220_vm1, %v5008_v0  ;;  %v5009_v5 = vpack.c.bf16 %v3439_v1, %v3439_v1  ;;  %v2954_v12 = vadd.f32 %v5404_v2, %v6519_v11  ;;  %v2945_v13 = vpop.f32.mrb[49].mxu1 }
 0x2be   : > { %4076 = vst.msk [vmem:[%s6533_s26 + $0xb0] sm:$0xf] %vm2220_vm1, %v5006_v51  ;;  %v5007_v14 = vpack.c.bf16 %v3437_v61, %v3437_v61  ;;  %v2946_v15 = vadd.f32 %v6519_v11, %v2945_v13  ;;  %v5405_v16 = vpop.f32.mrb[50].mxu1 }
 0x2bf   : > { %v5226_v19 = vpop.f32.mrb[0].mxu0  ;;  %v693_v20 = vpop.trf.xlu0  ;;  %4079 = vst.msk [vmem:[%s6533_s26 + $0xbc] sm:$0xf] %vm2220_vm1, %v5009_v5  ;;  %v3314_v21 = vmax.f32 %v2954_v12, 0.0  ;;  %v2957_v23 = vadd.f32 %v5405_v16, %v6519_v11 }
 0x2c0   : > { %v950_v55 = vadd.f32 %v5226_v19, %v6697_v3  ;;  %v941_v62 = vpop.f32.mrb[1].mxu0  ;;  %5332 = vmatprep.mubr.msk.bf16.mxu0 %vm711_vm0, %v693_v20  ;;  %4077 = vst.msk [vmem:[%s6533_s26 + $0xb4] sm:$0xf] %vm2220_vm1, %v5007_v14  ;;  %v3312_v6 = vmax.f32 %v2946_v15, 0.0  ;;  %v2948_v24 = vpop.f32.mrb[51].mxu1 }
 0x2c1   : > { %v942_v26 = vadd.f32 %v6697_v3, %v941_v62  ;;  %v5227_v29 = vpop.f32.mrb[2].mxu0  ;;  %v3442_v30 = vmin.f32 %v3314_v21, 6.0  ;;  %v3315_v31 = vmax.f32 %v2957_v23, 0.0  ;;  %v2949_v32 = vadd.f32 %v6519_v11, %v2948_v24 }
 0x2c2   : > { %v1454_v33 = vmax.f32 %v950_v55, 0.0  ;;  %v953_v34 = vadd.f32 %v5227_v29, %v6697_v3  ;;  %v944_v35 = vpop.f32.mrb[3].mxu0  ;;  %v3440_v36 = vmin.f32 %v3312_v6, 6.0 }
 0x2c3   : > { %v1452_v37 = vmax.f32 %v942_v26, 0.0  ;;  %v945_v60 = vadd.f32 %v6697_v3, %v944_v35  ;;  %v694_v63 = vpop.trf.xlu0  ;;  %v5012_v7 = vpack.c.bf16 %v3442_v30, %v3442_v30  ;;  %v3443_v17 = vmin.f32 %v3315_v31, 6.0 }
 0x2c4   : > { %v1582_v22 = vmin.f32 %v1454_v33, 6.0  ;;  %v1455_v38 = vmax.f32 %v953_v34, 0.0  ;;  %5333 = vmatmul.mubr.msk.bf16.gmra.mrb[108].mxu0 %vm711_vm0, %v694_v63  ;;  %v5010_v10 = vpack.c.bf16 %v3440_v36, %v3440_v36  ;;  %v3313_v9 = vmax.f32 %v2949_v32, 0.0  ;;  %v5408_v39 = vpop.f32.mrb[52].mxu1 }
 0x2c5   : > { %v1580_v28 = vmin.f32 %v1452_v37, 6.0  ;;  %v1453_v40 = vmax.f32 %v945_v60, 0.0  ;;  %4082 = vst.msk [vmem:[%s6533_s26 + $0xc8] sm:$0xf] %vm2220_vm1, %v5012_v7  ;;  %v5013_v27 = vpack.c.bf16 %v3443_v17, %v3443_v17  ;;  %v2970_v41 = vadd.f32 %v5408_v39, %v6519_v11  ;;  %v2961_v42 = vpop.f32.mrb[53].mxu1 }
 0x2c6   : > { %v4836_v4 = vpack.c.bf16 %v1582_v22, %v1582_v22  ;;  %v1583_v8 = vmin.f32 %v1455_v38, 6.0  ;;  %4080 = vst.msk [vmem:[%s6533_s26 + $0xc0] sm:$0xf] %vm2220_vm1, %v5010_v10  ;;  %v3441_v43 = vmin.f32 %v3313_v9, 6.0  ;;  %v2962_v44 = vadd.f32 %v6519_v11, %v2961_v42  ;;  %v5409_v45 = vpop.f32.mrb[54].mxu1 }
 0x2c7   : > { %v4834_v47 = vpack.c.bf16 %v1580_v28, %v1580_v28  ;;  %v1581_v48 = vmin.f32 %v1453_v40, 6.0  ;;  %v5230_v49 = vpop.f32.mrb[4].mxu0  ;;  %v703_v46 = vpop.trf.xlu0  ;;  %4083 = vst.msk [vmem:[%s6533_s26 + $0xcc] sm:$0xf] %vm2220_vm1, %v5013_v27  ;;  %v3318_v50 = vmax.f32 %v2970_v41, 0.0  ;;  %v2973_v52 = vadd.f32 %v5409_v45, %v6519_v11 }
 0x2c8   : > { %2223 = vst.msk [vmem:[%s6728_s24 + $0x8] sm:$0xf] %vm2220_vm1, %v4836_v4  ;;  %v4837_v53 = vpack.c.bf16 %v1583_v8, %v1583_v8  ;;  %v966_v54 = vadd.f32 %v5230_v49, %v6697_v3  ;;  %v957_v18 = vpop.f32.mrb[5].mxu0  ;;  %5336 = vmatprep.mubr.msk.bf16.mxu0 %vm711_vm0, %v703_v46  ;;  %v5011_v25 = vpack.c.bf16 %v3441_v43, %v3441_v43  ;;  %v3316_v56 = vmax.f32 %v2962_v44, 0.0  ;;  %v2964_v57 = vpop.f32.mrb[55].mxu1 }
 0x2c9   : > { %2221 = vst.msk [vmem:[%s6728_s24] sm:$0xf] %vm2220_vm1, %v4834_v47  ;;  %v4835_v58 = vpack.c.bf16 %v1581_v48, %v1581_v48  ;;  %v958_v59 = vadd.f32 %v6697_v3, %v957_v18  ;;  %v5231_v0 = vpop.f32.mrb[6].mxu0  ;;  %v3446_v1 = vmin.f32 %v3318_v50, 6.0  ;;  %v3319_v51 = vmax.f32 %v2973_v52, 0.0 }
 0x2ca   : > { %2224 = vst.msk [vmem:[%s6728_s24 + $0xc] sm:$0xf] %vm2220_vm1, %v4837_v53  ;;  %v1458_v61 = vmax.f32 %v966_v54, 0.0  ;;  %v969_v2 = vadd.f32 %v5231_v0, %v6697_v3  ;;  %v960_v5 = vpop.f32.mrb[7].mxu0  ;;  %4081 = vst.msk [vmem:[%s6533_s26 + $0xc4] sm:$0xf] %vm2220_vm1, %v5011_v25  ;;  %v2965_v13 = vadd.f32 %v6519_v11, %v2964_v57 }
 0x2cb   : > { %v3444_v12 = vmin.f32 %v3316_v56, 6.0  ;;  %2222 = vst.msk [vmem:[%s6728_s24 + $0x4] sm:$0xf] %vm2220_vm1, %v4835_v58  ;;  %v1456_v14 = vmax.f32 %v958_v59, 0.0  ;;  %v961_v15 = vadd.f32 %v6697_v3, %v960_v5  ;;  %v704_v16 = vpop.trf.xlu0  ;;  %v5016_v19 = vpack.c.bf16 %v3446_v1, %v3446_v1 }
 0x2cc   : > { %v3447_v20 = vmin.f32 %v3319_v51, 6.0  ;;  %v1586_v21 = vmin.f32 %v1458_v61, 6.0  ;;  %v1459_v23 = vmax.f32 %v969_v2, 0.0  ;;  %5337 = vmatmul.mubr.msk.bf16.gmra.mrb[112].mxu0 %vm711_vm0, %v704_v16  ;;  %v3317_v62 = vmax.f32 %v2965_v13, 0.0  ;;  %v5412_v6 = vpop.f32.mrb[56].mxu1 }
 0x2cd   : > { %v5014_v55 = vpack.c.bf16 %v3444_v12, %v3444_v12  ;;  %v1584_v24 = vmin.f32 %v1456_v14, 6.0  ;;  %v1457_v26 = vmax.f32 %v961_v15, 0.0  ;;  %4086 = vst.msk [vmem:[%s6533_s26 + $0xd8] sm:$0xf] %vm2220_vm1, %v5016_v19  ;;  %v2986_v30 = vadd.f32 %v5412_v6, %v6519_v11  ;;  %v2977_v31 = vpop.f32.mrb[57].mxu1 }
 0x2ce   : > { %v5017_v29 = vpack.c.bf16 %v3447_v20, %v3447_v20  ;;  %v4840_v32 = vpack.c.bf16 %v1586_v21, %v1586_v21  ;;  %v1587_v33 = vmin.f32 %v1459_v23, 6.0  ;;  %v3445_v34 = vmin.f32 %v3317_v62, 6.0  ;;  %v5413_v36 = vpop.f32.mrb[58].mxu1  ;;  %v6778_v12 = vld [vmem:[#allocation13] ss:$0 sm:$0xff] }
 0x2cf   : > { %4084 = vst.msk [vmem:[%s6533_s26 + $0xd0] sm:$0xf] %vm2220_vm1, %v5014_v55  ;;  %v2978_v35 = vadd.f32 %v6519_v11, %v2977_v31  ;;  %v4838_v37 = vpack.c.bf16 %v1584_v24, %v1584_v24  ;;  %v1585_v60 = vmin.f32 %v1457_v26, 6.0  ;;  %v5234_v63 = vpop.f32.mrb[8].mxu0  ;;  %v705_v7 = vpop.trf.xlu0  ;;  %v3322_v17 = vmax.f32 %v2986_v30, 0.0 }
 0x2d0   : > { %4087 = vst.msk [vmem:[%s6533_s26 + $0xdc] sm:$0xf] %vm2220_vm1, %v5017_v29  ;;  %v2989_v22 = vadd.f32 %v5413_v36, %v6519_v11  ;;  %2227 = vst.msk [vmem:[%s6728_s24 + $0x18] sm:$0xf] %vm2220_vm1, %v4840_v32  ;;  %v4841_v38 = vpack.c.bf16 %v1587_v33, %v1587_v33  ;;  %v982_v10 = vadd.f32 %v5234_v63, %v6697_v3  ;;  %v973_v9 = vpop.f32.mrb[9].mxu0  ;;  %5340 = vmatprep.mubr.msk.bf16.mxu0 %vm711_vm0, %v705_v7  ;;  %v2980_v40 = vpop.f32.mrb[59].mxu1 }
 0x2d1   : > { %v5015_v39 = vpack.c.bf16 %v3445_v34, %v3445_v34  ;;  %v3320_v28 = vmax.f32 %v2978_v35, 0.0  ;;  %2225 = vst.msk [vmem:[%s6728_s24 + $0x10] sm:$0xf] %vm2220_vm1, %v4838_v37  ;;  %v4839_v27 = vpack.c.bf16 %v1585_v60, %v1585_v60  ;;  %v974_v41 = vadd.f32 %v6697_v3, %v973_v9  ;;  %v5235_v42 = vpop.f32.mrb[10].mxu0 }
 0x2d2   : > { %v3450_v4 = vmin.f32 %v3322_v17, 6.0  ;;  %v3323_v8 = vmax.f32 %v2989_v22, 0.0  ;;  %2228 = vst.msk [vmem:[%s6728_s24 + $0x1c] sm:$0xf] %vm2220_vm1, %v4841_v38  ;;  %v1462_v43 = vmax.f32 %v982_v10, 0.0  ;;  %v985_v44 = vadd.f32 %v5235_v42, %v6697_v3  ;;  %v976_v45 = vpop.f32.mrb[11].mxu0 }
 0x2d3   : > { %4085 = vst.msk [vmem:[%s6533_s26 + $0xd4] sm:$0xf] %vm2220_vm1, %v5015_v39  ;;  %v3448_v47 = vmin.f32 %v3320_v28, 6.0  ;;  %v2981_v48 = vadd.f32 %v6519_v11, %v2980_v40  ;;  %2226 = vst.msk [vmem:[%s6728_s24 + $0x14] sm:$0xf] %vm2220_vm1, %v4839_v27  ;;  %v1460_v49 = vmax.f32 %v974_v41, 0.0  ;;  %v977_v46 = vadd.f32 %v6697_v3, %v976_v45  ;;  %v706_v50 = vpop.trf.xlu0 }
 0x2d4   : > { %v5020_v52 = vpack.c.bf16 %v3450_v4, %v3450_v4  ;;  %v3451_v53 = vmin.f32 %v3323_v8, 6.0  ;;  %v1590_v54 = vmin.f32 %v1462_v43, 6.0  ;;  %v1463_v18 = vmax.f32 %v985_v44, 0.0  ;;  %5341 = vmatmul.mubr.msk.bf16.gmra.mrb[116].mxu0 %vm711_vm0, %v706_v50  ;;  %v5416_v57 = vpop.f32.mrb[60].mxu1 }
 0x2d5   : > { %v5018_v25 = vpack.c.bf16 %v3448_v47, %v3448_v47  ;;  %v3321_v56 = vmax.f32 %v2981_v48, 0.0  ;;  %v1588_v58 = vmin.f32 %v1460_v49, 6.0  ;;  %v1461_v59 = vmax.f32 %v977_v46, 0.0  ;;  %v2993_v51 = vpop.f32.mrb[61].mxu1 }
 0x2d6   : > { %4090 = vst.msk [vmem:[%s6533_s26 + $0xe8] sm:$0xf] %vm2220_vm1, %v5020_v52  ;;  %v5021_v0 = vpack.c.bf16 %v3451_v53, %v3451_v53  ;;  %v3002_v1 = vadd.f32 %v5416_v57, %v6519_v11  ;;  %v4844_v61 = vpack.c.bf16 %v1590_v54, %v1590_v54  ;;  %v1591_v2 = vmin.f32 %v1463_v18, 6.0  ;;  %v5417_v14 = vpop.f32.mrb[62].mxu1 }
 0x2d7   : > { %4088 = vst.msk [vmem:[%s6533_s26 + $0xe0] sm:$0xf] %vm2220_vm1, %v5018_v25  ;;  %v3449_v5 = vmin.f32 %v3321_v56, 6.0  ;;  %v2994_v13 = vadd.f32 %v6778_v12, %v2993_v51  ;;  %v4842_v15 = vpack.c.bf16 %v1588_v58, %v1588_v58  ;;  %v1589_v16 = vmin.f32 %v1461_v59, 6.0  ;;  %v5238_v19 = vpop.f32.mrb[12].mxu0  ;;  %v707_v20 = vpop.trf.xlu0 }
 0x2d8   : > { %4091 = vst.msk [vmem:[%s6533_s26 + $0xec] sm:$0xf] %vm2220_vm1, %v5021_v0  ;;  %v3326_v11 = vmax.f32 %v3002_v1, 0.0  ;;  %v3005_v21 = vadd.f32 %v6778_v12, %v5417_v14  ;;  %2231 = vst.msk [vmem:[%s6728_s24 + $0x28] sm:$0xf] %vm2220_vm1, %v4844_v61  ;;  %v4845_v23 = vpack.c.bf16 %v1591_v2, %v1591_v2  ;;  %v998_v55 = vadd.f32 %v5238_v19, %v6697_v3  ;;  %v989_v62 = vpop.f32.mrb[13].mxu0 }
 0x2d9   : > { %5344 = vmatprep.mubr.msk.bf16.mxu0 %vm711_vm0, %v707_v20  ;;  %v5019_v6 = vpack.c.bf16 %v3449_v5, %v3449_v5  ;;  %v3324_v24 = vmax.f32 %v2994_v13, 0.0  ;;  %v2996_v26 = vpop.f32.mrb[63].mxu1  ;;  %2229 = vst.msk [vmem:[%s6728_s24 + $0x20] sm:$0xf] %vm2220_vm1, %v4842_v15  ;;  %v4843_v29 = vpack.c.bf16 %v1589_v16, %v1589_v16  ;;  %v990_v30 = vadd.f32 %v6697_v3, %v989_v62  ;;  %v5239_v31 = vpop.f32.mrb[14].mxu0 }
 0x2da   : > { %v3454_v32 = vmin.f32 %v3326_v11, 6.0  ;;  %v3327_v33 = vmax.f32 %v3005_v21, 0.0  ;;  %2232 = vst.msk [vmem:[%s6728_s24 + $0x2c] sm:$0xf] %vm2220_vm1, %v4845_v23  ;;  %v1466_v34 = vmax.f32 %v998_v55, 0.0  ;;  %v1001_v35 = vadd.f32 %v5239_v31, %v6697_v3  ;;  %v992_v36 = vpop.f32.mrb[15].mxu0 }
 0x2db   : > { %4089 = vst.msk [vmem:[%s6533_s26 + $0xe4] sm:$0xf] %vm2220_vm1, %v5019_v6  ;;  %v3452_v37 = vmin.f32 %v3324_v24, 6.0  ;;  %v2997_v60 = vadd.f32 %v6778_v12, %v2996_v26  ;;  %2230 = vst.msk [vmem:[%s6728_s24 + $0x24] sm:$0xf] %vm2220_vm1, %v4843_v29  ;;  %v1464_v63 = vmax.f32 %v990_v30, 0.0  ;;  %v993_v7 = vadd.f32 %v6697_v3, %v992_v36  ;;  %v708_v17 = vpop.trf.xlu0 }
 0x2dc   : > { %v5024_v22 = vpack.c.bf16 %v3454_v32, %v3454_v32  ;;  %v3455_v38 = vmin.f32 %v3327_v33, 6.0  ;;  %v1594_v10 = vmin.f32 %v1466_v34, 6.0  ;;  %v1467_v9 = vmax.f32 %v1001_v35, 0.0  ;;  %5345 = vmatmul.mubr.msk.bf16.gmra.mrb[120].mxu0 %vm711_vm0, %v708_v17  ;;  %v5420_v40 = vpop.f32.mrb[64].mxu1 }
 0x2dd   : > { %v5022_v39 = vpack.c.bf16 %v3452_v37, %v3452_v37  ;;  %v3325_v28 = vmax.f32 %v2997_v60, 0.0  ;;  %v1592_v27 = vmin.f32 %v1464_v63, 6.0  ;;  %v1465_v41 = vmax.f32 %v993_v7, 0.0  ;;  %v3009_v8 = vpop.f32.mrb[65].mxu1 }
 0x2de   : > { %4094 = vst.msk [vmem:[%s6533_s26 + $0xf8] sm:$0xf] %vm2220_vm1, %v5024_v22  ;;  %v5025_v42 = vpack.c.bf16 %v3455_v38, %v3455_v38  ;;  %v3018_v4 = vadd.f32 %v6778_v12, %v5420_v40  ;;  %v4848_v43 = vpack.c.bf16 %v1594_v10, %v1594_v10  ;;  %v1595_v44 = vmin.f32 %v1467_v9, 6.0  ;;  %v5421_v48 = vpop.f32.mrb[66].mxu1 }
 0x2df   : > { %4092 = vst.msk [vmem:[%s6533_s26 + $0xf0] sm:$0xf] %vm2220_vm1, %v5022_v39  ;;  %v3453_v45 = vmin.f32 %v3325_v28, 6.0  ;;  %v3010_v47 = vadd.f32 %v6778_v12, %v3009_v8  ;;  %v4846_v49 = vpack.c.bf16 %v1592_v27, %v1592_v27  ;;  %v1593_v46 = vmin.f32 %v1465_v41, 6.0  ;;  %v5242_v50 = vpop.f32.mrb[16].mxu0  ;;  %v709_v52 = vpop.trf.xlu0 }
 0x2e0   : > { %4095 = vst.msk [vmem:[%s6533_s26 + $0xfc] sm:$0xf] %vm2220_vm1, %v5025_v42  ;;  %v3330_v53 = vmax.f32 %v3018_v4, 0.0  ;;  %v3021_v54 = vadd.f32 %v6778_v12, %v5421_v48  ;;  %2235 = vst.msk [vmem:[%s6728_s24 + $0x38] sm:$0xf] %vm2220_vm1, %v4848_v43  ;;  %v4849_v18 = vpack.c.bf16 %v1595_v44, %v1595_v44  ;;  %v1014_v25 = vadd.f32 %v5242_v50, %v6697_v3  ;;  %v1005_v56 = vpop.f32.mrb[17].mxu0 }
 0x2e1   : > { %5348 = vmatprep.mubr.msk.bf16.mxu0 %vm711_vm0, %v709_v52  ;;  %v5023_v57 = vpack.c.bf16 %v3453_v45, %v3453_v45  ;;  %v3328_v58 = vmax.f32 %v3010_v47, 0.0  ;;  %v3012_v59 = vpop.f32.mrb[67].mxu1  ;;  %2233 = vst.msk [vmem:[%s6728_s24 + $0x30] sm:$0xf] %vm2220_vm1, %v4846_v49  ;;  %v4847_v0 = vpack.c.bf16 %v1593_v46, %v1593_v46  ;;  %v1006_v1 = vadd.f32 %v6697_v3, %v1005_v56  ;;  %v5243_v51 = vpop.f32.mrb[18].mxu0 }
 0x2e2   : > { %v3458_v61 = vmin.f32 %v3330_v53, 6.0  ;;  %v3331_v2 = vmax.f32 %v3021_v54, 0.0  ;;  %2236 = vst.msk [vmem:[%s6728_s24 + $0x3c] sm:$0xf] %vm2220_vm1, %v4849_v18  ;;  %v1470_v5 = vmax.f32 %v1014_v25, 0.0  ;;  %v1017_v13 = vadd.f32 %v5243_v51, %v6697_v3  ;;  %v1008_v14 = vpop.f32.mrb[19].mxu0 }
 0x2e3   : > { %4093 = vst.msk [vmem:[%s6533_s26 + $0xf4] sm:$0xf] %vm2220_vm1, %v5023_v57  ;;  %v3456_v15 = vmin.f32 %v3328_v58, 6.0  ;;  %v3013_v16 = vadd.f32 %v6778_v12, %v3012_v59  ;;  %2234 = vst.msk [vmem:[%s6728_s24 + $0x34] sm:$0xf] %vm2220_vm1, %v4847_v0  ;;  %v1468_v19 = vmax.f32 %v1006_v1, 0.0  ;;  %v1009_v20 = vadd.f32 %v6697_v3, %v1008_v14  ;;  %v710_v11 = vpop.trf.xlu0 }
 0x2e4   : > { %v5028_v21 = vpack.c.bf16 %v3458_v61, %v3458_v61  ;;  %v3459_v23 = vmin.f32 %v3331_v2, 6.0  ;;  %v1598_v55 = vmin.f32 %v1470_v5, 6.0  ;;  %v1471_v62 = vmax.f32 %v1017_v13, 0.0  ;;  %5349 = vmatmul.mubr.msk.bf16.gmra.mrb[124].mxu0 %vm711_vm0, %v710_v11  ;;  %v5424_v26 = vpop.f32.mrb[68].mxu1 }
 0x2e5   : > { %v5026_v6 = vpack.c.bf16 %v3456_v15, %v3456_v15  ;;  %v3329_v24 = vmax.f32 %v3013_v16, 0.0  ;;  %v1596_v29 = vmin.f32 %v1468_v19, 6.0  ;;  %v1469_v30 = vmax.f32 %v1009_v20, 0.0  ;;  %v3025_v33 = vpop.f32.mrb[69].mxu1 }
 0x2e6   : > { %4098 = vst.msk [vmem:[%s6533_s26 + $0x108] sm:$0xf] %vm2220_vm1, %v5028_v21  ;;  %v5029_v31 = vpack.c.bf16 %v3459_v23, %v3459_v23  ;;  %v3034_v32 = vadd.f32 %v6778_v12, %v5424_v26  ;;  %v4852_v34 = vpack.c.bf16 %v1598_v55, %v1598_v55  ;;  %v1599_v35 = vmin.f32 %v1471_v62, 6.0  ;;  %v5425_v60 = vpop.f32.mrb[70].mxu1 }
 0x2e7   : > { %4096 = vst.msk [vmem:[%s6533_s26 + $0x100] sm:$0xf] %vm2220_vm1, %v5026_v6  ;;  %v3457_v36 = vmin.f32 %v3329_v24, 6.0  ;;  %v3026_v37 = vadd.f32 %v6778_v12, %v3025_v33  ;;  %v4850_v63 = vpack.c.bf16 %v1596_v29, %v1596_v29  ;;  %v1597_v7 = vmin.f32 %v1469_v30, 6.0  ;;  %v5246_v17 = vpop.f32.mrb[20].mxu0  ;;  %v3028_v10 = vpop.f32.mrb[71].mxu1 }
 0x2e8   : > { %4099 = vst.msk [vmem:[%s6533_s26 + $0x10c] sm:$0xf] %vm2220_vm1, %v5029_v31  ;;  %v3334_v22 = vmax.f32 %v3034_v32, 0.0  ;;  %v3037_v38 = vadd.f32 %v6778_v12, %v5425_v60  ;;  %2239 = vst.msk [vmem:[%s6728_s24 + $0x48] sm:$0xf] %vm2220_vm1, %v4852_v34  ;;  %v4853_v9 = vpack.c.bf16 %v1599_v35, %v1599_v35  ;;  %v1030_v39 = vadd.f32 %v5246_v17, %v6697_v3  ;;  %v1021_v28 = vpop.f32.mrb[21].mxu0 }
 0x2e9   : > { %v5027_v40 = vpack.c.bf16 %v3457_v36, %v3457_v36  ;;  %v3332_v27 = vmax.f32 %v3026_v37, 0.0  ;;  %2237 = vst.msk [vmem:[%s6728_s24 + $0x40] sm:$0xf] %vm2220_vm1, %v4850_v63  ;;  %v4851_v41 = vpack.c.bf16 %v1597_v7, %v1597_v7  ;;  %v1022_v42 = vadd.f32 %v6697_v3, %v1021_v28  ;;  %v5247_v4 = vpop.f32.mrb[22].mxu0 }
 0x2ea   : > { %v3462_v8 = vmin.f32 %v3334_v22, 6.0  ;;  %v3335_v43 = vmax.f32 %v3037_v38, 0.0  ;;  %2240 = vst.msk [vmem:[%s6728_s24 + $0x4c] sm:$0xf] %vm2220_vm1, %v4853_v9  ;;  %v1474_v44 = vmax.f32 %v1030_v39, 0.0  ;;  %v1033_v45 = vadd.f32 %v5247_v4, %v6697_v3  ;;  %v1024_v47 = vpop.f32.mrb[23].mxu0 }
 0x2eb   : > { %4097 = vst.msk [vmem:[%s6533_s26 + $0x104] sm:$0xf] %vm2220_vm1, %v5027_v40  ;;  %v3460_v48 = vmin.f32 %v3332_v27, 6.0  ;;  %v3029_v49 = vadd.f32 %v6778_v12, %v3028_v10  ;;  %2238 = vst.msk [vmem:[%s6728_s24 + $0x44] sm:$0xf] %vm2220_vm1, %v4851_v41  ;;  %v1472_v46 = vmax.f32 %v1022_v42, 0.0  ;;  %v1025_v50 = vadd.f32 %v6697_v3, %v1024_v47 }
 0x2ec   : > { %v5032_v52 = vpack.c.bf16 %v3462_v8, %v3462_v8  ;;  %v3463_v53 = vmin.f32 %v3335_v43, 6.0  ;;  %v1602_v54 = vmin.f32 %v1474_v44, 6.0  ;;  %v1475_v18 = vmax.f32 %v1033_v45, 0.0  ;;  %v5428_v57 = vpop.f32.mrb[72].mxu1 }
 0x2ed   : > { %v5030_v25 = vpack.c.bf16 %v3460_v48, %v3460_v48  ;;  %v3333_v56 = vmax.f32 %v3029_v49, 0.0  ;;  %v1600_v58 = vmin.f32 %v1472_v46, 6.0  ;;  %v1473_v59 = vmax.f32 %v1025_v50, 0.0  ;;  %v3041_v51 = vpop.f32.mrb[73].mxu1 }
 0x2ee   : > { %4102 = vst.msk [vmem:[%s6533_s26 + $0x118] sm:$0xf] %vm2220_vm1, %v5032_v52  ;;  %v5033_v0 = vpack.c.bf16 %v3463_v53, %v3463_v53  ;;  %v3050_v1 = vadd.f32 %v6778_v12, %v5428_v57  ;;  %v4856_v61 = vpack.c.bf16 %v1602_v54, %v1602_v54  ;;  %v1603_v2 = vmin.f32 %v1475_v18, 6.0  ;;  %v5429_v14 = vpop.f32.mrb[74].mxu1 }
 0x2ef   : > { %4100 = vst.msk [vmem:[%s6533_s26 + $0x110] sm:$0xf] %vm2220_vm1, %v5030_v25  ;;  %v3461_v5 = vmin.f32 %v3333_v56, 6.0  ;;  %v3042_v13 = vadd.f32 %v6778_v12, %v3041_v51  ;;  %v4854_v15 = vpack.c.bf16 %v1600_v58, %v1600_v58  ;;  %v1601_v16 = vmin.f32 %v1473_v59, 6.0  ;;  %v5250_v19 = vpop.f32.mrb[24].mxu0  ;;  %v3044_v21 = vpop.f32.mrb[75].mxu1 }
 0x2f0   : > { %4103 = vst.msk [vmem:[%s6533_s26 + $0x11c] sm:$0xf] %vm2220_vm1, %v5033_v0  ;;  %v3338_v20 = vmax.f32 %v3050_v1, 0.0  ;;  %v3053_v11 = vadd.f32 %v6778_v12, %v5429_v14  ;;  %2243 = vst.msk [vmem:[%s6728_s24 + $0x58] sm:$0xf] %vm2220_vm1, %v4856_v61  ;;  %v4857_v23 = vpack.c.bf16 %v1603_v2, %v1603_v2  ;;  %v1046_v55 = vadd.f32 %v5250_v19, %v6697_v3  ;;  %v1037_v62 = vpop.f32.mrb[25].mxu0 }
 0x2f1   : > { %v5031_v6 = vpack.c.bf16 %v3461_v5, %v3461_v5  ;;  %v3336_v24 = vmax.f32 %v3042_v13, 0.0  ;;  %2241 = vst.msk [vmem:[%s6728_s24 + $0x50] sm:$0xf] %vm2220_vm1, %v4854_v15  ;;  %v4855_v26 = vpack.c.bf16 %v1601_v16, %v1601_v16  ;;  %v1038_v29 = vadd.f32 %v6697_v3, %v1037_v62  ;;  %v5251_v30 = vpop.f32.mrb[26].mxu0 }
 0x2f2   : > { %v3466_v31 = vmin.f32 %v3338_v20, 6.0  ;;  %v3339_v32 = vmax.f32 %v3053_v11, 0.0  ;;  %2244 = vst.msk [vmem:[%s6728_s24 + $0x5c] sm:$0xf] %vm2220_vm1, %v4857_v23  ;;  %v1478_v33 = vmax.f32 %v1046_v55, 0.0  ;;  %v1049_v34 = vadd.f32 %v5251_v30, %v6697_v3  ;;  %v1040_v35 = vpop.f32.mrb[27].mxu0 }
 0x2f3   : > { %4101 = vst.msk [vmem:[%s6533_s26 + $0x114] sm:$0xf] %vm2220_vm1, %v5031_v6  ;;  %v3464_v36 = vmin.f32 %v3336_v24, 6.0  ;;  %v3045_v37 = vadd.f32 %v6778_v12, %v3044_v21  ;;  %2242 = vst.msk [vmem:[%s6728_s24 + $0x54] sm:$0xf] %vm2220_vm1, %v4855_v26  ;;  %v1476_v60 = vmax.f32 %v1038_v29, 0.0  ;;  %v1041_v63 = vadd.f32 %v6697_v3, %v1040_v35 }
 0x2f4   : > { %v5036_v7 = vpack.c.bf16 %v3466_v31, %v3466_v31  ;;  %v3467_v17 = vmin.f32 %v3339_v32, 6.0  ;;  %v1606_v22 = vmin.f32 %v1478_v33, 6.0  ;;  %v1479_v38 = vmax.f32 %v1049_v34, 0.0  ;;  %v5432_v39 = vpop.f32.mrb[76].mxu1 }
 0x2f5   : > { %v5034_v10 = vpack.c.bf16 %v3464_v36, %v3464_v36  ;;  %v3337_v9 = vmax.f32 %v3045_v37, 0.0  ;;  %v1604_v28 = vmin.f32 %v1476_v60, 6.0  ;;  %v1477_v40 = vmax.f32 %v1041_v63, 0.0  ;;  %v3057_v42 = vpop.f32.mrb[77].mxu1 }
 0x2f6   : > { %4106 = vst.msk [vmem:[%s6533_s26 + $0x128] sm:$0xf] %vm2220_vm1, %v5036_v7  ;;  %v5037_v27 = vpack.c.bf16 %v3467_v17, %v3467_v17  ;;  %v3066_v41 = vadd.f32 %v6778_v12, %v5432_v39  ;;  %v4860_v4 = vpack.c.bf16 %v1606_v22, %v1606_v22  ;;  %v1607_v8 = vmin.f32 %v1479_v38, 6.0  ;;  %v5433_v45 = vpop.f32.mrb[78].mxu1 }
 0x2f7   : > { %4104 = vst.msk [vmem:[%s6533_s26 + $0x120] sm:$0xf] %vm2220_vm1, %v5034_v10  ;;  %v3465_v43 = vmin.f32 %v3337_v9, 6.0  ;;  %v3058_v44 = vadd.f32 %v6778_v12, %v3057_v42  ;;  %v4858_v47 = vpack.c.bf16 %v1604_v28, %v1604_v28  ;;  %v1605_v48 = vmin.f32 %v1477_v40, 6.0  ;;  %v5254_v49 = vpop.f32.mrb[28].mxu0  ;;  %v3060_v52 = vpop.f32.mrb[79].mxu1 }
 0x2f8   : > { %4107 = vst.msk [vmem:[%s6533_s26 + $0x12c] sm:$0xf] %vm2220_vm1, %v5037_v27  ;;  %v3342_v46 = vmax.f32 %v3066_v41, 0.0  ;;  %v3069_v50 = vadd.f32 %v6778_v12, %v5433_v45  ;;  %2247 = vst.msk [vmem:[%s6728_s24 + $0x68] sm:$0xf] %vm2220_vm1, %v4860_v4  ;;  %v4861_v53 = vpack.c.bf16 %v1607_v8, %v1607_v8  ;;  %v1062_v54 = vadd.f32 %v5254_v49, %v6697_v3  ;;  %v1053_v18 = vpop.f32.mrb[29].mxu0 }
 0x2f9   : > { %v5035_v25 = vpack.c.bf16 %v3465_v43, %v3465_v43  ;;  %v3340_v56 = vmax.f32 %v3058_v44, 0.0  ;;  %2245 = vst.msk [vmem:[%s6728_s24 + $0x60] sm:$0xf] %vm2220_vm1, %v4858_v47  ;;  %v4859_v57 = vpack.c.bf16 %v1605_v48, %v1605_v48  ;;  %v1054_v58 = vadd.f32 %v6697_v3, %v1053_v18  ;;  %v5255_v59 = vpop.f32.mrb[30].mxu0 }
 0x2fa   : > { %v3470_v0 = vmin.f32 %v3342_v46, 6.0  ;;  %v3343_v1 = vmax.f32 %v3069_v50, 0.0  ;;  %2248 = vst.msk [vmem:[%s6728_s24 + $0x6c] sm:$0xf] %vm2220_vm1, %v4861_v53  ;;  %v1482_v51 = vmax.f32 %v1062_v54, 0.0  ;;  %v1065_v61 = vadd.f32 %v5255_v59, %v6697_v3  ;;  %v1056_v2 = vpop.f32.mrb[31].mxu0 }
 0x2fb   : > { %4105 = vst.msk [vmem:[%s6533_s26 + $0x124] sm:$0xf] %vm2220_vm1, %v5035_v25  ;;  %v3468_v5 = vmin.f32 %v3340_v56, 6.0  ;;  %v3061_v13 = vadd.f32 %v6778_v12, %v3060_v52  ;;  %2246 = vst.msk [vmem:[%s6728_s24 + $0x64] sm:$0xf] %vm2220_vm1, %v4859_v57  ;;  %v1480_v14 = vmax.f32 %v1054_v58, 0.0  ;;  %v1057_v15 = vadd.f32 %v6697_v3, %v1056_v2 }
 0x2fc   : > { %v5040_v16 = vpack.c.bf16 %v3470_v0, %v3470_v0  ;;  %v3471_v19 = vmin.f32 %v3343_v1, 6.0  ;;  %v1610_v20 = vmin.f32 %v1482_v51, 6.0  ;;  %v1483_v11 = vmax.f32 %v1065_v61, 0.0  ;;  %v5436_v55 = vpop.f32.mrb[80].mxu1 }
 0x2fd   : > { %v5038_v21 = vpack.c.bf16 %v3468_v5, %v3468_v5  ;;  %v3341_v23 = vmax.f32 %v3061_v13, 0.0  ;;  %v1608_v62 = vmin.f32 %v1480_v14, 6.0  ;;  %v1481_v6 = vmax.f32 %v1057_v15, 0.0  ;;  %v3073_v29 = vpop.f32.mrb[81].mxu1 }
 0x2fe   : > { %4110 = vst.msk [vmem:[%s6533_s26 + $0x138] sm:$0xf] %vm2220_vm1, %v5040_v16  ;;  %v5041_v24 = vpack.c.bf16 %v3471_v19, %v3471_v19  ;;  %v3082_v26 = vadd.f32 %v6778_v12, %v5436_v55  ;;  %v4864_v30 = vpack.c.bf16 %v1610_v20, %v1610_v20  ;;  %v1611_v31 = vmin.f32 %v1483_v11, 6.0  ;;  %v5437_v34 = vpop.f32.mrb[82].mxu1 }
 0x2ff   : > { %4108 = vst.msk [vmem:[%s6533_s26 + $0x130] sm:$0xf] %vm2220_vm1, %v5038_v21  ;;  %v3469_v32 = vmin.f32 %v3341_v23, 6.0  ;;  %v3074_v33 = vadd.f32 %v6778_v12, %v3073_v29  ;;  %v4862_v35 = vpack.c.bf16 %v1608_v62, %v1608_v62  ;;  %v1609_v36 = vmin.f32 %v1481_v6, 6.0  ;;  %v5258_v37 = vpop.f32.mrb[32].mxu0  ;;  %v3076_v7 = vpop.f32.mrb[83].mxu1 }
 0x300   : > { %4111 = vst.msk [vmem:[%s6533_s26 + $0x13c] sm:$0xf] %vm2220_vm1, %v5041_v24  ;;  %v3346_v60 = vmax.f32 %v3082_v26, 0.0  ;;  %v3085_v63 = vadd.f32 %v6778_v12, %v5437_v34  ;;  %2251 = vst.msk [vmem:[%s6728_s24 + $0x78] sm:$0xf] %vm2220_vm1, %v4864_v30  ;;  %v4865_v17 = vpack.c.bf16 %v1611_v31, %v1611_v31  ;;  %v1078_v22 = vadd.f32 %v5258_v37, %v6697_v3  ;;  %v1069_v38 = vpop.f32.mrb[33].mxu0 }
 0x301   : > { %v5039_v10 = vpack.c.bf16 %v3469_v32, %v3469_v32  ;;  %v3344_v9 = vmax.f32 %v3074_v33, 0.0  ;;  %2249 = vst.msk [vmem:[%s6728_s24 + $0x70] sm:$0xf] %vm2220_vm1, %v4862_v35  ;;  %v4863_v39 = vpack.c.bf16 %v1609_v36, %v1609_v36  ;;  %v1070_v28 = vadd.f32 %v6697_v3, %v1069_v38  ;;  %v5259_v40 = vpop.f32.mrb[34].mxu0 }
 0x302   : > { %v3474_v27 = vmin.f32 %v3346_v60, 6.0  ;;  %v3347_v41 = vmax.f32 %v3085_v63, 0.0  ;;  %2252 = vst.msk [vmem:[%s6728_s24 + $0x7c] sm:$0xf] %vm2220_vm1, %v4865_v17  ;;  %v1486_v42 = vmax.f32 %v1078_v22, 0.0  ;;  %v1081_v4 = vadd.f32 %v5259_v40, %v6697_v3  ;;  %v1072_v8 = vpop.f32.mrb[35].mxu0 }
 0x303   : > { %4109 = vst.msk [vmem:[%s6533_s26 + $0x134] sm:$0xf] %vm2220_vm1, %v5039_v10  ;;  %v3472_v43 = vmin.f32 %v3344_v9, 6.0  ;;  %v3077_v44 = vadd.f32 %v6778_v12, %v3076_v7  ;;  %2250 = vst.msk [vmem:[%s6728_s24 + $0x74] sm:$0xf] %vm2220_vm1, %v4863_v39  ;;  %v1484_v45 = vmax.f32 %v1070_v28, 0.0  ;;  %v1073_v47 = vadd.f32 %v6697_v3, %v1072_v8 }
 0x304   : > { %v5044_v48 = vpack.c.bf16 %v3474_v27, %v3474_v27  ;;  %v3475_v49 = vmin.f32 %v3347_v41, 6.0  ;;  %v1614_v46 = vmin.f32 %v1486_v42, 6.0  ;;  %v1487_v50 = vmax.f32 %v1081_v4, 0.0  ;;  %v5440_v54 = vpop.f32.mrb[84].mxu1 }
 0x305   : > { %v5042_v52 = vpack.c.bf16 %v3472_v43, %v3472_v43  ;;  %v3345_v53 = vmax.f32 %v3077_v44, 0.0  ;;  %v1612_v18 = vmin.f32 %v1484_v45, 6.0  ;;  %v1485_v25 = vmax.f32 %v1073_v47, 0.0  ;;  %v3089_v58 = vpop.f32.mrb[85].mxu1 }
 0x306   : > { %4114 = vst.msk [vmem:[%s6533_s26 + $0x148] sm:$0xf] %vm2220_vm1, %v5044_v48  ;;  %v5045_v56 = vpack.c.bf16 %v3475_v49, %v3475_v49  ;;  %v3098_v57 = vadd.f32 %v6778_v12, %v5440_v54  ;;  %v4868_v59 = vpack.c.bf16 %v1614_v46, %v1614_v46  ;;  %v1615_v0 = vmin.f32 %v1487_v50, 6.0  ;;  %v5441_v61 = vpop.f32.mrb[86].mxu1 }
 0x307   : > { %4112 = vst.msk [vmem:[%s6533_s26 + $0x140] sm:$0xf] %vm2220_vm1, %v5042_v52  ;;  %v3473_v1 = vmin.f32 %v3345_v53, 6.0  ;;  %v3090_v51 = vadd.f32 %v6778_v12, %v3089_v58  ;;  %v4866_v2 = vpack.c.bf16 %v1612_v18, %v1612_v18  ;;  %v1613_v5 = vmin.f32 %v1485_v25, 6.0  ;;  %v5262_v13 = vpop.f32.mrb[36].mxu0  ;;  %v3092_v16 = vpop.f32.mrb[87].mxu1 }
 0x308   : > { %4115 = vst.msk [vmem:[%s6533_s26 + $0x14c] sm:$0xf] %vm2220_vm1, %v5045_v56  ;;  %v3350_v14 = vmax.f32 %v3098_v57, 0.0  ;;  %v3101_v15 = vadd.f32 %v6778_v12, %v5441_v61  ;;  %2255 = vst.msk [vmem:[%s6728_s24 + $0x88] sm:$0xf] %vm2220_vm1, %v4868_v59  ;;  %v4869_v19 = vpack.c.bf16 %v1615_v0, %v1615_v0  ;;  %v1094_v20 = vadd.f32 %v5262_v13, %v6697_v3  ;;  %v1085_v11 = vpop.f32.mrb[37].mxu0 }
 0x309   : > { %v5043_v21 = vpack.c.bf16 %v3473_v1, %v3473_v1  ;;  %v3348_v23 = vmax.f32 %v3090_v51, 0.0  ;;  %2253 = vst.msk [vmem:[%s6728_s24 + $0x80] sm:$0xf] %vm2220_vm1, %v4866_v2  ;;  %v4867_v55 = vpack.c.bf16 %v1613_v5, %v1613_v5  ;;  %v1086_v62 = vadd.f32 %v6697_v3, %v1085_v11  ;;  %v5263_v6 = vpop.f32.mrb[38].mxu0  ;;  %v6961_v18 = vld [vmem:[#allocation10] ss:$0 sm:$0xff] }
 0x30a   : > { %v3478_v24 = vmin.f32 %v3350_v14, 6.0  ;;  %v3351_v26 = vmax.f32 %v3101_v15, 0.0  ;;  %2256 = vst.msk [vmem:[%s6728_s24 + $0x8c] sm:$0xf] %vm2220_vm1, %v4869_v19  ;;  %v1490_v29 = vmax.f32 %v1094_v20, 0.0  ;;  %v1097_v30 = vadd.f32 %v5263_v6, %v6697_v3  ;;  %v1088_v31 = vpop.f32.mrb[39].mxu0 }
 0x30b   : > { %4113 = vst.msk [vmem:[%s6533_s26 + $0x144] sm:$0xf] %vm2220_vm1, %v5043_v21  ;;  %v3476_v32 = vmin.f32 %v3348_v23, 6.0  ;;  %v3093_v33 = vadd.f32 %v6778_v12, %v3092_v16  ;;  %2254 = vst.msk [vmem:[%s6728_s24 + $0x84] sm:$0xf] %vm2220_vm1, %v4867_v55  ;;  %v1488_v34 = vmax.f32 %v1086_v62, 0.0  ;;  %v1089_v35 = vadd.f32 %v6697_v3, %v1088_v31 }
 0x30c   : > { %v5048_v36 = vpack.c.bf16 %v3478_v24, %v3478_v24  ;;  %v3479_v37 = vmin.f32 %v3351_v26, 6.0  ;;  %v1618_v60 = vmin.f32 %v1490_v29, 6.0  ;;  %v1491_v63 = vmax.f32 %v1097_v30, 0.0  ;;  %v5444_v22 = vpop.f32.mrb[88].mxu1 }
 0x30d   : > { %v5046_v7 = vpack.c.bf16 %v3476_v32, %v3476_v32  ;;  %v3349_v17 = vmax.f32 %v3093_v33, 0.0  ;;  %v1616_v38 = vmin.f32 %v1488_v34, 6.0  ;;  %v1489_v10 = vmax.f32 %v1089_v35, 0.0  ;;  %v3105_v28 = vpop.f32.mrb[89].mxu1 }
 0x30e   : > { %4118 = vst.msk [vmem:[%s6533_s26 + $0x158] sm:$0xf] %vm2220_vm1, %v5048_v36  ;;  %v5049_v9 = vpack.c.bf16 %v3479_v37, %v3479_v37  ;;  %v3114_v39 = vadd.f32 %v6778_v12, %v5444_v22  ;;  %v4872_v40 = vpack.c.bf16 %v1618_v60, %v1618_v60  ;;  %v1619_v27 = vmin.f32 %v1491_v63, 6.0  ;;  %v5445_v4 = vpop.f32.mrb[90].mxu1 }
 0x30f   : > { %4116 = vst.msk [vmem:[%s6533_s26 + $0x150] sm:$0xf] %vm2220_vm1, %v5046_v7  ;;  %v3477_v41 = vmin.f32 %v3349_v17, 6.0  ;;  %v3106_v42 = vadd.f32 %v6778_v12, %v3105_v28  ;;  %v4870_v8 = vpack.c.bf16 %v1616_v38, %v1616_v38  ;;  %v1617_v43 = vmin.f32 %v1489_v10, 6.0  ;;  %v5266_v44 = vpop.f32.mrb[40].mxu0  ;;  %v3108_v48 = vpop.f32.mrb[91].mxu1 }
 0x310   : > { %4119 = vst.msk [vmem:[%s6533_s26 + $0x15c] sm:$0xf] %vm2220_vm1, %v5049_v9  ;;  %v3354_v45 = vmax.f32 %v3114_v39, 0.0  ;;  %v3117_v47 = vadd.f32 %v6778_v12, %v5445_v4  ;;  %2259 = vst.msk [vmem:[%s6728_s24 + $0x98] sm:$0xf] %vm2220_vm1, %v4872_v40  ;;  %v4873_v49 = vpack.c.bf16 %v1619_v27, %v1619_v27  ;;  %v1110_v46 = vadd.f32 %v5266_v44, %v6697_v3  ;;  %v1101_v50 = vpop.f32.mrb[41].mxu0 }
 0x311   : > { %v5047_v52 = vpack.c.bf16 %v3477_v41, %v3477_v41  ;;  %v3352_v53 = vmax.f32 %v3106_v42, 0.0  ;;  %2257 = vst.msk [vmem:[%s6728_s24 + $0x90] sm:$0xf] %vm2220_vm1, %v4870_v8  ;;  %v4871_v54 = vpack.c.bf16 %v1617_v43, %v1617_v43  ;;  %v1102_v25 = vadd.f32 %v6961_v18, %v1101_v50  ;;  %v5267_v56 = vpop.f32.mrb[42].mxu0 }
 0x312   : > { %v3482_v57 = vmin.f32 %v3354_v45, 6.0  ;;  %v3355_v58 = vmax.f32 %v3117_v47, 0.0  ;;  %2260 = vst.msk [vmem:[%s6728_s24 + $0x9c] sm:$0xf] %vm2220_vm1, %v4873_v49  ;;  %v1494_v59 = vmax.f32 %v1110_v46, 0.0  ;;  %v1113_v0 = vadd.f32 %v6961_v18, %v5267_v56  ;;  %v1104_v3 = vpop.f32.mrb[43].mxu0 }
 0x313   : > { %4117 = vst.msk [vmem:[%s6533_s26 + $0x154] sm:$0xf] %vm2220_vm1, %v5047_v52  ;;  %v3480_v1 = vmin.f32 %v3352_v53, 6.0  ;;  %v3109_v51 = vadd.f32 %v6778_v12, %v3108_v48  ;;  %2258 = vst.msk [vmem:[%s6728_s24 + $0x94] sm:$0xf] %vm2220_vm1, %v4871_v54  ;;  %v1492_v61 = vmax.f32 %v1102_v25, 0.0  ;;  %v1105_v2 = vadd.f32 %v6961_v18, %v1104_v3 }
 0x314   : > { %v5052_v5 = vpack.c.bf16 %v3482_v57, %v3482_v57  ;;  %v3483_v13 = vmin.f32 %v3355_v58, 6.0  ;;  %v1622_v14 = vmin.f32 %v1494_v59, 6.0  ;;  %v1495_v15 = vmax.f32 %v1113_v0, 0.0  ;;  %v5448_v20 = vpop.f32.mrb[92].mxu1 }
 0x315   : > { %v5050_v16 = vpack.c.bf16 %v3480_v1, %v3480_v1  ;;  %v3353_v19 = vmax.f32 %v3109_v51, 0.0  ;;  %v1620_v11 = vmin.f32 %v1492_v61, 6.0  ;;  %v1493_v21 = vmax.f32 %v1105_v2, 0.0  ;;  %v3121_v62 = vpop.f32.mrb[93].mxu1 }
 0x316   : > { %4122 = vst.msk [vmem:[%s6533_s26 + $0x168] sm:$0xf] %vm2220_vm1, %v5052_v5  ;;  %v5053_v23 = vpack.c.bf16 %v3483_v13, %v3483_v13  ;;  %v3130_v55 = vadd.f32 %v6778_v12, %v5448_v20  ;;  %v4876_v6 = vpack.c.bf16 %v1622_v14, %v1622_v14  ;;  %v1623_v24 = vmin.f32 %v1495_v15, 6.0  ;;  %v5449_v30 = vpop.f32.mrb[94].mxu1 }
 0x317   : > { %4120 = vst.msk [vmem:[%s6533_s26 + $0x160] sm:$0xf] %vm2220_vm1, %v5050_v16  ;;  %v3481_v26 = vmin.f32 %v3353_v19, 6.0  ;;  %v3122_v29 = vadd.f32 %v6778_v12, %v3121_v62  ;;  %v4874_v31 = vpack.c.bf16 %v1620_v11, %v1620_v11  ;;  %v1621_v32 = vmin.f32 %v1493_v21, 6.0  ;;  %v5270_v33 = vpop.f32.mrb[44].mxu0  ;;  %v3124_v36 = vpop.f32.mrb[95].mxu1 }
 0x318   : > { %4123 = vst.msk [vmem:[%s6533_s26 + $0x16c] sm:$0xf] %vm2220_vm1, %v5053_v23  ;;  %v3358_v34 = vmax.f32 %v3130_v55, 0.0  ;;  %v3133_v35 = vadd.f32 %v6778_v12, %v5449_v30  ;;  %2263 = vst.msk [vmem:[%s6728_s24 + $0xa8] sm:$0xf] %vm2220_vm1, %v4876_v6  ;;  %v4877_v37 = vpack.c.bf16 %v1623_v24, %v1623_v24  ;;  %v1126_v60 = vadd.f32 %v6961_v18, %v5270_v33  ;;  %v1117_v63 = vpop.f32.mrb[45].mxu0 }
 0x319   : > { %v5051_v7 = vpack.c.bf16 %v3481_v26, %v3481_v26  ;;  %v3356_v17 = vmax.f32 %v3122_v29, 0.0  ;;  %2261 = vst.msk [vmem:[%s6728_s24 + $0xa0] sm:$0xf] %vm2220_vm1, %v4874_v31  ;;  %v4875_v22 = vpack.c.bf16 %v1621_v32, %v1621_v32  ;;  %v1118_v38 = vadd.f32 %v6961_v18, %v1117_v63  ;;  %v5271_v10 = vpop.f32.mrb[46].mxu0 }
 0x31a   : > { %v3486_v9 = vmin.f32 %v3358_v34, 6.0  ;;  %v3359_v39 = vmax.f32 %v3133_v35, 0.0  ;;  %2264 = vst.msk [vmem:[%s6728_s24 + $0xac] sm:$0xf] %vm2220_vm1, %v4877_v37  ;;  %v1498_v28 = vmax.f32 %v1126_v60, 0.0  ;;  %v1129_v40 = vadd.f32 %v6961_v18, %v5271_v10  ;;  %v1120_v27 = vpop.f32.mrb[47].mxu0 }
 0x31b   : > { %4121 = vst.msk [vmem:[%s6533_s26 + $0x164] sm:$0xf] %vm2220_vm1, %v5051_v7  ;;  %v3484_v41 = vmin.f32 %v3356_v17, 6.0  ;;  %v3125_v42 = vadd.f32 %v6778_v12, %v3124_v36  ;;  %2262 = vst.msk [vmem:[%s6728_s24 + $0xa4] sm:$0xf] %vm2220_vm1, %v4875_v22  ;;  %v1496_v4 = vmax.f32 %v1118_v38, 0.0  ;;  %v1121_v8 = vadd.f32 %v6961_v18, %v1120_v27 }
 0x31c   : > { %v5056_v43 = vpack.c.bf16 %v3486_v9, %v3486_v9  ;;  %v3487_v44 = vmin.f32 %v3359_v39, 6.0  ;;  %v1626_v45 = vmin.f32 %v1498_v28, 6.0  ;;  %v1499_v47 = vmax.f32 %v1129_v40, 0.0  ;;  %v5452_v46 = vpop.f32.mrb[96].mxu1 }
 0x31d   : > { %v5054_v48 = vpack.c.bf16 %v3484_v41, %v3484_v41  ;;  %v3357_v49 = vmax.f32 %v3125_v42, 0.0  ;;  %v1624_v50 = vmin.f32 %v1496_v4, 6.0  ;;  %v1497_v52 = vmax.f32 %v1121_v8, 0.0  ;;  %v3137_v25 = vpop.f32.mrb[97].mxu1 }
 0x31e   : > { %4126 = vst.msk [vmem:[%s6533_s26 + $0x178] sm:$0xf] %vm2220_vm1, %v5056_v43  ;;  %v5057_v53 = vpack.c.bf16 %v3487_v44, %v3487_v44  ;;  %v3146_v54 = vadd.f32 %v6778_v12, %v5452_v46  ;;  %v4880_v56 = vpack.c.bf16 %v1626_v45, %v1626_v45  ;;  %v1627_v57 = vmin.f32 %v1499_v47, 6.0  ;;  %v5453_v0 = vpop.f32.mrb[98].mxu1 }
 0x31f   : > { %4124 = vst.msk [vmem:[%s6533_s26 + $0x170] sm:$0xf] %vm2220_vm1, %v5054_v48  ;;  %v3485_v58 = vmin.f32 %v3357_v49, 6.0  ;;  %v3138_v59 = vadd.f32 %v6778_v12, %v3137_v25  ;;  %v4878_v3 = vpack.c.bf16 %v1624_v50, %v1624_v50  ;;  %v1625_v1 = vmin.f32 %v1497_v52, 6.0  ;;  %v5274_v51 = vpop.f32.mrb[48].mxu0  ;;  %v3140_v5 = vpop.f32.mrb[99].mxu1 }
 0x320   : > { %4127 = vst.msk [vmem:[%s6533_s26 + $0x17c] sm:$0xf] %vm2220_vm1, %v5057_v53  ;;  %v3362_v61 = vmax.f32 %v3146_v54, 0.0  ;;  %v3149_v2 = vadd.f32 %v6778_v12, %v5453_v0  ;;  %2267 = vst.msk [vmem:[%s6728_s24 + $0xb8] sm:$0xf] %vm2220_vm1, %v4880_v56  ;;  %v4881_v13 = vpack.c.bf16 %v1627_v57, %v1627_v57  ;;  %v1142_v14 = vadd.f32 %v6961_v18, %v5274_v51  ;;  %v1133_v15 = vpop.f32.mrb[49].mxu0 }
 0x321   : > { %v5055_v16 = vpack.c.bf16 %v3485_v58, %v3485_v58  ;;  %v3360_v19 = vmax.f32 %v3138_v59, 0.0  ;;  %2265 = vst.msk [vmem:[%s6728_s24 + $0xb0] sm:$0xf] %vm2220_vm1, %v4878_v3  ;;  %v4879_v20 = vpack.c.bf16 %v1625_v1, %v1625_v1  ;;  %v1134_v11 = vadd.f32 %v6961_v18, %v1133_v15  ;;  %v5275_v21 = vpop.f32.mrb[50].mxu0  ;;  %v7041_v58 = vld [vmem:[#allocation13] ss:$0 sm:$0xff] }
 0x322   : > { %v3490_v23 = vmin.f32 %v3362_v61, 6.0  ;;  %v3363_v55 = vmax.f32 %v3149_v2, 0.0  ;;  %2268 = vst.msk [vmem:[%s6728_s24 + $0xbc] sm:$0xf] %vm2220_vm1, %v4881_v13  ;;  %v1502_v62 = vmax.f32 %v1142_v14, 0.0  ;;  %v1145_v6 = vadd.f32 %v6961_v18, %v5275_v21  ;;  %v1136_v24 = vpop.f32.mrb[51].mxu0 }
 0x323   : > { %4125 = vst.msk [vmem:[%s6533_s26 + $0x174] sm:$0xf] %vm2220_vm1, %v5055_v16  ;;  %v3488_v26 = vmin.f32 %v3360_v19, 6.0  ;;  %v3141_v29 = vadd.f32 %v6778_v12, %v3140_v5  ;;  %2266 = vst.msk [vmem:[%s6728_s24 + $0xb4] sm:$0xf] %vm2220_vm1, %v4879_v20  ;;  %v1500_v30 = vmax.f32 %v1134_v11, 0.0  ;;  %v1137_v31 = vadd.f32 %v6961_v18, %v1136_v24 }
 0x324   : > { %v5060_v32 = vpack.c.bf16 %v3490_v23, %v3490_v23  ;;  %v3491_v33 = vmin.f32 %v3363_v55, 6.0  ;;  %v1630_v34 = vmin.f32 %v1502_v62, 6.0  ;;  %v1503_v35 = vmax.f32 %v1145_v6, 0.0  ;;  %v5456_v60 = vpop.f32.mrb[100].mxu1 }
 0x325   : > { %v5058_v36 = vpack.c.bf16 %v3488_v26, %v3488_v26  ;;  %v3361_v37 = vmax.f32 %v3141_v29, 0.0  ;;  %v1628_v63 = vmin.f32 %v1500_v30, 6.0  ;;  %v1501_v7 = vmax.f32 %v1137_v31, 0.0  ;;  %v3153_v38 = vpop.f32.mrb[101].mxu1 }
 0x326   : > { %4130 = vst.msk [vmem:[%s6533_s26 + $0x188] sm:$0xf] %vm2220_vm1, %v5060_v32  ;;  %v5061_v17 = vpack.c.bf16 %v3491_v33, %v3491_v33  ;;  %v3162_v22 = vadd.f32 %v6778_v12, %v5456_v60  ;;  %v4884_v10 = vpack.c.bf16 %v1630_v34, %v1630_v34  ;;  %v1631_v9 = vmin.f32 %v1503_v35, 6.0  ;;  %v5457_v40 = vpop.f32.mrb[102].mxu1 }
 0x327   : > { %4128 = vst.msk [vmem:[%s6533_s26 + $0x180] sm:$0xf] %vm2220_vm1, %v5058_v36  ;;  %v3489_v39 = vmin.f32 %v3361_v37, 6.0  ;;  %v3154_v28 = vadd.f32 %v6778_v12, %v3153_v38  ;;  %v4882_v27 = vpack.c.bf16 %v1628_v63, %v1628_v63  ;;  %v1629_v41 = vmin.f32 %v1501_v7, 6.0  ;;  %v5278_v42 = vpop.f32.mrb[52].mxu0  ;;  %v3156_v43 = vpop.f32.mrb[103].mxu1 }
 0x328   : > { %4131 = vst.msk [vmem:[%s6533_s26 + $0x18c] sm:$0xf] %vm2220_vm1, %v5061_v17  ;;  %v3366_v4 = vmax.f32 %v3162_v22, 0.0  ;;  %v3165_v8 = vadd.f32 %v6778_v12, %v5457_v40  ;;  %2271 = vst.msk [vmem:[%s6728_s24 + $0xc8] sm:$0xf] %vm2220_vm1, %v4884_v10  ;;  %v4885_v44 = vpack.c.bf16 %v1631_v9, %v1631_v9  ;;  %v1158_v45 = vadd.f32 %v6961_v18, %v5278_v42  ;;  %v1149_v47 = vpop.f32.mrb[53].mxu0 }
 0x329   : > { %v5059_v48 = vpack.c.bf16 %v3489_v39, %v3489_v39  ;;  %v3364_v49 = vmax.f32 %v3154_v28, 0.0  ;;  %2269 = vst.msk [vmem:[%s6728_s24 + $0xc0] sm:$0xf] %vm2220_vm1, %v4882_v27  ;;  %v4883_v46 = vpack.c.bf16 %v1629_v41, %v1629_v41  ;;  %v1150_v50 = vadd.f32 %v6961_v18, %v1149_v47  ;;  %v5279_v52 = vpop.f32.mrb[54].mxu0 }
 0x32a   : > { %v3494_v53 = vmin.f32 %v3366_v4, 6.0  ;;  %v3367_v54 = vmax.f32 %v3165_v8, 0.0  ;;  %2272 = vst.msk [vmem:[%s6728_s24 + $0xcc] sm:$0xf] %vm2220_vm1, %v4885_v44  ;;  %v1506_v12 = vmax.f32 %v1158_v45, 0.0  ;;  %v1161_v25 = vadd.f32 %v6961_v18, %v5279_v52  ;;  %v1152_v56 = vpop.f32.mrb[55].mxu0 }
 0x32b   : > { %4129 = vst.msk [vmem:[%s6533_s26 + $0x184] sm:$0xf] %vm2220_vm1, %v5059_v48  ;;  %v3492_v57 = vmin.f32 %v3364_v49, 6.0  ;;  %v3157_v59 = vadd.f32 %v7041_v58, %v3156_v43  ;;  %2270 = vst.msk [vmem:[%s6728_s24 + $0xc4] sm:$0xf] %vm2220_vm1, %v4883_v46  ;;  %v1504_v0 = vmax.f32 %v1150_v50, 0.0  ;;  %v1153_v3 = vadd.f32 %v6961_v18, %v1152_v56 }
 0x32c   : > { %v5064_v1 = vpack.c.bf16 %v3494_v53, %v3494_v53  ;;  %v3495_v51 = vmin.f32 %v3367_v54, 6.0  ;;  %v1634_v61 = vmin.f32 %v1506_v12, 6.0  ;;  %v1507_v2 = vmax.f32 %v1161_v25, 0.0  ;;  %v5460_v14 = vpop.f32.mrb[104].mxu1 }
 0x32d   : > { %v5062_v5 = vpack.c.bf16 %v3492_v57, %v3492_v57  ;;  %v3365_v13 = vmax.f32 %v3157_v59, 0.0  ;;  %v1632_v15 = vmin.f32 %v1504_v0, 6.0  ;;  %v1505_v16 = vmax.f32 %v1153_v3, 0.0  ;;  %v3169_v11 = vpop.f32.mrb[105].mxu1 }
 0x32e   : > { %4134 = vst.msk [vmem:[%s6533_s26 + $0x198] sm:$0xf] %vm2220_vm1, %v5064_v1  ;;  %v5065_v19 = vpack.c.bf16 %v3495_v51, %v3495_v51  ;;  %v3178_v20 = vadd.f32 %v7041_v58, %v5460_v14  ;;  %v4888_v21 = vpack.c.bf16 %v1634_v61, %v1634_v61  ;;  %v1635_v23 = vmin.f32 %v1507_v2, 6.0  ;;  %v5461_v6 = vpop.f32.mrb[106].mxu1 }
 0x32f   : > { %4132 = vst.msk [vmem:[%s6533_s26 + $0x190] sm:$0xf] %vm2220_vm1, %v5062_v5  ;;  %v3493_v55 = vmin.f32 %v3365_v13, 6.0  ;;  %v3170_v62 = vadd.f32 %v7041_v58, %v3169_v11  ;;  %v4886_v24 = vpack.c.bf16 %v1632_v15, %v1632_v15  ;;  %v1633_v26 = vmin.f32 %v1505_v16, 6.0  ;;  %v5282_v29 = vpop.f32.mrb[56].mxu0  ;;  %v3172_v32 = vpop.f32.mrb[107].mxu1 }
 0x330   : > { %4135 = vst.msk [vmem:[%s6533_s26 + $0x19c] sm:$0xf] %vm2220_vm1, %v5065_v19  ;;  %v3370_v30 = vmax.f32 %v3178_v20, 0.0  ;;  %v3181_v31 = vadd.f32 %v7041_v58, %v5461_v6  ;;  %2275 = vst.msk [vmem:[%s6728_s24 + $0xd8] sm:$0xf] %vm2220_vm1, %v4888_v21  ;;  %v4889_v33 = vpack.c.bf16 %v1635_v23, %v1635_v23  ;;  %v1174_v34 = vadd.f32 %v6961_v18, %v5282_v29  ;;  %v1165_v35 = vpop.f32.mrb[57].mxu0 }
 0x331   : > { %v5063_v36 = vpack.c.bf16 %v3493_v55, %v3493_v55  ;;  %v3368_v37 = vmax.f32 %v3170_v62, 0.0  ;;  %2273 = vst.msk [vmem:[%s6728_s24 + $0xd0] sm:$0xf] %vm2220_vm1, %v4886_v24  ;;  %v4887_v60 = vpack.c.bf16 %v1633_v26, %v1633_v26  ;;  %v1166_v63 = vadd.f32 %v6961_v18, %v1165_v35  ;;  %v5283_v7 = vpop.f32.mrb[58].mxu0 }
 0x332   : > { %v3498_v17 = vmin.f32 %v3370_v30, 6.0  ;;  %v3371_v22 = vmax.f32 %v3181_v31, 0.0  ;;  %2276 = vst.msk [vmem:[%s6728_s24 + $0xdc] sm:$0xf] %vm2220_vm1, %v4889_v33  ;;  %v1510_v38 = vmax.f32 %v1174_v34, 0.0  ;;  %v1177_v10 = vadd.f32 %v6961_v18, %v5283_v7  ;;  %v1168_v9 = vpop.f32.mrb[59].mxu0 }
 0x333   : > { %4133 = vst.msk [vmem:[%s6533_s26 + $0x194] sm:$0xf] %vm2220_vm1, %v5063_v36  ;;  %v3496_v39 = vmin.f32 %v3368_v37, 6.0  ;;  %v3173_v28 = vadd.f32 %v7041_v58, %v3172_v32  ;;  %2274 = vst.msk [vmem:[%s6728_s24 + $0xd4] sm:$0xf] %vm2220_vm1, %v4887_v60  ;;  %v1508_v40 = vmax.f32 %v1166_v63, 0.0  ;;  %v1169_v27 = vadd.f32 %v6961_v18, %v1168_v9 }
 0x334   : > { %v5068_v41 = vpack.c.bf16 %v3498_v17, %v3498_v17  ;;  %v3499_v42 = vmin.f32 %v3371_v22, 6.0  ;;  %v1638_v4 = vmin.f32 %v1510_v38, 6.0  ;;  %v1511_v8 = vmax.f32 %v1177_v10, 0.0  ;;  %v5464_v45 = vpop.f32.mrb[108].mxu1 }
 0x335   : > { %v5066_v43 = vpack.c.bf16 %v3496_v39, %v3496_v39  ;;  %v3369_v44 = vmax.f32 %v3173_v28, 0.0  ;;  %v1636_v47 = vmin.f32 %v1508_v40, 6.0  ;;  %v1509_v48 = vmax.f32 %v1169_v27, 0.0  ;;  %v3185_v50 = vpop.f32.mrb[109].mxu1 }
 0x336   : > { %4138 = vst.msk [vmem:[%s6533_s26 + $0x1a8] sm:$0xf] %vm2220_vm1, %v5068_v41  ;;  %v5069_v49 = vpack.c.bf16 %v3499_v42, %v3499_v42  ;;  %v3194_v46 = vadd.f32 %v7041_v58, %v5464_v45  ;;  %v4892_v52 = vpack.c.bf16 %v1638_v4, %v1638_v4  ;;  %v1639_v53 = vmin.f32 %v1511_v8, 6.0  ;;  %v5465_v25 = vpop.f32.mrb[110].mxu1 }
 0x337   : > { %4136 = vst.msk [vmem:[%s6533_s26 + $0x1a0] sm:$0xf] %vm2220_vm1, %v5066_v43  ;;  %v3497_v54 = vmin.f32 %v3369_v44, 6.0  ;;  %v3186_v12 = vadd.f32 %v7041_v58, %v3185_v50  ;;  %v4890_v56 = vpack.c.bf16 %v1636_v47, %v1636_v47  ;;  %v1637_v57 = vmin.f32 %v1509_v48, 6.0  ;;  %v5286_v59 = vpop.f32.mrb[60].mxu0  ;;  %v3188_v1 = vpop.f32.mrb[111].mxu1 }
 0x338   : > { %4139 = vst.msk [vmem:[%s6533_s26 + $0x1ac] sm:$0xf] %vm2220_vm1, %v5069_v49  ;;  %v3374_v0 = vmax.f32 %v3194_v46, 0.0  ;;  %v3197_v3 = vadd.f32 %v7041_v58, %v5465_v25  ;;  %2279 = vst.msk [vmem:[%s6728_s24 + $0xe8] sm:$0xf] %vm2220_vm1, %v4892_v52  ;;  %v4893_v51 = vpack.c.bf16 %v1639_v53, %v1639_v53  ;;  %v1190_v61 = vadd.f32 %v6961_v18, %v5286_v59  ;;  %v1181_v2 = vpop.f32.mrb[61].mxu0 }
 0x339   : > { %v5067_v5 = vpack.c.bf16 %v3497_v54, %v3497_v54  ;;  %v3372_v13 = vmax.f32 %v3186_v12, 0.0  ;;  %2277 = vst.msk [vmem:[%s6728_s24 + $0xe0] sm:$0xf] %vm2220_vm1, %v4890_v56  ;;  %v4891_v14 = vpack.c.bf16 %v1637_v57, %v1637_v57  ;;  %v1182_v15 = vadd.f32 %v6961_v18, %v1181_v2  ;;  %v5287_v16 = vpop.f32.mrb[62].mxu0 }
 0x33a   : > { %v3502_v19 = vmin.f32 %v3374_v0, 6.0  ;;  %v3375_v20 = vmax.f32 %v3197_v3, 0.0  ;;  %2280 = vst.msk [vmem:[%s6728_s24 + $0xec] sm:$0xf] %vm2220_vm1, %v4893_v51  ;;  %v1514_v11 = vmax.f32 %v1190_v61, 0.0  ;;  %v1193_v21 = vadd.f32 %v6961_v18, %v5287_v16  ;;  %v1184_v23 = vpop.f32.mrb[63].mxu0 }
 0x33b   : > { %4137 = vst.msk [vmem:[%s6533_s26 + $0x1a4] sm:$0xf] %vm2220_vm1, %v5067_v5  ;;  %v3500_v55 = vmin.f32 %v3372_v13, 6.0  ;;  %v3189_v62 = vadd.f32 %v7041_v58, %v3188_v1  ;;  %2278 = vst.msk [vmem:[%s6728_s24 + $0xe4] sm:$0xf] %vm2220_vm1, %v4891_v14  ;;  %v1512_v6 = vmax.f32 %v1182_v15, 0.0  ;;  %v1185_v24 = vadd.f32 %v6961_v18, %v1184_v23 }
 0x33c   : > { %v5072_v26 = vpack.c.bf16 %v3502_v19, %v3502_v19  ;;  %v3503_v29 = vmin.f32 %v3375_v20, 6.0  ;;  %v1642_v30 = vmin.f32 %v1514_v11, 6.0  ;;  %v1515_v31 = vmax.f32 %v1193_v21, 0.0  ;;  %v5468_v34 = vpop.f32.mrb[112].mxu1 }
 0x33d   : > { %v5070_v32 = vpack.c.bf16 %v3500_v55, %v3500_v55  ;;  %v3373_v33 = vmax.f32 %v3189_v62, 0.0  ;;  %v1640_v35 = vmin.f32 %v1512_v6, 6.0  ;;  %v1513_v36 = vmax.f32 %v1185_v24, 0.0  ;;  %v3201_v63 = vpop.f32.mrb[113].mxu1 }
 0x33e   : > { %4142 = vst.msk [vmem:[%s6533_s26 + $0x1b8] sm:$0xf] %vm2220_vm1, %v5072_v26  ;;  %v5073_v37 = vpack.c.bf16 %v3503_v29, %v3503_v29  ;;  %v3210_v60 = vadd.f32 %v7041_v58, %v5468_v34  ;;  %v4896_v7 = vpack.c.bf16 %v1642_v30, %v1642_v30  ;;  %v1643_v17 = vmin.f32 %v1515_v31, 6.0  ;;  %v5469_v10 = vpop.f32.mrb[114].mxu1 }
 0x33f   : > { %4140 = vst.msk [vmem:[%s6533_s26 + $0x1b0] sm:$0xf] %vm2220_vm1, %v5070_v32  ;;  %v3501_v22 = vmin.f32 %v3373_v33, 6.0  ;;  %v3202_v38 = vadd.f32 %v7041_v58, %v3201_v63  ;;  %v4894_v9 = vpack.c.bf16 %v1640_v35, %v1640_v35  ;;  %v1641_v39 = vmin.f32 %v1513_v36, 6.0  ;;  %v5290_v28 = vpop.f32.mrb[64].mxu0  ;;  %v3204_v41 = vpop.f32.mrb[115].mxu1 }
 0x340   : > { %4143 = vst.msk [vmem:[%s6533_s26 + $0x1bc] sm:$0xf] %vm2220_vm1, %v5073_v37  ;;  %v3378_v40 = vmax.f32 %v3210_v60, 0.0  ;;  %v3213_v27 = vadd.f32 %v7041_v58, %v5469_v10  ;;  %2283 = vst.msk [vmem:[%s6728_s24 + $0xf8] sm:$0xf] %vm2220_vm1, %v4896_v7  ;;  %v4897_v42 = vpack.c.bf16 %v1643_v17, %v1643_v17  ;;  %v1206_v4 = vadd.f32 %v6961_v18, %v5290_v28  ;;  %v1197_v8 = vpop.f32.mrb[65].mxu0 }
 0x341   : > { %v5071_v43 = vpack.c.bf16 %v3501_v22, %v3501_v22  ;;  %v3376_v44 = vmax.f32 %v3202_v38, 0.0  ;;  %2281 = vst.msk [vmem:[%s6728_s24 + $0xf0] sm:$0xf] %vm2220_vm1, %v4894_v9  ;;  %v4895_v45 = vpack.c.bf16 %v1641_v39, %v1641_v39  ;;  %v1198_v47 = vadd.f32 %v6961_v18, %v1197_v8  ;;  %v5291_v48 = vpop.f32.mrb[66].mxu0 }
 0x342   : > { %v3506_v49 = vmin.f32 %v3378_v40, 6.0  ;;  %v3379_v46 = vmax.f32 %v3213_v27, 0.0  ;;  %2284 = vst.msk [vmem:[%s6728_s24 + $0xfc] sm:$0xf] %vm2220_vm1, %v4897_v42  ;;  %v1518_v50 = vmax.f32 %v1206_v4, 0.0  ;;  %v1209_v52 = vadd.f32 %v6961_v18, %v5291_v48  ;;  %v1200_v53 = vpop.f32.mrb[67].mxu0 }
 0x343   : > { %4141 = vst.msk [vmem:[%s6533_s26 + $0x1b4] sm:$0xf] %vm2220_vm1, %v5071_v43  ;;  %v3504_v54 = vmin.f32 %v3376_v44, 6.0  ;;  %v3205_v12 = vadd.f32 %v7041_v58, %v3204_v41  ;;  %2282 = vst.msk [vmem:[%s6728_s24 + $0xf4] sm:$0xf] %vm2220_vm1, %v4895_v45  ;;  %v1516_v25 = vmax.f32 %v1198_v47, 0.0  ;;  %v1201_v56 = vadd.f32 %v6961_v18, %v1200_v53 }
 0x344   : > { %v5076_v57 = vpack.c.bf16 %v3506_v49, %v3506_v49  ;;  %v3507_v59 = vmin.f32 %v3379_v46, 6.0  ;;  %v1646_v0 = vmin.f32 %v1518_v50, 6.0  ;;  %v1519_v3 = vmax.f32 %v1209_v52, 0.0  ;;  %v5472_v61 = vpop.f32.mrb[116].mxu1 }
 0x345   : > { %v5074_v1 = vpack.c.bf16 %v3504_v54, %v3504_v54  ;;  %v3377_v51 = vmax.f32 %v3205_v12, 0.0  ;;  %v1644_v2 = vmin.f32 %v1516_v25, 6.0  ;;  %v1517_v5 = vmax.f32 %v1201_v56, 0.0  ;;  %v3217_v15 = vpop.f32.mrb[117].mxu1 }
 0x346   : > { %4146 = vst.msk [vmem:[%s6533_s26 + $0x1c8] sm:$0xf] %vm2220_vm1, %v5076_v57  ;;  %v5077_v13 = vpack.c.bf16 %v3507_v59, %v3507_v59  ;;  %v3226_v14 = vadd.f32 %v7041_v58, %v5472_v61  ;;  %v4900_v16 = vpack.c.bf16 %v1646_v0, %v1646_v0  ;;  %v1647_v19 = vmin.f32 %v1519_v3, 6.0  ;;  %v5473_v21 = vpop.f32.mrb[118].mxu1 }
 0x347   : > { %4144 = vst.msk [vmem:[%s6533_s26 + $0x1c0] sm:$0xf] %vm2220_vm1, %v5074_v1  ;;  %v3505_v20 = vmin.f32 %v3377_v51, 6.0  ;;  %v3218_v11 = vadd.f32 %v7041_v58, %v3217_v15  ;;  %v4898_v23 = vpack.c.bf16 %v1644_v2, %v1644_v2  ;;  %v1645_v55 = vmin.f32 %v1517_v5, 6.0  ;;  %v5294_v62 = vpop.f32.mrb[68].mxu0  ;;  %v3220_v26 = vpop.f32.mrb[119].mxu1 }
 0x348   : > { %4147 = vst.msk [vmem:[%s6533_s26 + $0x1cc] sm:$0xf] %vm2220_vm1, %v5077_v13  ;;  %v3382_v6 = vmax.f32 %v3226_v14, 0.0  ;;  %v3229_v24 = vadd.f32 %v7041_v58, %v5473_v21  ;;  %2287 = vst.msk [vmem:[%s6728_s24 + $0x108] sm:$0xf] %vm2220_vm1, %v4900_v16  ;;  %v4901_v29 = vpack.c.bf16 %v1647_v19, %v1647_v19  ;;  %v1222_v30 = vadd.f32 %v6961_v18, %v5294_v62  ;;  %v1213_v31 = vpop.f32.mrb[69].mxu0 }
 0x349   : > { %v5075_v32 = vpack.c.bf16 %v3505_v20, %v3505_v20  ;;  %v3380_v33 = vmax.f32 %v3218_v11, 0.0  ;;  %2285 = vst.msk [vmem:[%s6728_s24 + $0x100] sm:$0xf] %vm2220_vm1, %v4898_v23  ;;  %v4899_v34 = vpack.c.bf16 %v1645_v55, %v1645_v55  ;;  %v1214_v35 = vadd.f32 %v6961_v18, %v1213_v31  ;;  %v5295_v36 = vpop.f32.mrb[70].mxu0 }
 0x34a   : > { %v3510_v37 = vmin.f32 %v3382_v6, 6.0  ;;  %v3383_v60 = vmax.f32 %v3229_v24, 0.0  ;;  %2288 = vst.msk [vmem:[%s6728_s24 + $0x10c] sm:$0xf] %vm2220_vm1, %v4901_v29  ;;  %v1522_v63 = vmax.f32 %v1222_v30, 0.0  ;;  %v1225_v7 = vadd.f32 %v6961_v18, %v5295_v36  ;;  %v1216_v17 = vpop.f32.mrb[71].mxu0 }
 0x34b   : > { %4145 = vst.msk [vmem:[%s6533_s26 + $0x1c4] sm:$0xf] %vm2220_vm1, %v5075_v32  ;;  %v3508_v22 = vmin.f32 %v3380_v33, 6.0  ;;  %v3221_v38 = vadd.f32 %v7041_v58, %v3220_v26  ;;  %2286 = vst.msk [vmem:[%s6728_s24 + $0x104] sm:$0xf] %vm2220_vm1, %v4899_v34  ;;  %v1520_v10 = vmax.f32 %v1214_v35, 0.0  ;;  %v1217_v9 = vadd.f32 %v6961_v18, %v1216_v17 }
 0x34c   : > { %v5080_v39 = vpack.c.bf16 %v3510_v37, %v3510_v37  ;;  %v3511_v28 = vmin.f32 %v3383_v60, 6.0  ;;  %v1650_v40 = vmin.f32 %v1522_v63, 6.0  ;;  %v1523_v27 = vmax.f32 %v1225_v7, 0.0  ;;  %v5476_v4 = vpop.f32.mrb[120].mxu1 }
 0x34d   : > { %v5078_v41 = vpack.c.bf16 %v3508_v22, %v3508_v22  ;;  %v3381_v42 = vmax.f32 %v3221_v38, 0.0  ;;  %v1648_v8 = vmin.f32 %v1520_v10, 6.0  ;;  %v1521_v43 = vmax.f32 %v1217_v9, 0.0  ;;  %v3233_v47 = vpop.f32.mrb[121].mxu1 }
 0x34e   : > { %4150 = vst.msk [vmem:[%s6533_s26 + $0x1d8] sm:$0xf] %vm2220_vm1, %v5080_v39  ;;  %v5081_v44 = vpack.c.bf16 %v3511_v28, %v3511_v28  ;;  %v3242_v45 = vadd.f32 %v7041_v58, %v5476_v4  ;;  %v4904_v48 = vpack.c.bf16 %v1650_v40, %v1650_v40  ;;  %v1651_v49 = vmin.f32 %v1523_v27, 6.0  ;;  %v5477_v52 = vpop.f32.mrb[122].mxu1 }
 0x34f   : > { %4148 = vst.msk [vmem:[%s6533_s26 + $0x1d0] sm:$0xf] %vm2220_vm1, %v5078_v41  ;;  %v3509_v46 = vmin.f32 %v3381_v42, 6.0  ;;  %v3234_v50 = vadd.f32 %v7041_v58, %v3233_v47  ;;  %v4902_v53 = vpack.c.bf16 %v1648_v8, %v1648_v8  ;;  %v1649_v54 = vmin.f32 %v1521_v43, 6.0  ;;  %v5298_v12 = vpop.f32.mrb[72].mxu0  ;;  %v3236_v57 = vpop.f32.mrb[123].mxu1 }
 0x350   : > { %4151 = vst.msk [vmem:[%s6533_s26 + $0x1dc] sm:$0xf] %vm2220_vm1, %v5081_v44  ;;  %v3386_v25 = vmax.f32 %v3242_v45, 0.0  ;;  %v3245_v56 = vadd.f32 %v7041_v58, %v5477_v52  ;;  %2291 = vst.msk [vmem:[%s6728_s24 + $0x118] sm:$0xf] %vm2220_vm1, %v4904_v48  ;;  %v4905_v59 = vpack.c.bf16 %v1651_v49, %v1651_v49  ;;  %v1238_v0 = vadd.f32 %v6961_v18, %v5298_v12  ;;  %v1229_v3 = vpop.f32.mrb[73].mxu0 }
 0x351   : > { %v5079_v1 = vpack.c.bf16 %v3509_v46, %v3509_v46  ;;  %v3384_v51 = vmax.f32 %v3234_v50, 0.0  ;;  %2289 = vst.msk [vmem:[%s6728_s24 + $0x110] sm:$0xf] %vm2220_vm1, %v4902_v53  ;;  %v4903_v61 = vpack.c.bf16 %v1649_v54, %v1649_v54  ;;  %v1230_v2 = vadd.f32 %v6961_v18, %v1229_v3  ;;  %v5299_v5 = vpop.f32.mrb[74].mxu0 }
 0x352   : > { %v3514_v13 = vmin.f32 %v3386_v25, 6.0  ;;  %v3387_v14 = vmax.f32 %v3245_v56, 0.0  ;;  %2292 = vst.msk [vmem:[%s6728_s24 + $0x11c] sm:$0xf] %vm2220_vm1, %v4905_v59  ;;  %v1526_v15 = vmax.f32 %v1238_v0, 0.0  ;;  %v1241_v16 = vadd.f32 %v6961_v18, %v5299_v5  ;;  %v1232_v19 = vpop.f32.mrb[75].mxu0 }
 0x353   : > { %4149 = vst.msk [vmem:[%s6533_s26 + $0x1d4] sm:$0xf] %vm2220_vm1, %v5079_v1  ;;  %v3512_v20 = vmin.f32 %v3384_v51, 6.0  ;;  %v3237_v11 = vadd.f32 %v7041_v58, %v3236_v57  ;;  %2290 = vst.msk [vmem:[%s6728_s24 + $0x114] sm:$0xf] %vm2220_vm1, %v4903_v61  ;;  %v1524_v21 = vmax.f32 %v1230_v2, 0.0  ;;  %v1233_v23 = vadd.f32 %v6961_v18, %v1232_v19 }
 0x354   : > { %v5084_v55 = vpack.c.bf16 %v3514_v13, %v3514_v13  ;;  %v3515_v62 = vmin.f32 %v3387_v14, 6.0  ;;  %v1654_v6 = vmin.f32 %v1526_v15, 6.0  ;;  %v1527_v24 = vmax.f32 %v1241_v16, 0.0  ;;  %v5480_v30 = vpop.f32.mrb[124].mxu1 }
 0x355   : > { %v5082_v26 = vpack.c.bf16 %v3512_v20, %v3512_v20  ;;  %v3385_v29 = vmax.f32 %v3237_v11, 0.0  ;;  %v1652_v31 = vmin.f32 %v1524_v21, 6.0  ;;  %v1525_v32 = vmax.f32 %v1233_v23, 0.0  ;;  %v3249_v35 = vpop.f32.mrb[125].mxu1 }
 0x356   : > { %4154 = vst.msk [vmem:[%s6533_s26 + $0x1e8] sm:$0xf] %vm2220_vm1, %v5084_v55  ;;  %v5085_v33 = vpack.c.bf16 %v3515_v62, %v3515_v62  ;;  %v3258_v34 = vadd.f32 %v7041_v58, %v5480_v30  ;;  %v4908_v36 = vpack.c.bf16 %v1654_v6, %v1654_v6  ;;  %v1655_v37 = vmin.f32 %v1527_v24, 6.0  ;;  %v5481_v7 = vpop.f32.mrb[126].mxu1 }
 0x357   : > { %4152 = vst.msk [vmem:[%s6533_s26 + $0x1e0] sm:$0xf] %vm2220_vm1, %v5082_v26  ;;  %v3513_v60 = vmin.f32 %v3385_v29, 6.0  ;;  %v3250_v63 = vadd.f32 %v7041_v58, %v3249_v35  ;;  %v4906_v17 = vpack.c.bf16 %v1652_v31, %v1652_v31  ;;  %v1653_v22 = vmin.f32 %v1525_v32, 6.0  ;;  %v5302_v38 = vpop.f32.mrb[76].mxu0  ;;  %v3252_v39 = vpop.f32.mrb[127].mxu1 }
 0x358   : > { %4155 = vst.msk [vmem:[%s6533_s26 + $0x1ec] sm:$0xf] %vm2220_vm1, %v5085_v33  ;;  %v3390_v10 = vmax.f32 %v3258_v34, 0.0  ;;  %v3261_v9 = vadd.f32 %v7041_v58, %v5481_v7  ;;  %2295 = vst.msk [vmem:[%s6728_s24 + $0x128] sm:$0xf] %vm2220_vm1, %v4908_v36  ;;  %v4909_v28 = vpack.c.bf16 %v1655_v37, %v1655_v37  ;;  %v1254_v40 = vadd.f32 %v6961_v18, %v5302_v38  ;;  %v1245_v27 = vpop.f32.mrb[77].mxu0 }
 0x359   : > { %v5083_v41 = vpack.c.bf16 %v3513_v60, %v3513_v60  ;;  %v3388_v42 = vmax.f32 %v3250_v63, 0.0  ;;  %2293 = vst.msk [vmem:[%s6728_s24 + $0x120] sm:$0xf] %vm2220_vm1, %v4906_v17  ;;  %v4907_v4 = vpack.c.bf16 %v1653_v22, %v1653_v22  ;;  %v1246_v8 = vadd.f32 %v6961_v18, %v1245_v27  ;;  %v5303_v43 = vpop.f32.mrb[78].mxu0 }
 0x35a   : > { %v3518_v44 = vmin.f32 %v3390_v10, 6.0  ;;  %v3391_v45 = vmax.f32 %v3261_v9, 0.0  ;;  %2296 = vst.msk [vmem:[%s6728_s24 + $0x12c] sm:$0xf] %vm2220_vm1, %v4909_v28  ;;  %v1530_v47 = vmax.f32 %v1254_v40, 0.0  ;;  %v1257_v48 = vadd.f32 %v6961_v18, %v5303_v43  ;;  %v1248_v49 = vpop.f32.mrb[79].mxu0 }
 0x35b   : > { %4153 = vst.msk [vmem:[%s6533_s26 + $0x1e4] sm:$0xf] %vm2220_vm1, %v5083_v41  ;;  %v3516_v46 = vmin.f32 %v3388_v42, 6.0  ;;  %v3253_v50 = vadd.f32 %v7041_v58, %v3252_v39  ;;  %2294 = vst.msk [vmem:[%s6728_s24 + $0x124] sm:$0xf] %vm2220_vm1, %v4907_v4  ;;  %v1528_v52 = vmax.f32 %v1246_v8, 0.0  ;;  %v1249_v53 = vadd.f32 %v6961_v18, %v1248_v49 }
 0x35c   : > { %v5088_v54 = vpack.c.bf16 %v3518_v44, %v3518_v44  ;;  %v3519_v12 = vmin.f32 %v3391_v45, 6.0  ;;  %v1658_v25 = vmin.f32 %v1530_v47, 6.0  ;;  %v1531_v56 = vmax.f32 %v1257_v48, 0.0 }
 0x35d   : > { %v5086_v57 = vpack.c.bf16 %v3516_v46, %v3516_v46  ;;  %v3389_v59 = vmax.f32 %v3253_v50, 0.0  ;;  %v1656_v0 = vmin.f32 %v1528_v52, 6.0  ;;  %v1529_v3 = vmax.f32 %v1249_v53, 0.0 }
 0x35e   : > { %4158 = vst.msk [vmem:[%s6533_s26 + $0x1f8] sm:$0xf] %vm2220_vm1, %v5088_v54  ;;  %v5089_v1 = vpack.c.bf16 %v3519_v12, %v3519_v12  ;;  %v4912_v58 = vpack.c.bf16 %v1658_v25, %v1658_v25  ;;  %v1659_v51 = vmin.f32 %v1531_v56, 6.0 }
 0x35f   : > { %4156 = vst.msk [vmem:[%s6533_s26 + $0x1f0] sm:$0xf] %vm2220_vm1, %v5086_v57  ;;  %v3517_v61 = vmin.f32 %v3389_v59, 6.0  ;;  %v4910_v2 = vpack.c.bf16 %v1656_v0, %v1656_v0  ;;  %v1657_v5 = vmin.f32 %v1529_v3, 6.0  ;;  %v5306_v13 = vpop.f32.mrb[80].mxu0 }
 0x360   : > { %4159 = vst.msk [vmem:[%s6533_s26 + $0x1fc] sm:$0xf] %vm2220_vm1, %v5089_v1  ;;  %2299 = vst.msk [vmem:[%s6728_s24 + $0x138] sm:$0xf] %vm2220_vm1, %v4912_v58  ;;  %v4913_v14 = vpack.c.bf16 %v1659_v51, %v1659_v51  ;;  %v1270_v15 = vadd.f32 %v6961_v18, %v5306_v13  ;;  %v1261_v16 = vpop.f32.mrb[81].mxu0 }
 0x361   : > { %v5087_v19 = vpack.c.bf16 %v3517_v61, %v3517_v61  ;;  %2297 = vst.msk [vmem:[%s6728_s24 + $0x130] sm:$0xf] %vm2220_vm1, %v4910_v2  ;;  %v4911_v20 = vpack.c.bf16 %v1657_v5, %v1657_v5  ;;  %v1262_v11 = vadd.f32 %v6961_v18, %v1261_v16  ;;  %v5307_v21 = vpop.f32.mrb[82].mxu0 }
 0x362   : > { %2300 = vst.msk [vmem:[%s6728_s24 + $0x13c] sm:$0xf] %vm2220_vm1, %v4913_v14  ;;  %v1534_v23 = vmax.f32 %v1270_v15, 0.0  ;;  %v1273_v55 = vadd.f32 %v6961_v18, %v5307_v21  ;;  %v1264_v62 = vpop.f32.mrb[83].mxu0 }
 0x363   : > { %4157 = vst.msk [vmem:[%s6533_s26 + $0x1f4] sm:$0xf] %vm2220_vm1, %v5087_v19  ;;  %2298 = vst.msk [vmem:[%s6728_s24 + $0x134] sm:$0xf] %vm2220_vm1, %v4911_v20  ;;  %v1532_v6 = vmax.f32 %v1262_v11, 0.0  ;;  %v1265_v24 = vadd.f32 %v6961_v18, %v1264_v62 }
 0x364   : > { %5830 = shalt.err (!%p5827_p0)
}
 0x365   : > { %s5831_s30 = scalar_lea.hbm %s7207_s1, 8192  ;;  %s5835_s29 = scalar_lea.hbm %s7529_s25, 16384 }
 0x366   : > { %p5832_p13 = scmp.ne.s32.totalorder %s7207_s1, %s5831_s30  ;;  %p5836_p5 = scmp.lt.u32.totalorder %s7207_s1, %s7529_s25 }
 0x367   : > { %p5837_p10 = scmp.lt.u32.totalorder %s5835_s29, %s5831_s30  ;;  %p5839_p2 = scmp.lt.u32.totalorder %s5831_s30, %s7207_s1 }
 0x368   : > { %p5833_p4 = pnand %p5832_p13, %p7531_p7 }
 0x369   : > { %p5838_p12 = por %p5837_p10, %p5836_p5 }
 0x36a   : > { %p5834_p8 = pneg %p5833_p4 }
 0x36b   : > { %p5840_p11 = por %p5839_p2, %p5838_p12 }
 0x36d   : > { %p5841_p9 = pnand %p5840_p11, %p5834_p8 }
 0x36f   : > { %5844 = shalt.err (!%p5841_p9)
}
 0x370   : > { %s5958_s23 = smov 64   ;;  %s5959_s21 = smov 4   ;;  %v1662_v26 = vmin.f32 %v1534_v23, 6.0  ;;  %v1535_v29 = vmax.f32 %v1273_v55, 0.0  ;;  %v1660_v30 = vmin.f32 %v1532_v6, 6.0  ;;  %v1533_v31 = vmax.f32 %v1265_v24, 0.0 }
 0x371   : > { %5507 = dma.vmem_to_hbm [thread:$0]  (%p7531_p7), %s7209_s5, 8192, %s7207_s1, %s4166_s3, %s5958_s23, %s5958_s23, %s5959_s21   ;;  %v5310_v36 = vpop.f32.mrb[84].mxu0  ;;  %v7260_v28 = vld [vmem:[#allocation10] ss:$0 sm:$0xff] }
 0x372   : > { %v4916_v32 = vpack.c.bf16 %v1662_v26, %v1662_v26  ;;  %v1663_v33 = vmin.f32 %v1535_v29, 6.0  ;;  %v4914_v34 = vpack.c.bf16 %v1660_v30, %v1660_v30  ;;  %v1661_v35 = vmin.f32 %v1533_v31, 6.0  ;;  %v1277_v63 = vpop.f32.mrb[85].mxu0  ;;  %s4181_s13 = sshll.u32 %s6728_s24, 4  ;;  %s7532_s8 = sld [smem:[#allocation35_spill]]  ;;  %s7395_s13 = int_to_ptr.vmem [resolvable:$true] %s4181_s13 }
 0x373   : > { %v1286_v60 = vadd.f32 %v6961_v18, %v5310_v36  ;;  %v1278_v17 = vadd.f32 %v6961_v18, %v1277_v63  ;;  %v5311_v22 = vpop.f32.mrb[86].mxu0  ;;  %s4161_s1 = scalar_lea.sflag [#allocation4], %s6299_s17  ;;  %s5845_s3 = scalar_lea.vmem %s7395_s13, 8192 }
 0x374   : > { %2303 = vst.msk [vmem:[%s6728_s24 + $0x148] sm:$0xf] %vm2220_vm1, %v4916_v32  ;;  %v4917_v37 = vpack.c.bf16 %v1663_v33, %v1663_v33  ;;  %2301 = vst.msk [vmem:[%s6728_s24 + $0x140] sm:$0xf] %vm2220_vm1, %v4914_v34  ;;  %v4915_v7 = vpack.c.bf16 %v1661_v35, %v1661_v35  ;;  %v1289_v10 = vadd.f32 %v6961_v18, %v5311_v22  ;;  %v1280_v9 = vpop.f32.mrb[87].mxu0  ;;  %p5846_p1 = scmp.ne.s32.totalorder %s7395_s13, %s5845_s3  ;;  %s5960_s18 = smov [#allocation14]  }
 0x375   : > { %v1538_v38 = vmax.f32 %v1286_v60, 0.0  ;;  %v1536_v39 = vmax.f32 %v1278_v17, 0.0  ;;  %v1281_v40 = vadd.f32 %v7260_v28, %v1280_v9  ;;  %v5314_v18 = vpop.f32.mrb[88].mxu0  ;;  %s5849_s16 = sshll.u32 %s5960_s18, 4  ;;  %s5850_s16 = int_to_ptr.vmem [resolvable:$false] %s5849_s16 }
 0x376   : > { %2304 = vst.msk [vmem:[%s6728_s24 + $0x14c] sm:$0xf] %vm2220_vm1, %v4917_v37  ;;  %2302 = vst.msk [vmem:[%s6728_s24 + $0x144] sm:$0xf] %vm2220_vm1, %v4915_v7  ;;  %v1539_v41 = vmax.f32 %v1289_v10, 0.0  ;;  %v1302_v48 = vadd.f32 %v7260_v28, %v5314_v18  ;;  %v1293_v49 = vpop.f32.mrb[89].mxu0  ;;  %p5847_p3 = pnand %p5846_p1, %p7531_p7  ;;  %p5852_p0 = scmp.lt.s32.totalorder %s7395_s13, %s5850_s16 }
 0x377   : > { %v1666_v27 = vmin.f32 %v1538_v38, 6.0  ;;  %v1664_v42 = vmin.f32 %v1536_v39, 6.0  ;;  %v1537_v4 = vmax.f32 %v1281_v40, 0.0  ;;  %v1294_v50 = vadd.f32 %v7260_v28, %v1293_v49  ;;  %v5315_v52 = vpop.f32.mrb[90].mxu0 }
 0x378   : > { %v1667_v43 = vmin.f32 %v1539_v41, 6.0  ;;  %v1542_v53 = vmax.f32 %v1302_v48, 0.0  ;;  %v1305_v54 = vadd.f32 %v7260_v28, %v5315_v52  ;;  %v1296_v12 = vpop.f32.mrb[91].mxu0  ;;  %s7393_s22 = scalar_lea.hbm %s7532_s8, %s5090_s20  ;;  %p5848_p6 = pneg %p5847_p3 }
 0x379   : > { %v4920_v8 = vpack.c.bf16 %v1666_v27, %v1666_v27  ;;  %v4918_v44 = vpack.c.bf16 %v1664_v42, %v1664_v42  ;;  %v1665_v45 = vmin.f32 %v1537_v4, 6.0  ;;  %v1540_v25 = vmax.f32 %v1294_v50, 0.0  ;;  %v5318_v2 = vpop.f32.mrb[92].mxu0  ;;  %s5851_s20 = scalar_lea.vmem %s5850_s16, 16384 }
 0x37a   : > { %v4921_v47 = vpack.c.bf16 %v1667_v43, %v1667_v43  ;;  %v1297_v56 = vadd.f32 %v7260_v28, %v1296_v12  ;;  %v1670_v57 = vmin.f32 %v1542_v53, 6.0  ;;  %v1543_v59 = vmax.f32 %v1305_v54, 0.0  ;;  %v1309_v14 = vpop.f32.mrb[93].mxu0  ;;  %p5853_p13 = scmp.lt.s32.totalorder %s5851_s20, %s5845_s3 }
 0x37b   : > { %2307 = vst.msk [vmem:[%s6728_s24 + $0x158] sm:$0xf] %vm2220_vm1, %v4920_v8  ;;  %2305 = vst.msk [vmem:[%s6728_s24 + $0x150] sm:$0xf] %vm2220_vm1, %v4918_v44  ;;  %v4919_v46 = vpack.c.bf16 %v1665_v45, %v1665_v45  ;;  %v1668_v0 = vmin.f32 %v1540_v25, 6.0  ;;  %v1318_v13 = vadd.f32 %v7260_v28, %v5318_v2  ;;  %v1310_v16 = vadd.f32 %v7260_v28, %v1309_v14  ;;  %v5319_v19 = vpop.f32.mrb[94].mxu0 }
 0x37c   : > { %2308 = vst.msk [vmem:[%s6728_s24 + $0x15c] sm:$0xf] %vm2220_vm1, %v4921_v47  ;;  %v1541_v3 = vmax.f32 %v1297_v56, 0.0  ;;  %v4924_v1 = vpack.c.bf16 %v1670_v57, %v1670_v57  ;;  %v1671_v58 = vmin.f32 %v1543_v59, 6.0  ;;  %v1321_v11 = vadd.f32 %v7260_v28, %v5319_v19  ;;  %v1312_v21 = vpop.f32.mrb[95].mxu0  ;;  %p5854_p4 = por %p5853_p13, %p5852_p0 }
 0x37d   : > { %2306 = vst.msk [vmem:[%s6728_s24 + $0x154] sm:$0xf] %vm2220_vm1, %v4919_v46  ;;  %v4922_v51 = vpack.c.bf16 %v1668_v0, %v1668_v0  ;;  %v1546_v20 = vmax.f32 %v1318_v13, 0.0  ;;  %v1544_v23 = vmax.f32 %v1310_v16, 0.0  ;;  %v1313_v55 = vadd.f32 %v7260_v28, %v1312_v21 }
 0x37e   : > { %v1669_v61 = vmin.f32 %v1541_v3, 6.0  ;;  %2311 = vst.msk [vmem:[%s6728_s24 + $0x168] sm:$0xf] %vm2220_vm1, %v4924_v1  ;;  %v4925_v5 = vpack.c.bf16 %v1671_v58, %v1671_v58  ;;  %v1547_v6 = vmax.f32 %v1321_v11, 0.0  ;;  %p5855_p8 = pnand %p5854_p4, %p5848_p6 }
 0x37f   : > { %2309 = vst.msk [vmem:[%s6728_s24 + $0x160] sm:$0xf] %vm2220_vm1, %v4922_v51  ;;  %v1674_v62 = vmin.f32 %v1546_v20, 6.0  ;;  %v1672_v24 = vmin.f32 %v1544_v23, 6.0  ;;  %v1545_v26 = vmax.f32 %v1313_v55, 0.0  ;;  %v5322_v33 = vpop.f32.mrb[96].mxu0 }
 0x380   : > { %v4923_v15 = vpack.c.bf16 %v1669_v61, %v1669_v61  ;;  %2312 = vst.msk [vmem:[%s6728_s24 + $0x16c] sm:$0xf] %vm2220_vm1, %v4925_v5  ;;  %v1675_v30 = vmin.f32 %v1547_v6, 6.0  ;;  %v1334_v35 = vadd.f32 %v7260_v28, %v5322_v33  ;;  %v1325_v36 = vpop.f32.mrb[97].mxu0 }
 0x381   : > { %v4928_v29 = vpack.c.bf16 %v1674_v62, %v1674_v62  ;;  %v4926_v31 = vpack.c.bf16 %v1672_v24, %v1672_v24  ;;  %v1673_v32 = vmin.f32 %v1545_v26, 6.0  ;;  %v1326_v60 = vadd.f32 %v7260_v28, %v1325_v36  ;;  %v5323_v63 = vpop.f32.mrb[98].mxu0 }
 0x382   : > { %2310 = vst.msk [vmem:[%s6728_s24 + $0x164] sm:$0xf] %vm2220_vm1, %v4923_v15  ;;  %v4929_v34 = vpack.c.bf16 %v1675_v30, %v1675_v30  ;;  %v1550_v7 = vmax.f32 %v1334_v35, 0.0  ;;  %v1337_v17 = vadd.f32 %v7260_v28, %v5323_v63  ;;  %v1328_v22 = vpop.f32.mrb[99].mxu0 }
 0x383   : > { %2315 = vst.msk [vmem:[%s6728_s24 + $0x178] sm:$0xf] %vm2220_vm1, %v4928_v29  ;;  %2313 = vst.msk [vmem:[%s6728_s24 + $0x170] sm:$0xf] %vm2220_vm1, %v4926_v31  ;;  %v4927_v37 = vpack.c.bf16 %v1673_v32, %v1673_v32  ;;  %v1548_v38 = vmax.f32 %v1326_v60, 0.0  ;;  %v1329_v10 = vadd.f32 %v7260_v28, %v1328_v22 }
 0x384   : > { %2316 = vst.msk [vmem:[%s6728_s24 + $0x17c] sm:$0xf] %vm2220_vm1, %v4929_v34  ;;  %v1678_v9 = vmin.f32 %v1550_v7, 6.0  ;;  %v1551_v39 = vmax.f32 %v1337_v17, 0.0 }
 0x385   : > { %2314 = vst.msk [vmem:[%s6728_s24 + $0x174] sm:$0xf] %vm2220_vm1, %v4927_v37  ;;  %v1676_v40 = vmin.f32 %v1548_v38, 6.0  ;;  %v1549_v27 = vmax.f32 %v1329_v10, 0.0 }
 0x386   : > { %v4932_v41 = vpack.c.bf16 %v1678_v9, %v1678_v9  ;;  %v1679_v42 = vmin.f32 %v1551_v39, 6.0 }
 0x387   : > { %v4930_v4 = vpack.c.bf16 %v1676_v40, %v1676_v40  ;;  %v1677_v8 = vmin.f32 %v1549_v27, 6.0  ;;  %v5326_v43 = vpop.f32.mrb[100].mxu0 }
 0x388   : > { %2319 = vst.msk [vmem:[%s6728_s24 + $0x188] sm:$0xf] %vm2220_vm1, %v4932_v41  ;;  %v4933_v44 = vpack.c.bf16 %v1679_v42, %v1679_v42  ;;  %v1350_v45 = vadd.f32 %v7260_v28, %v5326_v43  ;;  %v1341_v18 = vpop.f32.mrb[101].mxu0 }
 0x389   : > { %2317 = vst.msk [vmem:[%s6728_s24 + $0x180] sm:$0xf] %vm2220_vm1, %v4930_v4  ;;  %v4931_v47 = vpack.c.bf16 %v1677_v8, %v1677_v8  ;;  %v1342_v48 = vadd.f32 %v7260_v28, %v1341_v18  ;;  %v5327_v49 = vpop.f32.mrb[102].mxu0 }
 0x38a   : > { %2320 = vst.msk [vmem:[%s6728_s24 + $0x18c] sm:$0xf] %vm2220_vm1, %v4933_v44  ;;  %v1554_v46 = vmax.f32 %v1350_v45, 0.0  ;;  %v1353_v50 = vadd.f32 %v7260_v28, %v5327_v49  ;;  %v1344_v52 = vpop.f32.mrb[103].mxu0 }
 0x38b   : > { %2318 = vst.msk [vmem:[%s6728_s24 + $0x184] sm:$0xf] %vm2220_vm1, %v4931_v47  ;;  %v1552_v53 = vmax.f32 %v1342_v48, 0.0  ;;  %v1345_v54 = vadd.f32 %v7260_v28, %v1344_v52 }
 0x38c   : > { %v1682_v12 = vmin.f32 %v1554_v46, 6.0  ;;  %v1555_v25 = vmax.f32 %v1353_v50, 0.0 }
 0x38d   : > { %v1680_v56 = vmin.f32 %v1552_v53, 6.0  ;;  %v1553_v57 = vmax.f32 %v1345_v54, 0.0 }
 0x38e   : > { %v4936_v59 = vpack.c.bf16 %v1682_v12, %v1682_v12  ;;  %v1683_v0 = vmin.f32 %v1555_v25, 6.0 }
 0x38f   : > { %v4934_v3 = vpack.c.bf16 %v1680_v56, %v1680_v56  ;;  %v1681_v1 = vmin.f32 %v1553_v57, 6.0  ;;  %v5330_v58 = vpop.f32.mrb[104].mxu0 }
 0x390   : > { %2323 = vst.msk [vmem:[%s6728_s24 + $0x198] sm:$0xf] %vm2220_vm1, %v4936_v59  ;;  %v4937_v51 = vpack.c.bf16 %v1683_v0, %v1683_v0  ;;  %v1366_v61 = vadd.f32 %v7260_v28, %v5330_v58  ;;  %v1357_v2 = vpop.f32.mrb[105].mxu0 }
 0x391   : > { %2321 = vst.msk [vmem:[%s6728_s24 + $0x190] sm:$0xf] %vm2220_vm1, %v4934_v3  ;;  %v4935_v5 = vpack.c.bf16 %v1681_v1, %v1681_v1  ;;  %v1358_v13 = vadd.f32 %v7260_v28, %v1357_v2  ;;  %v5331_v14 = vpop.f32.mrb[106].mxu0 }
 0x392   : > { %2324 = vst.msk [vmem:[%s6728_s24 + $0x19c] sm:$0xf] %vm2220_vm1, %v4937_v51  ;;  %v1558_v15 = vmax.f32 %v1366_v61, 0.0  ;;  %v1369_v16 = vadd.f32 %v7260_v28, %v5331_v14  ;;  %v1360_v19 = vpop.f32.mrb[107].mxu0 }
 0x393   : > { %2322 = vst.msk [vmem:[%s6728_s24 + $0x194] sm:$0xf] %vm2220_vm1, %v4935_v5  ;;  %v1556_v20 = vmax.f32 %v1358_v13, 0.0  ;;  %v1361_v11 = vadd.f32 %v7260_v28, %v1360_v19 }
 0x394   : > { %v1686_v21 = vmin.f32 %v1558_v15, 6.0  ;;  %v1559_v23 = vmax.f32 %v1369_v16, 0.0 }
 0x395   : > { %v1684_v55 = vmin.f32 %v1556_v20, 6.0  ;;  %v1557_v62 = vmax.f32 %v1361_v11, 0.0 }
 0x396   : > { %v4940_v6 = vpack.c.bf16 %v1686_v21, %v1686_v21  ;;  %v1687_v24 = vmin.f32 %v1559_v23, 6.0 }
 0x397   : > { %v4938_v26 = vpack.c.bf16 %v1684_v55, %v1684_v55  ;;  %v1685_v29 = vmin.f32 %v1557_v62, 6.0  ;;  %v5334_v30 = vpop.f32.mrb[108].mxu0 }
 0x398   : > { %2327 = vst.msk [vmem:[%s6728_s24 + $0x1a8] sm:$0xf] %vm2220_vm1, %v4940_v6  ;;  %v4941_v31 = vpack.c.bf16 %v1687_v24, %v1687_v24  ;;  %v1382_v32 = vadd.f32 %v7260_v28, %v5334_v30  ;;  %v1373_v33 = vpop.f32.mrb[109].mxu0 }
 0x399   : > { %2325 = vst.msk [vmem:[%s6728_s24 + $0x1a0] sm:$0xf] %vm2220_vm1, %v4938_v26  ;;  %v4939_v34 = vpack.c.bf16 %v1685_v29, %v1685_v29  ;;  %v1374_v35 = vadd.f32 %v7260_v28, %v1373_v33  ;;  %v5335_v36 = vpop.f32.mrb[110].mxu0 }
 0x39a   : > { %2328 = vst.msk [vmem:[%s6728_s24 + $0x1ac] sm:$0xf] %vm2220_vm1, %v4941_v31  ;;  %v1562_v37 = vmax.f32 %v1382_v32, 0.0  ;;  %v1385_v60 = vadd.f32 %v7260_v28, %v5335_v36  ;;  %v1376_v63 = vpop.f32.mrb[111].mxu0 }
 0x39b   : > { %2326 = vst.msk [vmem:[%s6728_s24 + $0x1a4] sm:$0xf] %vm2220_vm1, %v4939_v34  ;;  %v1560_v7 = vmax.f32 %v1374_v35, 0.0  ;;  %v1377_v17 = vadd.f32 %v7260_v28, %v1376_v63 }
 0x39c   : > { %v1690_v22 = vmin.f32 %v1562_v37, 6.0  ;;  %v1563_v38 = vmax.f32 %v1385_v60, 0.0 }
 0x39d   : > { %v1688_v10 = vmin.f32 %v1560_v7, 6.0  ;;  %v1561_v9 = vmax.f32 %v1377_v17, 0.0 }
 0x39e   : > { %v4944_v39 = vpack.c.bf16 %v1690_v22, %v1690_v22  ;;  %v1691_v40 = vmin.f32 %v1563_v38, 6.0 }
 0x39f   : > { %v4942_v27 = vpack.c.bf16 %v1688_v10, %v1688_v10  ;;  %v1689_v41 = vmin.f32 %v1561_v9, 6.0  ;;  %v5338_v42 = vpop.f32.mrb[112].mxu0 }
 0x3a0   : > { %2331 = vst.msk [vmem:[%s6728_s24 + $0x1b8] sm:$0xf] %vm2220_vm1, %v4944_v39  ;;  %v4945_v4 = vpack.c.bf16 %v1691_v40, %v1691_v40  ;;  %v1398_v8 = vadd.f32 %v7260_v28, %v5338_v42  ;;  %v1389_v43 = vpop.f32.mrb[113].mxu0 }
 0x3a1   : > { %2329 = vst.msk [vmem:[%s6728_s24 + $0x1b0] sm:$0xf] %vm2220_vm1, %v4942_v27  ;;  %v4943_v44 = vpack.c.bf16 %v1689_v41, %v1689_v41  ;;  %v1390_v45 = vadd.f32 %v7260_v28, %v1389_v43  ;;  %v5339_v18 = vpop.f32.mrb[114].mxu0 }
 0x3a2   : > { %2332 = vst.msk [vmem:[%s6728_s24 + $0x1bc] sm:$0xf] %vm2220_vm1, %v4945_v4  ;;  %v1566_v47 = vmax.f32 %v1398_v8, 0.0  ;;  %v1401_v48 = vadd.f32 %v7260_v28, %v5339_v18  ;;  %v1392_v49 = vpop.f32.mrb[115].mxu0 }
 0x3a3   : > { %2330 = vst.msk [vmem:[%s6728_s24 + $0x1b4] sm:$0xf] %vm2220_vm1, %v4943_v44  ;;  %v1564_v46 = vmax.f32 %v1390_v45, 0.0  ;;  %v1393_v50 = vadd.f32 %v7260_v28, %v1392_v49 }
 0x3a4   : > { %v1694_v52 = vmin.f32 %v1566_v47, 6.0  ;;  %v1567_v53 = vmax.f32 %v1401_v48, 0.0 }
 0x3a5   : > { %v1692_v54 = vmin.f32 %v1564_v46, 6.0  ;;  %v1565_v12 = vmax.f32 %v1393_v50, 0.0 }
 0x3a6   : > { %v4948_v25 = vpack.c.bf16 %v1694_v52, %v1694_v52  ;;  %v1695_v56 = vmin.f32 %v1567_v53, 6.0 }
 0x3a7   : > { %v4946_v57 = vpack.c.bf16 %v1692_v54, %v1692_v54  ;;  %v1693_v59 = vmin.f32 %v1565_v12, 6.0  ;;  %v5342_v0 = vpop.f32.mrb[116].mxu0 }
 0x3a8   : > { %2335 = vst.msk [vmem:[%s6728_s24 + $0x1c8] sm:$0xf] %vm2220_vm1, %v4948_v25  ;;  %v4949_v3 = vpack.c.bf16 %v1695_v56, %v1695_v56  ;;  %v1414_v1 = vadd.f32 %v7260_v28, %v5342_v0  ;;  %v1405_v58 = vpop.f32.mrb[117].mxu0 }
 0x3a9   : > { %2333 = vst.msk [vmem:[%s6728_s24 + $0x1c0] sm:$0xf] %vm2220_vm1, %v4946_v57  ;;  %v4947_v51 = vpack.c.bf16 %v1693_v59, %v1693_v59  ;;  %v1406_v61 = vadd.f32 %v7260_v28, %v1405_v58  ;;  %v5343_v2 = vpop.f32.mrb[118].mxu0 }
 0x3aa   : > { %2336 = vst.msk [vmem:[%s6728_s24 + $0x1cc] sm:$0xf] %vm2220_vm1, %v4949_v3  ;;  %v1570_v5 = vmax.f32 %v1414_v1, 0.0  ;;  %v1417_v13 = vadd.f32 %v7260_v28, %v5343_v2  ;;  %v1408_v14 = vpop.f32.mrb[119].mxu0 }
 0x3ab   : > { %2334 = vst.msk [vmem:[%s6728_s24 + $0x1c4] sm:$0xf] %vm2220_vm1, %v4947_v51  ;;  %v1568_v15 = vmax.f32 %v1406_v61, 0.0  ;;  %v1409_v16 = vadd.f32 %v7260_v28, %v1408_v14 }
 0x3ac   : > { %v1698_v19 = vmin.f32 %v1570_v5, 6.0  ;;  %v1571_v20 = vmax.f32 %v1417_v13, 0.0 }
 0x3ad   : > { %v1696_v11 = vmin.f32 %v1568_v15, 6.0  ;;  %v1569_v21 = vmax.f32 %v1409_v16, 0.0 }
 0x3ae   : > { %v4952_v23 = vpack.c.bf16 %v1698_v19, %v1698_v19  ;;  %v1699_v55 = vmin.f32 %v1571_v20, 6.0 }
 0x3af   : > { %v4950_v62 = vpack.c.bf16 %v1696_v11, %v1696_v11  ;;  %v1697_v6 = vmin.f32 %v1569_v21, 6.0  ;;  %v5346_v24 = vpop.f32.mrb[120].mxu0 }
 0x3b0   : > { %2339 = vst.msk [vmem:[%s6728_s24 + $0x1d8] sm:$0xf] %vm2220_vm1, %v4952_v23  ;;  %v4953_v26 = vpack.c.bf16 %v1699_v55, %v1699_v55  ;;  %v1430_v29 = vadd.f32 %v7260_v28, %v5346_v24  ;;  %v1421_v30 = vpop.f32.mrb[121].mxu0 }
 0x3b1   : > { %2337 = vst.msk [vmem:[%s6728_s24 + $0x1d0] sm:$0xf] %vm2220_vm1, %v4950_v62  ;;  %v4951_v31 = vpack.c.bf16 %v1697_v6, %v1697_v6  ;;  %v1422_v32 = vadd.f32 %v7260_v28, %v1421_v30  ;;  %v5347_v33 = vpop.f32.mrb[122].mxu0 }
 0x3b2   : > { %2340 = vst.msk [vmem:[%s6728_s24 + $0x1dc] sm:$0xf] %vm2220_vm1, %v4953_v26  ;;  %v1574_v34 = vmax.f32 %v1430_v29, 0.0  ;;  %v1433_v35 = vadd.f32 %v7260_v28, %v5347_v33  ;;  %v1424_v36 = vpop.f32.mrb[123].mxu0 }
 0x3b3   : > { %2338 = vst.msk [vmem:[%s6728_s24 + $0x1d4] sm:$0xf] %vm2220_vm1, %v4951_v31  ;;  %v1572_v37 = vmax.f32 %v1422_v32, 0.0  ;;  %v1425_v60 = vadd.f32 %v7260_v28, %v1424_v36 }
 0x3b4   : > { %v1702_v63 = vmin.f32 %v1574_v34, 6.0  ;;  %v1575_v7 = vmax.f32 %v1433_v35, 0.0 }
 0x3b5   : > { %v1700_v17 = vmin.f32 %v1572_v37, 6.0  ;;  %v1573_v22 = vmax.f32 %v1425_v60, 0.0 }
 0x3b6   : > { %v4956_v38 = vpack.c.bf16 %v1702_v63, %v1702_v63  ;;  %v1703_v10 = vmin.f32 %v1575_v7, 6.0 }
 0x3b7   : > { %v4954_v9 = vpack.c.bf16 %v1700_v17, %v1700_v17  ;;  %v1701_v39 = vmin.f32 %v1573_v22, 6.0  ;;  %v5350_v40 = vpop.f32.mrb[124].mxu0 }
 0x3b8   : > { %2343 = vst.msk [vmem:[%s6728_s24 + $0x1e8] sm:$0xf] %vm2220_vm1, %v4956_v38  ;;  %v4957_v27 = vpack.c.bf16 %v1703_v10, %v1703_v10  ;;  %v1446_v41 = vadd.f32 %v7260_v28, %v5350_v40  ;;  %v1437_v42 = vpop.f32.mrb[125].mxu0 }
 0x3b9   : > { %2341 = vst.msk [vmem:[%s6728_s24 + $0x1e0] sm:$0xf] %vm2220_vm1, %v4954_v9  ;;  %v4955_v4 = vpack.c.bf16 %v1701_v39, %v1701_v39  ;;  %v1438_v8 = vadd.f32 %v7260_v28, %v1437_v42  ;;  %v5351_v43 = vpop.f32.mrb[126].mxu0 }
 0x3ba   : > { %2344 = vst.msk [vmem:[%s6728_s24 + $0x1ec] sm:$0xf] %vm2220_vm1, %v4957_v27  ;;  %v1578_v44 = vmax.f32 %v1446_v41, 0.0  ;;  %v1449_v45 = vadd.f32 %v7260_v28, %v5351_v43  ;;  %v1440_v18 = vpop.f32.mrb[127].mxu0 }
 0x3bb   : > { %2342 = vst.msk [vmem:[%s6728_s24 + $0x1e4] sm:$0xf] %vm2220_vm1, %v4955_v4  ;;  %v1576_v47 = vmax.f32 %v1438_v8, 0.0  ;;  %v1441_v48 = vadd.f32 %v7260_v28, %v1440_v18 }
 0x3bc   : > { %v1706_v49 = vmin.f32 %v1578_v44, 6.0  ;;  %v1579_v46 = vmax.f32 %v1449_v45, 0.0 }
 0x3bd   : > { %v1704_v50 = vmin.f32 %v1576_v47, 6.0  ;;  %v1577_v52 = vmax.f32 %v1441_v48, 0.0 }
 0x3be   : > { %v4960_v53 = vpack.c.bf16 %v1706_v49, %v1706_v49  ;;  %v1707_v54 = vmin.f32 %v1579_v46, 6.0 }
 0x3bf   : > { %v4958_v12 = vpack.c.bf16 %v1704_v50, %v1704_v50  ;;  %v1705_v25 = vmin.f32 %v1577_v52, 6.0 }
 0x3c0   : > { %2347 = vst.msk [vmem:[%s6728_s24 + $0x1f8] sm:$0xf] %vm2220_vm1, %v4960_v53  ;;  %v4961_v56 = vpack.c.bf16 %v1707_v54, %v1707_v54 }
 0x3c1   : > { %2345 = vst.msk [vmem:[%s6728_s24 + $0x1f0] sm:$0xf] %vm2220_vm1, %v4958_v12  ;;  %v4959_v57 = vpack.c.bf16 %v1705_v25, %v1705_v25 }
 0x3c2   : > { %2348 = vst.msk [vmem:[%s6728_s24 + $0x1fc] sm:$0xf] %vm2220_vm1, %v4961_v56 }
 0x3c3   : > { %2346 = vst.msk [vmem:[%s6728_s24 + $0x1f4] sm:$0xf] %vm2220_vm1, %v4959_v57 }
 0x3c4   : > { %5858 = shalt.err (!%p5855_p8)
}
 0x3c5   : > { %s5859_s24 = scalar_lea.hbm %s7393_s22, 8192  ;;  %s5863_s27 = scalar_lea.hbm %s7532_s8, 16384 }
 0x3c6   : > { %p5860_p5 = scmp.ne.s32.totalorder %s7393_s22, %s5859_s24  ;;  %p5864_p2 = scmp.lt.u32.totalorder %s7393_s22, %s7532_s8 }
 0x3c7   : > { %p5865_p11 = scmp.lt.u32.totalorder %s5863_s27, %s5859_s24  ;;  %p5867_p1 = scmp.lt.u32.totalorder %s5859_s24, %s7393_s22 }
 0x3c8   : > { %p5861_p10 = pnand %p5860_p5, %p7531_p7 }
 0x3c9   : > { %p5866_p9 = por %p5865_p11, %p5864_p2 }
 0x3ca   : > { %p5862_p12 = pneg %p5861_p10 }
 0x3cb   : > { %p5868_p3 = por %p5867_p1, %p5866_p9 }
 0x3cd   : > { %p5869_p6 = pnand %p5868_p3, %p5862_p12 }
 0x3cf   : > { %5872 = shalt.err (!%p5869_p6)
}
 0x3d0   : > { %5506 = dma.vmem_to_hbm [thread:$0]  (%p7531_p7), %s7395_s13, 8192, %s7393_s22, %s4161_s1, %s5958_s23, %s5958_s23, %s5959_s21  }
 0x3d1 PF: > { %s7533_s12 = sld [smem:[#allocation23_spill]]  ;;  %s7534_s29 = sld [smem:[#allocation28_spill]] }
 0x3d2   : > { %s7535_s10 = sld [smem:[#allocation26_spill]] }
 0x3d7   : > { %s4214_s15 = sand.u32 1, %s7533_s12   ;;  %p7536_p0 = scmp.ne.s32.totalorder %s7534_s29, 0 }
 0x3d8   : > { %p7537_p13 = scmp.ge.s32.totalorder %s7535_s10, 2  ;;  %s4215_s26 = scalar_lea.sflag [#allocation4], %s4214_s15 }
 0x3da   : > { %p5534_p4 = pnand %p7537_p13, %p7536_p0 }
 0x3dc   : > { %5914 = dma.done.wait (!%p5534_p4), %s4215_s26, 8192  }
 0x3dd   : > { %5916 = vsyncadd (!%p5534_p4), %s4215_s26, 4294959104  ;;  %s4224_s19 = scalar_lea.sflag [#allocation16], %s4214_s15 }
 0x3de   : > { %5918 = dma.done.wait (!%p5534_p4), %s4224_s19, 8192  }
 0x3df   : > { %5920 = vsyncadd (!%p5534_p4), %s4224_s19, 4294959104  ;;  %s33_s10 = sadd.s32 1, %s7535_s10   ;;  %s7538_s17 = sld [smem:[#allocation24_spill]] }
 0x3e0   : > { %p30_p8 = scmp.ge.s32.totalorder %s33_s10, 4   ;;  %s7539_s29 = sld [smem:[#allocation31_spill]] }
 0x3e1   : > { %s7540_s23 = sld [smem:[#allocation29_spill]]  ;;  %s7541_s27 = smov %s5927_s28 }
 0x3e2   : > { %s7543_s30 = smov %s5939_s9  ;;  %32 = sbr.rel (!%p30_p8) target bundleno = 18 (0x12), region = 150 }
 0x3e5   : > { %s7542_s28 = smov %s7538_s17 }
 0x3e7   : > { %s7544_s9 = smov %s7540_s23 }
 0x3e9   :  { %4229 = vsyncpa [#allocation3], 1 }
 0x3ea   :  { %4231 = vsyncpa [#allocation3 + $0x1], 1 }
 0x3eb   :  { %4232 = vsyncpa [#allocation6], 1 }
 0x3ec   :  { %4234 = vsyncpa [#allocation6 + $0x1], 1 }
 0x3ed   :  { %4235 = vsyncpa [#allocation9], 1 }
 0x3ee   :  { %4236 = vsyncpa [#allocation12], 1 }
 0x3ef   :  { %4237 = vsyncpa [#allocation4], 1 }
 0x3f0   :  { %4239 = vsyncpa [#allocation4 + $0x1], 1 }
 0x3f1   :  { %4240 = vsyncpa [#allocation16], 1 }
 0x3f2   :  { %4242 = vsyncpa [#allocation16 + $0x1], 1 }

</bundles_post_ra>
